<compile_context>
chip_gen: v7x
topology: tpu7x:2x2x1
jax: 0.10.0
libtpu: 0.0.40
codegen_flags: <defaults>
</compile_context>

<pallas_src>
import functools

import numpy as np
import jax
import jax.numpy as jnp
from jax.experimental import pallas as pl
from jax.experimental.pallas import tpu as pltpu


# Node rows per grid step: >=128 fills the v5e MXU edge, 256 fills v6e/v7x.
TARGET_ROWS = 256


def lgnn_kernel(x_ref, mask_ref, adj_ref,
                w_in_ref, b_in_ref,
                ggw_ref, wm_ref, wh_ref, b_gru_ref,
                w_gate_ref, fcw_ref, fcb_ref,
                w_out_ref, b_out_ref,
                out_ref, *, tile_n):
    f32 = jnp.float32
    bf16 = jnp.bfloat16

    x = x_ref[...]                               # [R, F] f32
    adj = adj_ref[0]                             # [R, R] bf16 block-diagonal adjacency
    mask = mask_ref[...]                         # [R, 1] f32 (1.0 real node, 0.0 padding)

    R = x.shape[0]
    C = w_in_ref.shape[1]
    L = ggw_ref.shape[0]
    B = R // tile_n                              # graphs in this grid step

    # ---- input_transform: Linear(input_dim, conv_dim) ----
    h = jnp.dot(x.astype(bf16), w_in_ref[...], preferred_element_type=f32) + b_in_ref[...]

    # Hoisted bias broadcast (JAX does not CSE broadcast_in_dim across the unrolled loop).
    b_gru = jnp.broadcast_to(b_gru_ref[...], (R, 4 * C))

    # ---- GatedGraphConv: L rounds of (linear -> add-aggregate -> GRUCell) ----
    for i in range(L):
        h_bf = h.astype(bf16)
        m = jnp.dot(h_bf, ggw_ref[i], preferred_element_type=f32)               # [R, C]
        m = jnp.dot(adj, m.astype(bf16), preferred_element_type=f32)            # aggr='add'
        gates = (jnp.dot(m.astype(bf16), wm_ref[...], preferred_element_type=f32)
                 + jnp.dot(h_bf, wh_ref[...], preferred_element_type=f32)
                 + b_gru)                                                        # [R, 4C]
        rz = jax.nn.sigmoid(gates[:, :2 * C])                                    # one 64-lane op
        r = rz[:, :C]
        z = rz[:, C:2 * C]
        n = jnp.tanh(gates[:, 2 * C:3 * C] + r * gates[:, 3 * C:4 * C])
        h = (1.0 - z) * n + z * h

    # ---- AttentionalAggregation: masked per-graph softmax(gate) weighted sum ----
    # gate bias dropped (softmax is shift-invariant).  VPU multiply + lane reduce.
    gate = jnp.sum(h * w_gate_ref[...], axis=-1, keepdims=True)                  # [R, 1]
    gate_r = gate.reshape(B, tile_n, 1)
    mask_r = mask.reshape(B, tile_n, 1) > 0.0
    h_r = h.reshape(B, tile_n, C)

    neg = f32(-1e30)
    maxg = jnp.max(jnp.where(mask_r, gate_r, neg), axis=1, keepdims=True)        # [B, 1, 1]
    e = jnp.exp(jnp.where(mask_r, gate_r - maxg, neg))                           # padded rows -> 0
    denom = jnp.maximum(jnp.sum(e, axis=1, keepdims=True), f32(1e-20))           # empty-graph guard
    alpha = e * pl.reciprocal(denom, approx=True)
    pooled = jnp.sum(alpha * h_r, axis=1)                                        # [B, C]

    # ---- hidden FC layers + relu (M = B rows) ----
    out = pooled
    for k in range(fcw_ref.shape[0]):
        out = jnp.maximum(
            jnp.dot(out.astype(bf16), fcw_ref[k], preferred_element_type=f32)
            + fcb_ref[k:k + 1, :], 0.0)

    # ---- lin_out: Linear(conv_dim, 1), produced lane-major ([1, B]) + SMEM bias ----
    y = jnp.dot(w_out_ref[...], out.T, preferred_element_type=f32) + b_out_ref[0]   # [1, B]

    # Dense output packing: B scalars into one lane-dense (8, 128) tile.
    out_ref[0] = jnp.zeros((8, 128), f32)
    out_ref[0, 0:1, 0:B] = y


def _pack_gru_weights(params):
    """Split GRUCell w_ih/w_hh into W_m[C,4C] / W_h[C,4C]; cols = [r, z, gi_n, gh_n]."""
    C = int(params['w_in'].shape[1])
    w_ih = np.asarray(params['w_ih'], np.float32)   # [C, 3C] (x @ W layout)
    w_hh = np.asarray(params['w_hh'], np.float32)
    b_ih = np.asarray(params['b_ih'], np.float32)   # [1, 3C]
    b_hh = np.asarray(params['b_hh'], np.float32)

    w_m = np.zeros((C, 4 * C), np.float32)
    w_h = np.zeros((C, 4 * C), np.float32)
    w_m[:, 0:2 * C] = w_ih[:, 0:2 * C]              # r, z contribution from m
    w_m[:, 2 * C:3 * C] = w_ih[:, 2 * C:3 * C]      # gi_n (from m only)
    w_h[:, 0:2 * C] = w_hh[:, 0:2 * C]              # r, z contribution from h
    w_h[:, 3 * C:4 * C] = w_hh[:, 2 * C:3 * C]      # gh_n (from h only)

    b = np.zeros((1, 4 * C), np.float32)
    b[:, 0:2 * C] = b_ih[:, 0:2 * C] + b_hh[:, 0:2 * C]
    b[:, 2 * C:3 * C] = b_ih[:, 2 * C:3 * C]
    b[:, 3 * C:4 * C] = b_hh[:, 2 * C:3 * C]
    return (jnp.asarray(w_m, jnp.bfloat16), jnp.asarray(w_h, jnp.bfloat16),
            jnp.asarray(b, jnp.float32))


@functools.lru_cache(maxsize=32)
def _build_lgnn_call(num_blocks, R, tile_n, F, C, L, H):
    """Build (and cache) the pallas_call for a bucketed static shape signature."""
    kernel = functools.partial(lgnn_kernel, tile_n=tile_n)

    grid_spec = pltpu.PrefetchScalarGridSpec(
        num_scalar_prefetch=0,
        grid=(num_blocks,),
        in_specs=[
            pl.BlockSpec((R, F), lambda i: (i, 0)),                  # node features of block i
            pl.BlockSpec((R, 1), lambda i: (i, 0)),                  # node validity mask
            pl.BlockSpec((1, R, R), lambda i: (i, 0, 0)),            # block-diag adjacency (bf16)
            pl.BlockSpec((F, C), lambda i: (0, 0)),                  # w_in  (resident, bf16)
            pl.BlockSpec((1, C), lambda i: (0, 0)),                  # b_in
            pl.BlockSpec((L, C, C), lambda i: (0, 0, 0)),            # ggw   (bf16)
            pl.BlockSpec((C, 4 * C), lambda i: (0, 0)),              # GRU weight for m (bf16)
            pl.BlockSpec((C, 4 * C), lambda i: (0, 0)),              # GRU weight for h (bf16)
            pl.BlockSpec((1, 4 * C), lambda i: (0, 0)),              # fused GRU bias
            pl.BlockSpec((1, C), lambda i: (0, 0)),                  # gate weight row
            pl.BlockSpec((H, C, C), lambda i: (0, 0, 0)),            # fc weights (bf16)
            pl.BlockSpec((H, C), lambda i: (0, 0)),                  # fc biases
            pl.BlockSpec((1, C), lambda i: (0, 0)),                  # out weight row
            pl.BlockSpec(memory_space=pltpu.MemorySpace.SMEM),       # b_out scalar
        ],
        out_specs=pl.BlockSpec((1, 8, 128), lambda i: (i, 0, 0)),    # B scalars, lane-dense
    )

    # VMEM budget: double-buffered per-block tiles + resident weights + activation headroom.
    # Clamp to 48 MiB so v7x (64 MiB physical / TC) keeps compiler scratch headroom.
    weight_bytes = (F * C * 2 + C * 4 + L * C * C * 2 + 2 * C * 4 * C * 2 + 4 * C * 4
                    + C * 4 + H * C * C * 2 + H * C * 4 + C * 4 + 4)
    tile_bytes = 2 * (R * R * 2 + R * max(F, 8) * 4 + R * 4 + 8 * 128 * 4)
    act_bytes = 10 * R * 128 * 4
    vmem_limit = int(min(max(2 * (weight_bytes + tile_bytes + act_bytes) + (4 << 20),
                             16 << 20), 48 << 20))

    return pl.pallas_call(
        kernel,
        out_shape=jax.ShapeDtypeStruct((num_blocks, 8, 128), jnp.float32),
        grid_spec=grid_spec,
        compiler_params=pltpu.CompilerParams(
            dimension_semantics=("parallel",),       # blocks of graphs are independent
            vmem_limit_bytes=vmem_limit,
        ),
    )


def lgnn_forward(params, x, edge_index, batch, n_graphs):
    """Host glue: block-diagonal per-step packing of B graphs + cached pallas_call.

    TODO(synk): in production, cache this numpy packing per dataset batch (it is not
    jittable) instead of rebuilding it on every forward.
    """
    x_np = np.asarray(x, np.float32)
    ei = np.asarray(edge_index)
    bvec = np.asarray(batch)
    N, F = x_np.shape
    C = int(params['w_in'].shape[1])
    G = int(n_graphs)
    L = int(params['ggw'].shape[0])
    H = int(params['fcw'].shape[0])

    counts = np.bincount(bvec, minlength=G).astype(np.int32)
    max_n = int(counts.max()) if counts.size else 1
    tile_n = max(8, int(pl.next_power_of_2(max(max_n, 1))))   # power-of-two bucket -> fewer recompiles
    B = max(1, TARGET_ROWS // tile_n)                         # graphs per grid step
    R = B * tile_n                                            # node rows per grid step
    num_blocks = -(-G // B)
    assert B <= 128, "lane-dense output packing assumes <= 128 graphs per grid step"

    offsets = np.zeros(G, np.int64)
    offsets[1:] = np.cumsum(counts)[:-1]
    local = np.arange(N) - offsets[bvec]                      # node index within its graph
    rows = bvec * tile_n + local                              # global padded row

    x_pad = np.zeros((num_blocks * R, F), np.float32)
    x_pad[rows] = x_np
    node_mask = np.zeros((num_blocks * R, 1), np.float32)
    node_mask[rows] = 1.0

    src, dst = ei[0], ei[1]
    g_e = bvec[src]
    adj = np.zeros((num_blocks, R, R), np.float32)            # adj[blk, i, j] = #edges j->i
    np.add.at(adj, (g_e // B,
                    (g_e % B) * tile_n + local[dst],
                    (g_e % B) * tile_n + local[src]), 1.0)
    assert adj.max() <= 256.0, "bf16 adjacency is exact only for edge multiplicities <= 256"

    w_gru_m, w_gru_h, b_gru = _pack_gru_weights(params)
    w_gate_row = jnp.asarray(params['w_gate'], jnp.float32).T   # [1, C]; b_gate dropped (shift-inv.)
    w_out_row = jnp.asarray(params['w_out'], jnp.float32).T     # [1, C]
    b_out = jnp.asarray(params['b_out'], jnp.float32).reshape(1)

    call = _build_lgnn_call(num_blocks, R, tile_n, F, C, L, H)
    out = call(
        jnp.asarray(x_pad),
        jnp.asarray(node_mask),
        jnp.asarray(adj, jnp.bfloat16),                         # bf16 adjacency (exact small ints)
        jnp.asarray(params['w_in'], jnp.bfloat16),
        jnp.asarray(params['b_in'], jnp.float32),
        jnp.asarray(params['ggw'], jnp.bfloat16),
        w_gru_m, w_gru_h, b_gru,
        w_gate_row,
        jnp.asarray(params['fcw'], jnp.bfloat16),
        jnp.asarray(params['fcb'], jnp.float32),
        w_out_row, b_out,
    )
    return out[:, 0, :B].reshape(-1)[:G]                        # per-graph scalars -> .view(-1)


def lgnn_reference(params, x, edge_index, batch, n_graphs):
    """Plain-JAX reference with identical semantics (dense, f32, unpadded)."""
    N = x.shape[0]
    src, dst = edge_index[0], edge_index[1]
    adj = jnp.zeros((N, N), jnp.float32).at[dst, src].add(1.0)
    seg = jnp.zeros((n_graphs, N), jnp.float32).at[batch, jnp.arange(N)].set(1.0)
    h = x @ params['w_in'] + params['b_in']
    C = h.shape[1]
    for i in range(params['ggw'].shape[0]):
        m = adj @ (h @ params['ggw'][i])
        gi = m @ params['w_ih'] + params['b_ih']
        gh = h @ params['w_hh'] + params['b_hh']
        r = jax.nn.sigmoid(gi[:, :C] + gh[:, :C])
        z = jax.nn.sigmoid(gi[:, C:2 * C] + gh[:, C:2 * C])
        n = jnp.tanh(gi[:, 2 * C:] + r * gh[:, 2 * C:])
        h = (1.0 - z) * n + z * h
    gate = (h @ params['w_gate'] + params['b_gate']).T
    masked = jnp.where(seg > 0, gate, -1e30)
    e = jnp.where(seg > 0, jnp.exp(gate - masked.max(1, keepdims=True)), 0.0)
    alpha = e / e.sum(1, keepdims=True)
    out = alpha @ h
    for k in range(params['fcw'].shape[0]):
        out = jnp.maximum(out @ params['fcw'][k] + params['fcb'][k], 0.0)
    out = out @ params['w_out'] + params['b_out']
    return out.reshape(-1)


def init_params(key, input_dim, conv_dim, n_conv_layers, n_hidden_layers):
    """Deterministic synthetic parameters matching the module's __init__ shapes."""
    C = conv_dim
    ks = jax.random.split(key, 12)
    s = 0.1
    return dict(
        w_in=s * jax.random.normal(ks[0], (input_dim, C), jnp.float32),
        b_in=s * jax.random.normal(ks[1], (1, C), jnp.float32),
        ggw=s * jax.random.normal(ks[2], (n_conv_layers, C, C), jnp.float32),
        w_ih=s * jax.random.normal(ks[3], (C, 3 * C), jnp.float32),
        b_ih=s * jax.random.normal(ks[4], (1, 3 * C), jnp.float32),
        w_hh=s * jax.random.normal(ks[5], (C, 3 * C), jnp.float32),
        b_hh=s * jax.random.normal(ks[6], (1, 3 * C), jnp.float32),
        w_gate=s * jax.random.normal(ks[7], (C, 1), jnp.float32),
        b_gate=s * jax.random.normal(ks[8], (1, 1), jnp.float32),
        fcw=s * jax.random.normal(ks[9], (n_hidden_layers, C, C), jnp.float32),
        fcb=s * jax.random.normal(ks[10], (n_hidden_layers, C), jnp.float32),
        w_out=s * jax.random.normal(ks[11], (C, 1), jnp.float32),
        b_out=jnp.zeros((1, 1), jnp.float32),
    )


if __name__ == "__main__":
    # arch = {'input_dim': 6, 'conv_dim': 32, 'n_conv_layers': 3,
    #         'n_hidden_layers': 2, 'act': 'relu'}
    input_dim, conv_dim, n_conv, n_hidden = 6, 32, 3, 2

    # Two graphs of unequal size (4-node ring and 6-node ring, both directions)
    # to exercise the per-graph padding + masked attention pooling.
    N, G = 10, 2
    batch = jnp.array([0] * 4 + [1] * 6, jnp.int32)
    src = jnp.array([0, 1, 2, 3, 1, 2, 3, 0,
                     4, 5, 6, 7, 8, 9, 5, 6, 7, 8, 9, 4], jnp.int32)
    dst = jnp.array([1, 2, 3, 0, 0, 1, 2, 3,
                     5, 6, 7, 8, 9, 4, 4, 5, 6, 7, 8, 9], jnp.int32)
    edge_index = jnp.stack([src, dst])

    key = jax.random.PRNGKey(0)
    kx, kp = jax.random.split(key)
    x = jax.random.normal(kx, (N, input_dim), jnp.float32)
    params = init_params(kp, input_dim, conv_dim, n_conv, n_hidden)

    out = lgnn_forward(params, x, edge_index, batch, G)
    out = jax.block_until_ready(out)

    ref = lgnn_reference(params, x, edge_index, batch, G)
    assert out.shape == (G,)
    assert np.allclose(np.asarray(out), np.asarray(ref), rtol=1e-2, atol=1e-2), (out, ref)
    print("KERNEL_OK")
</pallas_src>

<mosaic_0001>
module attributes {stable_mosaic.version = 11 : i64} {
  func.func @lgnn_kernel(%arg0: i32, %arg1: memref<256x6xf32, #tpu.memory_space<vmem>>, %arg2: memref<256x1xf32, #tpu.memory_space<vmem>>, %arg3: memref<1x256x256xbf16, #tpu.memory_space<vmem>>, %arg4: memref<6x32xbf16, #tpu.memory_space<vmem>>, %arg5: memref<1x32xf32, #tpu.memory_space<vmem>>, %arg6: memref<3x32x32xbf16, #tpu.memory_space<vmem>>, %arg7: memref<32x128xbf16, #tpu.memory_space<vmem>>, %arg8: memref<32x128xbf16, #tpu.memory_space<vmem>>, %arg9: memref<1x128xf32, #tpu.memory_space<vmem>>, %arg10: memref<1x32xf32, #tpu.memory_space<vmem>>, %arg11: memref<2x32x32xbf16, #tpu.memory_space<vmem>>, %arg12: memref<2x32xf32, #tpu.memory_space<vmem>>, %arg13: memref<1x32xf32, #tpu.memory_space<vmem>>, %arg14: memref<1xf32, #tpu.memory_space<smem>>, %arg15: memref<1x8x128xf32, #tpu.memory_space<vmem>>) attributes {dimension_semantics = [#tpu.dimension_semantics<parallel>], iteration_bounds = array<i64: 1>, scalar_prefetch = 0 : i64, scratch_operands = 0 : i64, tpu.core_type = #tpu.core_type<tc>, window_params = [{transform_indices = @transform_0, window_bounds = array<i64: 256, 6>}, {transform_indices = @transform_1, window_bounds = array<i64: 256, 1>}, {transform_indices = @transform_2, window_bounds = array<i64: 1, 256, 256>}, {pipeline_mode = #tpu.pipeline_mode<synchronous>, transform_indices = @transform_3, window_bounds = array<i64: 6, 32>}, {pipeline_mode = #tpu.pipeline_mode<synchronous>, transform_indices = @transform_4, window_bounds = array<i64: 1, 32>}, {pipeline_mode = #tpu.pipeline_mode<synchronous>, transform_indices = @transform_5, window_bounds = array<i64: 3, 32, 32>}, {pipeline_mode = #tpu.pipeline_mode<synchronous>, transform_indices = @transform_6, window_bounds = array<i64: 32, 128>}, {pipeline_mode = #tpu.pipeline_mode<synchronous>, transform_indices = @transform_7, window_bounds = array<i64: 32, 128>}, {pipeline_mode = #tpu.pipeline_mode<synchronous>, transform_indices = @transform_8, window_bounds = array<i64: 1, 128>}, {pipeline_mode = #tpu.pipeline_mode<synchronous>, transform_indices = @transform_9, window_bounds = array<i64: 1, 32>}, {pipeline_mode = #tpu.pipeline_mode<synchronous>, transform_indices = @transform_10, window_bounds = array<i64: 2, 32, 32>}, {pipeline_mode = #tpu.pipeline_mode<synchronous>, transform_indices = @transform_11, window_bounds = array<i64: 2, 32>}, {pipeline_mode = #tpu.pipeline_mode<synchronous>, transform_indices = @transform_12, window_bounds = array<i64: 1, 32>}, {transform_indices = @transform_13, window_bounds = array<i64: 1>}, {transform_indices = @transform_14, window_bounds = array<i64: 1, 8, 128>}]} {
    %c0 = arith.constant 0 : index
    %c0_0 = arith.constant 0 : index
    %0 = vector.load %arg1[%c0, %c0_0] : memref<256x6xf32, #tpu.memory_space<vmem>>, vector<256x6xf32>
    %c0_1 = arith.constant 0 : index
    %c0_2 = arith.constant 0 : index
    %c0_3 = arith.constant 0 : index
    %1 = vector.load %arg3[%c0_1, %c0_2, %c0_3] : memref<1x256x256xbf16, #tpu.memory_space<vmem>>, vector<1x256x256xbf16>
    %2 = vector.shape_cast %1 : vector<1x256x256xbf16> to vector<256x256xbf16>
    %c0_4 = arith.constant 0 : index
    %c0_5 = arith.constant 0 : index
    %3 = vector.load %arg2[%c0_4, %c0_5] : memref<256x1xf32, #tpu.memory_space<vmem>>, vector<256x1xf32>
    %4 = arith.truncf %0 : vector<256x6xf32> to vector<256x6xbf16>
    %c0_6 = arith.constant 0 : index
    %c0_7 = arith.constant 0 : index
    %5 = vector.load %arg4[%c0_6, %c0_7] : memref<6x32xbf16, #tpu.memory_space<vmem>>, vector<6x32xbf16>
    %cst = arith.constant dense<0.000000e+00> : vector<256x32xf32>
    %6 = tpu.matmul %4, %5, %cst {dimension_numbers = #tpu.dot_dimension_numbers<[1], [0], [0], [1], [0, 0, 1, 1], [], []>} : vector<256x6xbf16>, vector<6x32xbf16>, vector<256x32xf32> -> vector<256x32xf32>
    %c0_8 = arith.constant 0 : index
    %c0_9 = arith.constant 0 : index
    %7 = vector.load %arg5[%c0_8, %c0_9] : memref<1x32xf32, #tpu.memory_space<vmem>>, vector<1x32xf32>
    %8 = vector.broadcast %7 : vector<1x32xf32> to vector<256x32xf32>
    %9 = arith.addf %6, %8 : vector<256x32xf32>
    %c0_10 = arith.constant 0 : index
    %c0_11 = arith.constant 0 : index
    %10 = vector.load %arg9[%c0_10, %c0_11] : memref<1x128xf32, #tpu.memory_space<vmem>>, vector<1x128xf32>
    %11 = vector.shape_cast %10 : vector<1x128xf32> to vector<1x128xf32>
    %12 = vector.broadcast %11 : vector<1x128xf32> to vector<256x128xf32>
    %13 = arith.truncf %9 : vector<256x32xf32> to vector<256x32xbf16>
    %c0_12 = arith.constant 0 : index
    %c0_13 = arith.constant 0 : index
    %c0_14 = arith.constant 0 : index
    %14 = vector.load %arg6[%c0_12, %c0_13, %c0_14] : memref<3x32x32xbf16, #tpu.memory_space<vmem>>, vector<1x32x32xbf16>
    %15 = vector.shape_cast %14 : vector<1x32x32xbf16> to vector<32x32xbf16>
    %cst_15 = arith.constant dense<0.000000e+00> : vector<256x32xf32>
    %16 = tpu.matmul %13, %15, %cst_15 {dimension_numbers = #tpu.dot_dimension_numbers<[1], [0], [0], [1], [0, 0, 1, 1], [], []>} : vector<256x32xbf16>, vector<32x32xbf16>, vector<256x32xf32> -> vector<256x32xf32>
    %17 = arith.truncf %16 : vector<256x32xf32> to vector<256x32xbf16>
    %cst_16 = arith.constant dense<0.000000e+00> : vector<256x32xf32>
    %18 = tpu.matmul %2, %17, %cst_16 {dimension_numbers = #tpu.dot_dimension_numbers<[1], [0], [0], [1], [0, 0, 1, 1], [], []>} : vector<256x256xbf16>, vector<256x32xbf16>, vector<256x32xf32> -> vector<256x32xf32>
    %19 = arith.truncf %18 : vector<256x32xf32> to vector<256x32xbf16>
    %c0_17 = arith.constant 0 : index
    %c0_18 = arith.constant 0 : index
    %20 = vector.load %arg7[%c0_17, %c0_18] : memref<32x128xbf16, #tpu.memory_space<vmem>>, vector<32x128xbf16>
    %cst_19 = arith.constant dense<0.000000e+00> : vector<256x128xf32>
    %21 = tpu.matmul %19, %20, %cst_19 {dimension_numbers = #tpu.dot_dimension_numbers<[1], [0], [0], [1], [0, 0, 1, 1], [], []>} : vector<256x32xbf16>, vector<32x128xbf16>, vector<256x128xf32> -> vector<256x128xf32>
    %c0_20 = arith.constant 0 : index
    %c0_21 = arith.constant 0 : index
    %22 = vector.load %arg8[%c0_20, %c0_21] : memref<32x128xbf16, #tpu.memory_space<vmem>>, vector<32x128xbf16>
    %cst_22 = arith.constant dense<0.000000e+00> : vector<256x128xf32>
    %23 = tpu.matmul %13, %22, %cst_22 {dimension_numbers = #tpu.dot_dimension_numbers<[1], [0], [0], [1], [0, 0, 1, 1], [], []>} : vector<256x32xbf16>, vector<32x128xbf16>, vector<256x128xf32> -> vector<256x128xf32>
    %24 = arith.addf %21, %23 : vector<256x128xf32>
    %25 = arith.addf %24, %12 : vector<256x128xf32>
    %26 = vector.extract_strided_slice %25 {offsets = [0, 0], sizes = [256, 64], strides = [1, 1]} : vector<256x128xf32> to vector<256x64xf32>
    %27 = arith.negf %26 : vector<256x64xf32>
    %28 = math.exp %27 : vector<256x64xf32>
    %cst_23 = arith.constant 1.000000e+00 : f32
    %29 = vector.broadcast %cst_23 : f32 to vector<256x64xf32>
    %30 = arith.addf %29, %28 : vector<256x64xf32>
    %31 = arith.divf %29, %30 : vector<256x64xf32>
    %32 = vector.extract_strided_slice %31 {offsets = [0, 0], sizes = [256, 32], strides = [1, 1]} : vector<256x64xf32> to vector<256x32xf32>
    %33 = vector.extract_strided_slice %31 {offsets = [0, 32], sizes = [256, 32], strides = [1, 1]} : vector<256x64xf32> to vector<256x32xf32>
    %34 = vector.extract_strided_slice %25 {offsets = [0, 64], sizes = [256, 32], strides = [1, 1]} : vector<256x128xf32> to vector<256x32xf32>
    %35 = vector.extract_strided_slice %25 {offsets = [0, 96], sizes = [256, 32], strides = [1, 1]} : vector<256x128xf32> to vector<256x32xf32>
    %36 = arith.mulf %32, %35 : vector<256x32xf32>
    %37 = arith.addf %34, %36 : vector<256x32xf32>
    %38 = math.tanh %37 : vector<256x32xf32>
    %cst_24 = arith.constant 1.000000e+00 : f32
    %39 = vector.broadcast %cst_24 : f32 to vector<256x32xf32>
    %40 = arith.subf %39, %33 : vector<256x32xf32>
    %41 = arith.mulf %40, %38 : vector<256x32xf32>
    %42 = arith.mulf %33, %9 : vector<256x32xf32>
    %43 = arith.addf %41, %42 : vector<256x32xf32>
    %44 = arith.truncf %43 : vector<256x32xf32> to vector<256x32xbf16>
    %c1 = arith.constant 1 : index
    %c0_25 = arith.constant 0 : index
    %c0_26 = arith.constant 0 : index
    %45 = vector.load %arg6[%c1, %c0_25, %c0_26] : memref<3x32x32xbf16, #tpu.memory_space<vmem>>, vector<1x32x32xbf16>
    %46 = vector.shape_cast %45 : vector<1x32x32xbf16> to vector<32x32xbf16>
    %cst_27 = arith.constant dense<0.000000e+00> : vector<256x32xf32>
    %47 = tpu.matmul %44, %46, %cst_27 {dimension_numbers = #tpu.dot_dimension_numbers<[1], [0], [0], [1], [0, 0, 1, 1], [], []>} : vector<256x32xbf16>, vector<32x32xbf16>, vector<256x32xf32> -> vector<256x32xf32>
    %48 = arith.truncf %47 : vector<256x32xf32> to vector<256x32xbf16>
    %cst_28 = arith.constant dense<0.000000e+00> : vector<256x32xf32>
    %49 = tpu.matmul %2, %48, %cst_28 {dimension_numbers = #tpu.dot_dimension_numbers<[1], [0], [0], [1], [0, 0, 1, 1], [], []>} : vector<256x256xbf16>, vector<256x32xbf16>, vector<256x32xf32> -> vector<256x32xf32>
    %50 = arith.truncf %49 : vector<256x32xf32> to vector<256x32xbf16>
    %c0_29 = arith.constant 0 : index
    %c0_30 = arith.constant 0 : index
    %51 = vector.load %arg7[%c0_29, %c0_30] : memref<32x128xbf16, #tpu.memory_space<vmem>>, vector<32x128xbf16>
    %cst_31 = arith.constant dense<0.000000e+00> : vector<256x128xf32>
    %52 = tpu.matmul %50, %51, %cst_31 {dimension_numbers = #tpu.dot_dimension_numbers<[1], [0], [0], [1], [0, 0, 1, 1], [], []>} : vector<256x32xbf16>, vector<32x128xbf16>, vector<256x128xf32> -> vector<256x128xf32>
    %c0_32 = arith.constant 0 : index
    %c0_33 = arith.constant 0 : index
    %53 = vector.load %arg8[%c0_32, %c0_33] : memref<32x128xbf16, #tpu.memory_space<vmem>>, vector<32x128xbf16>
    %cst_34 = arith.constant dense<0.000000e+00> : vector<256x128xf32>
    %54 = tpu.matmul %44, %53, %cst_34 {dimension_numbers = #tpu.dot_dimension_numbers<[1], [0], [0], [1], [0, 0, 1, 1], [], []>} : vector<256x32xbf16>, vector<32x128xbf16>, vector<256x128xf32> -> vector<256x128xf32>
    %55 = arith.addf %52, %54 : vector<256x128xf32>
    %56 = arith.addf %55, %12 : vector<256x128xf32>
    %57 = vector.extract_strided_slice %56 {offsets = [0, 0], sizes = [256, 64], strides = [1, 1]} : vector<256x128xf32> to vector<256x64xf32>
    %58 = arith.negf %57 : vector<256x64xf32>
    %59 = math.exp %58 : vector<256x64xf32>
    %cst_35 = arith.constant 1.000000e+00 : f32
    %60 = vector.broadcast %cst_35 : f32 to vector<256x64xf32>
    %61 = arith.addf %60, %59 : vector<256x64xf32>
    %62 = arith.divf %60, %61 : vector<256x64xf32>
    %63 = vector.extract_strided_slice %62 {offsets = [0, 0], sizes = [256, 32], strides = [1, 1]} : vector<256x64xf32> to vector<256x32xf32>
    %64 = vector.extract_strided_slice %62 {offsets = [0, 32], sizes = [256, 32], strides = [1, 1]} : vector<256x64xf32> to vector<256x32xf32>
    %65 = vector.extract_strided_slice %56 {offsets = [0, 64], sizes = [256, 32], strides = [1, 1]} : vector<256x128xf32> to vector<256x32xf32>
    %66 = vector.extract_strided_slice %56 {offsets = [0, 96], sizes = [256, 32], strides = [1, 1]} : vector<256x128xf32> to vector<256x32xf32>
    %67 = arith.mulf %63, %66 : vector<256x32xf32>
    %68 = arith.addf %65, %67 : vector<256x32xf32>
    %69 = math.tanh %68 : vector<256x32xf32>
    %cst_36 = arith.constant 1.000000e+00 : f32
    %70 = vector.broadcast %cst_36 : f32 to vector<256x32xf32>
    %71 = arith.subf %70, %64 : vector<256x32xf32>
    %72 = arith.mulf %71, %69 : vector<256x32xf32>
    %73 = arith.mulf %64, %43 : vector<256x32xf32>
    %74 = arith.addf %72, %73 : vector<256x32xf32>
    %75 = arith.truncf %74 : vector<256x32xf32> to vector<256x32xbf16>
    %c2 = arith.constant 2 : index
    %c0_37 = arith.constant 0 : index
    %c0_38 = arith.constant 0 : index
    %76 = vector.load %arg6[%c2, %c0_37, %c0_38] : memref<3x32x32xbf16, #tpu.memory_space<vmem>>, vector<1x32x32xbf16>
    %77 = vector.shape_cast %76 : vector<1x32x32xbf16> to vector<32x32xbf16>
    %cst_39 = arith.constant dense<0.000000e+00> : vector<256x32xf32>
    %78 = tpu.matmul %75, %77, %cst_39 {dimension_numbers = #tpu.dot_dimension_numbers<[1], [0], [0], [1], [0, 0, 1, 1], [], []>} : vector<256x32xbf16>, vector<32x32xbf16>, vector<256x32xf32> -> vector<256x32xf32>
    %79 = arith.truncf %78 : vector<256x32xf32> to vector<256x32xbf16>
    %cst_40 = arith.constant dense<0.000000e+00> : vector<256x32xf32>
    %80 = tpu.matmul %2, %79, %cst_40 {dimension_numbers = #tpu.dot_dimension_numbers<[1], [0], [0], [1], [0, 0, 1, 1], [], []>} : vector<256x256xbf16>, vector<256x32xbf16>, vector<256x32xf32> -> vector<256x32xf32>
    %81 = arith.truncf %80 : vector<256x32xf32> to vector<256x32xbf16>
    %c0_41 = arith.constant 0 : index
    %c0_42 = arith.constant 0 : index
    %82 = vector.load %arg7[%c0_41, %c0_42] : memref<32x128xbf16, #tpu.memory_space<vmem>>, vector<32x128xbf16>
    %cst_43 = arith.constant dense<0.000000e+00> : vector<256x128xf32>
    %83 = tpu.matmul %81, %82, %cst_43 {dimension_numbers = #tpu.dot_dimension_numbers<[1], [0], [0], [1], [0, 0, 1, 1], [], []>} : vector<256x32xbf16>, vector<32x128xbf16>, vector<256x128xf32> -> vector<256x128xf32>
    %c0_44 = arith.constant 0 : index
    %c0_45 = arith.constant 0 : index
    %84 = vector.load %arg8[%c0_44, %c0_45] : memref<32x128xbf16, #tpu.memory_space<vmem>>, vector<32x128xbf16>
    %cst_46 = arith.constant dense<0.000000e+00> : vector<256x128xf32>
    %85 = tpu.matmul %75, %84, %cst_46 {dimension_numbers = #tpu.dot_dimension_numbers<[1], [0], [0], [1], [0, 0, 1, 1], [], []>} : vector<256x32xbf16>, vector<32x128xbf16>, vector<256x128xf32> -> vector<256x128xf32>
    %86 = arith.addf %83, %85 : vector<256x128xf32>
    %87 = arith.addf %86, %12 : vector<256x128xf32>
    %88 = vector.extract_strided_slice %87 {offsets = [0, 0], sizes = [256, 64], strides = [1, 1]} : vector<256x128xf32> to vector<256x64xf32>
    %89 = arith.negf %88 : vector<256x64xf32>
    %90 = math.exp %89 : vector<256x64xf32>
    %cst_47 = arith.constant 1.000000e+00 : f32
    %91 = vector.broadcast %cst_47 : f32 to vector<256x64xf32>
    %92 = arith.addf %91, %90 : vector<256x64xf32>
    %93 = arith.divf %91, %92 : vector<256x64xf32>
    %94 = vector.extract_strided_slice %93 {offsets = [0, 0], sizes = [256, 32], strides = [1, 1]} : vector<256x64xf32> to vector<256x32xf32>
    %95 = vector.extract_strided_slice %93 {offsets = [0, 32], sizes = [256, 32], strides = [1, 1]} : vector<256x64xf32> to vector<256x32xf32>
    %96 = vector.extract_strided_slice %87 {offsets = [0, 64], sizes = [256, 32], strides = [1, 1]} : vector<256x128xf32> to vector<256x32xf32>
    %97 = vector.extract_strided_slice %87 {offsets = [0, 96], sizes = [256, 32], strides = [1, 1]} : vector<256x128xf32> to vector<256x32xf32>
    %98 = arith.mulf %94, %97 : vector<256x32xf32>
    %99 = arith.addf %96, %98 : vector<256x32xf32>
    %100 = math.tanh %99 : vector<256x32xf32>
    %cst_48 = arith.constant 1.000000e+00 : f32
    %101 = vector.broadcast %cst_48 : f32 to vector<256x32xf32>
    %102 = arith.subf %101, %95 : vector<256x32xf32>
    %103 = arith.mulf %102, %100 : vector<256x32xf32>
    %104 = arith.mulf %95, %74 : vector<256x32xf32>
    %105 = arith.addf %103, %104 : vector<256x32xf32>
    %c0_49 = arith.constant 0 : index
    %c0_50 = arith.constant 0 : index
    %106 = vector.load %arg10[%c0_49, %c0_50] : memref<1x32xf32, #tpu.memory_space<vmem>>, vector<1x32xf32>
    %107 = vector.broadcast %106 : vector<1x32xf32> to vector<256x32xf32>
    %108 = arith.mulf %105, %107 : vector<256x32xf32>
    %cst_51 = arith.constant dense<0.000000e+00> : vector<256xf32>
    %109 = vector.multi_reduction <add>, %108, %cst_51 [1] : vector<256x32xf32> to vector<256xf32>
    %110 = vector.shape_cast %109 : vector<256xf32> to vector<256x1xf32>
    %111 = vector.shape_cast %110 : vector<256x1xf32> to vector<32x8x1xf32>
    %112 = vector.shape_cast %3 : vector<256x1xf32> to vector<32x8x1xf32>
    %cst_52 = arith.constant 0.000000e+00 : f32
    %113 = vector.broadcast %cst_52 : f32 to vector<32x8x1xf32>
    %114 = arith.cmpf ogt, %112, %113 : vector<32x8x1xf32>
    %115 = vector.shape_cast %105 : vector<256x32xf32> to vector<32x8x32xf32>
    %cst_53 = arith.constant -1.000000e+30 : f32
    %116 = vector.broadcast %cst_53 : f32 to vector<32x8x1xf32>
    %117 = arith.select %114, %111, %116 : vector<32x8x1xi1>, vector<32x8x1xf32>
    %cst_54 = arith.constant dense<0xFF800000> : vector<32x1xf32>
    %118 = vector.multi_reduction <maximumf>, %117, %cst_54 [1] : vector<32x8x1xf32> to vector<32x1xf32>
    %119 = vector.shape_cast %118 : vector<32x1xf32> to vector<32x1x1xf32>
    %120 = vector.broadcast %119 : vector<32x1x1xf32> to vector<32x8x1xf32>
    %121 = arith.subf %111, %120 : vector<32x8x1xf32>
    %cst_55 = arith.constant -1.000000e+30 : f32
    %122 = vector.broadcast %cst_55 : f32 to vector<32x8x1xf32>
    %123 = arith.select %114, %121, %122 : vector<32x8x1xi1>, vector<32x8x1xf32>
    %124 = math.exp %123 : vector<32x8x1xf32>
    %cst_56 = arith.constant dense<0.000000e+00> : vector<32x1xf32>
    %125 = vector.multi_reduction <add>, %124, %cst_56 [1] : vector<32x8x1xf32> to vector<32x1xf32>
    %126 = vector.shape_cast %125 : vector<32x1xf32> to vector<32x1x1xf32>
    %cst_57 = arith.constant 9.99999968E-21 : f32
    %127 = vector.broadcast %cst_57 : f32 to vector<32x1x1xf32>
    %128 = arith.maximumf %126, %127 : vector<32x1x1xf32>
    %129 = tpu.reciprocal %128 {approx = true} : vector<32x1x1xf32> -> vector<32x1x1xf32>
    %130 = vector.broadcast %129 : vector<32x1x1xf32> to vector<32x8x1xf32>
    %131 = arith.mulf %124, %130 : vector<32x8x1xf32>
    %132 = vector.broadcast %131 : vector<32x8x1xf32> to vector<32x8x32xf32>
    %133 = arith.mulf %132, %115 : vector<32x8x32xf32>
    %cst_58 = arith.constant dense<0.000000e+00> : vector<32x32xf32>
    %134 = vector.multi_reduction <add>, %133, %cst_58 [1] : vector<32x8x32xf32> to vector<32x32xf32>
    %135 = arith.truncf %134 : vector<32x32xf32> to vector<32x32xbf16>
    %c0_59 = arith.constant 0 : index
    %c0_60 = arith.constant 0 : index
    %c0_61 = arith.constant 0 : index
    %136 = vector.load %arg11[%c0_59, %c0_60, %c0_61] : memref<2x32x32xbf16, #tpu.memory_space<vmem>>, vector<1x32x32xbf16>
    %137 = vector.shape_cast %136 : vector<1x32x32xbf16> to vector<32x32xbf16>
    %cst_62 = arith.constant dense<0.000000e+00> : vector<32x32xf32>
    %138 = tpu.matmul %135, %137, %cst_62 {dimension_numbers = #tpu.dot_dimension_numbers<[1], [0], [0], [1], [0, 0, 1, 1], [], []>} : vector<32x32xbf16>, vector<32x32xbf16>, vector<32x32xf32> -> vector<32x32xf32>
    %c0_63 = arith.constant 0 : index
    %c0_64 = arith.constant 0 : index
    %139 = vector.load %arg12[%c0_63, %c0_64] : memref<2x32xf32, #tpu.memory_space<vmem>>, vector<1x32xf32>
    %140 = vector.broadcast %139 : vector<1x32xf32> to vector<32x32xf32>
    %141 = arith.addf %138, %140 : vector<32x32xf32>
    %cst_65 = arith.constant 0.000000e+00 : f32
    %142 = vector.broadcast %cst_65 : f32 to vector<32x32xf32>
    %143 = arith.maximumf %141, %142 : vector<32x32xf32>
    %144 = arith.truncf %143 : vector<32x32xf32> to vector<32x32xbf16>
    %c1_66 = arith.constant 1 : index
    %c0_67 = arith.constant 0 : index
    %c0_68 = arith.constant 0 : index
    %145 = vector.load %arg11[%c1_66, %c0_67, %c0_68] : memref<2x32x32xbf16, #tpu.memory_space<vmem>>, vector<1x32x32xbf16>
    %146 = vector.shape_cast %145 : vector<1x32x32xbf16> to vector<32x32xbf16>
    %cst_69 = arith.constant dense<0.000000e+00> : vector<32x32xf32>
    %147 = tpu.matmul %144, %146, %cst_69 {dimension_numbers = #tpu.dot_dimension_numbers<[1], [0], [0], [1], [0, 0, 1, 1], [], []>} : vector<32x32xbf16>, vector<32x32xbf16>, vector<32x32xf32> -> vector<32x32xf32>
    %c1_70 = arith.constant 1 : index
    %c0_71 = arith.constant 0 : index
    %148 = vector.load %arg12[%c1_70, %c0_71] : memref<2x32xf32, #tpu.memory_space<vmem>>, vector<1x32xf32>
    %149 = vector.broadcast %148 : vector<1x32xf32> to vector<32x32xf32>
    %150 = arith.addf %147, %149 : vector<32x32xf32>
    %cst_72 = arith.constant 0.000000e+00 : f32
    %151 = vector.broadcast %cst_72 : f32 to vector<32x32xf32>
    %152 = arith.maximumf %150, %151 : vector<32x32xf32>
    %c0_73 = arith.constant 0 : index
    %c0_74 = arith.constant 0 : index
    %153 = vector.load %arg13[%c0_73, %c0_74] : memref<1x32xf32, #tpu.memory_space<vmem>>, vector<1x32xf32>
    %154 = tpu.transpose %152, [1, 0] : vector<32x32xf32> -> vector<32x32xf32>
    %cst_75 = arith.constant dense<0.000000e+00> : vector<1x32xf32>
    %155 = tpu.matmul %153, %154, %cst_75 {dimension_numbers = #tpu.dot_dimension_numbers<[1], [0], [0], [1], [0, 0, 1, 1], [], []>} : vector<1x32xf32>, vector<32x32xf32>, vector<1x32xf32> -> vector<1x32xf32>
    %c0_76 = arith.constant 0 : index
    %156 = memref.load %arg14[%c0_76] : memref<1xf32, #tpu.memory_space<smem>>
    %157 = vector.broadcast %156 : f32 to vector<1x32xf32>
    %158 = arith.addf %155, %157 : vector<1x32xf32>
    %cst_77 = arith.constant 0.000000e+00 : f32
    %159 = vector.broadcast %cst_77 : f32 to vector<8x128xf32>
    %c0_78 = arith.constant 0 : index
    %c0_79 = arith.constant 0 : index
    %c0_80 = arith.constant 0 : index
    %160 = vector.load %arg15[%c0_78, %c0_79, %c0_80] : memref<1x8x128xf32, #tpu.memory_space<vmem>>, vector<1x8x128xf32>
    %161 = vector.shape_cast %160 : vector<1x8x128xf32> to vector<8x128xf32>
    %162 = vector.shape_cast %159 : vector<8x128xf32> to vector<1x8x128xf32>
    tpu.vector_store %arg15[%c0_78, %c0_79, %c0_80], %162 {strides = array<i32>} : memref<1x8x128xf32, #tpu.memory_space<vmem>>, vector<1x8x128xf32>,
    %c0_81 = arith.constant 0 : index
    %c0_82 = arith.constant 0 : index
    %c0_83 = arith.constant 0 : index
    %163 = vector.load %arg15[%c0_81, %c0_82, %c0_83] : memref<1x8x128xf32, #tpu.memory_space<vmem>>, vector<1x1x32xf32>
    %164 = vector.shape_cast %163 : vector<1x1x32xf32> to vector<1x32xf32>
    %165 = vector.shape_cast %158 : vector<1x32xf32> to vector<1x1x32xf32>
    tpu.vector_store %arg15[%c0_81, %c0_82, %c0_83], %165 {strides = array<i32>} : memref<1x8x128xf32, #tpu.memory_space<vmem>>, vector<1x1x32xf32>,
    return
  }
  func.func @transform_0(%arg0: i32) -> (i32, i32) {
    %c0_i32 = arith.constant 0 : i32
    %c0_i32_0 = arith.constant 0 : i32
    return %arg0, %c0_i32 : i32, i32
  }
  func.func @transform_1(%arg0: i32) -> (i32, i32) {
    %c0_i32 = arith.constant 0 : i32
    %c0_i32_0 = arith.constant 0 : i32
    return %arg0, %c0_i32 : i32, i32
  }
  func.func @transform_2(%arg0: i32) -> (i32, i32, i32) {
    %c0_i32 = arith.constant 0 : i32
    %c0_i32_0 = arith.constant 0 : i32
    %c0_i32_1 = arith.constant 0 : i32
    return %arg0, %c0_i32, %c0_i32_0 : i32, i32, i32
  }
  func.func @transform_3(%arg0: i32) -> (i32, i32) {
    %c0_i32 = arith.constant 0 : i32
    %c0_i32_0 = arith.constant 0 : i32
    %c0_i32_1 = arith.constant 0 : i32
    return %c0_i32, %c0_i32_0 : i32, i32
  }
  func.func @transform_4(%arg0: i32) -> (i32, i32) {
    %c0_i32 = arith.constant 0 : i32
    %c0_i32_0 = arith.constant 0 : i32
    %c0_i32_1 = arith.constant 0 : i32
    return %c0_i32, %c0_i32_0 : i32, i32
  }
  func.func @transform_5(%arg0: i32) -> (i32, i32, i32) {
    %c0_i32 = arith.constant 0 : i32
    %c0_i32_0 = arith.constant 0 : i32
    %c0_i32_1 = arith.constant 0 : i32
    %c0_i32_2 = arith.constant 0 : i32
    return %c0_i32, %c0_i32_0, %c0_i32_1 : i32, i32, i32
  }
  func.func @transform_6(%arg0: i32) -> (i32, i32) {
    %c0_i32 = arith.constant 0 : i32
    %c0_i32_0 = arith.constant 0 : i32
    %c0_i32_1 = arith.constant 0 : i32
    return %c0_i32, %c0_i32_0 : i32, i32
  }
  func.func @transform_7(%arg0: i32) -> (i32, i32) {
    %c0_i32 = arith.constant 0 : i32
    %c0_i32_0 = arith.constant 0 : i32
    %c0_i32_1 = arith.constant 0 : i32
    return %c0_i32, %c0_i32_0 : i32, i32
  }
  func.func @transform_8(%arg0: i32) -> (i32, i32) {
    %c0_i32 = arith.constant 0 : i32
    %c0_i32_0 = arith.constant 0 : i32
    %c0_i32_1 = arith.constant 0 : i32
    return %c0_i32, %c0_i32_0 : i32, i32
  }
  func.func @transform_9(%arg0: i32) -> (i32, i32) {
    %c0_i32 = arith.constant 0 : i32
    %c0_i32_0 = arith.constant 0 : i32
    %c0_i32_1 = arith.constant 0 : i32
    return %c0_i32, %c0_i32_0 : i32, i32
  }
  func.func @transform_10(%arg0: i32) -> (i32, i32, i32) {
    %c0_i32 = arith.constant 0 : i32
    %c0_i32_0 = arith.constant 0 : i32
    %c0_i32_1 = arith.constant 0 : i32
    %c0_i32_2 = arith.constant 0 : i32
    return %c0_i32, %c0_i32_0, %c0_i32_1 : i32, i32, i32
  }
  func.func @transform_11(%arg0: i32) -> (i32, i32) {
    %c0_i32 = arith.constant 0 : i32
    %c0_i32_0 = arith.constant 0 : i32
    %c0_i32_1 = arith.constant 0 : i32
    return %c0_i32, %c0_i32_0 : i32, i32
  }
  func.func @transform_12(%arg0: i32) -> (i32, i32) {
    %c0_i32 = arith.constant 0 : i32
    %c0_i32_0 = arith.constant 0 : i32
    %c0_i32_1 = arith.constant 0 : i32
    return %c0_i32, %c0_i32_0 : i32, i32
  }
  func.func @transform_13(%arg0: i32) -> i32 {
    %c0_i32 = arith.constant 0 : i32
    %c0_i32_0 = arith.constant 0 : i32
    return %c0_i32 : i32
  }
  func.func @transform_14(%arg0: i32) -> (i32, i32, i32) {
    %c0_i32 = arith.constant 0 : i32
    %c0_i32_0 = arith.constant 0 : i32
    %c0_i32_1 = arith.constant 0 : i32
    return %arg0, %c0_i32, %c0_i32_0 : i32, i32, i32
  }
}

</mosaic_0001>

<bundles_post_ra>
// kernel: tpu_custom_call.1
= control target key start
LH: loop header
LB: loop body
LE: loop exit
PB: predicated region body
PF: predicated region fallthrough
CT: control target
= control target key end

     0   :  { %vm219_vm0 = vcmask 1042432   ;;  %vm170_vm1 = vcmask 48128   ;;  %s13448_s0 = inlined_call_operand.vmem [shape: f32[256,6], index: 0, kind: input, shape index: {}]   ;;  %s13449_s1 = inlined_call_operand.vmem [shape: f32[256,1], index: 1, kind: input, shape index: {}]   ;;  %s13450_s2 = inlined_call_operand.vmem [shape: bf16[1,256,256], index: 2, kind: input, shape index: {}]   ;;  %s13451_s3 = inlined_call_operand.vmem [shape: bf16[6,32], index: 3, kind: input, shape index: {}]   ;;  %s13452_s4 = inlined_call_operand.vmem [shape: f32[1,32], index: 4, kind: input, shape index: {}]   ;;  %s13453_s5 = inlined_call_operand.vmem [shape: bf16[3,32,32], index: 5, kind: input, shape index: {}]   ;;  %s13454_s6 = inlined_call_operand.vmem [shape: bf16[32,128], index: 6, kind: input, shape index: {}]   ;;  %s13455_s7 = inlined_call_operand.vmem [shape: bf16[32,128], index: 7, kind: input, shape index: {}]   ;;  %s13456_s8 = inlined_call_operand.vmem [shape: f32[1,128], index: 8, kind: input, shape index: {}]   ;;  %s13457_s9 = inlined_call_operand.vmem [shape: f32[1,32], index: 9, kind: input, shape index: {}]   ;;  %s13458_s10 = inlined_call_operand.vmem [shape: bf16[2,32,32], index: 10, kind: input, shape index: {}]   ;;  %s13459_s11 = inlined_call_operand.vmem [shape: f32[2,32], index: 11, kind: input, shape index: {}]   ;;  %s13460_s12 = inlined_call_operand.vmem [shape: f32[1,32], index: 12, kind: input, shape index: {}]   ;;  %s13461_s13 = inlined_call_operand.<no memory space> [shape: f32[1], index: 13, kind: input, shape index: {}]   ;;  %s13462_s14 = inlined_call_operand.hbm [shape: f32[1,8,128], index: 14, kind: output, shape index: {}]  }
   0x1   :  { %v162_v0 = vld [vmem:[%s13451_s3] sm:$0x7]  ;;  %v51_v2 = vld [vmem:[%s13448_s0 + $0x8] sm:$0xff]  ;;  %v52_v5 = vld [vmem:[%s13448_s0 + $0x10] sm:$0xff] }
   0x2   :  { %v50_v1 = vld [vmem:[%s13448_s0] sm:$0xff]  ;;  %8887 = vmatprep.subr.msk.bf16.mxu0 %vm219_vm0, %v162_v0  ;;  %v221_v3 = vsel %vm219_vm0, %v162_v0, 0  ;;  %v53_v6 = vld [vmem:[%s13448_s0 + $0x18] sm:$0xff]  ;;  %v55_v9 = vld [vmem:[%s13448_s0 + $0x28] sm:$0xff] }
   0x3   :  { %v146_v4 = vpack.c.bf16 %v51_v2, %v50_v1  ;;  %v54_v7 = vld [vmem:[%s13448_s0 + $0x20] sm:$0xff]  ;;  %8399 = vmatpush3.bf16.msra.mxu0 %v221_v3  ;;  %v147_v8 = vpack.c.bf16 %v53_v6, %v52_v5  ;;  %v56_v11 = vld [vmem:[%s13448_s0 + $0x30] sm:$0xff]  ;;  %v57_v12 = vld [vmem:[%s13448_s0 + $0x38] sm:$0xff] }
   0x4   :  { %v148_v10 = vpack.c.bf16 %v55_v9, %v54_v7  ;;  %v58_v13 = vld [vmem:[%s13448_s0 + $0x40] sm:$0xff]  ;;  %v59_v14 = vld [vmem:[%s13448_s0 + $0x48] sm:$0xff]  ;;  %v149_v15 = vpack.c.bf16 %v57_v12, %v56_v11  ;;  %v60_v17 = vld [vmem:[%s13448_s0 + $0x50] sm:$0xff] }
   0x5   :  { %8400 = vmatprep.mubr.msk.bf16.mxu0 %vm170_vm1, %v146_v4  ;;  %v150_v16 = vpack.c.bf16 %v59_v14, %v58_v13  ;;  %v61_v18 = vld [vmem:[%s13448_s0 + $0x58] sm:$0xff]  ;;  %v62_v19 = vld [vmem:[%s13448_s0 + $0x60] sm:$0xff]  ;;  %v63_v20 = vld [vmem:[%s13448_s0 + $0x68] sm:$0xff] }
   0x6   :  { %8401 = vmatmul.mubr.msk.bf16.vlgmr.msra.gmra.mrb[0].mxu0 %vm170_vm1, %v147_v8  ;;  %v151_v21 = vpack.c.bf16 %v61_v18, %v60_v17  ;;  %v152_v22 = vpack.c.bf16 %v63_v20, %v62_v19  ;;  %v64_v23 = vld [vmem:[%s13448_s0 + $0x70] sm:$0xff]  ;;  %v65_v24 = vld [vmem:[%s13448_s0 + $0x78] sm:$0xff]  ;;  %v66_v25 = vld [vmem:[%s13448_s0 + $0x80] sm:$0xff] }
   0x7   :  { %8404 = vmatprep.mubr.msk.bf16.mxu0 %vm170_vm1, %v148_v10  ;;  %v67_v26 = vld [vmem:[%s13448_s0 + $0x88] sm:$0xff]  ;;  %v153_v27 = vpack.c.bf16 %v65_v24, %v64_v23  ;;  %v68_v29 = vld [vmem:[%s13448_s0 + $0x90] sm:$0xff]  ;;  %v69_v30 = vld [vmem:[%s13448_s0 + $0x98] sm:$0xff] }
   0x8   :  { %v154_v28 = vpack.c.bf16 %v67_v26, %v66_v25  ;;  %v70_v31 = vld [vmem:[%s13448_s0 + $0xa0] sm:$0xff]  ;;  %v71_v32 = vld [vmem:[%s13448_s0 + $0xa8] sm:$0xff] }
   0xe   :  { %8405 = vmatmul.mubr.msk.bf16.gmra.mrb[4].mxu0 %vm170_vm1, %v149_v15 }
   0xf   :  { %8408 = vmatprep.mubr.msk.bf16.mxu0 %vm170_vm1, %v150_v16 }
  0x16   :  { %8409 = vmatmul.mubr.msk.bf16.gmra.mrb[8].mxu0 %vm170_vm1, %v151_v21 }
  0x17   :  { %8412 = vmatprep.mubr.msk.bf16.mxu0 %vm170_vm1, %v152_v22 }
  0x1e   :  { %8413 = vmatmul.mubr.msk.bf16.gmra.mrb[12].mxu0 %vm170_vm1, %v153_v27 }
  0x1f   :  { %8416 = vmatprep.mubr.msk.bf16.mxu0 %vm170_vm1, %v154_v28 }
  0x20   :  { %20 = vsyncpa [#allocation4], 0  ;;  %v155_v33 = vpack.c.bf16 %v69_v30, %v68_v29  ;;  %v156_v34 = vpack.c.bf16 %v71_v32, %v70_v31  ;;  %v72_v35 = vld [vmem:[%s13448_s0 + $0xb0] sm:$0xff]  ;;  %v73_v36 = vld [vmem:[%s13448_s0 + $0xb8] sm:$0xff]  ;;  %s9761_s18 = smov 32   ;;  %vm423_vm2 = vcmask 261120  }
  0x21   :  { %v74_v37 = vld [vmem:[%s13448_s0 + $0xc0] sm:$0xff]  ;;  %v75_v38 = vld [vmem:[%s13448_s0 + $0xc8] sm:$0xff]  ;;  %v157_v39 = vpack.c.bf16 %v73_v36, %v72_v35  ;;  %v76_v41 = vld [vmem:[%s13448_s0 + $0xd0] sm:$0xff]  ;;  %s9763_s19 = smov 96   ;;  %vm6047_vm4 = vcmask 7168   ;;  %s9768_s17 = smov [#allocation3]  }
  0x22   :  { %v158_v40 = vpack.c.bf16 %v75_v38, %v74_v37  ;;  %v77_v42 = vld [vmem:[%s13448_s0 + $0xd8] sm:$0xff]  ;;  %v78_v43 = vld [vmem:[%s13448_s0 + $0xe0] sm:$0xff]  ;;  %v79_v44 = vld [vmem:[%s13448_s0 + $0xe8] sm:$0xff]  ;;  %s7534_s20 = sshll.u32 %s9768_s17, 4  ;;  %s7535_s20 = int_to_ptr.vmem [resolvable:$true] %s7534_s20 }
  0x23   :  { %v159_v45 = vpack.c.bf16 %v77_v42, %v76_v41  ;;  %v160_v46 = vpack.c.bf16 %v79_v44, %v78_v43  ;;  %v80_v47 = vld [vmem:[%s13448_s0 + $0xf0] sm:$0xff]  ;;  %v81_v48 = vld [vmem:[%s13448_s0 + $0xf8] sm:$0xff]  ;;  %v8898_v50 = vld [vmem:[%s13453_s5] sm:$0xff]   ;;  %s9737_s21 = scalar_lea.vmem %s7535_s20, 128  ;;  %p9742_p1 = scmp.lt.s32.totalorder %s7535_s20, %s7535_s20 }
  0x24   :  { %v161_v49 = vpack.c.bf16 %v81_v48, %v80_v47  ;;  %8432 = vmatprep.subr.bf16.mxu1 %v8898_v50  ;;  %v8899_v51 = vld [vmem:[%s13453_s5 + $0x8] sm:$0xff]   ;;  %v8900_v52 = vld [vmem:[%s13455_s7] sm:$0xff]   ;;  %p9738_p0 = scmp.ne.s32.totalorder %s7535_s20, %s9737_s21  ;;  %p9743_p2 = scmp.lt.s32.totalorder %s9737_s21, %s9737_s21 }
  0x25   :  { %8433 = vmatpush3.bf16.msra.mxu1 %v8898_v50  ;;  %v9971_v53 = vld [vmem:[%s13452_s4] ss:$0 sm:$0xff]  ;;  %v8901_v0 = vld [vmem:[%s13455_s7 + $0x8] sm:$0xff]   ;;  %s9762_s4 = smov 64  }
  0x26   :  { %8417 = vmatmul.mubr.msk.bf16.gmra.mrb[16].mxu0 %vm170_vm1, %v155_v33  ;;  %8434 = vmatprep.subr.bf16.mxu1 %v8899_v51  ;;  %p9744_p3 = por %p9743_p2, %p9742_p1 }
  0x27   :  { %8420 = vmatprep.mubr.msk.bf16.mxu0 %vm170_vm1, %v156_v34 }
  0x28   :  { %p9745_p4 = pnand %p9744_p3, %p9738_p0 }
  0x29   :  { %8435 = vmatpush3.bf16.msra.mxu1 %v8899_v51 }
  0x2a   :  { %8468 = vmatprep.subr.bf16.mxu1 %v8900_v52 }
  0x2e   :  { %8421 = vmatmul.mubr.msk.bf16.gmra.mrb[20].mxu0 %vm170_vm1, %v157_v39 }
  0x2f   :  { %8424 = vmatprep.mubr.msk.bf16.mxu0 %vm170_vm1, %v158_v40 }
  0x36   :  { %8425 = vmatmul.mubr.msk.bf16.gmra.mrb[24].mxu0 %vm170_vm1, %v159_v45 }
  0x37   :  { %8428 = vmatprep.mubr.msk.bf16.mxu0 %vm170_vm1, %v160_v46 }
  0x3e   :  { %8429 = vmatmul.mubr.msk.bf16.gmra.mrb[28].mxu0 %vm170_vm1, %v161_v49 }
  0xd9   :  { %v8402_v54 = vpop.f32.mrb[0].mxu0 }
  0xda   :  { %v266_v55 = vadd.f32 %v8402_v54, %v9971_v53  ;;  %v257_v56 = vpop.f32.mrb[1].mxu0 }
  0xdb   :  { %v8403_v57 = vpop.f32.mrb[2].mxu0  ;;  %v258_v60 = vadd.f32 %v9971_v53, %v257_v56 }
  0xdc   :  { %v269_v58 = vadd.f32 %v8403_v57, %v9971_v53  ;;  %2192 = vrot.lane.b32.xlu0 %v266_v55, %s9761_s18  ;;  %v260_v59 = vpop.f32.mrb[3].mxu0 }
  0xdd   :  { %v261_v61 = vadd.f32 %v9971_v53, %v260_v59 }
  0xde   :  { %v9978_v62 = vpack.c.bf16 %v269_v58, %v266_v55  ;;  %2194 = vrot.lane.b32.xlu1 %v269_v58, %s9761_s18 }
  0xdf   :  { %v9981_v63 = vpack.c.bf16 %v261_v61, %v258_v60 }
  0xe0   :  { %2188 = vrot.lane.b32.xlu0 %v258_v60, %s9761_s18 }
  0xe1   :  { %v8406_v1 = vpop.f32.mrb[4].mxu0  ;;  %8436 = vmatprep.mubr.msk.bf16.mxu1 %vm423_vm2, %v9981_v63 }
  0xe2   :  { %v282_v2 = vadd.f32 %v8406_v1, %v9971_v53  ;;  %v273_v3 = vpop.f32.mrb[5].mxu0  ;;  %2190 = vrot.lane.b32.xlu1 %v261_v61, %s9761_s18  ;;  %8437 = vmatmul.mubr.msk.bf16.vlgmr.msra.gmra.mrb[0].mxu1 %vm423_vm2, %v9978_v62 }
  0xe3   :  { %v8407_v4 = vpop.f32.mrb[6].mxu0  ;;  %8469 = vmatpush3.bf16.msra.mxu1 %v8900_v52  ;;  %v274_v7 = vadd.f32 %v9971_v53, %v273_v3 }
  0xe4   :  { %v285_v5 = vadd.f32 %v8407_v4, %v9971_v53  ;;  %v276_v6 = vpop.f32.mrb[7].mxu0  ;;  %2200 = vrot.lane.b32.xlu0 %v282_v2, %s9761_s18  ;;  %8470 = vmatprep.subr.bf16.mxu1 %v8901_v0 }
  0xe5   :  { %v277_v8 = vadd.f32 %v9971_v53, %v276_v6 }
  0xe6   :  { %v9997_v9 = vpack.c.bf16 %v285_v5, %v282_v2  ;;  %2202 = vrot.lane.b32.xlu1 %v285_v5, %s9761_s18 }
  0xe7   :  { %v10000_v10 = vpack.c.bf16 %v277_v8, %v274_v7  ;;  %8471 = vmatpush3.bf16.msra.mxu1 %v8901_v0 }
  0xe8   :  { %2196 = vrot.lane.b32.xlu0 %v274_v7, %s9761_s18 }
  0xe9   :  { %v8410_v11 = vpop.f32.mrb[8].mxu0  ;;  %8440 = vmatprep.mubr.msk.bf16.mxu1 %vm423_vm2, %v10000_v10 }
  0xea   :  { %v298_v12 = vadd.f32 %v8410_v11, %v9971_v53  ;;  %v289_v13 = vpop.f32.mrb[9].mxu0  ;;  %2198 = vrot.lane.b32.xlu1 %v277_v8, %s9761_s18  ;;  %8441 = vmatmul.mubr.msk.bf16.gmra.mrb[4].mxu1 %vm423_vm2, %v9997_v9 }
  0xeb   :  { %v8411_v14 = vpop.f32.mrb[10].mxu0  ;;  %v290_v17 = vadd.f32 %v9971_v53, %v289_v13 }
  0xec   :  { %v301_v15 = vadd.f32 %v8411_v14, %v9971_v53  ;;  %v292_v16 = vpop.f32.mrb[11].mxu0  ;;  %2208 = vrot.lane.b32.xlu0 %v298_v12, %s9761_s18 }
  0xed   :  { %v293_v18 = vadd.f32 %v9971_v53, %v292_v16 }
  0xee   :  { %v10013_v19 = vpack.c.bf16 %v301_v15, %v298_v12  ;;  %2210 = vrot.lane.b32.xlu1 %v301_v15, %s9761_s18 }
  0xef   :  { %v10016_v20 = vpack.c.bf16 %v293_v18, %v290_v17 }
  0xf0   :  { %2204 = vrot.lane.b32.xlu0 %v290_v17, %s9761_s18 }
  0xf1   :  { %v8414_v21 = vpop.f32.mrb[12].mxu0  ;;  %8444 = vmatprep.mubr.msk.bf16.mxu1 %vm423_vm2, %v10016_v20 }
  0xf2   :  { %v314_v22 = vadd.f32 %v8414_v21, %v9971_v53  ;;  %v305_v23 = vpop.f32.mrb[13].mxu0  ;;  %2206 = vrot.lane.b32.xlu1 %v293_v18, %s9761_s18  ;;  %8445 = vmatmul.mubr.msk.bf16.gmra.mrb[8].mxu1 %vm423_vm2, %v10013_v19 }
  0xf3   :  { %v8415_v24 = vpop.f32.mrb[14].mxu0  ;;  %v306_v27 = vadd.f32 %v9971_v53, %v305_v23 }
  0xf4   :  { %v317_v25 = vadd.f32 %v8415_v24, %v9971_v53  ;;  %v308_v26 = vpop.f32.mrb[15].mxu0  ;;  %2216 = vrot.lane.b32.xlu0 %v314_v22, %s9761_s18 }
  0xf5   :  { %v309_v28 = vadd.f32 %v9971_v53, %v308_v26 }
  0xf6   :  { %v10029_v29 = vpack.c.bf16 %v317_v25, %v314_v22  ;;  %2218 = vrot.lane.b32.xlu1 %v317_v25, %s9761_s18 }
  0xf7   :  { %v10032_v30 = vpack.c.bf16 %v309_v28, %v306_v27 }
  0xf8   :  { %2212 = vrot.lane.b32.xlu0 %v306_v27, %s9761_s18 }
  0xf9   :  { %v8418_v31 = vpop.f32.mrb[16].mxu0  ;;  %8448 = vmatprep.mubr.msk.bf16.mxu1 %vm423_vm2, %v10032_v30 }
  0xfa   :  { %v330_v32 = vadd.f32 %v8418_v31, %v9971_v53  ;;  %v321_v33 = vpop.f32.mrb[17].mxu0  ;;  %2214 = vrot.lane.b32.xlu1 %v309_v28, %s9761_s18  ;;  %8449 = vmatmul.mubr.msk.bf16.gmra.mrb[12].mxu1 %vm423_vm2, %v10029_v29 }
  0xfb   :  { %v8419_v34 = vpop.f32.mrb[18].mxu0  ;;  %v322_v37 = vadd.f32 %v9971_v53, %v321_v33 }
  0xfc   :  { %v333_v35 = vadd.f32 %v8419_v34, %v9971_v53  ;;  %v324_v36 = vpop.f32.mrb[19].mxu0  ;;  %2224 = vrot.lane.b32.xlu0 %v330_v32, %s9761_s18 }
  0xfd   :  { %v325_v38 = vadd.f32 %v9971_v53, %v324_v36 }
  0xfe   :  { %v400_v39 = vpack.c.bf16 %v333_v35, %v330_v32  ;;  %2226 = vrot.lane.b32.xlu1 %v333_v35, %s9761_s18 }
  0xff   :  { %v399_v40 = vpack.c.bf16 %v325_v38, %v322_v37 }
 0x100   :  { %2220 = vrot.lane.b32.xlu0 %v322_v37, %s9761_s18 }
 0x101   :  { %v8422_v41 = vpop.f32.mrb[20].mxu0  ;;  %8452 = vmatprep.mubr.msk.bf16.mxu1 %vm423_vm2, %v399_v40 }
 0x102   :  { %v346_v42 = vadd.f32 %v8422_v41, %v9971_v53  ;;  %v337_v43 = vpop.f32.mrb[21].mxu0  ;;  %2222 = vrot.lane.b32.xlu1 %v325_v38, %s9761_s18  ;;  %8453 = vmatmul.mubr.msk.bf16.gmra.mrb[16].mxu1 %vm423_vm2, %v400_v39 }
 0x103   :  { %v8423_v44 = vpop.f32.mrb[22].mxu0  ;;  %v338_v47 = vadd.f32 %v9971_v53, %v337_v43 }
 0x104   :  { %v349_v45 = vadd.f32 %v8423_v44, %v9971_v53  ;;  %v340_v46 = vpop.f32.mrb[23].mxu0  ;;  %2232 = vrot.lane.b32.xlu0 %v346_v42, %s9761_s18 }
 0x105   :  { %v341_v48 = vadd.f32 %v9971_v53, %v340_v46 }
 0x106   :  { %v402_v49 = vpack.c.bf16 %v349_v45, %v346_v42  ;;  %2234 = vrot.lane.b32.xlu1 %v349_v45, %s9761_s18 }
 0x107   :  { %v401_v50 = vpack.c.bf16 %v341_v48, %v338_v47 }
 0x108   :  { %2228 = vrot.lane.b32.xlu0 %v338_v47, %s9761_s18 }
 0x109   :  { %v8426_v51 = vpop.f32.mrb[24].mxu0  ;;  %8456 = vmatprep.mubr.msk.bf16.mxu1 %vm423_vm2, %v401_v50 }
 0x10a   :  { %v362_v52 = vadd.f32 %v8426_v51, %v9971_v53  ;;  %v353_v54 = vpop.f32.mrb[25].mxu0  ;;  %8457 = vmatmul.mubr.msk.bf16.gmra.mrb[20].mxu1 %vm423_vm2, %v402_v49  ;;  %2230 = vrot.lane.b32.xlu1 %v341_v48, %s9761_s18 }
 0x10b   :  { %v8427_v55 = vpop.f32.mrb[26].mxu0  ;;  %v354_v58 = vadd.f32 %v9971_v53, %v353_v54 }
 0x10c   :  { %v365_v56 = vadd.f32 %v8427_v55, %v9971_v53  ;;  %v356_v57 = vpop.f32.mrb[27].mxu0  ;;  %2240 = vrot.lane.b32.xlu0 %v362_v52, %s9761_s18 }
 0x10d   :  { %v357_v59 = vadd.f32 %v9971_v53, %v356_v57  ;;  %v8902_v57 = vld [vmem:[%s13450_s2] ss:$8 sps:$4 sm:$0xff]  }
 0x10e   :  { %v404_v60 = vpack.c.bf16 %v365_v56, %v362_v52  ;;  %2242 = vrot.lane.b32.xlu1 %v365_v56, %s9761_s18 }
 0x10f   :  { %v403_v61 = vpack.c.bf16 %v357_v59, %v354_v58 }
 0x110   :  { %2236 = vrot.lane.b32.xlu0 %v354_v58, %s9761_s18  ;;  %v8905_v58 = vld [vmem:[%s13450_s2 + $0x14] ss:$8 sps:$4 sm:$0xff]  }
 0x111   :  { %v8430_v0 = vpop.f32.mrb[28].mxu0  ;;  %8460 = vmatprep.mubr.msk.bf16.mxu1 %vm423_vm2, %v403_v61 }
 0x112   :  { %v369_v1 = vpop.f32.mrb[29].mxu0  ;;  %8461 = vmatmul.mubr.msk.bf16.gmra.mrb[24].mxu1 %vm423_vm2, %v404_v60  ;;  %2238 = vrot.lane.b32.xlu1 %v357_v59, %s9761_s18  ;;  %v10080_v7 = vadd.f32 %v8430_v0, %v9971_v53  ;;  %v8907_v59 = vld [vmem:[%s13450_s2 + $0x10] ss:$8 sps:$4 sm:$0xff]   ;;  %v8911_v0 = vld [vmem:[%s13450_s2 + $0x34] ss:$8 sps:$4 sm:$0xff]  }
 0x113   :  { %v8431_v2 = vpop.f32.mrb[30].mxu0  ;;  %v10074_v5 = vadd.f32 %v9971_v53, %v369_v1  ;;  %v8913_v1 = vld [vmem:[%s13450_s2 + $0x30] ss:$8 sps:$4 sm:$0xff]  }
 0x114   :  { %v10071_v3 = vadd.f32 %v8431_v2, %v9971_v53  ;;  %v372_v4 = vpop.f32.mrb[31].mxu0  ;;  %v8914_v2 = vld [vmem:[%s13450_s2 + $0x44] ss:$8 sps:$4 sm:$0xff]  }
 0x115   :  { %v10077_v6 = vadd.f32 %v9971_v53, %v372_v4  ;;  %v10115_v53 = vld [vmem:[%s13450_s2 + $0x4] ss:$8 sps:$4 sm:$0xff]   ;;  %v8916_v4 = vld [vmem:[%s13450_s2 + $0x40] ss:$8 sps:$4 sm:$0xff]  }
 0x116   :  { %v406_v11 = vpack.c.bf16 %v10071_v3, %v10080_v7  ;;  %841 = vmatprep.mubr.bf16.mxu0 %v10115_v53 }
 0x117   :  { %v405_v8 = vpack.c.bf16 %v10077_v6, %v10074_v5 }
 0x119   :  { %8464 = vmatprep.mubr.msk.bf16.mxu1 %vm423_vm2, %v405_v8 }
 0x11a   :  { %8465 = vmatmul.mubr.msk.bf16.gmra.mrb[28].mxu1 %vm423_vm2, %v406_v11 }
 0x11b   :  { %8472 = vmatprep.mubr.msk.bf16.mxu1 %vm423_vm2, %v9981_v63 }
 0x122   :  { %8473 = vmatmul.mubr.msk.bf16.vlgmr.msra.gmra.mrb[32].mxu1 %vm423_vm2, %v9978_v62 }
 0x123   :  { %8476 = vmatprep.mubr.msk.bf16.mxu1 %vm423_vm2, %v10000_v10 }
 0x12a   :  { %8477 = vmatmul.mubr.msk.bf16.gmra.mrb[36].mxu1 %vm423_vm2, %v9997_v9 }
 0x12b   :  { %8480 = vmatprep.mubr.msk.bf16.mxu1 %vm423_vm2, %v10016_v20 }
 0x132   :  { %8481 = vmatmul.mubr.msk.bf16.gmra.mrb[40].mxu1 %vm423_vm2, %v10013_v19 }
 0x133   :  { %8484 = vmatprep.mubr.msk.bf16.mxu1 %vm423_vm2, %v10032_v30 }
 0x13a   :  { %8485 = vmatmul.mubr.msk.bf16.gmra.mrb[44].mxu1 %vm423_vm2, %v10029_v29 }
 0x13b   :  { %8488 = vmatprep.mubr.msk.bf16.mxu1 %vm423_vm2, %v399_v40 }
 0x142   :  { %8489 = vmatmul.mubr.msk.bf16.gmra.mrb[48].mxu1 %vm423_vm2, %v400_v39 }
 0x143   :  { %8492 = vmatprep.mubr.msk.bf16.mxu1 %vm423_vm2, %v401_v50 }
 0x14a   :  { %8493 = vmatmul.mubr.msk.bf16.gmra.mrb[52].mxu1 %vm423_vm2, %v402_v49 }
 0x14b   :  { %8496 = vmatprep.mubr.msk.bf16.mxu1 %vm423_vm2, %v403_v61  ;;  %v8910_v61 = vld [vmem:[%s13450_s2 + $0x20] ss:$8 sps:$4 sm:$0xff]  }
 0x152   :  { %8497 = vmatmul.mubr.msk.bf16.gmra.mrb[56].mxu1 %vm423_vm2, %v404_v60  ;;  %v8908_v60 = vld [vmem:[%s13450_s2 + $0x24] ss:$8 sps:$4 sm:$0xff]  }
 0x153   :  { %8500 = vmatprep.mubr.msk.bf16.mxu1 %vm423_vm2, %v405_v8  ;;  %v8917_v8 = vld [vmem:[%s13450_s2 + $0x54] ss:$8 sps:$4 sm:$0xff]  }
 0x15a   :  { %8501 = vmatmul.mubr.msk.bf16.gmra.mrb[60].mxu1 %vm423_vm2, %v406_v11  ;;  %v8919_v11 = vld [vmem:[%s13450_s2 + $0x50] ss:$8 sps:$4 sm:$0xff]  }
 0x1b5   :  { %v8438_v62 = vpop.f32.mrb[0].mxu1 }
 0x1b6   :  { %v506_v63 = vpop.f32.mrb[1].mxu1 }
 0x1b7   :  { %v8439_v9 = vpop.f32.mrb[2].mxu1 }
 0x1b8   :  { %v634_v10 = vpack.c.bf16 %v8439_v9, %v8438_v62  ;;  %v509_v12 = vpop.f32.mrb[3].mxu1  ;;  %v8920_v62 = vld [vmem:[%s13450_s2 + $0x64] ss:$8 sps:$4 sm:$0xff]   ;;  %v8923_v9 = vld [vmem:[%s13450_s2 + $0x74] ss:$8 sps:$4 sm:$0xff]  }
 0x1b9   :  { %v633_v13 = vpack.c.bf16 %v509_v12, %v506_v63  ;;  %v8922_v63 = vld [vmem:[%s13450_s2 + $0x60] ss:$8 sps:$4 sm:$0xff]   ;;  %v8926_v12 = vld [vmem:[%s13450_s2 + $0x84] ss:$8 sps:$4 sm:$0xff]  }
 0x1bd   :  { %v8442_v14 = vpop.f32.mrb[4].mxu1 }
 0x1be   :  { %v522_v15 = vpop.f32.mrb[5].mxu1 }
 0x1bf   :  { %v8443_v16 = vpop.f32.mrb[6].mxu1 }
 0x1c0   :  { %v636_v17 = vpack.c.bf16 %v8443_v16, %v8442_v14  ;;  %v525_v18 = vpop.f32.mrb[7].mxu1  ;;  %v8929_v14 = vld [vmem:[%s13450_s2 + $0x94] ss:$8 sps:$4 sm:$0xff]   ;;  %v8932_v16 = vld [vmem:[%s13450_s2 + $0xa4] ss:$8 sps:$4 sm:$0xff]  }
 0x1c1   :  { %v635_v19 = vpack.c.bf16 %v525_v18, %v522_v15  ;;  %v8931_v15 = vld [vmem:[%s13450_s2 + $0x90] ss:$8 sps:$4 sm:$0xff]   ;;  %v8935_v18 = vld [vmem:[%s13450_s2 + $0xb4] ss:$8 sps:$4 sm:$0xff]  }
 0x1c5   :  { %v8446_v20 = vpop.f32.mrb[8].mxu1 }
 0x1c6   :  { %v538_v21 = vpop.f32.mrb[9].mxu1 }
 0x1c7   :  { %v8447_v22 = vpop.f32.mrb[10].mxu1 }
 0x1c8   :  { %v638_v23 = vpack.c.bf16 %v8447_v22, %v8446_v20  ;;  %v541_v24 = vpop.f32.mrb[11].mxu1  ;;  %v8938_v20 = vld [vmem:[%s13450_s2 + $0xc4] ss:$8 sps:$4 sm:$0xff]   ;;  %v8940_v22 = vld [vmem:[%s13450_s2 + $0xc0] ss:$8 sps:$4 sm:$0xff]  }
 0x1c9   :  { %v637_v25 = vpack.c.bf16 %v541_v24, %v538_v21  ;;  %v8950_v21 = vld [vmem:[%s13454_s6] sm:$0xff]   ;;  %v8951_v24 = vld [vmem:[%s13454_s6 + $0x8] sm:$0xff]  }
 0x1ca   :  { %8504 = vmatprep.subr.bf16.mxu1 %v8950_v21 }
 0x1cb   :  { %8505 = vmatpush3.bf16.msra.mxu1 %v8950_v21 }
 0x1cc   :  { %8506 = vmatprep.subr.bf16.mxu1 %v8951_v24 }
 0x1cd   :  { %v8450_v26 = vpop.f32.mrb[12].mxu1 }
 0x1ce   :  { %v554_v27 = vpop.f32.mrb[13].mxu1 }
 0x1cf   :  { %v8451_v28 = vpop.f32.mrb[14].mxu1  ;;  %8507 = vmatpush3.bf16.msra.mxu1 %v8951_v24 }
 0x1d0   :  { %v640_v29 = vpack.c.bf16 %v8451_v28, %v8450_v26  ;;  %v557_v30 = vpop.f32.mrb[15].mxu1  ;;  %v8944_v26 = vld [vmem:[%s13450_s2 + $0xe4] ss:$8 sps:$4 sm:$0xff]   ;;  %v8947_v28 = vld [vmem:[%s13450_s2 + $0xf4] ss:$8 sps:$4 sm:$0xff]  }
 0x1d1   :  { %v639_v31 = vpack.c.bf16 %v557_v30, %v554_v27  ;;  %v8946_v27 = vld [vmem:[%s13450_s2 + $0xe0] ss:$8 sps:$4 sm:$0xff]  }
 0x1d5   :  { %v8454_v32 = vpop.f32.mrb[16].mxu1 }
 0x1d6   :  { %v570_v33 = vpop.f32.mrb[17].mxu1 }
 0x1d7   :  { %v8455_v34 = vpop.f32.mrb[18].mxu1 }
 0x1d8   :  { %v642_v35 = vpack.c.bf16 %v8455_v34, %v8454_v32  ;;  %v573_v36 = vpop.f32.mrb[19].mxu1 }
 0x1d9   :  { %v641_v37 = vpack.c.bf16 %v573_v36, %v570_v33 }
 0x1db   :  { %7905 = vmatprep.subr.bf16.mxu0 %v641_v37 }
 0x1dc   :  { %7906 = vmatpush3.bf16.msra.mxu0 %v633_v13  ;;  %v8928_v13 = vld [vmem:[%s13450_s2 + $0x80] ss:$8 sps:$4 sm:$0xff]  }
 0x1dd   :  { %v8458_v38 = vpop.f32.mrb[20].mxu1  ;;  %7907 = vmatprep.subr.bf16.mxu0 %v642_v35 }
 0x1de   :  { %v586_v39 = vpop.f32.mrb[21].mxu1 }
 0x1df   :  { %v8459_v40 = vpop.f32.mrb[22].mxu1 }
 0x1e0   :  { %v644_v41 = vpack.c.bf16 %v8459_v40, %v8458_v38  ;;  %v589_v42 = vpop.f32.mrb[23].mxu1  ;;  %7908 = vmatpush3.bf16.msra.mxu0 %v634_v10  ;;  %v8925_v10 = vld [vmem:[%s13450_s2 + $0x70] ss:$8 sps:$4 sm:$0xff]  }
 0x1e1   :  { %v643_v43 = vpack.c.bf16 %v589_v42, %v586_v39 }
 0x1e3   :  { %7909 = vmatprep.subr.bf16.mxu0 %v643_v43 }
 0x1e4   :  { %7910 = vmatpush3.bf16.msra.mxu0 %v635_v19  ;;  %v8937_v19 = vld [vmem:[%s13450_s2 + $0xb0] ss:$8 sps:$4 sm:$0xff]  }
 0x1e5   :  { %v8462_v44 = vpop.f32.mrb[24].mxu1  ;;  %7911 = vmatprep.subr.bf16.mxu0 %v644_v41 }
 0x1e6   :  { %v602_v45 = vpop.f32.mrb[25].mxu1 }
 0x1e7   :  { %v8463_v46 = vpop.f32.mrb[26].mxu1 }
 0x1e8   :  { %v646_v47 = vpack.c.bf16 %v8463_v46, %v8462_v44  ;;  %v605_v48 = vpop.f32.mrb[27].mxu1  ;;  %7912 = vmatpush3.bf16.msra.mxu0 %v636_v17  ;;  %v8934_v17 = vld [vmem:[%s13450_s2 + $0xa0] ss:$8 sps:$4 sm:$0xff]  }
 0x1e9   :  { %v645_v49 = vpack.c.bf16 %v605_v48, %v602_v45 }
 0x1eb   :  { %7913 = vmatprep.subr.bf16.mxu0 %v645_v49 }
 0x1ec   :  { %7914 = vmatpush3.bf16.msra.mxu0 %v637_v25  ;;  %v8943_v25 = vld [vmem:[%s13450_s2 + $0xd0] ss:$8 sps:$4 sm:$0xff]  }
 0x1ed   :  { %v8466_v50 = vpop.f32.mrb[28].mxu1  ;;  %7915 = vmatprep.subr.bf16.mxu0 %v646_v47 }
 0x1ee   :  { %v618_v51 = vpop.f32.mrb[29].mxu1 }
 0x1ef   :  { %v8467_v52 = vpop.f32.mrb[30].mxu1 }
 0x1f0   :  { %v648_v54 = vpack.c.bf16 %v8467_v52, %v8466_v50  ;;  %v621_v55 = vpop.f32.mrb[31].mxu1  ;;  %7916 = vmatpush3.bf16.msra.mxu0 %v638_v23  ;;  %v8941_v23 = vld [vmem:[%s13450_s2 + $0xd4] ss:$8 sps:$4 sm:$0xff]  }
 0x1f1   :  { %v647_v56 = vpack.c.bf16 %v621_v55, %v618_v51 }
 0x1f3   :  { %7917 = vmatprep.subr.bf16.mxu0 %v647_v56 }
 0x1f4   :  { %7918 = vmatpush3.bf16.msra.mxu0 %v639_v31 }
 0x1f5   :  { %7919 = vmatprep.subr.bf16.mxu0 %v648_v54 }
 0x1f8   :  { %7920 = vmatpush3.bf16.msra.mxu0 %v640_v29  ;;  %v8949_v29 = vld [vmem:[%s13450_s2 + $0xf0] ss:$8 sps:$4 sm:$0xff]  }
 0x1fb   :  { %842 = vmatmul.mubr.bf16.vlgmr.msra.gmra.mrb[32].mxu0 %v8902_v57 }
 0x1fc   :  { %849 = vmatprep.mubr.bf16.mxu0 %v8905_v58 }
 0x203   :  { %850 = vmatmul.mubr.bf16.gmra.mrb[36].mxu0 %v8907_v59 }
 0x204   :  { %857 = vmatprep.mubr.bf16.mxu0 %v8908_v60 }
 0x20b   :  { %858 = vmatmul.mubr.bf16.gmra.mrb[40].mxu0 %v8910_v61 }
 0x20c   :  { %865 = vmatprep.mubr.bf16.mxu0 %v8911_v0 }
 0x213   :  { %866 = vmatmul.mubr.bf16.gmra.mrb[44].mxu0 %v8913_v1 }
 0x214   :  { %873 = vmatprep.mubr.bf16.mxu0 %v8914_v2 }
 0x21b   :  { %874 = vmatmul.mubr.bf16.gmra.mrb[48].mxu0 %v8916_v4 }
 0x21c   :  { %881 = vmatprep.mubr.bf16.mxu0 %v8917_v8 }
 0x223   :  { %882 = vmatmul.mubr.bf16.gmra.mrb[52].mxu0 %v8919_v11 }
 0x224   :  { %889 = vmatprep.mubr.bf16.mxu0 %v8920_v62 }
 0x22b   :  { %890 = vmatmul.mubr.bf16.gmra.mrb[56].mxu0 %v8922_v63 }
 0x22c   :  { %897 = vmatprep.mubr.bf16.mxu0 %v8923_v9 }
 0x233   :  { %898 = vmatmul.mubr.bf16.gmra.mrb[60].mxu0 %v8925_v10 }
 0x234   :  { %905 = vmatprep.mubr.bf16.mxu0 %v8926_v12 }
 0x23b   :  { %906 = vmatmul.mubr.bf16.gmra.mrb[64].mxu0 %v8928_v13 }
 0x23c   :  { %913 = vmatprep.mubr.bf16.mxu0 %v8929_v14 }
 0x243   :  { %914 = vmatmul.mubr.bf16.gmra.mrb[68].mxu0 %v8931_v15 }
 0x244   :  { %921 = vmatprep.mubr.bf16.mxu0 %v8932_v16 }
 0x24b   :  { %922 = vmatmul.mubr.bf16.gmra.mrb[72].mxu0 %v8934_v17 }
 0x24c   :  { %929 = vmatprep.mubr.bf16.mxu0 %v8935_v18 }
 0x253   :  { %930 = vmatmul.mubr.bf16.gmra.mrb[76].mxu0 %v8937_v19 }
 0x254   :  { %937 = vmatprep.mubr.bf16.mxu0 %v8938_v20 }
 0x25b   :  { %938 = vmatmul.mubr.bf16.gmra.mrb[80].mxu0 %v8940_v22 }
 0x25c   :  { %945 = vmatprep.mubr.bf16.mxu0 %v8941_v23 }
 0x263   :  { %946 = vmatmul.mubr.bf16.gmra.mrb[84].mxu0 %v8943_v25 }
 0x264   :  { %953 = vmatprep.mubr.bf16.mxu0 %v8944_v26 }
 0x26b   :  { %954 = vmatmul.mubr.bf16.gmra.mrb[88].mxu0 %v8946_v27 }
 0x26c   :  { %961 = vmatprep.mubr.bf16.mxu0 %v8947_v28 }
 0x273   :  { %962 = vmatmul.mubr.bf16.gmra.mrb[92].mxu0 %v8949_v29 }
 0x2ce   :  { %v7921_v30 = vpop.f32.mrb[32].mxu0 }
 0x2cf   :  { %v7922_v31 = vpop.f32.mrb[33].mxu0 }
 0x2d0   :  { %v7923_v32 = vadd.f32 %v7922_v31, %v7921_v30  ;;  %v7924_v33 = vpop.f32.mrb[34].mxu0 }
 0x2d1   :  { %v7925_v34 = vpop.f32.mrb[35].mxu0 }
 0x2d2   :  { %v7926_v35 = vadd.f32 %v7925_v34, %v7924_v33 }
 0x2d4   :  { %v970_v36 = vpack.c.bf16 %v7926_v35, %v7923_v32 }
 0x2d6   :  { %v7927_v37 = vpop.f32.mrb[36].mxu0  ;;  %8508 = vmatprep.mubr.msk.bf16.mxu1 %vm423_vm2, %v970_v36 }
 0x2d7   :  { %v7928_v38 = vpop.f32.mrb[37].mxu0 }
 0x2d8   :  { %v7929_v39 = vadd.f32 %v7928_v38, %v7927_v37  ;;  %v7930_v40 = vpop.f32.mrb[38].mxu0 }
 0x2d9   :  { %v7931_v41 = vpop.f32.mrb[39].mxu0 }
 0x2da   :  { %v7932_v42 = vadd.f32 %v7931_v41, %v7930_v40 }
 0x2dc   :  { %v971_v43 = vpack.c.bf16 %v7932_v42, %v7929_v39 }
 0x2de   :  { %8509 = vmatmul.mubr.msk.bf16.vlgmr.msra.gmra.mrb[32].mxu1 %vm423_vm2, %v971_v43  ;;  %v7933_v44 = vpop.f32.mrb[40].mxu0 }
 0x2df   :  { %v7934_v45 = vpop.f32.mrb[41].mxu0 }
 0x2e0   :  { %v7935_v46 = vadd.f32 %v7934_v45, %v7933_v44  ;;  %v7936_v47 = vpop.f32.mrb[42].mxu0 }
 0x2e1   :  { %v7937_v48 = vpop.f32.mrb[43].mxu0 }
 0x2e2   :  { %v7938_v49 = vadd.f32 %v7937_v48, %v7936_v47 }
 0x2e4   :  { %v972_v50 = vpack.c.bf16 %v7938_v49, %v7935_v46 }
 0x2e6   :  { %v7939_v51 = vpop.f32.mrb[44].mxu0  ;;  %8512 = vmatprep.mubr.msk.bf16.mxu1 %vm423_vm2, %v972_v50 }
 0x2e7   :  { %v7940_v52 = vpop.f32.mrb[45].mxu0 }
 0x2e8   :  { %v7941_v54 = vadd.f32 %v7940_v52, %v7939_v51  ;;  %v7942_v55 = vpop.f32.mrb[46].mxu0 }
 0x2e9   :  { %v7943_v56 = vpop.f32.mrb[47].mxu0 }
 0x2ea   :  { %v7944_v57 = vadd.f32 %v7943_v56, %v7942_v55 }
 0x2ec   :  { %v973_v58 = vpack.c.bf16 %v7944_v57, %v7941_v54 }
 0x2ee   :  { %8513 = vmatmul.mubr.msk.bf16.gmra.mrb[36].mxu1 %vm423_vm2, %v973_v58  ;;  %v7945_v59 = vpop.f32.mrb[48].mxu0 }
 0x2ef   :  { %v7946_v60 = vpop.f32.mrb[49].mxu0 }
 0x2f0   :  { %v7947_v61 = vadd.f32 %v7946_v60, %v7945_v59  ;;  %v7948_v0 = vpop.f32.mrb[50].mxu0 }
 0x2f1   :  { %v7949_v1 = vpop.f32.mrb[51].mxu0 }
 0x2f2   :  { %v7950_v2 = vadd.f32 %v7949_v1, %v7948_v0 }
 0x2f4   :  { %v974_v4 = vpack.c.bf16 %v7950_v2, %v7947_v61 }
 0x2f6   :  { %v7951_v8 = vpop.f32.mrb[52].mxu0  ;;  %8516 = vmatprep.mubr.msk.bf16.mxu1 %vm423_vm2, %v974_v4 }
 0x2f7   :  { %v7952_v11 = vpop.f32.mrb[53].mxu0 }
 0x2f8   :  { %v7953_v62 = vadd.f32 %v7952_v11, %v7951_v8  ;;  %v7954_v63 = vpop.f32.mrb[54].mxu0 }
 0x2f9   :  { %v7955_v9 = vpop.f32.mrb[55].mxu0 }
 0x2fa   :  { %v7956_v10 = vadd.f32 %v7955_v9, %v7954_v63 }
 0x2fc   :  { %v975_v12 = vpack.c.bf16 %v7956_v10, %v7953_v62 }
 0x2fe   :  { %8517 = vmatmul.mubr.msk.bf16.gmra.mrb[40].mxu1 %vm423_vm2, %v975_v12  ;;  %v7957_v13 = vpop.f32.mrb[56].mxu0 }
 0x2ff   :  { %v7958_v14 = vpop.f32.mrb[57].mxu0 }
 0x300   :  { %v7959_v15 = vadd.f32 %v7958_v14, %v7957_v13  ;;  %v7960_v16 = vpop.f32.mrb[58].mxu0 }
 0x301   :  { %v7961_v17 = vpop.f32.mrb[59].mxu0 }
 0x302   :  { %v7962_v18 = vadd.f32 %v7961_v17, %v7960_v16 }
 0x304   :  { %v976_v19 = vpack.c.bf16 %v7962_v18, %v7959_v15 }
 0x306   :  { %v7963_v20 = vpop.f32.mrb[60].mxu0  ;;  %8520 = vmatprep.mubr.msk.bf16.mxu1 %vm423_vm2, %v976_v19 }
 0x307   :  { %v7964_v21 = vpop.f32.mrb[61].mxu0 }
 0x308   :  { %v7965_v22 = vadd.f32 %v7964_v21, %v7963_v20  ;;  %v7966_v23 = vpop.f32.mrb[62].mxu0 }
 0x309   :  { %v7967_v24 = vpop.f32.mrb[63].mxu0 }
 0x30a   :  { %v7968_v25 = vadd.f32 %v7967_v24, %v7966_v23  ;;  %v10237_v24 = vld [vmem:[%s13456_s8] ss:$0 sm:$0xff] }
 0x30c   :  { %v977_v26 = vpack.c.bf16 %v7968_v25, %v7965_v22 }
 0x30e   :  { %8521 = vmatmul.mubr.msk.bf16.gmra.mrb[44].mxu1 %vm423_vm2, %v977_v26  ;;  %v7969_v27 = vpop.f32.mrb[64].mxu0 }
 0x30f   :  { %v7970_v28 = vpop.f32.mrb[65].mxu0 }
 0x310   :  { %v7971_v29 = vadd.f32 %v7970_v28, %v7969_v27  ;;  %v7972_v30 = vpop.f32.mrb[66].mxu0 }
 0x311   :  { %v7973_v31 = vpop.f32.mrb[67].mxu0 }
 0x312   :  { %v7974_v32 = vadd.f32 %v7973_v31, %v7972_v30 }
 0x314   :  { %v978_v33 = vpack.c.bf16 %v7974_v32, %v7971_v29 }
 0x316   :  { %v7975_v34 = vpop.f32.mrb[68].mxu0  ;;  %8524 = vmatprep.mubr.msk.bf16.mxu1 %vm423_vm2, %v978_v33 }
 0x317   :  { %v7976_v35 = vpop.f32.mrb[69].mxu0 }
 0x318   :  { %v7977_v36 = vadd.f32 %v7976_v35, %v7975_v34  ;;  %v7978_v37 = vpop.f32.mrb[70].mxu0 }
 0x319   :  { %v7979_v38 = vpop.f32.mrb[71].mxu0 }
 0x31a   :  { %v7980_v39 = vadd.f32 %v7979_v38, %v7978_v37 }
 0x31c   :  { %v979_v40 = vpack.c.bf16 %v7980_v39, %v7977_v36 }
 0x31e   :  { %8525 = vmatmul.mubr.msk.bf16.gmra.mrb[48].mxu1 %vm423_vm2, %v979_v40  ;;  %v7981_v41 = vpop.f32.mrb[72].mxu0 }
 0x31f   :  { %v7982_v42 = vpop.f32.mrb[73].mxu0 }
 0x320   :  { %v7983_v43 = vadd.f32 %v7982_v42, %v7981_v41  ;;  %v7984_v44 = vpop.f32.mrb[74].mxu0 }
 0x321   :  { %v7985_v45 = vpop.f32.mrb[75].mxu0 }
 0x322   :  { %v7986_v46 = vadd.f32 %v7985_v45, %v7984_v44  ;;  %v10282_v44 = vpop.permute.xlu1 %2194 }
 0x324   :  { %v980_v47 = vpack.c.bf16 %v7986_v46, %v7983_v43 }
 0x326   :  { %v7987_v48 = vpop.f32.mrb[76].mxu0  ;;  %8528 = vmatprep.mubr.msk.bf16.mxu1 %vm423_vm2, %v980_v47  ;;  %v10289_v47 = vpop.permute.xlu0 %2192 }
 0x327   :  { %v7988_v49 = vpop.f32.mrb[77].mxu0 }
 0x328   :  { %v7989_v50 = vadd.f32 %v7988_v49, %v7987_v48  ;;  %v7990_v51 = vpop.f32.mrb[78].mxu0 }
 0x329   :  { %v7991_v52 = vpop.f32.mrb[79].mxu0 }
 0x32a   :  { %v7992_v54 = vadd.f32 %v7991_v52, %v7990_v51  ;;  %v10305_v51 = vpop.permute.xlu0 %2188 }
 0x32c   :  { %v981_v55 = vpack.c.bf16 %v7992_v54, %v7989_v50  ;;  %v10301_v50 = vpop.permute.xlu1 %2190 }
 0x32e   :  { %8529 = vmatmul.mubr.msk.bf16.gmra.mrb[52].mxu1 %vm423_vm2, %v981_v55  ;;  %v7993_v56 = vpop.f32.mrb[80].mxu0  ;;  %v10309_v54 = vpop.permute.xlu0 %2200 }
 0x32f   :  { %v7994_v57 = vpop.f32.mrb[81].mxu0  ;;  %13654 = vst [vmem:[#allocation7_spill] sm:$0xff] %v10309_v54 }
 0x330   :  { %v7995_v58 = vadd.f32 %v7994_v57, %v7993_v56  ;;  %v7996_v59 = vpop.f32.mrb[82].mxu0  ;;  %v10307_v52 = vpop.permute.xlu1 %2202 }
 0x331   :  { %v7997_v60 = vpop.f32.mrb[83].mxu0  ;;  %13653 = vst [vmem:[#allocation6_spill] sm:$0xff] %v10307_v52 }
 0x332   :  { %v7998_v61 = vadd.f32 %v7997_v60, %v7996_v59 }
 0x334   :  { %v982_v0 = vpack.c.bf16 %v7998_v61, %v7995_v58  ;;  %v10319_v61 = vpop.permute.xlu1 %2198 }
 0x335   :  { %13655 = vst [vmem:[#allocation8_spill] sm:$0xff] %v10319_v61 }
 0x336   :  { %v7999_v1 = vpop.f32.mrb[84].mxu0  ;;  %8532 = vmatprep.mubr.msk.bf16.mxu1 %vm423_vm2, %v982_v0 }
 0x337   :  { %v8000_v2 = vpop.f32.mrb[85].mxu0 }
 0x338   :  { %v8001_v4 = vadd.f32 %v8000_v2, %v7999_v1  ;;  %v8002_v8 = vpop.f32.mrb[86].mxu0  ;;  %v10326_v1 = vpop.permute.xlu0 %2196 }
 0x339   :  { %v8003_v11 = vpop.f32.mrb[87].mxu0  ;;  %13656 = vst [vmem:[#allocation9_spill] sm:$0xff] %v10326_v1 }
 0x33a   :  { %v8004_v62 = vadd.f32 %v8003_v11, %v8002_v8 }
 0x33c   :  { %v983_v63 = vpack.c.bf16 %v8004_v62, %v8001_v4  ;;  %v10335_v4 = vpop.permute.xlu1 %2210  ;;  %v10337_v8 = vpop.permute.xlu0 %2208 }
 0x33d   :  { %13657 = vst [vmem:[#allocation10_spill] sm:$0xff] %v10335_v4  ;;  %13658 = vst [vmem:[#allocation11_spill] sm:$0xff] %v10337_v8 }
 0x33e   :  { %8533 = vmatmul.mubr.msk.bf16.gmra.mrb[56].mxu1 %vm423_vm2, %v983_v63  ;;  %v8005_v9 = vpop.f32.mrb[88].mxu0 }
 0x33f   :  { %v8006_v10 = vpop.f32.mrb[89].mxu0 }
 0x340   :  { %v8007_v12 = vadd.f32 %v8006_v10, %v8005_v9  ;;  %v8008_v13 = vpop.f32.mrb[90].mxu0  ;;  %v10339_v62 = vpop.permute.xlu1 %2206 }
 0x341   :  { %v8009_v14 = vpop.f32.mrb[91].mxu0  ;;  %13659 = vst [vmem:[#allocation12_spill] sm:$0xff] %v10339_v62  ;;  %v10344_v10 = vpop.permute.xlu0 %2204 }
 0x342   :  { %v8010_v15 = vadd.f32 %v8009_v14, %v8008_v13  ;;  %13660 = vst [vmem:[#allocation13_spill] sm:$0xff] %v10344_v10 }
 0x344   :  { %v984_v16 = vpack.c.bf16 %v8010_v15, %v8007_v12 }
 0x346   :  { %v8011_v17 = vpop.f32.mrb[92].mxu0  ;;  %8536 = vmatprep.mubr.msk.bf16.mxu1 %vm423_vm2, %v984_v16  ;;  %v10356_v16 = vpop.permute.xlu1 %2218 }
 0x347   :  { %v8012_v18 = vpop.f32.mrb[93].mxu0  ;;  %13661 = vst [vmem:[#allocation14_spill] sm:$0xff] %v10356_v16 }
 0x348   :  { %v8013_v19 = vadd.f32 %v8012_v18, %v8011_v17  ;;  %v8014_v20 = vpop.f32.mrb[94].mxu0  ;;  %v10363_v18 = vpop.permute.xlu0 %2216 }
 0x349   :  { %v8015_v21 = vpop.f32.mrb[95].mxu0  ;;  %13662 = vst [vmem:[#allocation15_spill] sm:$0xff] %v10363_v18 }
 0x34a   :  { %v8016_v22 = vadd.f32 %v8015_v21, %v8014_v20 }
 0x34c   :  { %v985_v23 = vpack.c.bf16 %v8016_v22, %v8013_v19  ;;  %v10367_v19 = vpop.permute.xlu1 %2214  ;;  %v10369_v20 = vpop.permute.xlu0 %2212 }
 0x34d   :  { %13663 = vst [vmem:[#allocation16_spill] sm:$0xff] %v10367_v19  ;;  %13664 = vst [vmem:[#allocation17_spill] sm:$0xff] %v10369_v20 }
 0x34e   :  { %8537 = vmatmul.mubr.msk.bf16.gmra.mrb[60].mxu1 %vm423_vm2, %v985_v23 }
 0x34f   :  { %2686 = vmatprep.mubr.bf16.mxu1 %v10115_v53 }
 0x3b1   :  { %v8510_v25 = vpop.f32.mrb[32].mxu1 }
 0x3b2   :  { %v10240_v26 = vadd.f32 %v8510_v25, %v10237_v24  ;;  %v1261_v27 = vpop.f32.mrb[33].mxu1 }
 0x3b3   :  { %v10243_v28 = vadd.f32 %v10237_v24, %v1261_v27  ;;  %v8511_v29 = vpop.f32.mrb[34].mxu1  ;;  %v10374_v27 = vpop.permute.xlu1 %2226 }
 0x3b4   :  { %1648 = vrot.lane.b32.xlu1 %v10240_v26, %s9761_s18  ;;  %v1264_v30 = vpop.f32.mrb[35].mxu1  ;;  %v10250_v53 = vadd.f32 %v8511_v29, %v10237_v24  ;;  %13665 = vst [vmem:[#allocation18_spill] sm:$0xff] %v10374_v27 }
 0x3b5   :  { %1644 = vrot.lane.b32.xlu0 %v10243_v28, %s9761_s18  ;;  %v10253_v31 = vadd.f32 %v10237_v24, %v1264_v30 }
 0x3b8   :  { %1650 = vrot.lane.b32.xlu1 %v10250_v53, %s9761_s18 }
 0x3b9   :  { %1646 = vrot.lane.b32.xlu0 %v10253_v31, %s9761_s18 }
 0x3c1   :  { %v8514_v32 = vpop.f32.mrb[36].mxu1 }
 0x3c2   :  { %v10260_v33 = vadd.f32 %v8514_v32, %v10237_v24  ;;  %v1277_v34 = vpop.f32.mrb[37].mxu1  ;;  %v10381_v32 = vpop.permute.xlu0 %2224 }
 0x3c3   :  { %v8515_v35 = vpop.f32.mrb[38].mxu1  ;;  %v10268_v38 = vadd.f32 %v10237_v24, %v1277_v34  ;;  %13666 = vst [vmem:[#allocation19_spill] sm:$0xff] %v10381_v32 }
 0x3c4   :  { %v10263_v36 = vadd.f32 %v8515_v35, %v10237_v24  ;;  %1656 = vrot.lane.b32.xlu0 %v10260_v33, %s9761_s18  ;;  %v1280_v37 = vpop.f32.mrb[39].mxu1 }
 0x3c5   :  { %v10273_v39 = vadd.f32 %v10237_v24, %v1280_v37  ;;  %v7648_v37 = vmul.f32 -1.442695, %v10240_v26 }
 0x3c6   :  { %1658 = vrot.lane.b32.xlu1 %v10263_v36, %s9761_s18 }
 0x3c7   :  { %8960 = vpow2.f32 %v7648_v37 }
 0x3c8   :  { %1652 = vrot.lane.b32.xlu0 %v10268_v38, %s9761_s18 }
 0x3ca   :  { %1654 = vrot.lane.b32.xlu1 %v10273_v39, %s9761_s18 }
 0x3d1   :  { %v8518_v40 = vpop.f32.mrb[40].mxu1 }
 0x3d2   :  { %v10280_v41 = vadd.f32 %v8518_v40, %v10237_v24  ;;  %v1293_v42 = vpop.f32.mrb[41].mxu1  ;;  %v10394_v40 = vpop.permute.xlu1 %2222 }
 0x3d3   :  { %v8519_v43 = vpop.f32.mrb[42].mxu1  ;;  %v10292_v48 = vadd.f32 %v10237_v24, %v1293_v42  ;;  %13667 = vst [vmem:[#allocation20_spill] sm:$0xff] %v10394_v40  ;;  %v10398_v42 = vpop.permute.xlu0 %2220 }
 0x3d4   :  { %v10285_v45 = vadd.f32 %v8519_v43, %v10237_v24  ;;  %1664 = vrot.lane.b32.xlu0 %v10280_v41, %s9761_s18  ;;  %v1296_v46 = vpop.f32.mrb[43].mxu1  ;;  %13668 = vst [vmem:[#allocation21_spill] sm:$0xff] %v10398_v42  ;;  %v7649_v43 = vmul.f32 -1.442695, %v10250_v53 }
 0x3d5   :  { %v10297_v49 = vadd.f32 %v10237_v24, %v1296_v46  ;;  %v7646_v46 = vmul.f32 -1.442695, %v10243_v28 }
 0x3d6   :  { %1666 = vrot.lane.b32.xlu1 %v10285_v45, %s9761_s18  ;;  %8962 = vpow2.f32 %v7649_v43  ;;  %v7652_v43 = vmul.f32 -1.442695, %v10260_v33 }
 0x3d7   :  { %8964 = vpow2.f32 %v7646_v46 }
 0x3d8   :  { %1660 = vrot.lane.b32.xlu0 %v10292_v48, %s9761_s18 }
 0x3da   :  { %1662 = vrot.lane.b32.xlu1 %v10297_v49, %s9761_s18 }
 0x3e1   :  { %v8522_v55 = vpop.f32.mrb[44].mxu1 }
 0x3e2   :  { %v10312_v56 = vadd.f32 %v8522_v55, %v10237_v24  ;;  %v1309_v57 = vpop.f32.mrb[45].mxu1  ;;  %v10402_v55 = vpop.permute.xlu1 %2234 }
 0x3e3   :  { %v8523_v58 = vpop.f32.mrb[46].mxu1  ;;  %v10322_v0 = vadd.f32 %v10237_v24, %v1309_v57  ;;  %13669 = vst [vmem:[#allocation22_spill] sm:$0xff] %v10402_v55  ;;  %v7647_v57 = vmul.f32 -1.442695, %v10253_v31 }
 0x3e4   :  { %v10315_v59 = vadd.f32 %v8523_v58, %v10237_v24  ;;  %1672 = vrot.lane.b32.xlu0 %v10312_v56, %s9761_s18  ;;  %v1312_v60 = vpop.f32.mrb[47].mxu1  ;;  %v10405_v58 = vpop.permute.xlu0 %2232 }
 0x3e5   :  { %v10329_v2 = vadd.f32 %v10237_v24, %v1312_v60  ;;  %13670 = vst [vmem:[#allocation23_spill] sm:$0xff] %v10405_v58  ;;  %8966 = vpow2.f32 %v7647_v57  ;;  %v7658_v61 = vmul.f32 -1.442695, %v10322_v0 }
 0x3e6   :  { %1674 = vrot.lane.b32.xlu1 %v10315_v59, %s9761_s18  ;;  %8968 = vpow2.f32 %v7652_v43 }
 0x3e8   :  { %1668 = vrot.lane.b32.xlu0 %v10322_v0, %s9761_s18  ;;  %v10422_v37 = vpop.permute.xlu0 %2228 }
 0x3e9   :  { %13672 = vst [vmem:[#allocation25_spill] sm:$0xff] %v10422_v37 }
 0x3ea   :  { %1670 = vrot.lane.b32.xlu1 %v10329_v2, %s9761_s18 }
 0x3ec   :  { %v10436_v58 = vpop.permute.xlu0 %2240 }
 0x3ed   :  { %13674 = vst [vmem:[#allocation27_spill] sm:$0xff] %v10436_v58 }
 0x3f1   :  { %v8526_v11 = vpop.f32.mrb[48].mxu1 }
 0x3f2   :  { %v10342_v63 = vadd.f32 %v8526_v11, %v10237_v24  ;;  %v1325_v9 = vpop.f32.mrb[49].mxu1 }
 0x3f3   :  { %v8527_v12 = vpop.f32.mrb[50].mxu1  ;;  %v10352_v15 = vadd.f32 %v10237_v24, %v1325_v9 }
 0x3f4   :  { %v10347_v13 = vadd.f32 %v8527_v12, %v10237_v24  ;;  %1680 = vrot.lane.b32.xlu0 %v10342_v63, %s9761_s18  ;;  %v1328_v14 = vpop.f32.mrb[51].mxu1 }
 0x3f5   :  { %v10359_v17 = vadd.f32 %v10237_v24, %v1328_v14 }
 0x3f6   :  { %1682 = vrot.lane.b32.xlu1 %v10347_v13, %s9761_s18 }
 0x3f8   :  { %1676 = vrot.lane.b32.xlu0 %v10352_v15, %s9761_s18 }
 0x3fa   :  { %1678 = vrot.lane.b32.xlu1 %v10359_v17, %s9761_s18 }
 0x401   :  { %v8530_v21 = vpop.f32.mrb[52].mxu1 }
 0x402   :  { %v10372_v22 = vadd.f32 %v8530_v21, %v10237_v24  ;;  %v1341_v23 = vpop.f32.mrb[53].mxu1 }
 0x403   :  { %v8531_v25 = vpop.f32.mrb[54].mxu1  ;;  %v10384_v34 = vadd.f32 %v10237_v24, %v1341_v23  ;;  %v10415_v23 = vpop.permute.xlu1 %2230 }
 0x404   :  { %v10377_v29 = vadd.f32 %v8531_v25, %v10237_v24  ;;  %1688 = vrot.lane.b32.xlu0 %v10372_v22, %s9761_s18  ;;  %v1344_v30 = vpop.f32.mrb[55].mxu1  ;;  %13671 = vst [vmem:[#allocation24_spill] sm:$0xff] %v10415_v23 }
 0x405   :  { %v10389_v35 = vadd.f32 %v10237_v24, %v1344_v30  ;;  %v8961_v30 = vpop.eup %8960 }
 0x406   :  { %1690 = vrot.lane.b32.xlu1 %v10377_v29, %s9761_s18  ;;  %v8963_v57 = vpop.eup %8962 }
 0x407   :  { %v8965_v23 = vpop.eup %8964  ;;  %v10434_v37 = vpop.permute.xlu1 %2242  ;;  %v1519_v55 = vadd.f32 1.0, %v8963_v57 }
 0x408   :  { %1684 = vrot.lane.b32.xlu0 %v10384_v34, %s9761_s18  ;;  %13673 = vst [vmem:[#allocation26_spill] sm:$0xff] %v10434_v37  ;;  %v8967_v40 = vpop.eup %8966  ;;  %v1516_v42 = vadd.f32 1.0, %v8965_v23  ;;  %v10444_v57 = vpop.permute.xlu0 %2236 }
 0x409   :  { %13676 = vst [vmem:[#allocation29_spill] sm:$0xff] %v10444_v57 }
 0x40a   :  { %1686 = vrot.lane.b32.xlu1 %v10389_v35, %s9761_s18 }
 0x40b   :  { %v10439_v43 = vpop.permute.xlu1 %2238 }
 0x40c   :  { %13675 = vst [vmem:[#allocation28_spill] sm:$0xff] %v10439_v43 }
 0x411   :  { %v8534_v60 = vpop.f32.mrb[56].mxu1 }
 0x412   :  { %v10408_v11 = vadd.f32 %v8534_v60, %v10237_v24  ;;  %v1357_v9 = vpop.f32.mrb[57].mxu1  ;;  %v7653_v60 = vmul.f32 -1.442695, %v10263_v36 }
 0x413   :  { %v8535_v12 = vpop.f32.mrb[58].mxu1  ;;  %v10418_v25 = vadd.f32 %v10237_v24, %v1357_v9  ;;  %v7650_v9 = vmul.f32 -1.442695, %v10268_v38 }
 0x414   :  { %v10411_v14 = vadd.f32 %v8535_v12, %v10237_v24  ;;  %1696 = vrot.lane.b32.xlu0 %v10408_v11, %s9761_s18  ;;  %v1360_v21 = vpop.f32.mrb[59].mxu1  ;;  %v1518_v12 = vadd.f32 1.0, %v8961_v30  ;;  %8970 = vpow2.f32 %v7653_v60  ;;  %v1517_v30 = vadd.f32 1.0, %v8967_v40  ;;  %v8969_v40 = vpop.eup %8968 }
 0x415   :  { %v10426_v46 = vadd.f32 %v10237_v24, %v1360_v21  ;;  %v7651_v21 = vmul.f32 -1.442695, %v10273_v39 }
 0x416   :  { %1698 = vrot.lane.b32.xlu1 %v10411_v14, %s9761_s18  ;;  %8972 = vrcp.f32 %v1518_v12 }
 0x417   :  { %8974 = vpow2.f32 %v7650_v9 }
 0x418   :  { %1692 = vrot.lane.b32.xlu0 %v10418_v25, %s9761_s18  ;;  %8976 = vrcp.f32 %v1519_v55 }
 0x419   :  { %8978 = vpow2.f32 %v7651_v21 }
 0x41a   :  { %1694 = vrot.lane.b32.xlu1 %v10426_v46, %s9761_s18  ;;  %8980 = vrcp.f32 %v1516_v42  ;;  %v7656_v42 = vmul.f32 -1.442695, %v10280_v41 }
 0x41b   :  { %8982 = vrcp.f32 %v1517_v30 }
 0x41c   :  { %8984 = vpow2.f32 %v7656_v42 }
 0x421   :  { %v8538_v27 = vpop.f32.mrb[60].mxu1 }
 0x422   :  { %v10442_v32 = vadd.f32 %v8538_v27, %v10237_v24  ;;  %v1373_v37 = vpop.f32.mrb[61].mxu1  ;;  %v8971_v27 = vpop.eup %8970 }
 0x423   :  { %v8539_v60 = vpop.f32.mrb[62].mxu1  ;;  %v10452_v23 = vadd.f32 %v10237_v24, %v1373_v37  ;;  %v10457_v21 = vpop.eup %8972  ;;  %v7657_v37 = vmul.f32 -1.442695, %v10285_v45  ;;  %v1523_v19 = vadd.f32 1.0, %v8971_v27 }
 0x424   :  { %v10447_v58 = vadd.f32 %v8539_v60, %v10237_v24  ;;  %1704 = vrot.lane.b32.xlu0 %v10442_v32, %s9761_s18  ;;  %v1376_v55 = vpop.f32.mrb[63].mxu1  ;;  %v1522_v60 = vadd.f32 1.0, %v8969_v40  ;;  %v8975_v30 = vpop.eup %8974 }
 0x425   :  { %v10460_v43 = vadd.f32 %v10237_v24, %v1376_v55  ;;  %v10465_v57 = vpop.eup %8976  ;;  %v7654_v24 = vmul.f32 -1.442695, %v10292_v48  ;;  %v1520_v40 = vadd.f32 1.0, %v8975_v30 }
 0x426   :  { %v1649_v12 = vpop.permute.xlu1 %1648  ;;  %1706 = vrot.lane.b32.xlu1 %v10447_v58, %s9761_s18  ;;  %v8979_v18 = vpop.eup %8978  ;;  %8986 = vrcp.f32 %v1522_v60 }
 0x427   :  { %v1645_v9 = vpop.permute.xlu0 %1644  ;;  %v1742_v20 = vmul.f32 %v10457_v21, %v1649_v12  ;;  %v10473_v62 = vpop.eup %8980  ;;  %8988 = vpow2.f32 %v7657_v37  ;;  %v7655_v12 = vmul.f32 -1.442695, %v10297_v49  ;;  %v1521_v10 = vadd.f32 1.0, %v8979_v18 }
 0x428   :  { %1700 = vrot.lane.b32.xlu0 %v10452_v23, %s9761_s18  ;;  %8990 = vrcp.f32 %v1523_v19  ;;  %v1740_v4 = vmul.f32 %v10473_v62, %v1645_v9  ;;  %v10478_v42 = vpop.eup %8982  ;;  %v7660_v9 = vmul.f32 -1.442695, %v10312_v56 }
 0x429   :  { %8992 = vpow2.f32 %v7654_v24 }
 0x42a   :  { %v1651_v16 = vpop.permute.xlu1 %1650  ;;  %1702 = vrot.lane.b32.xlu1 %v10460_v43, %s9761_s18  ;;  %8994 = vrcp.f32 %v1520_v40 }
 0x42b   :  { %v1743_v55 = vmul.f32 %v10465_v57, %v1651_v16  ;;  %v1647_v27 = vpop.permute.xlu0 %1646  ;;  %8996 = vpow2.f32 %v7655_v12 }
 0x42c   :  { %1808 = vrot.lane.b32.xlu0 %v1742_v20, %s9762_s4  ;;  %v1741_v16 = vmul.f32 %v10478_v42, %v1647_v27  ;;  %8998 = vrcp.f32 %v1521_v10  ;;  %v8985_v20 = vpop.eup %8984 }
 0x42d   :  { %v1526_v24 = vadd.f32 1.0, %v8985_v20  ;;  %9000 = vpow2.f32 %v7660_v9 }
 0x42e   :  { %1810 = vrot.lane.b32.xlu1 %v1743_v55, %s9762_s4 }
 0x42f   :  { %9002 = vrcp.f32 %v1526_v24 }
 0x430   :  { %1804 = vrot.lane.b32.xlu0 %v1740_v4, %s9762_s4  ;;  %v10483_v60 = vpop.eup %8986  ;;  %v7661_v4 = vmul.f32 -1.442695, %v10315_v59 }
 0x431   :  { %v8989_v19 = vpop.eup %8988 }
 0x432   :  { %1806 = vrot.lane.b32.xlu1 %v1741_v16, %s9762_s4  ;;  %v10487_v37 = vpop.eup %8990  ;;  %v1527_v27 = vadd.f32 1.0, %v8989_v19  ;;  %9004 = vpow2.f32 %v7661_v4  ;;  %v7664_v4 = vmul.f32 -1.442695, %v10342_v63 }
 0x433   :  { %v8993_v40 = vpop.eup %8992 }
 0x434   :  { %v10492_v12 = vpop.eup %8994  ;;  %v1524_v1 = vadd.f32 1.0, %v8993_v40  ;;  %9006 = vrcp.f32 %v1527_v27 }
 0x435   :  { %13677 = vst [vmem:[#allocation30_spill] sm:$0xff] %v10492_v12  ;;  %v8997_v8 = vpop.eup %8996  ;;  %9008 = vpow2.f32 %v7658_v61  ;;  %v7665_v61 = vmul.f32 -1.442695, %v10347_v13 }
 0x436   :  { %v1657_v18 = vpop.permute.xlu0 %1656  ;;  %v10497_v20 = vpop.eup %8998  ;;  %v1525_v19 = vadd.f32 1.0, %v8997_v8  ;;  %9010 = vrcp.f32 %v1524_v1 }
 0x437   :  { %v1746_v30 = vmul.f32 %v10483_v60, %v1657_v18  ;;  %13678 = vst [vmem:[#allocation31_spill] sm:$0xff] %v10497_v20  ;;  %v9001_v9 = vpop.eup %9000 }
 0x438   :  { %v1659_v55 = vpop.permute.xlu1 %1658 }
 0x439   :  { %v1747_v10 = vmul.f32 %v10487_v37, %v1659_v55  ;;  %1816 = vrot.lane.b32.xlu0 %v1746_v30, %s9762_s4  ;;  %v7659_v30 = vmul.f32 -1.442695, %v10329_v2 }
 0x43a   :  { %v1653_v16 = vpop.permute.xlu0 %1652 }
 0x43b   :  { %v1744_v18 = vmul.f32 %v10492_v12, %v1653_v16  ;;  %1818 = vrot.lane.b32.xlu1 %v1747_v10, %s9762_s4  ;;  %9012 = vpow2.f32 %v7659_v30  ;;  %v10503_v10 = vpop.eup %9002  ;;  %v7662_v12 = vmul.f32 -1.442695, %v10352_v15 }
 0x43c   :  { %v1655_v52 = vpop.permute.xlu1 %1654  ;;  %9014 = vrcp.f32 %v1525_v19  ;;  %13679 = vst [vmem:[#allocation32_spill] sm:$0xff] %v10503_v10  ;;  %v9005_v40 = vpop.eup %9004 }
 0x43d   :  { %v1745_v55 = vmul.f32 %v10497_v20, %v1655_v52  ;;  %1812 = vrot.lane.b32.xlu0 %v1744_v18, %s9762_s4  ;;  %v1530_v18 = vadd.f32 1.0, %v9001_v9  ;;  %9016 = vpow2.f32 %v7664_v4 }
 0x43e   :  { %v10507_v52 = vpop.eup %9006 }
 0x43f   :  { %1814 = vrot.lane.b32.xlu1 %v1745_v55, %s9762_s4  ;;  %13680 = vst [vmem:[#allocation33_spill] sm:$0xff] %v10507_v52  ;;  %v9009_v8 = vpop.eup %9008  ;;  %v1531_v55 = vadd.f32 1.0, %v9005_v40  ;;  %9018 = vrcp.f32 %v1530_v18 }
 0x440   :  { %v10512_v30 = vpop.eup %9010  ;;  %9020 = vpow2.f32 %v7665_v61  ;;  %v7668_v61 = vmul.f32 -1.442695, %v10372_v22 }
 0x441   :  { %13681 = vst [vmem:[#allocation34_spill] sm:$0xff] %v10512_v30  ;;  %9022 = vrcp.f32 %v1531_v55 }
 0x442   :  { %9024 = vpow2.f32 %v7662_v12  ;;  %v7669_v12 = vmul.f32 -1.442695, %v10377_v29 }
 0x445   :  { %v9013_v20 = vpop.eup %9012 }
 0x446   :  { %v1665_v24 = vpop.permute.xlu0 %1664  ;;  %v10517_v9 = vpop.eup %9014  ;;  %v1529_v40 = vadd.f32 1.0, %v9013_v20 }
 0x447   :  { %v1750_v16 = vmul.f32 %v10503_v10, %v1665_v24  ;;  %13682 = vst [vmem:[#allocation35_spill] sm:$0xff] %v10517_v9  ;;  %v1528_v10 = vadd.f32 1.0, %v9009_v8  ;;  %v9017_v4 = vpop.eup %9016 }
 0x448   :  { %v1667_v27 = vpop.permute.xlu1 %1666 }
 0x449   :  { %v1751_v1 = vmul.f32 %v10507_v52, %v1667_v27  ;;  %1824 = vrot.lane.b32.xlu0 %v1750_v16, %s9762_s4  ;;  %v7663_v16 = vmul.f32 -1.442695, %v10359_v17  ;;  %9026 = vrcp.f32 %v1528_v10 }
 0x44a   :  { %v1661_v19 = vpop.permute.xlu0 %1660 }
 0x44b   :  { %v1748_v24 = vmul.f32 %v10512_v30, %v1661_v19  ;;  %1826 = vrot.lane.b32.xlu1 %v1751_v1, %s9762_s4  ;;  %9028 = vpow2.f32 %v7663_v16  ;;  %v10523_v1 = vpop.eup %9018  ;;  %v7666_v30 = vmul.f32 -1.442695, %v10384_v34 }
 0x44c   :  { %v1663_v54 = vpop.permute.xlu1 %1662  ;;  %9030 = vrcp.f32 %v1529_v40  ;;  %13683 = vst [vmem:[#allocation36_spill] sm:$0xff] %v10523_v1  ;;  %v9021_v8 = vpop.eup %9020 }
 0x44d   :  { %v1749_v27 = vmul.f32 %v10517_v9, %v1663_v54  ;;  %1820 = vrot.lane.b32.xlu0 %v1748_v24, %s9762_s4  ;;  %v10527_v54 = vpop.eup %9022  ;;  %v1534_v24 = vadd.f32 1.0, %v9017_v4  ;;  %9032 = vpow2.f32 %v7668_v61 }
 0x44e   :  { %13684 = vst [vmem:[#allocation37_spill] sm:$0xff] %v10527_v54  ;;  %v9025_v20 = vpop.eup %9024 }
 0x44f   :  { %1822 = vrot.lane.b32.xlu1 %v1749_v27, %s9762_s4  ;;  %v1535_v27 = vadd.f32 1.0, %v9021_v8  ;;  %9034 = vrcp.f32 %v1534_v24 }
 0x450   :  { %9036 = vpow2.f32 %v7669_v12  ;;  %v7672_v12 = vmul.f32 -1.442695, %v10408_v11 }
 0x451   :  { %9038 = vrcp.f32 %v1535_v27 }
 0x452   :  { %9040 = vpow2.f32 %v7666_v30  ;;  %v7673_v30 = vmul.f32 -1.442695, %v10411_v14 }
 0x453   :  { %v10532_v16 = vpop.eup %9026 }
 0x454   :  { %13685 = vst [vmem:[#allocation38_spill] sm:$0xff] %v10532_v16 }
 0x455   :  { %v9029_v9 = vpop.eup %9028 }
 0x456   :  { %v1673_v18 = vpop.permute.xlu0 %1672  ;;  %v10537_v4 = vpop.eup %9030  ;;  %v1533_v8 = vadd.f32 1.0, %v9029_v9 }
 0x457   :  { %v1754_v19 = vmul.f32 %v10523_v1, %v1673_v18  ;;  %13686 = vst [vmem:[#allocation39_spill] sm:$0xff] %v10537_v4  ;;  %v1532_v1 = vadd.f32 1.0, %v9025_v20  ;;  %v9033_v61 = vpop.eup %9032 }
 0x458   :  { %v1675_v55 = vpop.permute.xlu1 %1674 }
 0x459   :  { %v1755_v10 = vmul.f32 %v10527_v54, %v1675_v55  ;;  %1832 = vrot.lane.b32.xlu0 %v1754_v19, %s9762_s4  ;;  %v7667_v19 = vmul.f32 -1.442695, %v10389_v35  ;;  %9042 = vrcp.f32 %v1532_v1 }
 0x45a   :  { %v1669_v40 = vpop.permute.xlu0 %1668 }
 0x45b   :  { %v1752_v18 = vmul.f32 %v10532_v16, %v1669_v40  ;;  %1834 = vrot.lane.b32.xlu1 %v1755_v10, %s9762_s4  ;;  %9044 = vpow2.f32 %v7667_v19  ;;  %v10543_v10 = vpop.eup %9034  ;;  %v7670_v16 = vmul.f32 -1.442695, %v10418_v25 }
 0x45c   :  { %v1671_v52 = vpop.permute.xlu1 %1670  ;;  %9046 = vrcp.f32 %v1533_v8  ;;  %13687 = vst [vmem:[#allocation40_spill] sm:$0xff] %v10543_v10  ;;  %v9037_v20 = vpop.eup %9036 }
 0x45d   :  { %v1753_v55 = vmul.f32 %v10537_v4, %v1671_v52  ;;  %1828 = vrot.lane.b32.xlu0 %v1752_v18, %s9762_s4  ;;  %v10547_v52 = vpop.eup %9038  ;;  %v1538_v18 = vadd.f32 1.0, %v9033_v61  ;;  %9048 = vpow2.f32 %v7672_v12 }
 0x45e   :  { %13688 = vst [vmem:[#allocation41_spill] sm:$0xff] %v10547_v52  ;;  %v9041_v9 = vpop.eup %9040 }
 0x45f   :  { %1830 = vrot.lane.b32.xlu1 %v1753_v55, %s9762_s4  ;;  %v1539_v55 = vadd.f32 1.0, %v9037_v20  ;;  %9050 = vrcp.f32 %v1538_v18 }
 0x460   :  { %9052 = vpow2.f32 %v7673_v30  ;;  %v7676_v30 = vmul.f32 -1.442695, %v10442_v32 }
 0x461   :  { %9054 = vrcp.f32 %v1539_v55 }
 0x462   :  { %9056 = vpow2.f32 %v7670_v16  ;;  %v7677_v16 = vmul.f32 -1.442695, %v10447_v58 }
 0x463   :  { %v10552_v19 = vpop.eup %9042 }
 0x464   :  { %13689 = vst [vmem:[#allocation42_spill] sm:$0xff] %v10552_v19 }
 0x465   :  { %v9045_v4 = vpop.eup %9044 }
 0x466   :  { %v1681_v24 = vpop.permute.xlu0 %1680  ;;  %v10557_v61 = vpop.eup %9046  ;;  %v1537_v20 = vadd.f32 1.0, %v9045_v4 }
 0x467   :  { %v1758_v40 = vmul.f32 %v10543_v10, %v1681_v24  ;;  %13690 = vst [vmem:[#allocation43_spill] sm:$0xff] %v10557_v61  ;;  %v1536_v10 = vadd.f32 1.0, %v9041_v9  ;;  %v9049_v12 = vpop.eup %9048 }
 0x468   :  { %v1683_v27 = vpop.permute.xlu1 %1682 }
 0x469   :  { %v1759_v1 = vmul.f32 %v10547_v52, %v1683_v27  ;;  %1840 = vrot.lane.b32.xlu0 %v1758_v40, %s9762_s4  ;;  %v7671_v40 = vmul.f32 -1.442695, %v10426_v46  ;;  %9058 = vrcp.f32 %v1536_v10 }
 0x46a   :  { %v1677_v8 = vpop.permute.xlu0 %1676 }
 0x46b   :  { %v1756_v24 = vmul.f32 %v10552_v19, %v1677_v8  ;;  %1842 = vrot.lane.b32.xlu1 %v1759_v1, %s9762_s4  ;;  %9060 = vpow2.f32 %v7671_v40  ;;  %v10563_v1 = vpop.eup %9050  ;;  %v7674_v19 = vmul.f32 -1.442695, %v10452_v23 }
 0x46c   :  { %v1679_v54 = vpop.permute.xlu1 %1678  ;;  %9062 = vrcp.f32 %v1537_v20  ;;  %13691 = vst [vmem:[#allocation44_spill] sm:$0xff] %v10563_v1  ;;  %v9053_v9 = vpop.eup %9052 }
 0x46d   :  { %v1757_v27 = vmul.f32 %v10557_v61, %v1679_v54  ;;  %1836 = vrot.lane.b32.xlu0 %v1756_v24, %s9762_s4  ;;  %v10567_v54 = vpop.eup %9054  ;;  %v1542_v24 = vadd.f32 1.0, %v9049_v12  ;;  %9064 = vpow2.f32 %v7676_v30 }
 0x46e   :  { %v9057_v4 = vpop.eup %9056 }
 0x46f   :  { %1838 = vrot.lane.b32.xlu1 %v1757_v27, %s9762_s4  ;;  %v1543_v27 = vadd.f32 1.0, %v9053_v9  ;;  %9066 = vrcp.f32 %v1542_v24 }
 0x470   :  { %9068 = vpow2.f32 %v7677_v16 }
 0x471   :  { %9070 = vrcp.f32 %v1543_v27 }
 0x472   :  { %9072 = vpow2.f32 %v7674_v19 }
 0x473   :  { %v10572_v40 = vpop.eup %9058 }
 0x475   :  { %v9061_v61 = vpop.eup %9060 }
 0x476   :  { %v1689_v18 = vpop.permute.xlu0 %1688  ;;  %v10577_v12 = vpop.eup %9062  ;;  %v1541_v9 = vadd.f32 1.0, %v9061_v61 }
 0x477   :  { %v1762_v8 = vmul.f32 %v10563_v1, %v1689_v18  ;;  %13692 = vst [vmem:[#allocation45_spill] sm:$0xff] %v10577_v12  ;;  %v1540_v1 = vadd.f32 1.0, %v9057_v4  ;;  %v9065_v30 = vpop.eup %9064 }
 0x478   :  { %v1691_v55 = vpop.permute.xlu1 %1690 }
 0x479   :  { %v1763_v10 = vmul.f32 %v10567_v54, %v1691_v55  ;;  %1848 = vrot.lane.b32.xlu0 %v1762_v8, %s9762_s4  ;;  %v7675_v8 = vmul.f32 -1.442695, %v10460_v43  ;;  %9074 = vrcp.f32 %v1540_v1 }
 0x47a   :  { %v1685_v20 = vpop.permute.xlu0 %1684 }
 0x47b   :  { %v1760_v18 = vmul.f32 %v10572_v40, %v1685_v20  ;;  %1850 = vrot.lane.b32.xlu1 %v1763_v10, %s9762_s4  ;;  %9076 = vpow2.f32 %v7675_v8  ;;  %v10583_v10 = vpop.eup %9066 }
 0x47c   :  { %v1687_v52 = vpop.permute.xlu1 %1686  ;;  %9078 = vrcp.f32 %v1541_v9  ;;  %13693 = vst [vmem:[#allocation46_spill] sm:$0xff] %v10583_v10  ;;  %v9069_v4 = vpop.eup %9068 }
 0x47d   :  { %v1761_v55 = vmul.f32 %v10577_v12, %v1687_v52  ;;  %1844 = vrot.lane.b32.xlu0 %v1760_v18, %s9762_s4  ;;  %v10586_v20 = vpop.eup %9070  ;;  %v1546_v52 = vadd.f32 1.0, %v9065_v30  ;;  %v1547_v1 = vadd.f32 1.0, %v9069_v4 }
 0x47e   :  { %v9073_v18 = vpop.eup %9072 }
 0x47f   :  { %1846 = vrot.lane.b32.xlu1 %v1761_v55, %s9762_s4  ;;  %9080 = vrcp.f32 %v1546_v52 }
 0x480   :  { %9082 = vrcp.f32 %v1547_v1 }
 0x483   :  { %v10590_v19 = vpop.eup %9074 }
 0x485   :  { %v9077_v8 = vpop.eup %9076 }
 0x486   :  { %v1697_v24 = vpop.permute.xlu0 %1696  ;;  %v10594_v9 = vpop.eup %9078 }
 0x487   :  { %v1766_v16 = vmul.f32 %v10583_v10, %v1697_v24  ;;  %v1544_v24 = vadd.f32 1.0, %v9073_v18 }
 0x488   :  { %v1699_v12 = vpop.permute.xlu1 %1698 }
 0x489   :  { %v1767_v61 = vmul.f32 %v10586_v20, %v1699_v12  ;;  %1856 = vrot.lane.b32.xlu0 %v1766_v16, %s9762_s4  ;;  %v1545_v12 = vadd.f32 1.0, %v9077_v8  ;;  %9084 = vrcp.f32 %v1544_v24  ;;  %v10599_v4 = vpop.eup %9080 }
 0x48a   :  { %v1693_v27 = vpop.permute.xlu0 %1692 }
 0x48b   :  { %v1764_v55 = vmul.f32 %v10590_v19, %v1693_v27  ;;  %1858 = vrot.lane.b32.xlu1 %v1767_v61, %s9762_s4  ;;  %9086 = vrcp.f32 %v1545_v12  ;;  %v10602_v27 = vpop.eup %9082 }
 0x48c   :  { %v1695_v30 = vpop.permute.xlu1 %1694 }
 0x48d   :  { %v1765_v10 = vmul.f32 %v10594_v9, %v1695_v30  ;;  %1852 = vrot.lane.b32.xlu0 %v1764_v55, %s9762_s4 }
 0x48f   :  { %1854 = vrot.lane.b32.xlu1 %v1765_v10, %s9762_s4 }
 0x493   :  { %v10606_v30 = vpop.eup %9084 }
 0x495   :  { %v10610_v10 = vpop.eup %9086 }
 0x496   :  { %v1705_v16 = vpop.permute.xlu0 %1704 }
 0x497   :  { %v1770_v61 = vmul.f32 %v10599_v4, %v1705_v16 }
 0x498   :  { %v1707_v52 = vpop.permute.xlu1 %1706 }
 0x499   :  { %v1771_v18 = vmul.f32 %v10602_v27, %v1707_v52  ;;  %1864 = vrot.lane.b32.xlu0 %v1770_v61, %s9762_s4 }
 0x49a   :  { %v1701_v1 = vpop.permute.xlu0 %1700 }
 0x49b   :  { %v1768_v8 = vmul.f32 %v10606_v30, %v1701_v1  ;;  %1866 = vrot.lane.b32.xlu1 %v1771_v18, %s9762_s4 }
 0x49c   :  { %v1703_v55 = vpop.permute.xlu1 %1702 }
 0x49d   :  { %v1769_v24 = vmul.f32 %v10610_v10, %v1703_v55  ;;  %1860 = vrot.lane.b32.xlu0 %v1768_v8, %s9762_s4 }
 0x49e   :  { %v1809_v12 = vpop.permute.xlu0 %1808 }
 0x49f   :  { %v1902_v16 = vadd.f32 %v1809_v12, %v10240_v26  ;;  %1862 = vrot.lane.b32.xlu1 %v1769_v24, %s9762_s4 }
 0x4a0   :  { %v1811_v61 = vpop.permute.xlu1 %1810 }
 0x4a1   :  { %9088 = vtanh.f32 %v1902_v16  ;;  %v1903_v52 = vadd.f32 %v1811_v61, %v10250_v53  ;;  %2244 = vrot.lane.b32.xlu0 %v10074_v5, %s9761_s18 }
 0x4a2   :  { %v1805_v18 = vpop.permute.xlu0 %1804 }
 0x4a3   :  { %9090 = vtanh.f32 %v1903_v52  ;;  %v1900_v1 = vadd.f32 %v1805_v18, %v10243_v28  ;;  %2246 = vrot.lane.b32.xlu1 %v10077_v6, %s9761_s18 }
 0x4a4   :  { %v1807_v8 = vpop.permute.xlu1 %1806 }
 0x4a5   :  { %9092 = vtanh.f32 %v1900_v1  ;;  %v1901_v26 = vadd.f32 %v1807_v8, %v10253_v31 }
 0x4a7   :  { %9094 = vtanh.f32 %v1901_v26 }
 0x4ab   :  { %v9089_v55 = vpop.eup %9088  ;;  %v1817_v24 = vpop.permute.xlu0 %1816 }
 0x4ac   :  { %v1906_v12 = vadd.f32 %v1817_v24, %v10260_v33  ;;  %2032 = vrot.lane.b32.xlu0 %v9089_v55, %s9763_s19 }
 0x4ad   :  { %v9091_v5 = vpop.eup %9090  ;;  %v1819_v53 = vpop.permute.xlu1 %1818 }
 0x4ae   :  { %9096 = vtanh.f32 %v1906_v12  ;;  %v1907_v28 = vadd.f32 %v1819_v53, %v10263_v36  ;;  %2034 = vrot.lane.b32.xlu1 %v9091_v5, %s9763_s19 }
 0x4af   :  { %v9093_v6 = vpop.eup %9092  ;;  %v1813_v16 = vpop.permute.xlu0 %1812 }
 0x4b0   :  { %9098 = vtanh.f32 %v1907_v28  ;;  %v1904_v31 = vadd.f32 %v1813_v16, %v10268_v38  ;;  %2028 = vrot.lane.b32.xlu0 %v9093_v6, %s9763_s19 }
 0x4b1   :  { %v9095_v61 = vpop.eup %9094  ;;  %v1815_v52 = vpop.permute.xlu1 %1814 }
 0x4b2   :  { %9100 = vtanh.f32 %v1904_v31  ;;  %v1905_v33 = vadd.f32 %v1815_v52, %v10273_v39  ;;  %2030 = vrot.lane.b32.xlu1 %v9095_v61, %s9763_s19 }
 0x4b4   :  { %9102 = vtanh.f32 %v1905_v33 }
 0x4b8   :  { %v9097_v18 = vpop.eup %9096 }
 0x4b9   :  { %2040 = vrot.lane.b32.xlu0 %v9097_v18, %s9763_s19 }
 0x4ba   :  { %v9099_v36 = vpop.eup %9098 }
 0x4bb   :  { %v1825_v1 = vpop.permute.xlu0 %1824  ;;  %2042 = vrot.lane.b32.xlu1 %v9099_v36, %s9763_s19 }
 0x4bc   :  { %v9101_v8 = vpop.eup %9100  ;;  %v1910_v38 = vadd.f32 %v1825_v1, %v10280_v41 }
 0x4bd   :  { %2036 = vrot.lane.b32.xlu0 %v9101_v8, %s9763_s19  ;;  %v1827_v26 = vpop.permute.xlu1 %1826 }
 0x4be   :  { %v9103_v55 = vpop.eup %9102  ;;  %9104 = vtanh.f32 %v1910_v38  ;;  %v1911_v39 = vadd.f32 %v1827_v26, %v10285_v45 }
 0x4bf   :  { %v1821_v24 = vpop.permute.xlu0 %1820  ;;  %2038 = vrot.lane.b32.xlu1 %v9103_v55, %s9763_s19 }
 0x4c0   :  { %9106 = vtanh.f32 %v1911_v39  ;;  %v1908_v12 = vadd.f32 %v1821_v24, %v10292_v48 }
 0x4c1   :  { %v1823_v5 = vpop.permute.xlu1 %1822 }
 0x4c2   :  { %9108 = vtanh.f32 %v1908_v12  ;;  %v1909_v53 = vadd.f32 %v1823_v5, %v10297_v49 }
 0x4c4   :  { %9110 = vtanh.f32 %v1909_v53 }
 0x4c8   :  { %v9105_v28 = vpop.eup %9104 }
 0x4c9   :  { %2048 = vrot.lane.b32.xlu0 %v9105_v28, %s9763_s19 }
 0x4ca   :  { %v9107_v41 = vpop.eup %9106 }
 0x4cb   :  { %v1833_v6 = vpop.permute.xlu0 %1832  ;;  %2050 = vrot.lane.b32.xlu1 %v9107_v41, %s9763_s19 }
 0x4cc   :  { %v9109_v16 = vpop.eup %9108  ;;  %v1914_v45 = vadd.f32 %v1833_v6, %v10312_v56 }
 0x4cd   :  { %2044 = vrot.lane.b32.xlu0 %v9109_v16, %s9763_s19  ;;  %v1835_v31 = vpop.permute.xlu1 %1834 }
 0x4ce   :  { %v9111_v61 = vpop.eup %9110  ;;  %9112 = vtanh.f32 %v1914_v45  ;;  %v1915_v48 = vadd.f32 %v1835_v31, %v10315_v59 }
 0x4cf   :  { %v1829_v52 = vpop.permute.xlu0 %1828  ;;  %2046 = vrot.lane.b32.xlu1 %v9111_v61, %s9763_s19 }
 0x4d0   :  { %9114 = vtanh.f32 %v1915_v48  ;;  %v1912_v49 = vadd.f32 %v1829_v52, %v10322_v0 }
 0x4d1   :  { %v1831_v33 = vpop.permute.xlu1 %1830 }
 0x4d2   :  { %9116 = vtanh.f32 %v1912_v49  ;;  %v1913_v18 = vadd.f32 %v1831_v33, %v10329_v2 }
 0x4d4   :  { %9118 = vtanh.f32 %v1913_v18 }
 0x4d8   :  { %v9113_v36 = vpop.eup %9112 }
 0x4d9   :  { %2056 = vrot.lane.b32.xlu0 %v9113_v36, %s9763_s19 }
 0x4da   :  { %v9115_v56 = vpop.eup %9114 }
 0x4db   :  { %v1841_v1 = vpop.permute.xlu0 %1840  ;;  %2058 = vrot.lane.b32.xlu1 %v9115_v56, %s9763_s19 }
 0x4dc   :  { %v9117_v8 = vpop.eup %9116  ;;  %v1918_v59 = vadd.f32 %v1841_v1, %v10342_v63 }
 0x4dd   :  { %2052 = vrot.lane.b32.xlu0 %v9117_v8, %s9763_s19  ;;  %v1843_v38 = vpop.permute.xlu1 %1842 }
 0x4de   :  { %v9119_v26 = vpop.eup %9118  ;;  %9120 = vtanh.f32 %v1918_v59  ;;  %v1919_v0 = vadd.f32 %v1843_v38, %v10347_v13 }
 0x4df   :  { %v1837_v55 = vpop.permute.xlu0 %1836  ;;  %2054 = vrot.lane.b32.xlu1 %v9119_v26, %s9763_s19 }
 0x4e0   :  { %9122 = vtanh.f32 %v1919_v0  ;;  %v1916_v2 = vadd.f32 %v1837_v55, %v10352_v15 }
 0x4e1   :  { %v1839_v39 = vpop.permute.xlu1 %1838 }
 0x4e2   :  { %9124 = vtanh.f32 %v1916_v2  ;;  %v1917_v24 = vadd.f32 %v1839_v39, %v10359_v17 }
 0x4e4   :  { %9126 = vtanh.f32 %v1917_v24 }
 0x4e8   :  { %v9121_v12 = vpop.eup %9120 }
 0x4e9   :  { %2064 = vrot.lane.b32.xlu0 %v9121_v12, %s9763_s19 }
 0x4ea   :  { %v9123_v63 = vpop.eup %9122 }
 0x4eb   :  { %v1849_v5 = vpop.permute.xlu0 %1848  ;;  %2066 = vrot.lane.b32.xlu1 %v9123_v63, %s9763_s19 }
 0x4ec   :  { %v9125_v53 = vpop.eup %9124  ;;  %v1922_v13 = vadd.f32 %v1849_v5, %v10372_v22  ;;  %v8952_v22 = vld [vmem:[%s13453_s5 + $0x10] sm:$0xff]  }
 0x4ed   :  { %2060 = vrot.lane.b32.xlu0 %v9125_v53, %s9763_s19  ;;  %v1851_v28 = vpop.permute.xlu1 %1850  ;;  %8540 = vmatprep.subr.bf16.mxu0 %v8952_v22  ;;  %v10696_v53 = vld [vmem:[%s13455_s7] sm:$0xff]  }
 0x4ee   :  { %v9127_v41 = vpop.eup %9126  ;;  %9128 = vtanh.f32 %v1922_v13  ;;  %v1923_v15 = vadd.f32 %v1851_v28, %v10377_v29  ;;  %8541 = vmatpush3.bf16.msra.mxu0 %v8952_v22  ;;  %v1967_v28 = vsub.f32 1.0, %v10465_v57 }
 0x4ef   :  { %v1845_v6 = vpop.permute.xlu0 %1844  ;;  %2062 = vrot.lane.b32.xlu1 %v9127_v41, %s9763_s19 }
 0x4f0   :  { %9130 = vtanh.f32 %v1923_v15  ;;  %v1920_v17 = vadd.f32 %v1845_v6, %v10384_v34  ;;  %v2286_v15 = vmul.f32 %v10457_v21, %v10289_v47  ;;  %v2287_v6 = vmul.f32 %v10465_v57, %v10282_v44 }
 0x4f1   :  { %v1847_v16 = vpop.permute.xlu1 %1846  ;;  %v1965_v47 = vsub.f32 1.0, %v10478_v42  ;;  %v2285_v57 = vmul.f32 %v10478_v42, %v10301_v50  ;;  %v13694_v50 = vld [vmem:[#allocation7_spill] sm:$0xff] }
 0x4f2   :  { %9132 = vtanh.f32 %v1920_v17  ;;  %v1921_v45 = vadd.f32 %v1847_v16, %v10389_v35  ;;  %v1964_v16 = vsub.f32 1.0, %v10473_v62  ;;  %v2290_v42 = vmul.f32 %v10483_v60, %v13694_v50 }
 0x4f4   :  { %9134 = vtanh.f32 %v1921_v45 }
 0x4f8   :  { %v9129_v31 = vpop.eup %9128 }
 0x4f9   :  { %2072 = vrot.lane.b32.xlu0 %v9129_v31, %s9763_s19 }
 0x4fa   :  { %v9131_v29 = vpop.eup %9130 }
 0x4fb   :  { %v1857_v61 = vpop.permute.xlu0 %1856  ;;  %2074 = vrot.lane.b32.xlu1 %v9131_v29, %s9763_s19 }
 0x4fc   :  { %v9133_v48 = vpop.eup %9132  ;;  %v1926_v34 = vadd.f32 %v1857_v61, %v10408_v11 }
 0x4fd   :  { %2068 = vrot.lane.b32.xlu0 %v9133_v48, %s9763_s19  ;;  %v1859_v35 = vpop.permute.xlu1 %1858 }
 0x4fe   :  { %v9135_v52 = vpop.eup %9134  ;;  %9136 = vtanh.f32 %v1926_v34  ;;  %v1927_v49 = vadd.f32 %v1859_v35, %v10411_v14  ;;  %v1970_v35 = vsub.f32 1.0, %v10483_v60 }
 0x4ff   :  { %v1853_v33 = vpop.permute.xlu0 %1852  ;;  %2070 = vrot.lane.b32.xlu1 %v9135_v52, %s9763_s19 }
 0x500   :  { %9138 = vtanh.f32 %v1927_v49  ;;  %v1924_v18 = vadd.f32 %v1853_v33, %v10418_v25  ;;  %v13695_v33 = vld [vmem:[#allocation6_spill] sm:$0xff] }
 0x501   :  { %v1855_v36 = vpop.permute.xlu1 %1854 }
 0x502   :  { %9140 = vtanh.f32 %v1924_v18  ;;  %v1925_v56 = vadd.f32 %v1855_v36, %v10426_v46  ;;  %v2291_v18 = vmul.f32 %v10487_v37, %v13695_v33 }
 0x504   :  { %9142 = vtanh.f32 %v1925_v56  ;;  %v13696_v56 = vld [vmem:[#allocation30_spill] sm:$0xff] }
 0x508   :  { %v9137_v1 = vpop.eup %9136 }
 0x509   :  { %2080 = vrot.lane.b32.xlu0 %v9137_v1, %s9763_s19  ;;  %v1968_v1 = vsub.f32 1.0, %v13696_v56 }
 0x50a   :  { %v9139_v11 = vpop.eup %9138 }
 0x50b   :  { %v1865_v8 = vpop.permute.xlu0 %1864  ;;  %2082 = vrot.lane.b32.xlu1 %v9139_v11, %s9763_s19 }
 0x50c   :  { %v9141_v59 = vpop.eup %9140  ;;  %v1930_v14 = vadd.f32 %v1865_v8, %v10442_v32 }
 0x50d   :  { %2076 = vrot.lane.b32.xlu0 %v9141_v59, %s9763_s19  ;;  %v1867_v38 = vpop.permute.xlu1 %1866 }
 0x50e   :  { %v9143_v26 = vpop.eup %9142  ;;  %9144 = vtanh.f32 %v1930_v14  ;;  %v1931_v25 = vadd.f32 %v1867_v38, %v10447_v58  ;;  %v8953_v58 = vld [vmem:[%s13453_s5 + $0x18] sm:$0xff]   ;;  %v13699_v38 = vld [vmem:[#allocation31_spill] sm:$0xff] }
 0x50f   :  { %v1861_v0 = vpop.permute.xlu0 %1860  ;;  %2078 = vrot.lane.b32.xlu1 %v9143_v26, %s9763_s19  ;;  %8542 = vmatprep.subr.bf16.mxu0 %v8953_v58  ;;  %v1969_v26 = vsub.f32 1.0, %v13699_v38 }
 0x510   :  { %9146 = vtanh.f32 %v1931_v25  ;;  %v1928_v46 = vadd.f32 %v1861_v0, %v10452_v23  ;;  %8543 = vmatpush3.bf16.msra.mxu0 %v8953_v58 }
 0x511   :  { %v1863_v55 = vpop.permute.xlu1 %1862  ;;  %8576 = vmatprep.subr.bf16.mxu0 %v10696_v53 }
 0x512   :  { %9148 = vtanh.f32 %v1928_v46  ;;  %v1929_v2 = vadd.f32 %v1863_v55, %v10460_v43  ;;  %v1966_v43 = vsub.f32 1.0, %v10457_v21  ;;  %v13700_v46 = vld [vmem:[#allocation9_spill] sm:$0xff]  ;;  %v13701_v55 = vld [vmem:[#allocation8_spill] sm:$0xff] }
 0x513   :  { %v10683_v24 = vpop.permute.xlu0 %2244  ;;  %v2288_v60 = vmul.f32 %v13696_v56, %v13700_v46  ;;  %v13714_v56 = vld [vmem:[#allocation36_spill] sm:$0xff] }
 0x514   :  { %9150 = vtanh.f32 %v1929_v2 }
 0x515   :  { %v10689_v63 = vpop.permute.xlu1 %2246 }
 0x518   :  { %v9145_v39 = vpop.eup %9144 }
 0x519   :  { %2088 = vrot.lane.b32.xlu0 %v9145_v39, %s9763_s19 }
 0x51a   :  { %v9147_v32 = vpop.eup %9146 }
 0x51b   :  { %2090 = vrot.lane.b32.xlu1 %v9147_v32, %s9763_s19 }
 0x51c   :  { %v9149_v12 = vpop.eup %9148 }
 0x51d   :  { %2084 = vrot.lane.b32.xlu0 %v9149_v12, %s9763_s19  ;;  %v13702_v12 = vld [vmem:[#allocation32_spill] sm:$0xff] }
 0x51e   :  { %v9151_v23 = vpop.eup %9150  ;;  %v2033_v5 = vpop.permute.xlu0 %2032 }
 0x51f   :  { %v2126_v13 = vmul.f32 %v2033_v5, %v1966_v43  ;;  %2086 = vrot.lane.b32.xlu1 %v9151_v23, %s9763_s19  ;;  %v1974_v43 = vsub.f32 1.0, %v13702_v12 }
 0x520   :  { %v2035_v41 = vpop.permute.xlu1 %2034 }
 0x521   :  { %v2127_v17 = vmul.f32 %v2035_v41, %v1967_v28  ;;  %2248 = vrot.lane.b32.xlu0 %v10080_v7, %s9761_s18  ;;  %v10708_v22 = vadd.f32 %v2286_v15, %v2126_v13  ;;  %v2284_v7 = vmul.f32 %v10473_v62, %v10305_v51  ;;  %v1971_v51 = vsub.f32 1.0, %v10487_v37  ;;  %v13703_v13 = vld [vmem:[#allocation33_spill] sm:$0xff]  ;;  %v13704_v15 = vld [vmem:[#allocation11_spill] sm:$0xff] }
 0x522   :  { %v2029_v45 = vpop.permute.xlu0 %2028  ;;  %v2289_v37 = vmul.f32 %v13699_v38, %v13701_v55  ;;  %v1975_v28 = vsub.f32 1.0, %v13703_v13  ;;  %v13715_v38 = vld [vmem:[#allocation37_spill] sm:$0xff] }
 0x523   :  { %v10710_v31 = vadd.f32 %v2287_v6, %v2127_v17  ;;  %v2124_v29 = vmul.f32 %v2029_v45, %v1964_v16  ;;  %2250 = vrot.lane.b32.xlu1 %v10071_v3, %s9761_s18  ;;  %v2294_v6 = vmul.f32 %v13702_v12, %v13704_v15  ;;  %v13705_v17 = vld [vmem:[#allocation10_spill] sm:$0xff] }
 0x524   :  { %v2031_v21 = vpop.permute.xlu1 %2030  ;;  %v2295_v16 = vmul.f32 %v13703_v13, %v13705_v17  ;;  %v13721_v13 = vld [vmem:[#allocation39_spill] sm:$0xff] }
 0x525   :  { %v2349_v44 = vpack.c.bf16 %v10710_v31, %v10708_v22  ;;  %v2125_v61 = vmul.f32 %v2031_v21, %v1965_v47  ;;  %v10721_v48 = vadd.f32 %v2284_v7, %v2124_v29  ;;  %v13706_v29 = vld [vmem:[#allocation34_spill] sm:$0xff] }
 0x526   :  { %v1972_v47 = vsub.f32 1.0, %v13706_v29 }
 0x527   :  { %v10723_v34 = vadd.f32 %v2285_v57, %v2125_v61  ;;  %2387 = vrot.lane.b32.xlu1 %v2349_v44, %s9763_s19  ;;  %v13709_v61 = vld [vmem:[#allocation35_spill] sm:$0xff] }
 0x529   :  { %v2348_v3 = vpack.c.bf16 %v10723_v34, %v10721_v48 }
 0x52b   :  { %v2041_v52 = vpop.permute.xlu0 %2040  ;;  %2385 = vrot.lane.b32.xlu0 %v2348_v3, %s9763_s19  ;;  %v1973_v3 = vsub.f32 1.0, %v13709_v61 }
 0x52c   :  { %v2130_v49 = vmul.f32 %v2041_v52, %v1970_v35 }
 0x52d   :  { %v2043_v62 = vpop.permute.xlu1 %2042 }
 0x52e   :  { %v2131_v36 = vmul.f32 %v2043_v62, %v1971_v51  ;;  %v10736_v8 = vadd.f32 %v2290_v42, %v2130_v49  ;;  %v13710_v49 = vld [vmem:[#allocation13_spill] sm:$0xff]  ;;  %v13711_v62 = vld [vmem:[#allocation12_spill] sm:$0xff] }
 0x52f   :  { %v2037_v11 = vpop.permute.xlu0 %2036  ;;  %v2292_v51 = vmul.f32 %v13706_v29, %v13710_v49  ;;  %v2293_v50 = vmul.f32 %v13709_v61, %v13711_v62  ;;  %v13726_v61 = vld [vmem:[#allocation40_spill] sm:$0xff]  ;;  %v13727_v49 = vld [vmem:[#allocation41_spill] sm:$0xff] }
 0x530   :  { %13697 = vst [vmem:[#allocation7_spill] sm:$0xff] %v10736_v8  ;;  %v10738_v59 = vadd.f32 %v2291_v18, %v2131_v36  ;;  %v2128_v14 = vmul.f32 %v2037_v11, %v1968_v1  ;;  %v1978_v1 = vsub.f32 1.0, %v13714_v56 }
 0x531   :  { %v2039_v25 = vpop.permute.xlu1 %2038 }
 0x532   :  { %13698 = vst [vmem:[#allocation6_spill] sm:$0xff] %v10738_v59  ;;  %v2351_v0 = vpack.c.bf16 %v10738_v59, %v10736_v8  ;;  %v2129_v2 = vmul.f32 %v2039_v25, %v1969_v26  ;;  %v10747_v39 = vadd.f32 %v2288_v60, %v2128_v14  ;;  %v1979_v26 = vsub.f32 1.0, %v13715_v38  ;;  %v13717_v60 = vld [vmem:[#allocation14_spill] sm:$0xff] }
 0x533   :  { %v2299_v55 = vmul.f32 %v13715_v38, %v13717_v60 }
 0x534   :  { %v10749_v32 = vadd.f32 %v2289_v37, %v2129_v2  ;;  %2391 = vrot.lane.b32.xlu1 %v2351_v0, %s9763_s19  ;;  %v13716_v0 = vld [vmem:[#allocation15_spill] sm:$0xff]  ;;  %v13718_v2 = vld [vmem:[#allocation38_spill] sm:$0xff] }
 0x535   :  { %v2298_v46 = vmul.f32 %v13714_v56, %v13716_v0 }
 0x536   :  { %v2350_v58 = vpack.c.bf16 %v10749_v32, %v10747_v39 }
 0x538   :  { %2389 = vrot.lane.b32.xlu0 %v2350_v58, %s9763_s19  ;;  %v1976_v58 = vsub.f32 1.0, %v13718_v2 }
 0x53b   :  { %v2049_v23 = vpop.permute.xlu0 %2048 }
 0x53c   :  { %v2134_v5 = vmul.f32 %v2049_v23, %v1974_v43 }
 0x53d   :  { %v2051_v41 = vpop.permute.xlu1 %2050 }
 0x53e   :  { %v2135_v45 = vmul.f32 %v2051_v41, %v1975_v28  ;;  %v10762_v44 = vadd.f32 %v2294_v6, %v2134_v5  ;;  %v1977_v28 = vsub.f32 1.0, %v13721_v13  ;;  %v13722_v6 = vld [vmem:[#allocation17_spill] sm:$0xff] }
 0x53f   :  { %v2045_v21 = vpop.permute.xlu0 %2044  ;;  %v2296_v17 = vmul.f32 %v13718_v2, %v13722_v6  ;;  %v13734_v2 = vld [vmem:[#allocation21_spill] sm:$0xff]  ;;  %v13738_v6 = vld [vmem:[#allocation44_spill] sm:$0xff] }
 0x540   :  { %13707 = vst [vmem:[#allocation30_spill] sm:$0xff] %v10762_v44  ;;  %v10764_v7 = vadd.f32 %v2295_v16, %v2135_v45  ;;  %v2132_v57 = vmul.f32 %v2045_v21, %v1972_v47  ;;  %v13723_v16 = vld [vmem:[#allocation16_spill] sm:$0xff] }
 0x541   :  { %v2047_v35 = vpop.permute.xlu1 %2046  ;;  %v2297_v45 = vmul.f32 %v13721_v13, %v13723_v16 }
 0x542   :  { %13708 = vst [vmem:[#allocation31_spill] sm:$0xff] %v10764_v7  ;;  %v2353_v52 = vpack.c.bf16 %v10764_v7, %v10762_v44  ;;  %v2133_v42 = vmul.f32 %v2047_v35, %v1973_v3  ;;  %v10773_v33 = vadd.f32 %v2292_v51, %v2132_v57  ;;  %v1982_v3 = vsub.f32 1.0, %v13726_v61 }
 0x543   :  { %v1983_v51 = vsub.f32 1.0, %v13727_v49 }
 0x544   :  { %13712 = vst [vmem:[#allocation9_spill] sm:$0xff] %v10773_v33  ;;  %v10775_v18 = vadd.f32 %v2293_v50, %v2133_v42  ;;  %2395 = vrot.lane.b32.xlu1 %v2353_v52, %s9763_s19  ;;  %v13728_v50 = vld [vmem:[#allocation19_spill] sm:$0xff] }
 0x545   :  { %v2302_v42 = vmul.f32 %v13726_v61, %v13728_v50  ;;  %v13739_v61 = vld [vmem:[#allocation23_spill] sm:$0xff] }
 0x546   :  { %13713 = vst [vmem:[#allocation8_spill] sm:$0xff] %v10775_v18  ;;  %v2352_v36 = vpack.c.bf16 %v10775_v18, %v10773_v33 }
 0x548   :  { %2393 = vrot.lane.b32.xlu0 %v2352_v36, %s9763_s19  ;;  %v13729_v36 = vld [vmem:[#allocation18_spill] sm:$0xff] }
 0x549   :  { %v2303_v56 = vmul.f32 %v13727_v49, %v13729_v36 }
 0x54b   :  { %v2057_v11 = vpop.permute.xlu0 %2056 }
 0x54c   :  { %v2138_v14 = vmul.f32 %v2057_v11, %v1978_v1  ;;  %v13730_v11 = vld [vmem:[#allocation42_spill] sm:$0xff] }
 0x54d   :  { %v2059_v25 = vpop.permute.xlu1 %2058 }
 0x54e   :  { %v2139_v37 = vmul.f32 %v2059_v25, %v1979_v26  ;;  %v10788_v43 = vadd.f32 %v2298_v46, %v2138_v14  ;;  %v1980_v14 = vsub.f32 1.0, %v13730_v11  ;;  %v13733_v46 = vld [vmem:[#allocation43_spill] sm:$0xff] }
 0x54f   :  { %v2053_v12 = vpop.permute.xlu0 %2052  ;;  %v1981_v60 = vsub.f32 1.0, %v13733_v46 }
 0x550   :  { %13719 = vst [vmem:[#allocation32_spill] sm:$0xff] %v10788_v43  ;;  %v10790_v23 = vadd.f32 %v2299_v55, %v2139_v37  ;;  %v2136_v5 = vmul.f32 %v2053_v12, %v1976_v58  ;;  %v2300_v58 = vmul.f32 %v13730_v11, %v13734_v2  ;;  %v13735_v12 = vld [vmem:[#allocation20_spill] sm:$0xff] }
 0x551   :  { %v2055_v41 = vpop.permute.xlu1 %2054 }
 0x552   :  { %13720 = vst [vmem:[#allocation33_spill] sm:$0xff] %v10790_v23  ;;  %v2355_v15 = vpack.c.bf16 %v10790_v23, %v10788_v43  ;;  %v2137_v29 = vmul.f32 %v2055_v41, %v1977_v28  ;;  %v10799_v47 = vadd.f32 %v2296_v17, %v2136_v5  ;;  %v2301_v5 = vmul.f32 %v13733_v46, %v13735_v12  ;;  %v13745_v46 = vld [vmem:[#allocation24_spill] sm:$0xff] }
 0x553   :  { %v1986_v17 = vsub.f32 1.0, %v13738_v6 }
 0x554   :  { %13724 = vst [vmem:[#allocation11_spill] sm:$0xff] %v10799_v47  ;;  %v10801_v21 = vadd.f32 %v2297_v45, %v2137_v29  ;;  %2399 = vrot.lane.b32.xlu1 %v2355_v15, %s9763_s19  ;;  %v1987_v29 = vsub.f32 1.0, %v10567_v54 }
 0x556   :  { %13725 = vst [vmem:[#allocation10_spill] sm:$0xff] %v10801_v21  ;;  %v2354_v57 = vpack.c.bf16 %v10801_v21, %v10799_v47 }
 0x558   :  { %2397 = vrot.lane.b32.xlu0 %v2354_v57, %s9763_s19 }
 0x55b   :  { %v2065_v35 = vpop.permute.xlu0 %2064 }
 0x55c   :  { %v2142_v52 = vmul.f32 %v2065_v35, %v1982_v3  ;;  %v2306_v3 = vmul.f32 %v13738_v6, %v13739_v61  ;;  %v13740_v35 = vld [vmem:[#allocation22_spill] sm:$0xff]  ;;  %v13749_v6 = vld [vmem:[#allocation27_spill] sm:$0xff] }
 0x55d   :  { %v2067_v62 = vpop.permute.xlu1 %2066 }
 0x55e   :  { %v2143_v1 = vmul.f32 %v2067_v62, %v1983_v51  ;;  %v10814_v26 = vadd.f32 %v2302_v42, %v2142_v52  ;;  %v2307_v52 = vmul.f32 %v10567_v54, %v13740_v35  ;;  %v1984_v51 = vsub.f32 1.0, %v10572_v40 }
 0x55f   :  { %v2061_v38 = vpop.permute.xlu0 %2060 }
 0x560   :  { %13731 = vst [vmem:[#allocation34_spill] sm:$0xff] %v10814_v26  ;;  %v10816_v25 = vadd.f32 %v2303_v56, %v2143_v1  ;;  %v2140_v0 = vmul.f32 %v2061_v38, %v1980_v14  ;;  %v13743_v56 = vld [vmem:[#allocation45_spill] sm:$0xff] }
 0x561   :  { %v2063_v55 = vpop.permute.xlu1 %2062  ;;  %v1985_v1 = vsub.f32 1.0, %v13743_v56  ;;  %v13744_v38 = vld [vmem:[#allocation25_spill] sm:$0xff]  ;;  %v2305_v54 = vmul.f32 %v13743_v56, %v13745_v46 }
 0x562   :  { %13732 = vst [vmem:[#allocation35_spill] sm:$0xff] %v10816_v25  ;;  %v2357_v37 = vpack.c.bf16 %v10816_v25, %v10814_v26  ;;  %v2141_v13 = vmul.f32 %v2063_v55, %v1981_v60  ;;  %v10825_v28 = vadd.f32 %v2300_v58, %v2140_v0  ;;  %v2304_v0 = vmul.f32 %v10572_v40, %v13744_v38  ;;  %v13748_v58 = vld [vmem:[#allocation46_spill] sm:$0xff] }
 0x563   :  { %v1990_v12 = vsub.f32 1.0, %v13748_v58  ;;  %v1991_v40 = vsub.f32 1.0, %v10586_v20 }
 0x564   :  { %13736 = vst [vmem:[#allocation13_spill] sm:$0xff] %v10825_v28  ;;  %v10827_v41 = vadd.f32 %v2301_v5, %v2141_v13  ;;  %2403 = vrot.lane.b32.xlu1 %v2357_v37, %s9763_s19 }
 0x566   :  { %13737 = vst [vmem:[#allocation12_spill] sm:$0xff] %v10827_v41  ;;  %v2356_v15 = vpack.c.bf16 %v10827_v41, %v10825_v28 }
 0x568   :  { %2401 = vrot.lane.b32.xlu0 %v2356_v15, %s9763_s19 }
 0x56b   :  { %v2073_v16 = vpop.permute.xlu0 %2072 }
 0x56c   :  { %v2146_v45 = vmul.f32 %v2073_v16, %v1986_v17  ;;  %v2310_v17 = vmul.f32 %v13748_v58, %v13749_v6  ;;  %v13750_v16 = vld [vmem:[#allocation26_spill] sm:$0xff]  ;;  %v1995_v6 = vsub.f32 1.0, %v10602_v27 }
 0x56d   :  { %v2075_v57 = vpop.permute.xlu1 %2074 }
 0x56e   :  { %v2147_v49 = vmul.f32 %v2075_v57, %v1987_v29  ;;  %v10840_v50 = vadd.f32 %v2306_v3, %v2146_v45  ;;  %v2311_v45 = vmul.f32 %v10586_v20, %v13750_v16  ;;  %v1988_v57 = vsub.f32 1.0, %v10590_v19 }
 0x56f   :  { %v2069_v62 = vpop.permute.xlu0 %2068 }
 0x570   :  { %13741 = vst [vmem:[#allocation36_spill] sm:$0xff] %v10840_v50  ;;  %v10842_v42 = vadd.f32 %v2307_v52, %v2147_v49  ;;  %v2144_v36 = vmul.f32 %v2069_v62, %v1984_v51  ;;  %v1989_v49 = vsub.f32 1.0, %v10594_v9 }
 0x571   :  { %v2071_v11 = vpop.permute.xlu1 %2070 }
 0x572   :  { %13742 = vst [vmem:[#allocation37_spill] sm:$0xff] %v10842_v42  ;;  %v2359_v14 = vpack.c.bf16 %v10842_v42, %v10840_v50  ;;  %v2145_v60 = vmul.f32 %v2071_v11, %v1985_v1  ;;  %v10851_v55 = vadd.f32 %v2304_v0, %v2144_v36  ;;  %v13753_v36 = vld [vmem:[#allocation29_spill] sm:$0xff]  ;;  %v13754_v1 = vld [vmem:[#allocation28_spill] sm:$0xff] }
 0x573   :  { %v2308_v56 = vmul.f32 %v10590_v19, %v13753_v36  ;;  %v2309_v20 = vmul.f32 %v10594_v9, %v13754_v1  ;;  %v1993_v9 = vsub.f32 1.0, %v10610_v10 }
 0x574   :  { %13746 = vst [vmem:[#allocation15_spill] sm:$0xff] %v10851_v55  ;;  %v10853_v37 = vadd.f32 %v2305_v54, %v2145_v60  ;;  %2407 = vrot.lane.b32.xlu1 %v2359_v14, %s9763_s19  ;;  %v1992_v60 = vsub.f32 1.0, %v10606_v30 }
 0x576   :  { %13747 = vst [vmem:[#allocation14_spill] sm:$0xff] %v10853_v37  ;;  %v2358_v2 = vpack.c.bf16 %v10853_v37, %v10851_v55 }
 0x578   :  { %2405 = vrot.lane.b32.xlu0 %v2358_v2, %s9763_s19 }
 0x57b   :  { %v2081_v5 = vpop.permute.xlu0 %2080 }
 0x57c   :  { %v2150_v13 = vmul.f32 %v2081_v5, %v1990_v12  ;;  %v2312_v12 = vmul.f32 %v10606_v30, %v10683_v24  ;;  %v2313_v5 = vmul.f32 %v10610_v10, %v10689_v63 }
 0x57d   :  { %v2083_v15 = vpop.permute.xlu1 %2082 }
 0x57e   :  { %v2151_v29 = vmul.f32 %v2083_v15, %v1991_v40  ;;  %v10866_v3 = vadd.f32 %v2310_v17, %v2150_v13  ;;  %v1994_v40 = vsub.f32 1.0, %v10599_v4 }
 0x57f   :  { %v2077_v61 = vpop.permute.xlu0 %2076 }
 0x580   :  { %13751 = vst [vmem:[#allocation38_spill] sm:$0xff] %v10866_v3  ;;  %v10868_v35 = vadd.f32 %v2311_v45, %v2151_v29  ;;  %v2148_v52 = vmul.f32 %v2077_v61, %v1988_v57 }
 0x581   :  { %v2079_v51 = vpop.permute.xlu1 %2078 }
 0x582   :  { %13752 = vst [vmem:[#allocation39_spill] sm:$0xff] %v10868_v35  ;;  %v2361_v62 = vpack.c.bf16 %v10868_v35, %v10866_v3  ;;  %v2149_v11 = vmul.f32 %v2079_v51, %v1989_v49  ;;  %v10877_v14 = vadd.f32 %v2308_v56, %v2148_v52  ;;  %v9666_v51 = vld [vmem:[%s13454_s6] sm:$0xff]  }
 0x584   :  { %13755 = vst [vmem:[#allocation17_spill] sm:$0xff] %v10877_v14  ;;  %v10879_v38 = vadd.f32 %v2309_v20, %v2149_v11  ;;  %2411 = vrot.lane.b32.xlu1 %v2361_v62, %s9763_s19 }
 0x586   :  { %13756 = vst [vmem:[#allocation16_spill] sm:$0xff] %v10879_v38  ;;  %v2360_v0 = vpack.c.bf16 %v10879_v38, %v10877_v14 }
 0x588   :  { %2409 = vrot.lane.b32.xlu0 %v2360_v0, %s9763_s19 }
 0x58b   :  { %v2089_v46 = vpop.permute.xlu0 %2088 }
 0x58c   :  { %v2154_v57 = vmul.f32 %v2089_v46, %v1994_v40 }
 0x58d   :  { %v2091_v54 = vpop.permute.xlu1 %2090 }
 0x58e   :  { %v2155_v61 = vmul.f32 %v2091_v54, %v1995_v6 }
 0x58f   :  { %v2085_v19 = vpop.permute.xlu0 %2084 }
 0x590   :  { %v2152_v2 = vmul.f32 %v2085_v19, %v1992_v60 }
 0x591   :  { %v2087_v58 = vpop.permute.xlu1 %2086 }
 0x592   :  { %v2153_v13 = vmul.f32 %v2087_v58, %v1993_v9  ;;  %v10893_v17 = vadd.f32 %v2312_v12, %v2152_v2  ;;  %v9667_v58 = vld [vmem:[%s13454_s6 + $0x8] sm:$0xff]  }
 0x593   :  { %v2249_v15 = vpop.permute.xlu0 %2248 }
 0x594   :  { %13757 = vst [vmem:[#allocation40_spill] sm:$0xff] %v10893_v17  ;;  %v10895_v16 = vadd.f32 %v2313_v5, %v2153_v13  ;;  %v2314_v45 = vmul.f32 %v10599_v4, %v2249_v15 }
 0x595   :  { %v2251_v29 = vpop.permute.xlu1 %2250 }
 0x596   :  { %13758 = vst [vmem:[#allocation41_spill] sm:$0xff] %v10895_v16  ;;  %v2362_v30 = vpack.c.bf16 %v10895_v16, %v10893_v17  ;;  %v2315_v10 = vmul.f32 %v10602_v27, %v2251_v29  ;;  %v10901_v24 = vadd.f32 %v2314_v45, %v2154_v57  ;;  %v9665_v27 = vld [vmem:[%s13455_s7 + $0x8] sm:$0xff]  }
 0x598   :  { %13759 = vst [vmem:[#allocation19_spill] sm:$0xff] %v10901_v24  ;;  %v10903_v63 = vadd.f32 %v2315_v10, %v2155_v61  ;;  %2413 = vrot.lane.b32.xlu0 %v2362_v30, %s9763_s19 }
 0x599   :  { %v2388_v49 = vpop.permute.xlu1 %2387 }
 0x59a   :  { %13760 = vst [vmem:[#allocation18_spill] sm:$0xff] %v10903_v63  ;;  %v2363_v52 = vpack.c.bf16 %v10903_v63, %v10901_v24 }
 0x59c   :  { %2415 = vrot.lane.b32.xlu1 %v2363_v52, %s9763_s19 }
 0x59d   :  { %v2386_v4 = vpop.permute.xlu0 %2385 }
 0x59e   :  { %8544 = vmatprep.mubr.msk.bf16.mxu0 %vm423_vm2, %v2386_v4 }
 0x59f   :  { %8545 = vmatmul.mubr.msk.bf16.vlgmr.msra.gmra.mrb[96].mxu0 %vm423_vm2, %v2388_v49 }
 0x5a0   :  { %8577 = vmatpush3.bf16.msra.mxu0 %v10696_v53 }
 0x5a1   :  { %8578 = vmatprep.subr.bf16.mxu0 %v9665_v27 }
 0x5a4   :  { %8579 = vmatpush3.bf16.msra.mxu0 %v9665_v27 }
 0x5a5   :  { %8612 = vmatprep.subr.bf16.mxu0 %v9666_v51 }
 0x5a6   :  { %v2392_v36 = vpop.permute.xlu1 %2391 }
 0x5aa   :  { %v2390_v62 = vpop.permute.xlu0 %2389 }
 0x5ab   :  { %8548 = vmatprep.mubr.msk.bf16.mxu0 %vm423_vm2, %v2390_v62 }
 0x5ac   :  { %8549 = vmatmul.mubr.msk.bf16.gmra.mrb[100].mxu0 %vm423_vm2, %v2392_v36 }
 0x5b6   :  { %v2396_v1 = vpop.permute.xlu1 %2395 }
 0x5ba   :  { %v2394_v56 = vpop.permute.xlu0 %2393 }
 0x5bb   :  { %8552 = vmatprep.mubr.msk.bf16.mxu0 %vm423_vm2, %v2394_v56 }
 0x5bc   :  { %8553 = vmatmul.mubr.msk.bf16.gmra.mrb[104].mxu0 %vm423_vm2, %v2396_v1 }
 0x5c6   :  { %v2400_v20 = vpop.permute.xlu1 %2399 }
 0x5ca   :  { %v2398_v53 = vpop.permute.xlu0 %2397 }
 0x5cb   :  { %8556 = vmatprep.mubr.msk.bf16.mxu0 %vm423_vm2, %v2398_v53 }
 0x5cc   :  { %8557 = vmatmul.mubr.msk.bf16.gmra.mrb[108].mxu0 %vm423_vm2, %v2400_v20 }
 0x5d6   :  { %v2404_v0 = vpop.permute.xlu1 %2403 }
 0x5da   :  { %v2402_v11 = vpop.permute.xlu0 %2401 }
 0x5db   :  { %8560 = vmatprep.mubr.msk.bf16.mxu0 %vm423_vm2, %v2402_v11 }
 0x5dc   :  { %8561 = vmatmul.mubr.msk.bf16.gmra.mrb[112].mxu0 %vm423_vm2, %v2404_v0 }
 0x5e6   :  { %v2408_v54 = vpop.permute.xlu1 %2407 }
 0x5ea   :  { %v2406_v46 = vpop.permute.xlu0 %2405 }
 0x5eb   :  { %8564 = vmatprep.mubr.msk.bf16.mxu0 %vm423_vm2, %v2406_v46 }
 0x5ec   :  { %8565 = vmatmul.mubr.msk.bf16.gmra.mrb[116].mxu0 %vm423_vm2, %v2408_v54 }
 0x5f6   :  { %v2412_v19 = vpop.permute.xlu1 %2411 }
 0x5fa   :  { %v2410_v60 = vpop.permute.xlu0 %2409 }
 0x5fb   :  { %8568 = vmatprep.mubr.msk.bf16.mxu0 %vm423_vm2, %v2410_v60 }
 0x5fc   :  { %8569 = vmatmul.mubr.msk.bf16.gmra.mrb[120].mxu0 %vm423_vm2, %v2412_v19 }
 0x60a   :  { %v2414_v2 = vpop.permute.xlu0 %2413 }
 0x60b   :  { %8572 = vmatprep.mubr.msk.bf16.mxu0 %vm423_vm2, %v2414_v2 }
 0x60e   :  { %v2416_v9 = vpop.permute.xlu1 %2415 }
 0x60f   :  { %8573 = vmatmul.mubr.msk.bf16.gmra.mrb[124].mxu0 %vm423_vm2, %v2416_v9 }
 0x610   :  { %8580 = vmatprep.mubr.msk.bf16.mxu0 %vm423_vm2, %v2386_v4 }
 0x617   :  { %8581 = vmatmul.mubr.msk.bf16.vlgmr.msra.gmra.mrb[128].mxu0 %vm423_vm2, %v2388_v49 }
 0x618   :  { %8584 = vmatprep.mubr.msk.bf16.mxu0 %vm423_vm2, %v2390_v62  ;;  %8613 = vmatpush3.bf16.msra.mxu0 %v9666_v51 }
 0x619   :  { %8614 = vmatprep.subr.bf16.mxu0 %v9667_v58 }
 0x61c   :  { %8615 = vmatpush3.bf16.msra.mxu0 %v9667_v58 }
 0x61f   :  { %8585 = vmatmul.mubr.msk.bf16.gmra.mrb[132].mxu0 %vm423_vm2, %v2392_v36 }
 0x620   :  { %8588 = vmatprep.mubr.msk.bf16.mxu0 %vm423_vm2, %v2394_v56 }
 0x627   :  { %8589 = vmatmul.mubr.msk.bf16.gmra.mrb[136].mxu0 %vm423_vm2, %v2396_v1 }
 0x628   :  { %8592 = vmatprep.mubr.msk.bf16.mxu0 %vm423_vm2, %v2398_v53 }
 0x62f   :  { %8593 = vmatmul.mubr.msk.bf16.gmra.mrb[140].mxu0 %vm423_vm2, %v2400_v20 }
 0x630   :  { %8596 = vmatprep.mubr.msk.bf16.mxu0 %vm423_vm2, %v2402_v11 }
 0x637   :  { %8597 = vmatmul.mubr.msk.bf16.gmra.mrb[144].mxu0 %vm423_vm2, %v2404_v0 }
 0x638   :  { %8600 = vmatprep.mubr.msk.bf16.mxu0 %vm423_vm2, %v2406_v46 }
 0x63f   :  { %8601 = vmatmul.mubr.msk.bf16.gmra.mrb[148].mxu0 %vm423_vm2, %v2408_v54 }
 0x640   :  { %8604 = vmatprep.mubr.msk.bf16.mxu0 %vm423_vm2, %v2410_v60 }
 0x647   :  { %8605 = vmatmul.mubr.msk.bf16.gmra.mrb[152].mxu0 %vm423_vm2, %v2412_v19 }
 0x648   :  { %8608 = vmatprep.mubr.msk.bf16.mxu0 %vm423_vm2, %v2414_v2 }
 0x64f   :  { %8609 = vmatmul.mubr.msk.bf16.gmra.mrb[156].mxu0 %vm423_vm2, %v2416_v9 }
 0x672   :  { %v8546_v12 = vpop.f32.mrb[96].mxu0 }
 0x673   :  { %v2511_v5 = vpop.f32.mrb[97].mxu0 }
 0x674   :  { %v8547_v13 = vpop.f32.mrb[98].mxu0 }
 0x675   :  { %v2639_v40 = vpack.c.bf16 %v8547_v13, %v8546_v12  ;;  %v2514_v15 = vpop.f32.mrb[99].mxu0 }
 0x676   :  { %v2638_v6 = vpack.c.bf16 %v2514_v15, %v2511_v5 }
 0x67f   :  { %v8550_v45 = vpop.f32.mrb[100].mxu0 }
 0x680   :  { %v2527_v29 = vpop.f32.mrb[101].mxu0 }
 0x681   :  { %v8551_v57 = vpop.f32.mrb[102].mxu0 }
 0x682   :  { %v2641_v61 = vpack.c.bf16 %v8551_v57, %v8550_v45  ;;  %v2530_v30 = vpop.f32.mrb[103].mxu0 }
 0x683   :  { %v2640_v10 = vpack.c.bf16 %v2530_v30, %v2527_v29 }
 0x68f   :  { %v8554_v52 = vpop.f32.mrb[104].mxu0 }
 0x690   :  { %v2543_v4 = vpop.f32.mrb[105].mxu0 }
 0x691   :  { %v8555_v49 = vpop.f32.mrb[106].mxu0 }
 0x692   :  { %v2643_v27 = vpack.c.bf16 %v8555_v49, %v8554_v52  ;;  %v2546_v51 = vpop.f32.mrb[107].mxu0 }
 0x693   :  { %v2642_v62 = vpack.c.bf16 %v2546_v51, %v2543_v4 }
 0x69f   :  { %v8558_v36 = vpop.f32.mrb[108].mxu0 }
 0x6a0   :  { %v2559_v56 = vpop.f32.mrb[109].mxu0 }
 0x6a1   :  { %v8559_v1 = vpop.f32.mrb[110].mxu0 }
 0x6a2   :  { %v2645_v53 = vpack.c.bf16 %v8559_v1, %v8558_v36  ;;  %v2562_v20 = vpop.f32.mrb[111].mxu0  ;;  %v9672_v1 = vld [vmem:[%s13450_s2 + $0x20] ss:$8 sps:$4 sm:$0xff]  }
 0x6a3   :  { %v2644_v11 = vpack.c.bf16 %v2562_v20, %v2559_v56  ;;  %v9674_v20 = vld [vmem:[%s13450_s2 + $0x30] ss:$8 sps:$4 sm:$0xff]  }
 0x6af   :  { %v8562_v0 = vpop.f32.mrb[112].mxu0 }
 0x6b0   :  { %v2575_v46 = vpop.f32.mrb[113].mxu0 }
 0x6b1   :  { %v8563_v54 = vpop.f32.mrb[114].mxu0 }
 0x6b2   :  { %v2647_v60 = vpack.c.bf16 %v8563_v54, %v8562_v0  ;;  %v2578_v19 = vpop.f32.mrb[115].mxu0  ;;  %v9676_v0 = vld [vmem:[%s13450_s2 + $0x40] ss:$8 sps:$4 sm:$0xff]   ;;  %v9678_v54 = vld [vmem:[%s13450_s2 + $0x50] ss:$8 sps:$4 sm:$0xff]  }
 0x6b3   :  { %v2646_v2 = vpack.c.bf16 %v2578_v19, %v2575_v46  ;;  %v9677_v46 = vld [vmem:[%s13450_s2 + $0x54] ss:$8 sps:$4 sm:$0xff]   ;;  %v9680_v19 = vld [vmem:[%s13450_s2 + $0x60] ss:$8 sps:$4 sm:$0xff]  }
 0x6b5   :  { %8071 = vmatprep.subr.bf16.mxu1 %v2646_v2  ;;  %v9681_v2 = vld [vmem:[%s13450_s2 + $0x74] ss:$8 sps:$4 sm:$0xff]  }
 0x6b6   :  { %8072 = vmatpush3.bf16.msra.mxu1 %v2638_v6 }
 0x6b7   :  { %8073 = vmatprep.subr.bf16.mxu1 %v2647_v60  ;;  %v9679_v60 = vld [vmem:[%s13450_s2 + $0x64] ss:$8 sps:$4 sm:$0xff]  }
 0x6ba   :  { %8074 = vmatpush3.bf16.msra.mxu1 %v2639_v40 }
 0x6bf   :  { %v8566_v9 = vpop.f32.mrb[116].mxu0 }
 0x6c0   :  { %v2591_v58 = vpop.f32.mrb[117].mxu0 }
 0x6c1   :  { %v8567_v12 = vpop.f32.mrb[118].mxu0 }
 0x6c2   :  { %v2649_v5 = vpack.c.bf16 %v8567_v12, %v8566_v9  ;;  %v2594_v13 = vpop.f32.mrb[119].mxu0  ;;  %v9682_v9 = vld [vmem:[%s13450_s2 + $0x70] ss:$8 sps:$4 sm:$0xff]   ;;  %v9684_v12 = vld [vmem:[%s13450_s2 + $0x80] ss:$8 sps:$4 sm:$0xff]  }
 0x6c3   :  { %v2648_v15 = vpack.c.bf16 %v2594_v13, %v2591_v58  ;;  %v9683_v58 = vld [vmem:[%s13450_s2 + $0x84] ss:$8 sps:$4 sm:$0xff]   ;;  %v9686_v13 = vld [vmem:[%s13450_s2 + $0x90] ss:$8 sps:$4 sm:$0xff]  }
 0x6c5   :  { %8075 = vmatprep.subr.bf16.mxu1 %v2648_v15  ;;  %v9687_v15 = vld [vmem:[%s13450_s2 + $0xa4] ss:$8 sps:$4 sm:$0xff]  }
 0x6c6   :  { %8076 = vmatpush3.bf16.msra.mxu1 %v2640_v10  ;;  %v9669_v10 = vld [vmem:[%s13450_s2 + $0x14] ss:$8 sps:$4 sm:$0xff]  }
 0x6c7   :  { %8077 = vmatprep.subr.bf16.mxu1 %v2649_v5  ;;  %v9685_v5 = vld [vmem:[%s13450_s2 + $0x94] ss:$8 sps:$4 sm:$0xff]  }
 0x6ca   :  { %8078 = vmatpush3.bf16.msra.mxu1 %v2641_v61  ;;  %v9668_v61 = vld [vmem:[%s13450_s2] ss:$8 sps:$4 sm:$0xff]  }
 0x6cf   :  { %v8570_v45 = vpop.f32.mrb[120].mxu0 }
 0x6d0   :  { %v2607_v29 = vpop.f32.mrb[121].mxu0 }
 0x6d1   :  { %v8571_v57 = vpop.f32.mrb[122].mxu0 }
 0x6d2   :  { %v2651_v30 = vpack.c.bf16 %v8571_v57, %v8570_v45  ;;  %v2610_v52 = vpop.f32.mrb[123].mxu0  ;;  %v9688_v45 = vld [vmem:[%s13450_s2 + $0xa0] ss:$8 sps:$4 sm:$0xff]   ;;  %v9690_v57 = vld [vmem:[%s13450_s2 + $0xb0] ss:$8 sps:$4 sm:$0xff]  }
 0x6d3   :  { %v2650_v4 = vpack.c.bf16 %v2610_v52, %v2607_v29  ;;  %v9689_v29 = vld [vmem:[%s13450_s2 + $0xb4] ss:$8 sps:$4 sm:$0xff]   ;;  %v9692_v52 = vld [vmem:[%s13450_s2 + $0xc0] ss:$8 sps:$4 sm:$0xff]  }
 0x6d5   :  { %8079 = vmatprep.subr.bf16.mxu1 %v2650_v4  ;;  %v9693_v4 = vld [vmem:[%s13450_s2 + $0xd4] ss:$8 sps:$4 sm:$0xff]  }
 0x6d6   :  { %8080 = vmatpush3.bf16.msra.mxu1 %v2642_v62  ;;  %v9671_v62 = vld [vmem:[%s13450_s2 + $0x24] ss:$8 sps:$4 sm:$0xff]  }
 0x6d7   :  { %8081 = vmatprep.subr.bf16.mxu1 %v2651_v30  ;;  %v9691_v30 = vld [vmem:[%s13450_s2 + $0xc4] ss:$8 sps:$4 sm:$0xff]  }
 0x6da   :  { %8082 = vmatpush3.bf16.msra.mxu1 %v2643_v27  ;;  %v9670_v27 = vld [vmem:[%s13450_s2 + $0x10] ss:$8 sps:$4 sm:$0xff]  }
 0x6e2   :  { %v8574_v40 = vpop.f32.mrb[124].mxu0 }
 0x6e3   :  { %v2623_v6 = vpop.f32.mrb[125].mxu0 }
 0x6e4   :  { %v8575_v49 = vpop.f32.mrb[126].mxu0 }
 0x6e5   :  { %v2653_v51 = vpack.c.bf16 %v8575_v49, %v8574_v40  ;;  %v2626_v36 = vpop.f32.mrb[127].mxu0  ;;  %v9694_v40 = vld [vmem:[%s13450_s2 + $0xd0] ss:$8 sps:$4 sm:$0xff]   ;;  %v9696_v49 = vld [vmem:[%s13450_s2 + $0xe0] ss:$8 sps:$4 sm:$0xff]  }
 0x6e6   :  { %v2652_v56 = vpack.c.bf16 %v2626_v36, %v2623_v6  ;;  %v9695_v6 = vld [vmem:[%s13450_s2 + $0xe4] ss:$8 sps:$4 sm:$0xff]   ;;  %v9698_v36 = vld [vmem:[%s13450_s2 + $0xf0] ss:$8 sps:$4 sm:$0xff]  }
 0x6e8   :  { %8083 = vmatprep.subr.bf16.mxu1 %v2652_v56 }
 0x6e9   :  { %8084 = vmatpush3.bf16.msra.mxu1 %v2644_v11  ;;  %v9675_v11 = vld [vmem:[%s13450_s2 + $0x44] ss:$8 sps:$4 sm:$0xff]  }
 0x6ea   :  { %8085 = vmatprep.subr.bf16.mxu1 %v2653_v51  ;;  %v9697_v51 = vld [vmem:[%s13450_s2 + $0xf4] ss:$8 sps:$4 sm:$0xff]  }
 0x6ed   :  { %8086 = vmatpush3.bf16.msra.mxu1 %v2645_v53  ;;  %v9673_v53 = vld [vmem:[%s13450_s2 + $0x34] ss:$8 sps:$4 sm:$0xff]  }
 0x6f0   :  { %2687 = vmatmul.mubr.bf16.vlgmr.msra.gmra.mrb[64].mxu1 %v9668_v61 }
 0x6f1   :  { %2694 = vmatprep.mubr.bf16.mxu1 %v9669_v10 }
 0x6f8   :  { %2695 = vmatmul.mubr.bf16.gmra.mrb[68].mxu1 %v9670_v27 }
 0x6f9   :  { %2702 = vmatprep.mubr.bf16.mxu1 %v9671_v62 }
 0x700   :  { %2703 = vmatmul.mubr.bf16.gmra.mrb[72].mxu1 %v9672_v1 }
 0x701   :  { %2710 = vmatprep.mubr.bf16.mxu1 %v9673_v53 }
 0x708   :  { %2711 = vmatmul.mubr.bf16.gmra.mrb[76].mxu1 %v9674_v20 }
 0x709   :  { %2718 = vmatprep.mubr.bf16.mxu1 %v9675_v11 }
 0x710   :  { %2719 = vmatmul.mubr.bf16.gmra.mrb[80].mxu1 %v9676_v0 }
 0x711   :  { %2726 = vmatprep.mubr.bf16.mxu1 %v9677_v46 }
 0x718   :  { %2727 = vmatmul.mubr.bf16.gmra.mrb[84].mxu1 %v9678_v54 }
 0x719   :  { %2734 = vmatprep.mubr.bf16.mxu1 %v9679_v60 }
 0x720   :  { %2735 = vmatmul.mubr.bf16.gmra.mrb[88].mxu1 %v9680_v19 }
 0x721   :  { %2742 = vmatprep.mubr.bf16.mxu1 %v9681_v2 }
 0x728   :  { %2743 = vmatmul.mubr.bf16.gmra.mrb[92].mxu1 %v9682_v9 }
 0x729   :  { %2750 = vmatprep.mubr.bf16.mxu1 %v9683_v58 }
 0x730   :  { %2751 = vmatmul.mubr.bf16.gmra.mrb[96].mxu1 %v9684_v12 }
 0x731   :  { %2758 = vmatprep.mubr.bf16.mxu1 %v9685_v5 }
 0x738   :  { %2759 = vmatmul.mubr.bf16.gmra.mrb[100].mxu1 %v9686_v13 }
 0x739   :  { %2766 = vmatprep.mubr.bf16.mxu1 %v9687_v15 }
 0x740   :  { %2767 = vmatmul.mubr.bf16.gmra.mrb[104].mxu1 %v9688_v45 }
 0x741   :  { %2774 = vmatprep.mubr.bf16.mxu1 %v9689_v29 }
 0x748   :  { %2775 = vmatmul.mubr.bf16.gmra.mrb[108].mxu1 %v9690_v57 }
 0x749   :  { %2782 = vmatprep.mubr.bf16.mxu1 %v9691_v30 }
 0x750   :  { %2783 = vmatmul.mubr.bf16.gmra.mrb[112].mxu1 %v9692_v52 }
 0x751   :  { %2790 = vmatprep.mubr.bf16.mxu1 %v9693_v4 }
 0x758   :  { %2791 = vmatmul.mubr.bf16.gmra.mrb[116].mxu1 %v9694_v40 }
 0x759   :  { %2798 = vmatprep.mubr.bf16.mxu1 %v9695_v6 }
 0x760   :  { %2799 = vmatmul.mubr.bf16.gmra.mrb[120].mxu1 %v9696_v49 }
 0x761   :  { %2806 = vmatprep.mubr.bf16.mxu1 %v9697_v51 }
 0x768   :  { %2807 = vmatmul.mubr.bf16.gmra.mrb[124].mxu1 %v9698_v36 }
 0x7c3   :  { %v8087_v56 = vpop.f32.mrb[64].mxu1 }
 0x7c4   :  { %v8088_v61 = vpop.f32.mrb[65].mxu1 }
 0x7c5   :  { %v8089_v10 = vadd.f32 %v8088_v61, %v8087_v56  ;;  %v8090_v27 = vpop.f32.mrb[66].mxu1 }
 0x7c6   :  { %v8091_v62 = vpop.f32.mrb[67].mxu1 }
 0x7c7   :  { %v8092_v1 = vadd.f32 %v8091_v62, %v8090_v27 }
 0x7c9   :  { %v2815_v53 = vpack.c.bf16 %v8092_v1, %v8089_v10 }
 0x7cb   :  { %v8093_v20 = vpop.f32.mrb[68].mxu1  ;;  %8616 = vmatprep.mubr.msk.bf16.mxu0 %vm423_vm2, %v2815_v53 }
 0x7cc   :  { %v8094_v11 = vpop.f32.mrb[69].mxu1 }
 0x7cd   :  { %v8095_v0 = vadd.f32 %v8094_v11, %v8093_v20  ;;  %v8096_v46 = vpop.f32.mrb[70].mxu1 }
 0x7ce   :  { %v8097_v54 = vpop.f32.mrb[71].mxu1 }
 0x7cf   :  { %v8098_v60 = vadd.f32 %v8097_v54, %v8096_v46 }
 0x7d1   :  { %v2816_v19 = vpack.c.bf16 %v8098_v60, %v8095_v0 }
 0x7d3   :  { %8617 = vmatmul.mubr.msk.bf16.vlgmr.msra.gmra.mrb[128].mxu0 %vm423_vm2, %v2816_v19  ;;  %v8099_v2 = vpop.f32.mrb[72].mxu1 }
 0x7d4   :  { %v8100_v9 = vpop.f32.mrb[73].mxu1 }
 0x7d5   :  { %v8101_v58 = vadd.f32 %v8100_v9, %v8099_v2  ;;  %v8102_v12 = vpop.f32.mrb[74].mxu1 }
 0x7d6   :  { %v8103_v5 = vpop.f32.mrb[75].mxu1 }
 0x7d7   :  { %v8104_v13 = vadd.f32 %v8103_v5, %v8102_v12 }
 0x7d9   :  { %v2817_v15 = vpack.c.bf16 %v8104_v13, %v8101_v58 }
 0x7db   :  { %v8105_v45 = vpop.f32.mrb[76].mxu1  ;;  %8620 = vmatprep.mubr.msk.bf16.mxu0 %vm423_vm2, %v2817_v15 }
 0x7dc   :  { %v8106_v29 = vpop.f32.mrb[77].mxu1 }
 0x7dd   :  { %v8107_v57 = vadd.f32 %v8106_v29, %v8105_v45  ;;  %v8108_v30 = vpop.f32.mrb[78].mxu1 }
 0x7de   :  { %v8109_v52 = vpop.f32.mrb[79].mxu1 }
 0x7df   :  { %v8110_v4 = vadd.f32 %v8109_v52, %v8108_v30 }
 0x7e1   :  { %v2818_v40 = vpack.c.bf16 %v8110_v4, %v8107_v57 }
 0x7e3   :  { %8621 = vmatmul.mubr.msk.bf16.gmra.mrb[132].mxu0 %vm423_vm2, %v2818_v40  ;;  %v8111_v6 = vpop.f32.mrb[80].mxu1 }
 0x7e4   :  { %v8112_v49 = vpop.f32.mrb[81].mxu1 }
 0x7e5   :  { %v8113_v51 = vadd.f32 %v8112_v49, %v8111_v6  ;;  %v8114_v36 = vpop.f32.mrb[82].mxu1 }
 0x7e6   :  { %v8115_v56 = vpop.f32.mrb[83].mxu1 }
 0x7e7   :  { %v8116_v61 = vadd.f32 %v8115_v56, %v8114_v36 }
 0x7e9   :  { %v2819_v10 = vpack.c.bf16 %v8116_v61, %v8113_v51 }
 0x7eb   :  { %v8117_v27 = vpop.f32.mrb[84].mxu1  ;;  %8624 = vmatprep.mubr.msk.bf16.mxu0 %vm423_vm2, %v2819_v10 }
 0x7ec   :  { %v8118_v62 = vpop.f32.mrb[85].mxu1 }
 0x7ed   :  { %v8119_v1 = vadd.f32 %v8118_v62, %v8117_v27  ;;  %v8120_v53 = vpop.f32.mrb[86].mxu1 }
 0x7ee   :  { %v8121_v20 = vpop.f32.mrb[87].mxu1 }
 0x7ef   :  { %v8122_v11 = vadd.f32 %v8121_v20, %v8120_v53 }
 0x7f1   :  { %v2820_v0 = vpack.c.bf16 %v8122_v11, %v8119_v1 }
 0x7f3   :  { %8625 = vmatmul.mubr.msk.bf16.gmra.mrb[136].mxu0 %vm423_vm2, %v2820_v0  ;;  %v8123_v46 = vpop.f32.mrb[88].mxu1 }
 0x7f4   :  { %v8124_v54 = vpop.f32.mrb[89].mxu1 }
 0x7f5   :  { %v8125_v60 = vadd.f32 %v8124_v54, %v8123_v46  ;;  %v8126_v19 = vpop.f32.mrb[90].mxu1 }
 0x7f6   :  { %v8127_v2 = vpop.f32.mrb[91].mxu1 }
 0x7f7   :  { %v8128_v9 = vadd.f32 %v8127_v2, %v8126_v19 }
 0x7f9   :  { %v2821_v58 = vpack.c.bf16 %v8128_v9, %v8125_v60 }
 0x7fb   :  { %v8129_v12 = vpop.f32.mrb[92].mxu1  ;;  %8628 = vmatprep.mubr.msk.bf16.mxu0 %vm423_vm2, %v2821_v58 }
 0x7fc   :  { %v8130_v5 = vpop.f32.mrb[93].mxu1 }
 0x7fd   :  { %v8131_v13 = vadd.f32 %v8130_v5, %v8129_v12  ;;  %v8132_v15 = vpop.f32.mrb[94].mxu1 }
 0x7fe   :  { %v8133_v45 = vpop.f32.mrb[95].mxu1 }
 0x7ff   :  { %v8134_v29 = vadd.f32 %v8133_v45, %v8132_v15 }
 0x801   :  { %v2822_v57 = vpack.c.bf16 %v8134_v29, %v8131_v13 }
 0x803   :  { %8629 = vmatmul.mubr.msk.bf16.gmra.mrb[140].mxu0 %vm423_vm2, %v2822_v57  ;;  %v8135_v30 = vpop.f32.mrb[96].mxu1 }
 0x804   :  { %v8136_v52 = vpop.f32.mrb[97].mxu1 }
 0x805   :  { %v8137_v4 = vadd.f32 %v8136_v52, %v8135_v30  ;;  %v8138_v40 = vpop.f32.mrb[98].mxu1 }
 0x806   :  { %v8139_v6 = vpop.f32.mrb[99].mxu1 }
 0x807   :  { %v8140_v49 = vadd.f32 %v8139_v6, %v8138_v40 }
 0x809   :  { %v2823_v51 = vpack.c.bf16 %v8140_v49, %v8137_v4 }
 0x80b   :  { %v8141_v36 = vpop.f32.mrb[100].mxu1  ;;  %8632 = vmatprep.mubr.msk.bf16.mxu0 %vm423_vm2, %v2823_v51 }
 0x80c   :  { %v8142_v56 = vpop.f32.mrb[101].mxu1 }
 0x80d   :  { %v8143_v61 = vadd.f32 %v8142_v56, %v8141_v36  ;;  %v8144_v10 = vpop.f32.mrb[102].mxu1 }
 0x80e   :  { %v8145_v27 = vpop.f32.mrb[103].mxu1 }
 0x80f   :  { %v8146_v62 = vadd.f32 %v8145_v27, %v8144_v10 }
 0x811   :  { %v2824_v1 = vpack.c.bf16 %v8146_v62, %v8143_v61 }
 0x813   :  { %8633 = vmatmul.mubr.msk.bf16.gmra.mrb[144].mxu0 %vm423_vm2, %v2824_v1  ;;  %v8147_v53 = vpop.f32.mrb[104].mxu1 }
 0x814   :  { %v8148_v20 = vpop.f32.mrb[105].mxu1 }
 0x815   :  { %v8149_v11 = vadd.f32 %v8148_v20, %v8147_v53  ;;  %v8150_v0 = vpop.f32.mrb[106].mxu1 }
 0x816   :  { %v8151_v46 = vpop.f32.mrb[107].mxu1 }
 0x817   :  { %v8152_v54 = vadd.f32 %v8151_v46, %v8150_v0 }
 0x819   :  { %v2825_v60 = vpack.c.bf16 %v8152_v54, %v8149_v11 }
 0x81b   :  { %v8153_v19 = vpop.f32.mrb[108].mxu1  ;;  %8636 = vmatprep.mubr.msk.bf16.mxu0 %vm423_vm2, %v2825_v60 }
 0x81c   :  { %v8154_v2 = vpop.f32.mrb[109].mxu1 }
 0x81d   :  { %v8155_v9 = vadd.f32 %v8154_v2, %v8153_v19  ;;  %v8156_v58 = vpop.f32.mrb[110].mxu1 }
 0x81e   :  { %v8157_v12 = vpop.f32.mrb[111].mxu1 }
 0x81f   :  { %v8158_v5 = vadd.f32 %v8157_v12, %v8156_v58  ;;  %v9699_v58 = vld [vmem:[%s13450_s2 + $0x4] ss:$8 sps:$4 sm:$0xff]  }
 0x821   :  { %v2826_v13 = vpack.c.bf16 %v8158_v5, %v8155_v9  ;;  %v11066_v5 = vld [vmem:[%s13456_s8] ss:$0 sm:$0xff] }
 0x823   :  { %8637 = vmatmul.mubr.msk.bf16.gmra.mrb[148].mxu0 %vm423_vm2, %v2826_v13  ;;  %v8159_v15 = vpop.f32.mrb[112].mxu1 }
 0x824   :  { %v8160_v45 = vpop.f32.mrb[113].mxu1 }
 0x825   :  { %v8161_v29 = vadd.f32 %v8160_v45, %v8159_v15  ;;  %v8162_v57 = vpop.f32.mrb[114].mxu1 }
 0x826   :  { %v8163_v30 = vpop.f32.mrb[115].mxu1 }
 0x827   :  { %v8164_v52 = vadd.f32 %v8163_v30, %v8162_v57 }
 0x829   :  { %v2827_v4 = vpack.c.bf16 %v8164_v52, %v8161_v29 }
 0x82b   :  { %v8165_v40 = vpop.f32.mrb[116].mxu1  ;;  %8640 = vmatprep.mubr.msk.bf16.mxu0 %vm423_vm2, %v2827_v4 }
 0x82c   :  { %v8166_v6 = vpop.f32.mrb[117].mxu1 }
 0x82d   :  { %v8167_v49 = vadd.f32 %v8166_v6, %v8165_v40  ;;  %v8168_v51 = vpop.f32.mrb[118].mxu1 }
 0x82e   :  { %v8169_v36 = vpop.f32.mrb[119].mxu1 }
 0x82f   :  { %v8170_v56 = vadd.f32 %v8169_v36, %v8168_v51 }
 0x831   :  { %v2828_v61 = vpack.c.bf16 %v8170_v56, %v8167_v49 }
 0x833   :  { %8641 = vmatmul.mubr.msk.bf16.gmra.mrb[152].mxu0 %vm423_vm2, %v2828_v61  ;;  %v8171_v10 = vpop.f32.mrb[120].mxu1 }
 0x834   :  { %v8172_v27 = vpop.f32.mrb[121].mxu1 }
 0x835   :  { %v8173_v62 = vadd.f32 %v8172_v27, %v8171_v10  ;;  %v8174_v1 = vpop.f32.mrb[122].mxu1 }
 0x836   :  { %v8175_v53 = vpop.f32.mrb[123].mxu1 }
 0x837   :  { %v8176_v20 = vadd.f32 %v8175_v53, %v8174_v1 }
 0x839   :  { %v2829_v11 = vpack.c.bf16 %v8176_v20, %v8173_v62 }
 0x83b   :  { %v8177_v0 = vpop.f32.mrb[124].mxu1  ;;  %8644 = vmatprep.mubr.msk.bf16.mxu0 %vm423_vm2, %v2829_v11 }
 0x83c   :  { %v8178_v46 = vpop.f32.mrb[125].mxu1 }
 0x83d   :  { %v8179_v54 = vadd.f32 %v8178_v46, %v8177_v0  ;;  %v8180_v60 = vpop.f32.mrb[126].mxu1 }
 0x83e   :  { %v8181_v19 = vpop.f32.mrb[127].mxu1 }
 0x83f   :  { %v8182_v2 = vadd.f32 %v8181_v19, %v8180_v60 }
 0x841   :  { %v2830_v9 = vpack.c.bf16 %v8182_v2, %v8179_v54 }
 0x843   :  { %8645 = vmatmul.mubr.msk.bf16.gmra.mrb[156].mxu0 %vm423_vm2, %v2830_v9 }
 0x844   :  { %4371 = vmatprep.mubr.bf16.mxu0 %v9699_v58 }
 0x8a6   :  { %v8618_v12 = vpop.f32.mrb[128].mxu0 }
 0x8a7   :  { %v11069_v13 = vadd.f32 %v11066_v5, %v8618_v12  ;;  %v3074_v15 = vpop.f32.mrb[129].mxu0 }
 0x8a8   :  { %v8619_v45 = vpop.f32.mrb[130].mxu0  ;;  %v11077_v30 = vadd.f32 %v11066_v5, %v3074_v15 }
 0x8a9   :  { %v11072_v29 = vadd.f32 %v11066_v5, %v8619_v45  ;;  %3461 = vrot.lane.b32.xlu0 %v11069_v13, %s9761_s18  ;;  %v3077_v57 = vpop.f32.mrb[131].mxu0 }
 0x8aa   :  { %v11082_v52 = vadd.f32 %v11066_v5, %v3077_v57 }
 0x8ab   :  { %3463 = vrot.lane.b32.xlu1 %v11072_v29, %s9761_s18 }
 0x8ad   :  { %3457 = vrot.lane.b32.xlu0 %v11077_v30, %s9761_s18 }
 0x8af   :  { %3459 = vrot.lane.b32.xlu1 %v11082_v52, %s9761_s18 }
 0x8b6   :  { %v8622_v4 = vpop.f32.mrb[132].mxu0 }
 0x8b7   :  { %v11089_v40 = vadd.f32 %v11066_v5, %v8622_v4  ;;  %v3090_v6 = vpop.f32.mrb[133].mxu0 }
 0x8b8   :  { %v8623_v49 = vpop.f32.mrb[134].mxu0  ;;  %v11097_v56 = vadd.f32 %v11066_v5, %v3090_v6 }
 0x8b9   :  { %v11092_v51 = vadd.f32 %v11066_v5, %v8623_v49  ;;  %3469 = vrot.lane.b32.xlu0 %v11089_v40, %s9761_s18  ;;  %v3093_v36 = vpop.f32.mrb[135].mxu0  ;;  %v7738_v38 = vmul.f32 -1.442695, %v11089_v40 }
 0x8ba   :  { %v11102_v61 = vadd.f32 %v11066_v5, %v3093_v36 }
 0x8bb   :  { %3471 = vrot.lane.b32.xlu1 %v11092_v51, %s9761_s18  ;;  %v7739_v14 = vmul.f32 -1.442695, %v11092_v51 }
 0x8bd   :  { %3465 = vrot.lane.b32.xlu0 %v11097_v56, %s9761_s18 }
 0x8bf   :  { %3467 = vrot.lane.b32.xlu1 %v11102_v61, %s9761_s18 }
 0x8c6   :  { %v8626_v10 = vpop.f32.mrb[136].mxu0 }
 0x8c7   :  { %v11109_v27 = vadd.f32 %v11066_v5, %v8626_v10  ;;  %v3106_v62 = vpop.f32.mrb[137].mxu0 }
 0x8c8   :  { %v8627_v1 = vpop.f32.mrb[138].mxu0  ;;  %v11117_v11 = vadd.f32 %v11066_v5, %v3106_v62 }
 0x8c9   :  { %v11112_v53 = vadd.f32 %v11066_v5, %v8627_v1  ;;  %3477 = vrot.lane.b32.xlu0 %v11109_v27, %s9761_s18  ;;  %v3109_v20 = vpop.f32.mrb[139].mxu0  ;;  %v7742_v43 = vmul.f32 -1.442695, %v11109_v27 }
 0x8ca   :  { %v11122_v0 = vadd.f32 %v11066_v5, %v3109_v20 }
 0x8cb   :  { %3479 = vrot.lane.b32.xlu1 %v11112_v53, %s9761_s18  ;;  %v7743_v47 = vmul.f32 -1.442695, %v11112_v53 }
 0x8cc   :  { %v7741_v25 = vmul.f32 -1.442695, %v11122_v0 }
 0x8cd   :  { %3473 = vrot.lane.b32.xlu0 %v11117_v11, %s9761_s18 }
 0x8cf   :  { %3475 = vrot.lane.b32.xlu1 %v11122_v0, %s9761_s18 }
 0x8d6   :  { %v8630_v46 = vpop.f32.mrb[140].mxu0 }
 0x8d7   :  { %v11129_v54 = vadd.f32 %v11066_v5, %v8630_v46  ;;  %v3122_v60 = vpop.f32.mrb[141].mxu0 }
 0x8d8   :  { %v8631_v19 = vpop.f32.mrb[142].mxu0  ;;  %v11137_v58 = vadd.f32 %v11066_v5, %v3122_v60 }
 0x8d9   :  { %v11132_v2 = vadd.f32 %v11066_v5, %v8631_v19  ;;  %3485 = vrot.lane.b32.xlu0 %v11129_v54, %s9761_s18  ;;  %v3125_v9 = vpop.f32.mrb[143].mxu0  ;;  %v7746_v44 = vmul.f32 -1.442695, %v11129_v54 }
 0x8da   :  { %v11142_v12 = vadd.f32 %v11066_v5, %v3125_v9 }
 0x8db   :  { %3487 = vrot.lane.b32.xlu1 %v11132_v2, %s9761_s18  ;;  %v7747_v33 = vmul.f32 -1.442695, %v11132_v2 }
 0x8dd   :  { %3481 = vrot.lane.b32.xlu0 %v11137_v58, %s9761_s18 }
 0x8df   :  { %3483 = vrot.lane.b32.xlu1 %v11142_v12, %s9761_s18 }
 0x8e6   :  { %v8634_v15 = vpop.f32.mrb[144].mxu0 }
 0x8e7   :  { %v11149_v45 = vadd.f32 %v11066_v5, %v8634_v15  ;;  %v3138_v57 = vpop.f32.mrb[145].mxu0 }
 0x8e8   :  { %v8635_v4 = vpop.f32.mrb[146].mxu0  ;;  %v11157_v36 = vadd.f32 %v11066_v5, %v3138_v57  ;;  %v7732_v57 = vmul.f32 -1.442695, %v11077_v30 }
 0x8e9   :  { %v11152_v6 = vadd.f32 %v11066_v5, %v8635_v4  ;;  %3493 = vrot.lane.b32.xlu0 %v11149_v45, %s9761_s18  ;;  %v3141_v49 = vpop.f32.mrb[147].mxu0  ;;  %v7733_v4 = vmul.f32 -1.442695, %v11082_v52  ;;  %v7750_v8 = vmul.f32 -1.442695, %v11149_v45 }
 0x8ea   :  { %v11162_v10 = vadd.f32 %v11066_v5, %v3141_v49  ;;  %v7734_v49 = vmul.f32 -1.442695, %v11069_v13  ;;  %9152 = vpow2.f32 %v7732_v57 }
 0x8eb   :  { %3495 = vrot.lane.b32.xlu1 %v11152_v6, %s9761_s18  ;;  %9154 = vpow2.f32 %v7733_v4 }
 0x8ec   :  { %9156 = vpow2.f32 %v7734_v49 }
 0x8ed   :  { %3489 = vrot.lane.b32.xlu0 %v11157_v36, %s9761_s18 }
 0x8ef   :  { %3491 = vrot.lane.b32.xlu1 %v11162_v10, %s9761_s18 }
 0x8f4   :  { %v9153_v49 = vpop.eup %9152 }
 0x8f6   :  { %v8638_v62 = vpop.f32.mrb[148].mxu0 }
 0x8f7   :  { %v11169_v1 = vadd.f32 %v11066_v5, %v8638_v62  ;;  %v3154_v20 = vpop.f32.mrb[149].mxu0  ;;  %v7735_v62 = vmul.f32 -1.442695, %v11072_v29 }
 0x8f8   :  { %v8639_v46 = vpop.f32.mrb[150].mxu0  ;;  %v11177_v9 = vadd.f32 %v11066_v5, %v3154_v20 }
 0x8f9   :  { %v11172_v60 = vadd.f32 %v11066_v5, %v8639_v46  ;;  %3501 = vrot.lane.b32.xlu0 %v11169_v1, %s9761_s18  ;;  %v3157_v19 = vpop.f32.mrb[151].mxu0  ;;  %9158 = vpow2.f32 %v7735_v62  ;;  %v3329_v62 = vadd.f32 1.0, %v9153_v49 }
 0x8fa   :  { %v11182_v15 = vadd.f32 %v11066_v5, %v3157_v19 }
 0x8fb   :  { %3503 = vrot.lane.b32.xlu1 %v11172_v60, %s9761_s18 }
 0x8fd   :  { %3497 = vrot.lane.b32.xlu0 %v11177_v9, %s9761_s18 }
 0x8ff   :  { %3499 = vrot.lane.b32.xlu1 %v11182_v15, %s9761_s18 }
 0x906   :  { %v8642_v20 = vpop.f32.mrb[152].mxu0 }
 0x907   :  { %v11193_v46 = vadd.f32 %v11066_v5, %v8642_v20  ;;  %v3170_v19 = vpop.f32.mrb[153].mxu0  ;;  %v7736_v20 = vmul.f32 -1.442695, %v11097_v56 }
 0x908   :  { %v8643_v63 = vpop.f32.mrb[154].mxu0  ;;  %v11201_v57 = vadd.f32 %v11066_v5, %v3170_v19  ;;  %v7737_v19 = vmul.f32 -1.442695, %v11102_v61 }
 0x909   :  { %v11196_v24 = vadd.f32 %v11066_v5, %v8643_v63  ;;  %3509 = vrot.lane.b32.xlu0 %v11193_v46, %s9761_s18  ;;  %v3173_v16 = vpop.f32.mrb[155].mxu0  ;;  %v9155_v63 = vpop.eup %9154  ;;  %9160 = vpow2.f32 %v7736_v20 }
 0x90a   :  { %v11206_v4 = vadd.f32 %v11066_v5, %v3173_v16  ;;  %v9157_v17 = vpop.eup %9156  ;;  %v3330_v35 = vadd.f32 1.0, %v9155_v63  ;;  %9162 = vrcp.f32 %v3329_v62 }
 0x90b   :  { %3511 = vrot.lane.b32.xlu1 %v11196_v24, %s9761_s18  ;;  %v9159_v3 = vpop.eup %9158  ;;  %v3331_v16 = vadd.f32 1.0, %v9157_v17  ;;  %9164 = vpow2.f32 %v7737_v19 }
 0x90c   :  { %v3332_v50 = vadd.f32 1.0, %v9159_v3  ;;  %9166 = vrcp.f32 %v3330_v35 }
 0x90d   :  { %3505 = vrot.lane.b32.xlu0 %v11201_v57, %s9761_s18  ;;  %9168 = vpow2.f32 %v7738_v38 }
 0x90e   :  { %9170 = vrcp.f32 %v3331_v16 }
 0x90f   :  { %3507 = vrot.lane.b32.xlu1 %v11206_v4, %s9761_s18  ;;  %9172 = vpow2.f32 %v7739_v14  ;;  %v7740_v14 = vmul.f32 -1.442695, %v11117_v11 }
 0x910   :  { %9174 = vrcp.f32 %v3332_v50 }
 0x911   :  { %9176 = vpow2.f32 %v7740_v14 }
 0x916   :  { %v8646_v42 = vpop.f32.mrb[156].mxu0 }
 0x917   :  { %v11217_v37 = vadd.f32 %v11066_v5, %v8646_v42  ;;  %v3186_v49 = vpop.f32.mrb[157].mxu0 }
 0x918   :  { %v8647_v55 = vpop.f32.mrb[158].mxu0  ;;  %v11225_v20 = vadd.f32 %v11066_v5, %v3186_v49 }
 0x919   :  { %v11220_v63 = vadd.f32 %v11066_v5, %v8647_v55  ;;  %3517 = vrot.lane.b32.xlu0 %v11217_v37, %s9761_s18  ;;  %v3189_v17 = vpop.f32.mrb[159].mxu0  ;;  %v9161_v55 = vpop.eup %9160 }
 0x91a   :  { %v11230_v42 = vadd.f32 %v11066_v5, %v3189_v17  ;;  %v11234_v38 = vpop.eup %9162  ;;  %v3333_v5 = vadd.f32 1.0, %v9161_v55 }
 0x91b   :  { %v3462_v3 = vpop.permute.xlu0 %3461  ;;  %3519 = vrot.lane.b32.xlu1 %v11220_v63, %s9761_s18  ;;  %v9165_v50 = vpop.eup %9164 }
 0x91c   :  { %v11240_v16 = vpop.eup %9166  ;;  %v3334_v28 = vadd.f32 1.0, %v9165_v50  ;;  %9178 = vrcp.f32 %v3333_v5 }
 0x91d   :  { %v3464_v35 = vpop.permute.xlu1 %3463  ;;  %3513 = vrot.lane.b32.xlu0 %v11225_v20, %s9761_s18  ;;  %v9169_v17 = vpop.eup %9168  ;;  %9180 = vpow2.f32 %v7741_v25  ;;  %v7744_v25 = vmul.f32 -1.442695, %v11137_v58 }
 0x91e   :  { %v11245_v41 = vpop.eup %9170  ;;  %v3335_v21 = vadd.f32 1.0, %v9169_v17  ;;  %9182 = vrcp.f32 %v3334_v28 }
 0x91f   :  { %v3458_v62 = vpop.permute.xlu0 %3457  ;;  %3515 = vrot.lane.b32.xlu1 %v11230_v42, %s9761_s18  ;;  %v9173_v23 = vpop.eup %9172  ;;  %9184 = vpow2.f32 %v7742_v43 }
 0x920   :  { %v3553_v19 = vmul.f32 %v11234_v38, %v3458_v62  ;;  %v3555_v62 = vmul.f32 %v11245_v41, %v3462_v3  ;;  %v11250_v55 = vpop.eup %9174  ;;  %v3336_v50 = vadd.f32 1.0, %v9173_v23  ;;  %9186 = vrcp.f32 %v3335_v21 }
 0x921   :  { %v3460_v49 = vpop.permute.xlu1 %3459  ;;  %9188 = vpow2.f32 %v7743_v47  ;;  %v9177_v14 = vpop.eup %9176  ;;  %v7745_v21 = vmul.f32 -1.442695, %v11142_v12 }
 0x922   :  { %v3554_v26 = vmul.f32 %v11240_v16, %v3460_v49  ;;  %3617 = vrot.lane.b32.xlu0 %v3553_v19, %s9762_s4  ;;  %v3556_v19 = vmul.f32 %v11250_v55, %v3464_v35  ;;  %9190 = vrcp.f32 %v3336_v50  ;;  %v3337_v23 = vadd.f32 1.0, %v9177_v14 }
 0x923   :  { %9192 = vpow2.f32 %v7744_v25 }
 0x924   :  { %3619 = vrot.lane.b32.xlu1 %v3554_v26, %s9762_s4  ;;  %9194 = vrcp.f32 %v3337_v23 }
 0x925   :  { %9196 = vpow2.f32 %v7745_v21  ;;  %v7748_v21 = vmul.f32 -1.442695, %v11157_v36 }
 0x926   :  { %3621 = vrot.lane.b32.xlu0 %v3555_v62, %s9762_s4  ;;  %v11256_v49 = vpop.eup %9178 }
 0x927   :  { %v9181_v17 = vpop.eup %9180 }
 0x928   :  { %3623 = vrot.lane.b32.xlu1 %v3556_v19, %s9762_s4  ;;  %v11260_v62 = vpop.eup %9182  ;;  %v3338_v50 = vadd.f32 1.0, %v9181_v17 }
 0x929   :  { %v9185_v28 = vpop.eup %9184 }
 0x92a   :  { %v11265_v19 = vpop.eup %9186  ;;  %v3339_v18 = vadd.f32 1.0, %v9185_v28  ;;  %9198 = vrcp.f32 %v3338_v50 }
 0x92b   :  { %v3470_v26 = vpop.permute.xlu0 %3469  ;;  %v9189_v7 = vpop.eup %9188  ;;  %9200 = vpow2.f32 %v7746_v44 }
 0x92c   :  { %v11270_v14 = vpop.eup %9190  ;;  %v3340_v17 = vadd.f32 1.0, %v9189_v7  ;;  %9202 = vrcp.f32 %v3339_v18  ;;  %v7749_v18 = vmul.f32 -1.442695, %v11162_v10 }
 0x92d   :  { %v3472_v3 = vpop.permute.xlu1 %3471  ;;  %13761 = vst [vmem:[#allocation42_spill] sm:$0xff] %v11270_v14  ;;  %9204 = vpow2.f32 %v7747_v33 }
 0x92e   :  { %9206 = vrcp.f32 %v3340_v17 }
 0x92f   :  { %v3466_v5 = vpop.permute.xlu0 %3465  ;;  %9208 = vpow2.f32 %v7748_v21 }
 0x930   :  { %v3557_v35 = vmul.f32 %v11256_v49, %v3466_v5  ;;  %v3559_v5 = vmul.f32 %v11265_v19, %v3470_v26 }
 0x931   :  { %v3468_v43 = vpop.permute.xlu1 %3467 }
 0x932   :  { %v3558_v47 = vmul.f32 %v11260_v62, %v3468_v43  ;;  %3625 = vrot.lane.b32.xlu0 %v3557_v35, %s9762_s4  ;;  %v3560_v35 = vmul.f32 %v11270_v14, %v3472_v3  ;;  %v9193_v43 = vpop.eup %9192  ;;  %v7751_v14 = vmul.f32 -1.442695, %v11152_v6 }
 0x933   :  { %v11276_v28 = vpop.eup %9194  ;;  %v3341_v7 = vadd.f32 1.0, %v9193_v43 }
 0x934   :  { %3627 = vrot.lane.b32.xlu1 %v3558_v47, %s9762_s4  ;;  %13762 = vst [vmem:[#allocation43_spill] sm:$0xff] %v11276_v28  ;;  %v9197_v47 = vpop.eup %9196 }
 0x935   :  { %v3342_v17 = vadd.f32 1.0, %v9197_v47  ;;  %9210 = vrcp.f32 %v3341_v7 }
 0x936   :  { %3629 = vrot.lane.b32.xlu0 %v3559_v5, %s9762_s4  ;;  %v11280_v5 = vpop.eup %9198  ;;  %9212 = vpow2.f32 %v7749_v18  ;;  %v7752_v18 = vmul.f32 -1.442695, %v11177_v9 }
 0x937   :  { %13763 = vst [vmem:[#allocation21_spill] sm:$0xff] %v11280_v5  ;;  %v9201_v50 = vpop.eup %9200  ;;  %9214 = vrcp.f32 %v3342_v17 }
 0x938   :  { %3631 = vrot.lane.b32.xlu1 %v3560_v35, %s9762_s4  ;;  %v11285_v35 = vpop.eup %9202  ;;  %9216 = vpow2.f32 %v7750_v8 }
 0x939   :  { %13764 = vst [vmem:[#allocation20_spill] sm:$0xff] %v11285_v35  ;;  %v9205_v59 = vpop.eup %9204 }
 0x93a   :  { %v11290_v43 = vpop.eup %9206  ;;  %v3344_v47 = vadd.f32 1.0, %v9205_v59 }
 0x93b   :  { %v3478_v26 = vpop.permute.xlu0 %3477  ;;  %13765 = vst [vmem:[#allocation44_spill] sm:$0xff] %v11290_v43 }
 0x93d   :  { %v3480_v25 = vpop.permute.xlu1 %3479 }
 0x93f   :  { %v3474_v23 = vpop.permute.xlu0 %3473 }
 0x940   :  { %v3561_v3 = vmul.f32 %v11276_v28, %v3474_v23  ;;  %v3563_v23 = vmul.f32 %v11285_v35, %v3478_v26  ;;  %v3343_v28 = vadd.f32 1.0, %v9201_v50  ;;  %v7754_v35 = vmul.f32 -1.442695, %v11169_v1 }
 0x941   :  { %v3476_v44 = vpop.permute.xlu1 %3475 }
 0x942   :  { %v3562_v33 = vmul.f32 %v11280_v5, %v3476_v44  ;;  %3633 = vrot.lane.b32.xlu0 %v3561_v3, %s9762_s4  ;;  %v3564_v3 = vmul.f32 %v11290_v43, %v3480_v25  ;;  %9218 = vrcp.f32 %v3343_v28  ;;  %v9209_v44 = vpop.eup %9208  ;;  %v7753_v28 = vmul.f32 -1.442695, %v11182_v15 }
 0x943   :  { %9220 = vpow2.f32 %v7751_v14  ;;  %v11296_v50 = vpop.eup %9210  ;;  %v3345_v59 = vadd.f32 1.0, %v9209_v44  ;;  %v7755_v5 = vmul.f32 -1.442695, %v11172_v60 }
 0x944   :  { %3635 = vrot.lane.b32.xlu1 %v3562_v33, %s9762_s4  ;;  %9222 = vrcp.f32 %v3344_v47  ;;  %13766 = vst [vmem:[#allocation23_spill] sm:$0xff] %v11296_v50  ;;  %v9213_v33 = vpop.eup %9212 }
 0x945   :  { %v3346_v47 = vadd.f32 1.0, %v9213_v33  ;;  %9224 = vpow2.f32 %v7752_v18 }
 0x946   :  { %3637 = vrot.lane.b32.xlu0 %v3563_v23, %s9762_s4  ;;  %v11300_v23 = vpop.eup %9214  ;;  %9226 = vrcp.f32 %v3345_v59 }
 0x947   :  { %13767 = vst [vmem:[#allocation22_spill] sm:$0xff] %v11300_v23  ;;  %v9217_v17 = vpop.eup %9216  ;;  %9228 = vpow2.f32 %v7753_v28  ;;  %v7756_v28 = vmul.f32 -1.442695, %v11201_v57 }
 0x948   :  { %3639 = vrot.lane.b32.xlu1 %v3564_v3, %s9762_s4  ;;  %9230 = vrcp.f32 %v3346_v47 }
 0x949   :  { %9232 = vpow2.f32 %v7754_v35 }
 0x94b   :  { %v3486_v26 = vpop.permute.xlu0 %3485 }
 0x94c   :  { %v11305_v3 = vpop.eup %9218 }
 0x94d   :  { %v3488_v21 = vpop.permute.xlu1 %3487  ;;  %13768 = vst [vmem:[#allocation45_spill] sm:$0xff] %v11305_v3  ;;  %v9221_v43 = vpop.eup %9220 }
 0x94e   :  { %v11310_v44 = vpop.eup %9222  ;;  %v3348_v33 = vadd.f32 1.0, %v9221_v43 }
 0x94f   :  { %v3482_v7 = vpop.permute.xlu0 %3481  ;;  %13769 = vst [vmem:[#allocation25_spill] sm:$0xff] %v11310_v44 }
 0x950   :  { %v3565_v25 = vmul.f32 %v11296_v50, %v3482_v7  ;;  %v3567_v7 = vmul.f32 %v11305_v3, %v3486_v26  ;;  %v3347_v50 = vadd.f32 1.0, %v9217_v17  ;;  %v7758_v3 = vmul.f32 -1.442695, %v11193_v46 }
 0x951   :  { %v3484_v8 = vpop.permute.xlu1 %3483 }
 0x952   :  { %v3566_v14 = vmul.f32 %v11300_v23, %v3484_v8  ;;  %3641 = vrot.lane.b32.xlu0 %v3565_v25, %s9762_s4  ;;  %v3568_v25 = vmul.f32 %v11310_v44, %v3488_v21  ;;  %9234 = vrcp.f32 %v3347_v50  ;;  %v9225_v8 = vpop.eup %9224  ;;  %v7757_v50 = vmul.f32 -1.442695, %v11206_v4 }
 0x953   :  { %9236 = vpow2.f32 %v7755_v5  ;;  %v11316_v17 = vpop.eup %9226  ;;  %v3349_v43 = vadd.f32 1.0, %v9225_v8  ;;  %v7759_v23 = vmul.f32 -1.442695, %v11196_v24 }
 0x954   :  { %3643 = vrot.lane.b32.xlu1 %v3566_v14, %s9762_s4  ;;  %9238 = vrcp.f32 %v3348_v33  ;;  %13770 = vst [vmem:[#allocation24_spill] sm:$0xff] %v11316_v17  ;;  %v9229_v14 = vpop.eup %9228 }
 0x955   :  { %v3350_v33 = vadd.f32 1.0, %v9229_v14  ;;  %9240 = vpow2.f32 %v7756_v28 }
 0x956   :  { %3645 = vrot.lane.b32.xlu0 %v3567_v7, %s9762_s4  ;;  %v11320_v7 = vpop.eup %9230  ;;  %9242 = vrcp.f32 %v3349_v43 }
 0x957   :  { %13771 = vst [vmem:[#allocation46_spill] sm:$0xff] %v11320_v7  ;;  %v9233_v47 = vpop.eup %9232  ;;  %9244 = vpow2.f32 %v7757_v50  ;;  %v7760_v50 = vmul.f32 -1.442695, %v11225_v20 }
 0x958   :  { %3647 = vrot.lane.b32.xlu1 %v3568_v25, %s9762_s4  ;;  %9246 = vrcp.f32 %v3350_v33 }
 0x959   :  { %9248 = vpow2.f32 %v7758_v3 }
 0x95b   :  { %v3494_v26 = vpop.permute.xlu0 %3493 }
 0x95c   :  { %v11325_v25 = vpop.eup %9234 }
 0x95d   :  { %v3496_v18 = vpop.permute.xlu1 %3495  ;;  %13772 = vst [vmem:[#allocation27_spill] sm:$0xff] %v11325_v25  ;;  %v9237_v44 = vpop.eup %9236 }
 0x95e   :  { %v11330_v8 = vpop.eup %9238  ;;  %v3352_v14 = vadd.f32 1.0, %v9237_v44 }
 0x95f   :  { %v3490_v59 = vpop.permute.xlu0 %3489  ;;  %13773 = vst [vmem:[#allocation26_spill] sm:$0xff] %v11330_v8 }
 0x960   :  { %v3569_v21 = vmul.f32 %v11316_v17, %v3490_v59  ;;  %v3571_v59 = vmul.f32 %v11325_v25, %v3494_v26  ;;  %v3351_v17 = vadd.f32 1.0, %v9233_v47  ;;  %v7762_v25 = vmul.f32 -1.442695, %v11217_v37 }
 0x961   :  { %v3492_v35 = vpop.permute.xlu1 %3491 }
 0x962   :  { %v3570_v5 = vmul.f32 %v11320_v7, %v3492_v35  ;;  %3649 = vrot.lane.b32.xlu0 %v3569_v21, %s9762_s4  ;;  %v3572_v21 = vmul.f32 %v11330_v8, %v3496_v18  ;;  %9250 = vrcp.f32 %v3351_v17  ;;  %v9241_v35 = vpop.eup %9240  ;;  %v7761_v17 = vmul.f32 -1.442695, %v11230_v42 }
 0x963   :  { %9252 = vpow2.f32 %v7759_v23  ;;  %v11336_v47 = vpop.eup %9242  ;;  %v3353_v44 = vadd.f32 1.0, %v9241_v35  ;;  %v7763_v7 = vmul.f32 -1.442695, %v11220_v63 }
 0x964   :  { %3651 = vrot.lane.b32.xlu1 %v3570_v5, %s9762_s4  ;;  %9254 = vrcp.f32 %v3352_v14  ;;  %13774 = vst [vmem:[#allocation29_spill] sm:$0xff] %v11336_v47  ;;  %v9245_v5 = vpop.eup %9244 }
 0x965   :  { %v3354_v14 = vadd.f32 1.0, %v9245_v5  ;;  %9256 = vpow2.f32 %v7760_v50 }
 0x966   :  { %3653 = vrot.lane.b32.xlu0 %v3571_v59, %s9762_s4  ;;  %v11340_v59 = vpop.eup %9246  ;;  %9258 = vrcp.f32 %v3353_v44 }
 0x967   :  { %v9249_v33 = vpop.eup %9248  ;;  %9260 = vpow2.f32 %v7761_v17 }
 0x968   :  { %3655 = vrot.lane.b32.xlu1 %v3572_v21, %s9762_s4  ;;  %9262 = vrcp.f32 %v3354_v14 }
 0x969   :  { %9264 = vpow2.f32 %v7762_v25 }
 0x96b   :  { %v3502_v26 = vpop.permute.xlu0 %3501 }
 0x96c   :  { %v11345_v21 = vpop.eup %9250 }
 0x96d   :  { %v3504_v28 = vpop.permute.xlu1 %3503  ;;  %v9253_v8 = vpop.eup %9252 }
 0x96e   :  { %v11350_v35 = vpop.eup %9254  ;;  %v3356_v5 = vadd.f32 1.0, %v9253_v8 }
 0x96f   :  { %v3498_v43 = vpop.permute.xlu0 %3497  ;;  %13775 = vst [vmem:[#allocation28_spill] sm:$0xff] %v11350_v35 }
 0x970   :  { %v3573_v18 = vmul.f32 %v11336_v47, %v3498_v43  ;;  %v3575_v43 = vmul.f32 %v11345_v21, %v3502_v26  ;;  %v3355_v47 = vadd.f32 1.0, %v9249_v33 }
 0x971   :  { %v3500_v3 = vpop.permute.xlu1 %3499 }
 0x972   :  { %v3574_v23 = vmul.f32 %v11340_v59, %v3500_v3  ;;  %3657 = vrot.lane.b32.xlu0 %v3573_v18, %s9762_s4  ;;  %v3576_v18 = vmul.f32 %v11350_v35, %v3504_v28  ;;  %9266 = vrcp.f32 %v3355_v47  ;;  %v9257_v3 = vpop.eup %9256 }
 0x973   :  { %9268 = vpow2.f32 %v7763_v7  ;;  %v11356_v33 = vpop.eup %9258 }
 0x974   :  { %3659 = vrot.lane.b32.xlu1 %v3574_v23, %s9762_s4  ;;  %9270 = vrcp.f32 %v3356_v5  ;;  %13776 = vst [vmem:[#allocation47_spill] sm:$0xff] %v11356_v33  ;;  %v9261_v23 = vpop.eup %9260 }
 0x975   :  { %v11359_v28 = vpop.eup %9262  ;;  %v3358_v47 = vadd.f32 1.0, %v9261_v23 }
 0x976   :  { %3661 = vrot.lane.b32.xlu0 %v3575_v43, %s9762_s4  ;;  %v3357_v43 = vadd.f32 1.0, %v9257_v3  ;;  %v9265_v14 = vpop.eup %9264 }
 0x978   :  { %3663 = vrot.lane.b32.xlu1 %v3576_v18, %s9762_s4  ;;  %9272 = vrcp.f32 %v3357_v43 }
 0x979   :  { %9274 = vrcp.f32 %v3358_v47 }
 0x97b   :  { %v3510_v26 = vpop.permute.xlu0 %3509 }
 0x97c   :  { %v11363_v7 = vpop.eup %9266 }
 0x97d   :  { %v3512_v50 = vpop.permute.xlu1 %3511  ;;  %13777 = vst [vmem:[#allocation48_spill] sm:$0xff] %v11363_v7  ;;  %v9269_v18 = vpop.eup %9268  ;;  %v3579_v5 = vmul.f32 %v11363_v7, %v3510_v26 }
 0x97e   :  { %v11367_v35 = vpop.eup %9270 }
 0x97f   :  { %v3506_v44 = vpop.permute.xlu0 %3505  ;;  %v3580_v3 = vmul.f32 %v11367_v35, %v3512_v50 }
 0x980   :  { %v3577_v17 = vmul.f32 %v11356_v33, %v3506_v44  ;;  %v3359_v44 = vadd.f32 1.0, %v9265_v14  ;;  %v3360_v33 = vadd.f32 1.0, %v9269_v18 }
 0x981   :  { %v3508_v8 = vpop.permute.xlu1 %3507 }
 0x982   :  { %v3578_v25 = vmul.f32 %v11359_v28, %v3508_v8  ;;  %3665 = vrot.lane.b32.xlu0 %v3577_v17, %s9762_s4  ;;  %9276 = vrcp.f32 %v3359_v44  ;;  %v11372_v8 = vpop.eup %9272 }
 0x983   :  { %9278 = vrcp.f32 %v3360_v33  ;;  %v11375_v7 = vpop.eup %9274 }
 0x984   :  { %3667 = vrot.lane.b32.xlu1 %v3578_v25, %s9762_s4 }
 0x986   :  { %3669 = vrot.lane.b32.xlu0 %v3579_v5, %s9762_s4 }
 0x988   :  { %3671 = vrot.lane.b32.xlu1 %v3580_v3, %s9762_s4 }
 0x98b   :  { %v3518_v23 = vpop.permute.xlu0 %3517 }
 0x98c   :  { %v11379_v14 = vpop.eup %9276 }
 0x98d   :  { %v3520_v17 = vpop.permute.xlu1 %3519  ;;  %v3583_v47 = vmul.f32 %v11379_v14, %v3518_v23  ;;  %v11383_v33 = vpop.eup %9278 }
 0x98e   :  { %v3584_v44 = vmul.f32 %v11383_v33, %v3520_v17 }
 0x98f   :  { %v3514_v26 = vpop.permute.xlu0 %3513 }
 0x990   :  { %v3581_v25 = vmul.f32 %v11372_v8, %v3514_v26 }
 0x991   :  { %v3516_v43 = vpop.permute.xlu1 %3515 }
 0x992   :  { %v3582_v50 = vmul.f32 %v11375_v7, %v3516_v43  ;;  %3673 = vrot.lane.b32.xlu0 %v3581_v25, %s9762_s4 }
 0x994   :  { %v3618_v18 = vpop.permute.xlu0 %3617  ;;  %3675 = vrot.lane.b32.xlu1 %v3582_v50, %s9762_s4 }
 0x995   :  { %v3713_v5 = vadd.f32 %v3618_v18, %v11077_v30 }
 0x996   :  { %3677 = vrot.lane.b32.xlu0 %v3583_v47, %s9762_s4  ;;  %v3620_v3 = vpop.permute.xlu1 %3619 }
 0x997   :  { %9280 = vtanh.f32 %v3713_v5  ;;  %v3714_v26 = vadd.f32 %v3620_v3, %v11082_v52 }
 0x998   :  { %v3622_v25 = vpop.permute.xlu0 %3621  ;;  %3679 = vrot.lane.b32.xlu1 %v3584_v44, %s9762_s4 }
 0x999   :  { %9282 = vtanh.f32 %v3714_v26  ;;  %v3715_v23 = vadd.f32 %v3622_v25, %v11069_v13 }
 0x99a   :  { %v3624_v43 = vpop.permute.xlu1 %3623 }
 0x99b   :  { %9284 = vtanh.f32 %v3715_v23  ;;  %v3716_v50 = vadd.f32 %v3624_v43, %v11072_v29 }
 0x99d   :  { %9286 = vtanh.f32 %v3716_v50 }
 0x9a1   :  { %v9281_v30 = vpop.eup %9280 }
 0x9a2   :  { %3841 = vrot.lane.b32.xlu0 %v9281_v30, %s9763_s19 }
 0x9a3   :  { %v9283_v17 = vpop.eup %9282 }
 0x9a4   :  { %v3626_v47 = vpop.permute.xlu0 %3625  ;;  %3843 = vrot.lane.b32.xlu1 %v9283_v17, %s9763_s19 }
 0x9a5   :  { %v9285_v18 = vpop.eup %9284  ;;  %v3717_v52 = vadd.f32 %v3626_v47, %v11097_v56 }
 0x9a6   :  { %3845 = vrot.lane.b32.xlu0 %v9285_v18, %s9763_s19  ;;  %v3628_v5 = vpop.permute.xlu1 %3627 }
 0x9a7   :  { %v9287_v44 = vpop.eup %9286  ;;  %9288 = vtanh.f32 %v3717_v52  ;;  %v3718_v13 = vadd.f32 %v3628_v5, %v11102_v61 }
 0x9a8   :  { %v3630_v3 = vpop.permute.xlu0 %3629  ;;  %3847 = vrot.lane.b32.xlu1 %v9287_v44, %s9763_s19 }
 0x9a9   :  { %9290 = vtanh.f32 %v3718_v13  ;;  %v3719_v29 = vadd.f32 %v3630_v3, %v11089_v40 }
 0x9aa   :  { %v3632_v26 = vpop.permute.xlu1 %3631 }
 0x9ab   :  { %9292 = vtanh.f32 %v3719_v29  ;;  %v3720_v25 = vadd.f32 %v3632_v26, %v11092_v51 }
 0x9ad   :  { %9294 = vtanh.f32 %v3720_v25 }
 0x9b1   :  { %v9289_v23 = vpop.eup %9288 }
 0x9b2   :  { %3849 = vrot.lane.b32.xlu0 %v9289_v23, %s9763_s19 }
 0x9b3   :  { %v9291_v56 = vpop.eup %9290 }
 0x9b4   :  { %v3634_v43 = vpop.permute.xlu0 %3633  ;;  %3851 = vrot.lane.b32.xlu1 %v9291_v56, %s9763_s19 }
 0x9b5   :  { %v9293_v50 = vpop.eup %9292  ;;  %v3721_v61 = vadd.f32 %v3634_v43, %v11117_v11 }
 0x9b6   :  { %3853 = vrot.lane.b32.xlu0 %v9293_v50, %s9763_s19  ;;  %v3636_v30 = vpop.permute.xlu1 %3635 }
 0x9b7   :  { %v9295_v17 = vpop.eup %9294  ;;  %9296 = vtanh.f32 %v3721_v61  ;;  %v3722_v40 = vadd.f32 %v3636_v30, %v11122_v0 }
 0x9b8   :  { %v3638_v47 = vpop.permute.xlu0 %3637  ;;  %3855 = vrot.lane.b32.xlu1 %v9295_v17, %s9763_s19 }
 0x9b9   :  { %9298 = vtanh.f32 %v3722_v40  ;;  %v3723_v51 = vadd.f32 %v3638_v47, %v11109_v27 }
 0x9ba   :  { %v3640_v18 = vpop.permute.xlu1 %3639 }
 0x9bb   :  { %9300 = vtanh.f32 %v3723_v51  ;;  %v3724_v52 = vadd.f32 %v3640_v18, %v11112_v53 }
 0x9bd   :  { %9302 = vtanh.f32 %v3724_v52 }
 0x9c1   :  { %v9297_v5 = vpop.eup %9296 }
 0x9c2   :  { %3857 = vrot.lane.b32.xlu0 %v9297_v5, %s9763_s19 }
 0x9c3   :  { %v9299_v11 = vpop.eup %9298 }
 0x9c4   :  { %v3642_v44 = vpop.permute.xlu0 %3641  ;;  %3859 = vrot.lane.b32.xlu1 %v9299_v11, %s9763_s19 }
 0x9c5   :  { %v9301_v13 = vpop.eup %9300  ;;  %v3725_v0 = vadd.f32 %v3642_v44, %v11137_v58 }
 0x9c6   :  { %3861 = vrot.lane.b32.xlu0 %v9301_v13, %s9763_s19  ;;  %v3644_v3 = vpop.permute.xlu1 %3643 }
 0x9c7   :  { %v9303_v29 = vpop.eup %9302  ;;  %9304 = vtanh.f32 %v3725_v0  ;;  %v3726_v27 = vadd.f32 %v3644_v3, %v11142_v12 }
 0x9c8   :  { %v3646_v26 = vpop.permute.xlu0 %3645  ;;  %3863 = vrot.lane.b32.xlu1 %v9303_v29, %s9763_s19 }
 0x9c9   :  { %9306 = vtanh.f32 %v3726_v27  ;;  %v3727_v53 = vadd.f32 %v3646_v26, %v11129_v54 }
 0x9ca   :  { %v3648_v25 = vpop.permute.xlu1 %3647 }
 0x9cb   :  { %9308 = vtanh.f32 %v3727_v53  ;;  %v3728_v23 = vadd.f32 %v3648_v25, %v11132_v2 }
 0x9cd   :  { %9310 = vtanh.f32 %v3728_v23 }
 0x9d1   :  { %v9305_v56 = vpop.eup %9304 }
 0x9d2   :  { %3865 = vrot.lane.b32.xlu0 %v9305_v56, %s9763_s19 }
 0x9d3   :  { %v9307_v58 = vpop.eup %9306 }
 0x9d4   :  { %v3650_v43 = vpop.permute.xlu0 %3649  ;;  %3867 = vrot.lane.b32.xlu1 %v9307_v58, %s9763_s19 }
 0x9d5   :  { %v9309_v50 = vpop.eup %9308  ;;  %v3729_v12 = vadd.f32 %v3650_v43, %v11157_v36 }
 0x9d6   :  { %3869 = vrot.lane.b32.xlu0 %v9309_v50, %s9763_s19  ;;  %v3652_v61 = vpop.permute.xlu1 %3651 }
 0x9d7   :  { %v9311_v30 = vpop.eup %9310  ;;  %9312 = vtanh.f32 %v3729_v12  ;;  %v3730_v54 = vadd.f32 %v3652_v61, %v11162_v10 }
 0x9d8   :  { %v3654_v17 = vpop.permute.xlu0 %3653  ;;  %3871 = vrot.lane.b32.xlu1 %v9311_v30, %s9763_s19 }
 0x9d9   :  { %9314 = vtanh.f32 %v3730_v54  ;;  %v3731_v2 = vadd.f32 %v3654_v17, %v11149_v45 }
 0x9da   :  { %v3656_v40 = vpop.permute.xlu1 %3655 }
 0x9db   :  { %9316 = vtanh.f32 %v3731_v2  ;;  %v3732_v47 = vadd.f32 %v3656_v40, %v11152_v6 }
 0x9dd   :  { %9318 = vtanh.f32 %v3732_v47  ;;  %v3777_v47 = vsub.f32 1.0, %v11234_v38 }
 0x9e1   :  { %v9313_v51 = vpop.eup %9312 }
 0x9e2   :  { %3873 = vrot.lane.b32.xlu0 %v9313_v51, %s9763_s19 }
 0x9e3   :  { %v9315_v36 = vpop.eup %9314 }
 0x9e4   :  { %v3658_v18 = vpop.permute.xlu0 %3657  ;;  %3875 = vrot.lane.b32.xlu1 %v9315_v36, %s9763_s19 }
 0x9e5   :  { %v9317_v52 = vpop.eup %9316  ;;  %v3733_v10 = vadd.f32 %v3658_v18, %v11177_v9  ;;  %v8954_v9 = vld [vmem:[%s13453_s5 + $0x20] sm:$0xff]   ;;  %v3778_v18 = vsub.f32 1.0, %v11240_v16 }
 0x9e6   :  { %3877 = vrot.lane.b32.xlu0 %v9317_v52, %s9763_s19  ;;  %v3660_v5 = vpop.permute.xlu1 %3659  ;;  %8648 = vmatprep.subr.bf16.mxu1 %v8954_v9 }
 0x9e7   :  { %v9319_v11 = vpop.eup %9318  ;;  %9320 = vtanh.f32 %v3733_v10  ;;  %v3734_v45 = vadd.f32 %v3660_v5, %v11182_v15  ;;  %8649 = vmatpush3.bf16.msra.mxu1 %v8954_v9  ;;  %v3969_v5 = vmul.f32 %v11234_v38, %v10721_v48  ;;  %v3972_v38 = vmul.f32 %v11250_v55, %v10710_v31 }
 0x9e8   :  { %v3662_v44 = vpop.permute.xlu0 %3661  ;;  %3879 = vrot.lane.b32.xlu1 %v9319_v11, %s9763_s19  ;;  %v3970_v11 = vmul.f32 %v11240_v16, %v10723_v34  ;;  %v3971_v34 = vmul.f32 %v11245_v41, %v10708_v22  ;;  %v3782_v22 = vsub.f32 1.0, %v11260_v62  ;;  %v3973_v31 = vmul.f32 %v11256_v49, %v10747_v39 }
 0x9e9   :  { %9322 = vtanh.f32 %v3734_v45  ;;  %v3735_v6 = vadd.f32 %v3662_v44, %v11169_v1  ;;  %v3779_v44 = vsub.f32 1.0, %v11245_v41 }
 0x9ea   :  { %v3664_v13 = vpop.permute.xlu1 %3663 }
 0x9eb   :  { %9324 = vtanh.f32 %v3735_v6  ;;  %v3736_v0 = vadd.f32 %v3664_v13, %v11172_v60 }
 0x9ed   :  { %9326 = vtanh.f32 %v3736_v0 }
 0x9f1   :  { %v9321_v3 = vpop.eup %9320 }
 0x9f2   :  { %3881 = vrot.lane.b32.xlu0 %v9321_v3, %s9763_s19  ;;  %v3780_v3 = vsub.f32 1.0, %v11250_v55  ;;  %v3974_v55 = vmul.f32 %v11260_v62, %v10749_v32 }
 0x9f3   :  { %v9323_v15 = vpop.eup %9322 }
 0x9f4   :  { %v3666_v29 = vpop.permute.xlu0 %3665  ;;  %3883 = vrot.lane.b32.xlu1 %v9323_v15, %s9763_s19 }
 0x9f5   :  { %v9325_v27 = vpop.eup %9324  ;;  %v3737_v1 = vadd.f32 %v3666_v29, %v11201_v57 }
 0x9f6   :  { %3885 = vrot.lane.b32.xlu0 %v9325_v27, %s9763_s19  ;;  %v3668_v60 = vpop.permute.xlu1 %3667 }
 0x9f7   :  { %v9327_v26 = vpop.eup %9326  ;;  %9328 = vtanh.f32 %v3737_v1  ;;  %v3738_v53 = vadd.f32 %v3668_v60, %v11206_v4  ;;  %v3781_v60 = vsub.f32 1.0, %v11256_v49  ;;  %v13781_v49 = vld [vmem:[#allocation6_spill] sm:$0xff] }
 0x9f8   :  { %v3670_v25 = vpop.permute.xlu0 %3669  ;;  %3887 = vrot.lane.b32.xlu1 %v9327_v26, %s9763_s19 }
 0x9f9   :  { %9330 = vtanh.f32 %v3738_v53  ;;  %v3739_v23 = vadd.f32 %v3670_v25, %v11193_v46 }
 0x9fa   :  { %v3672_v56 = vpop.permute.xlu1 %3671 }
 0x9fb   :  { %9332 = vtanh.f32 %v3739_v23  ;;  %v3740_v58 = vadd.f32 %v3672_v56, %v11196_v24  ;;  %v3783_v23 = vsub.f32 1.0, %v11265_v19 }
 0x9fd   :  { %9334 = vtanh.f32 %v3740_v58 }
 0xa01   :  { %v9329_v43 = vpop.eup %9328 }
 0xa02   :  { %3889 = vrot.lane.b32.xlu0 %v9329_v43, %s9763_s19 }
 0xa03   :  { %v9331_v57 = vpop.eup %9330 }
 0xa04   :  { %v3674_v50 = vpop.permute.xlu0 %3673  ;;  %3891 = vrot.lane.b32.xlu1 %v9331_v57, %s9763_s19 }
 0xa05   :  { %v9333_v12 = vpop.eup %9332  ;;  %v3741_v4 = vadd.f32 %v3674_v50, %v11225_v20  ;;  %v8955_v20 = vld [vmem:[%s13453_s5 + $0x28] sm:$0xff]  }
 0xa06   :  { %3893 = vrot.lane.b32.xlu0 %v9333_v12, %s9763_s19  ;;  %v3676_v61 = vpop.permute.xlu1 %3675  ;;  %8650 = vmatprep.subr.bf16.mxu1 %v8955_v20  ;;  %v13779_v50 = vld [vmem:[#allocation42_spill] sm:$0xff] }
 0xa07   :  { %v9335_v30 = vpop.eup %9334  ;;  %9336 = vtanh.f32 %v3741_v4  ;;  %v3742_v46 = vadd.f32 %v3676_v61, %v11230_v42  ;;  %8651 = vmatpush3.bf16.msra.mxu1 %v8955_v20  ;;  %v3784_v12 = vsub.f32 1.0, %v13779_v50  ;;  %v3976_v32 = vmul.f32 %v13779_v50, %v13781_v49  ;;  %v13796_v50 = vld [vmem:[#allocation11_spill] sm:$0xff] }
 0xa08   :  { %v3678_v54 = vpop.permute.xlu0 %3677  ;;  %3895 = vrot.lane.b32.xlu1 %v9335_v30, %s9763_s19  ;;  %v13780_v30 = vld [vmem:[#allocation7_spill] sm:$0xff] }
 0xa09   :  { %9338 = vtanh.f32 %v3742_v46  ;;  %v3743_v24 = vadd.f32 %v3678_v54, %v11217_v37  ;;  %v11459_v37 = vld [vmem:[%s13455_s7] sm:$0xff]   ;;  %v3975_v39 = vmul.f32 %v11265_v19, %v13780_v30 }
 0xa0a   :  { %v3680_v17 = vpop.permute.xlu1 %3679  ;;  %8684 = vmatprep.subr.bf16.mxu1 %v11459_v37  ;;  %v13783_v19 = vld [vmem:[#allocation21_spill] sm:$0xff] }
 0xa0b   :  { %9340 = vtanh.f32 %v3743_v24  ;;  %v3744_v2 = vadd.f32 %v3680_v17, %v11220_v63  ;;  %v13782_v17 = vld [vmem:[#allocation43_spill] sm:$0xff] }
 0xa0d   :  { %9342 = vtanh.f32 %v3744_v2  ;;  %v3785_v2 = vsub.f32 1.0, %v13782_v17 }
 0xa11   :  { %v9337_v40 = vpop.eup %9336 }
 0xa12   :  { %3897 = vrot.lane.b32.xlu0 %v9337_v40, %s9763_s19 }
 0xa13   :  { %v9339_v42 = vpop.eup %9338 }
 0xa14   :  { %v3842_v63 = vpop.permute.xlu0 %3841  ;;  %3899 = vrot.lane.b32.xlu1 %v9339_v42, %s9763_s19  ;;  %v3786_v42 = vsub.f32 1.0, %v13783_v19 }
 0xa15   :  { %v9341_v51 = vpop.eup %9340  ;;  %v3937_v36 = vmul.f32 %v3842_v63, %v3777_v47  ;;  %v13784_v63 = vld [vmem:[#allocation9_spill] sm:$0xff] }
 0xa16   :  { %3901 = vrot.lane.b32.xlu0 %v9341_v51, %s9763_s19  ;;  %v3844_v52 = vpop.permute.xlu1 %3843  ;;  %v3977_v51 = vmul.f32 %v13782_v17, %v13784_v63  ;;  %v13803_v63 = vld [vmem:[#allocation33_spill] sm:$0xff] }
 0xa17   :  { %v9343_v10 = vpop.eup %9342  ;;  %v3938_v45 = vmul.f32 %v3844_v52, %v3778_v18  ;;  %v11471_v13 = vadd.f32 %v3969_v5, %v3937_v36  ;;  %v13785_v36 = vld [vmem:[#allocation8_spill] sm:$0xff] }
 0xa18   :  { %v3846_v6 = vpop.permute.xlu0 %3845  ;;  %3903 = vrot.lane.b32.xlu1 %v9343_v10, %s9763_s19  ;;  %v3978_v18 = vmul.f32 %v13783_v19, %v13785_v36  ;;  %v13786_v10 = vld [vmem:[#allocation20_spill] sm:$0xff] }
 0xa19   :  { %v11473_v0 = vadd.f32 %v3970_v11, %v3938_v45  ;;  %v3939_v9 = vmul.f32 %v3846_v6, %v3779_v44  ;;  %v3787_v5 = vsub.f32 1.0, %v13786_v10 }
 0xa1a   :  { %v3848_v15 = vpop.permute.xlu1 %3847 }
 0xa1b   :  { %v4033_v48 = vpack.c.bf16 %v11473_v0, %v11471_v13  ;;  %v3940_v16 = vmul.f32 %v3848_v15, %v3780_v3  ;;  %v11482_v29 = vadd.f32 %v3971_v34, %v3939_v9  ;;  %v13789_v9 = vld [vmem:[#allocation44_spill] sm:$0xff]  ;;  %v13790_v34 = vld [vmem:[#allocation30_spill] sm:$0xff] }
 0xa1c   :  { %v3788_v3 = vsub.f32 1.0, %v13789_v9 }
 0xa1d   :  { %v11484_v27 = vadd.f32 %v3972_v38, %v3940_v16  ;;  %4070 = vrot.lane.b32.xlu0 %v4033_v48, %s9763_s19  ;;  %v3979_v38 = vmul.f32 %v13786_v10, %v13790_v34  ;;  %v13791_v16 = vld [vmem:[#allocation31_spill] sm:$0xff]  ;;  %v13808_v34 = vld [vmem:[#allocation13_spill] sm:$0xff] }
 0xa1f   :  { %v4034_v1 = vpack.c.bf16 %v11484_v27, %v11482_v29 }
 0xa21   :  { %4072 = vrot.lane.b32.xlu1 %v4034_v1, %s9763_s19  ;;  %v3980_v1 = vmul.f32 %v13789_v9, %v13791_v16  ;;  %v13809_v16 = vld [vmem:[#allocation12_spill] sm:$0xff] }
 0xa24   :  { %v3850_v26 = vpop.permute.xlu0 %3849 }
 0xa25   :  { %v3941_v53 = vmul.f32 %v3850_v26, %v3781_v60 }
 0xa26   :  { %v3852_v41 = vpop.permute.xlu1 %3851 }
 0xa27   :  { %v3942_v25 = vmul.f32 %v3852_v41, %v3782_v22  ;;  %v11497_v58 = vadd.f32 %v3973_v31, %v3941_v53  ;;  %v13794_v41 = vld [vmem:[#allocation23_spill] sm:$0xff] }
 0xa28   :  { %v3854_v56 = vpop.permute.xlu0 %3853  ;;  %v3789_v31 = vsub.f32 1.0, %v13794_v41 }
 0xa29   :  { %v11499_v43 = vadd.f32 %v3974_v55, %v3942_v25  ;;  %v3943_v57 = vmul.f32 %v3854_v56, %v3783_v23  ;;  %v13795_v23 = vld [vmem:[#allocation22_spill] sm:$0xff] }
 0xa2a   :  { %v3856_v4 = vpop.permute.xlu1 %3855  ;;  %v3790_v56 = vsub.f32 1.0, %v13795_v23 }
 0xa2b   :  { %13778 = vst [vmem:[#allocation49_spill] sm:$0xff] %v11499_v43  ;;  %v4035_v61 = vpack.c.bf16 %v11499_v43, %v11497_v58  ;;  %v3944_v62 = vmul.f32 %v3856_v4, %v3784_v12  ;;  %v11508_v46 = vadd.f32 %v3975_v39, %v3943_v57  ;;  %v3981_v12 = vmul.f32 %v13794_v41, %v13796_v50  ;;  %v13797_v4 = vld [vmem:[#allocation10_spill] sm:$0xff]  ;;  %v13798_v39 = vld [vmem:[#allocation45_spill] sm:$0xff] }
 0xa2c   :  { %v3791_v49 = vsub.f32 1.0, %v13798_v39 }
 0xa2d   :  { %v11510_v54 = vadd.f32 %v3976_v32, %v3944_v62  ;;  %4074 = vrot.lane.b32.xlu0 %v4035_v61, %s9763_s19  ;;  %v3982_v61 = vmul.f32 %v13795_v23, %v13797_v4  ;;  %v13814_v4 = vld [vmem:[#allocation34_spill] sm:$0xff] }
 0xa2f   :  { %v4036_v24 = vpack.c.bf16 %v11510_v54, %v11508_v46 }
 0xa31   :  { %4076 = vrot.lane.b32.xlu1 %v4036_v24, %s9763_s19 }
 0xa34   :  { %v3858_v20 = vpop.permute.xlu0 %3857 }
 0xa35   :  { %v3945_v40 = vmul.f32 %v3858_v20, %v3785_v2  ;;  %v13801_v2 = vld [vmem:[#allocation25_spill] sm:$0xff] }
 0xa36   :  { %v3860_v47 = vpop.permute.xlu1 %3859  ;;  %v3792_v20 = vsub.f32 1.0, %v13801_v2 }
 0xa37   :  { %v3946_v52 = vmul.f32 %v3860_v47, %v3786_v42  ;;  %v11523_v45 = vadd.f32 %v3977_v51, %v3945_v40  ;;  %v13802_v42 = vld [vmem:[#allocation32_spill] sm:$0xff]  ;;  %v3984_v51 = vmul.f32 %v13801_v2, %v13803_v63 }
 0xa38   :  { %v3862_v11 = vpop.permute.xlu0 %3861  ;;  %v3983_v47 = vmul.f32 %v13798_v39, %v13802_v42 }
 0xa39   :  { %13787 = vst [vmem:[#allocation42_spill] sm:$0xff] %v11523_v45  ;;  %v11525_v44 = vadd.f32 %v3978_v18, %v3946_v52  ;;  %v3947_v6 = vmul.f32 %v3862_v11, %v3787_v5  ;;  %v13806_v5 = vld [vmem:[#allocation24_spill] sm:$0xff] }
 0xa3a   :  { %v3864_v15 = vpop.permute.xlu1 %3863  ;;  %v3793_v11 = vsub.f32 1.0, %v13806_v5 }
 0xa3b   :  { %13788 = vst [vmem:[#allocation7_spill] sm:$0xff] %v11525_v44  ;;  %v4037_v48 = vpack.c.bf16 %v11525_v44, %v11523_v45  ;;  %v3948_v60 = vmul.f32 %v3864_v15, %v3788_v3  ;;  %v11534_v26 = vadd.f32 %v3979_v38, %v3947_v6  ;;  %v13807_v3 = vld [vmem:[#allocation46_spill] sm:$0xff]  ;;  %v3985_v38 = vmul.f32 %v13806_v5, %v13808_v34  ;;  %v13823_v34 = vld [vmem:[#allocation28_spill] sm:$0xff] }
 0xa3c   :  { %v3794_v15 = vsub.f32 1.0, %v13807_v3 }
 0xa3d   :  { %13792 = vst [vmem:[#allocation6_spill] sm:$0xff] %v11534_v26  ;;  %v11536_v53 = vadd.f32 %v3980_v1, %v3948_v60  ;;  %4078 = vrot.lane.b32.xlu0 %v4037_v48, %s9763_s19  ;;  %v3986_v1 = vmul.f32 %v13807_v3, %v13809_v16 }
 0xa3f   :  { %13793 = vst [vmem:[#allocation43_spill] sm:$0xff] %v11536_v53  ;;  %v4038_v22 = vpack.c.bf16 %v11536_v53, %v11534_v26 }
 0xa41   :  { %4080 = vrot.lane.b32.xlu1 %v4038_v22, %s9763_s19  ;;  %v13810_v22 = vld [vmem:[#allocation27_spill] sm:$0xff] }
 0xa42   :  { %v3795_v41 = vsub.f32 1.0, %v13810_v22 }
 0xa44   :  { %v3866_v55 = vpop.permute.xlu0 %3865 }
 0xa45   :  { %v3949_v25 = vmul.f32 %v3866_v55, %v3789_v31 }
 0xa46   :  { %v3868_v57 = vpop.permute.xlu1 %3867 }
 0xa47   :  { %v3950_v30 = vmul.f32 %v3868_v57, %v3790_v56  ;;  %v11549_v62 = vadd.f32 %v3981_v12, %v3949_v25  ;;  %v13813_v56 = vld [vmem:[#allocation26_spill] sm:$0xff] }
 0xa48   :  { %v3870_v32 = vpop.permute.xlu0 %3869  ;;  %v3796_v57 = vsub.f32 1.0, %v13813_v56 }
 0xa49   :  { %13799 = vst [vmem:[#allocation21_spill] sm:$0xff] %v11549_v62  ;;  %v11551_v24 = vadd.f32 %v3982_v61, %v3950_v30  ;;  %v3951_v17 = vmul.f32 %v3870_v32, %v3791_v49  ;;  %v3987_v61 = vmul.f32 %v13810_v22, %v13814_v4  ;;  %v13815_v30 = vld [vmem:[#allocation35_spill] sm:$0xff] }
 0xa4a   :  { %v3872_v40 = vpop.permute.xlu1 %3871  ;;  %v3988_v39 = vmul.f32 %v13813_v56, %v13815_v30 }
 0xa4b   :  { %13800 = vst [vmem:[#allocation9_spill] sm:$0xff] %v11551_v24  ;;  %v4039_v19 = vpack.c.bf16 %v11551_v24, %v11549_v62  ;;  %v3952_v36 = vmul.f32 %v3872_v40, %v3792_v20  ;;  %v11560_v18 = vadd.f32 %v3983_v47, %v3951_v17  ;;  %v13818_v20 = vld [vmem:[#allocation29_spill] sm:$0xff]  ;;  %v3798_v47 = vsub.f32 1.0, %v11340_v59 }
 0xa4c   :  { %v3797_v40 = vsub.f32 1.0, %v13818_v20 }
 0xa4d   :  { %13804 = vst [vmem:[#allocation8_spill] sm:$0xff] %v11560_v18  ;;  %v11562_v52 = vadd.f32 %v3984_v51, %v3952_v36  ;;  %4082 = vrot.lane.b32.xlu0 %v4039_v19, %s9763_s19  ;;  %v13819_v51 = vld [vmem:[#allocation15_spill] sm:$0xff] }
 0xa4e   :  { %v3989_v36 = vmul.f32 %v13818_v20, %v13819_v51 }
 0xa4f   :  { %13805 = vst [vmem:[#allocation20_spill] sm:$0xff] %v11562_v52  ;;  %v4040_v10 = vpack.c.bf16 %v11562_v52, %v11560_v18 }
 0xa51   :  { %4084 = vrot.lane.b32.xlu1 %v4040_v10, %s9763_s19  ;;  %v13820_v10 = vld [vmem:[#allocation14_spill] sm:$0xff] }
 0xa52   :  { %v3990_v5 = vmul.f32 %v11340_v59, %v13820_v10  ;;  %v3804_v10 = vsub.f32 1.0, %v11367_v35 }
 0xa54   :  { %v3874_v6 = vpop.permute.xlu0 %3873 }
 0xa55   :  { %v3953_v9 = vmul.f32 %v3874_v6, %v3793_v11  ;;  %v3799_v6 = vsub.f32 1.0, %v11345_v21 }
 0xa56   :  { %v3876_v48 = vpop.permute.xlu1 %3875 }
 0xa57   :  { %v3954_v60 = vmul.f32 %v3876_v48, %v3794_v15  ;;  %v11575_v55 = vadd.f32 %v3985_v38, %v3953_v9  ;;  %v3800_v38 = vsub.f32 1.0, %v13823_v34 }
 0xa58   :  { %v3878_v31 = vpop.permute.xlu0 %3877 }
 0xa59   :  { %13811 = vst [vmem:[#allocation44_spill] sm:$0xff] %v11575_v55  ;;  %v11577_v25 = vadd.f32 %v3986_v1, %v3954_v60  ;;  %v3955_v23 = vmul.f32 %v3878_v31, %v3795_v41  ;;  %v13824_v60 = vld [vmem:[#allocation36_spill] sm:$0xff]  ;;  %v13825_v41 = vld [vmem:[#allocation37_spill] sm:$0xff] }
 0xa5a   :  { %v3880_v50 = vpop.permute.xlu1 %3879  ;;  %v3991_v22 = vmul.f32 %v11345_v21, %v13824_v60  ;;  %v3992_v59 = vmul.f32 %v13823_v34, %v13825_v41  ;;  %v3802_v21 = vsub.f32 1.0, %v11359_v28  ;;  %v3805_v60 = vsub.f32 1.0, %v11372_v8 }
 0xa5b   :  { %13812 = vst [vmem:[#allocation30_spill] sm:$0xff] %v11577_v25  ;;  %v4041_v12 = vpack.c.bf16 %v11577_v25, %v11575_v55  ;;  %v3956_v49 = vmul.f32 %v3880_v50, %v3796_v57  ;;  %v11586_v32 = vadd.f32 %v3987_v61, %v3955_v23  ;;  %v13828_v50 = vld [vmem:[#allocation47_spill] sm:$0xff] }
 0xa5d   :  { %13816 = vst [vmem:[#allocation31_spill] sm:$0xff] %v11586_v32  ;;  %v11588_v17 = vadd.f32 %v3988_v39, %v3956_v49  ;;  %4086 = vrot.lane.b32.xlu0 %v4041_v12, %s9763_s19  ;;  %v3801_v12 = vsub.f32 1.0, %v13828_v50  ;;  %v13829_v39 = vld [vmem:[#allocation17_spill] sm:$0xff] }
 0xa5e   :  { %v3993_v49 = vmul.f32 %v13828_v50, %v13829_v39  ;;  %v13839_v50 = vld [vmem:[#allocation41_spill] sm:$0xff] }
 0xa5f   :  { %13817 = vst [vmem:[#allocation23_spill] sm:$0xff] %v11588_v17  ;;  %v4042_v2 = vpack.c.bf16 %v11588_v17, %v11586_v32 }
 0xa61   :  { %4088 = vrot.lane.b32.xlu1 %v4042_v2, %s9763_s19  ;;  %v13830_v2 = vld [vmem:[#allocation16_spill] sm:$0xff] }
 0xa62   :  { %v3994_v20 = vmul.f32 %v11359_v28, %v13830_v2  ;;  %v3808_v2 = vsub.f32 1.0, %v11383_v33 }
 0xa64   :  { %v3882_v19 = vpop.permute.xlu0 %3881 }
 0xa65   :  { %v3957_v42 = vmul.f32 %v3882_v19, %v3797_v40  ;;  %v13831_v19 = vld [vmem:[#allocation48_spill] sm:$0xff] }
 0xa66   :  { %v3884_v63 = vpop.permute.xlu1 %3883 }
 0xa67   :  { %v3958_v11 = vmul.f32 %v3884_v63, %v3798_v47  ;;  %v11601_v3 = vadd.f32 %v3989_v36, %v3957_v42  ;;  %v3803_v42 = vsub.f32 1.0, %v13831_v19 }
 0xa68   :  { %v3886_v9 = vpop.permute.xlu0 %3885 }
 0xa69   :  { %13821 = vst [vmem:[#allocation22_spill] sm:$0xff] %v11601_v3  ;;  %v11603_v15 = vadd.f32 %v3990_v5, %v3958_v11  ;;  %v3959_v48 = vmul.f32 %v3886_v9, %v3799_v6  ;;  %v13834_v6 = vld [vmem:[#allocation38_spill] sm:$0xff] }
 0xa6a   :  { %v3888_v16 = vpop.permute.xlu1 %3887  ;;  %v3995_v9 = vmul.f32 %v13831_v19, %v13834_v6  ;;  %v13842_v19 = vld [vmem:[#allocation19_spill] sm:$0xff] }
 0xa6b   :  { %13822 = vst [vmem:[#allocation11_spill] sm:$0xff] %v11603_v15  ;;  %v4043_v1 = vpack.c.bf16 %v11603_v15, %v11601_v3  ;;  %v3960_v31 = vmul.f32 %v3888_v16, %v3800_v38  ;;  %v11612_v23 = vadd.f32 %v3991_v22, %v3959_v48  ;;  %v13835_v48 = vld [vmem:[#allocation39_spill] sm:$0xff] }
 0xa6c   :  { %v3996_v28 = vmul.f32 %v11367_v35, %v13835_v48  ;;  %v13838_v35 = vld [vmem:[#allocation40_spill] sm:$0xff] }
 0xa6d   :  { %13826 = vst [vmem:[#allocation10_spill] sm:$0xff] %v11612_v23  ;;  %v11614_v56 = vadd.f32 %v3992_v59, %v3960_v31  ;;  %4090 = vrot.lane.b32.xlu0 %v4043_v1, %s9763_s19  ;;  %v3806_v59 = vsub.f32 1.0, %v11375_v7 }
 0xa6f   :  { %13827 = vst [vmem:[#allocation45_spill] sm:$0xff] %v11614_v56  ;;  %v4044_v57 = vpack.c.bf16 %v11614_v56, %v11612_v23 }
 0xa71   :  { %4092 = vrot.lane.b32.xlu1 %v4044_v57, %s9763_s19  ;;  %v3997_v57 = vmul.f32 %v11372_v8, %v13838_v35  ;;  %v3999_v8 = vmul.f32 %v11379_v14, %v13842_v19 }
 0xa74   :  { %v3890_v4 = vpop.permute.xlu0 %3889 }
 0xa75   :  { %v3961_v61 = vmul.f32 %v3890_v4, %v3801_v12  ;;  %v3998_v12 = vmul.f32 %v11375_v7, %v13839_v50 }
 0xa76   :  { %v3892_v30 = vpop.permute.xlu1 %3891 }
 0xa77   :  { %v3962_v40 = vmul.f32 %v3892_v30, %v3802_v21  ;;  %v11627_v63 = vadd.f32 %v3993_v49, %v3961_v61  ;;  %v3807_v61 = vsub.f32 1.0, %v11379_v14  ;;  %v9702_v14 = vld [vmem:[%s13455_s7 + $0x8] sm:$0xff]  }
 0xa78   :  { %v3894_v47 = vpop.permute.xlu0 %3893 }
 0xa79   :  { %13832 = vst [vmem:[#allocation25_spill] sm:$0xff] %v11627_v63  ;;  %v11629_v51 = vadd.f32 %v3994_v20, %v3962_v40  ;;  %v3963_v36 = vmul.f32 %v3894_v47, %v3803_v42  ;;  %v13843_v42 = vld [vmem:[#allocation18_spill] sm:$0xff] }
 0xa7a   :  { %v3896_v5 = vpop.permute.xlu1 %3895  ;;  %v4000_v7 = vmul.f32 %v11383_v33, %v13843_v42  ;;  %v9703_v33 = vld [vmem:[%s13454_s6] sm:$0xff]  }
 0xa7b   :  { %13833 = vst [vmem:[#allocation32_spill] sm:$0xff] %v11629_v51  ;;  %v4045_v11 = vpack.c.bf16 %v11629_v51, %v11627_v63  ;;  %v3964_v34 = vmul.f32 %v3896_v5, %v3804_v10  ;;  %v11638_v38 = vadd.f32 %v3995_v9, %v3963_v36 }
 0xa7d   :  { %13836 = vst [vmem:[#allocation33_spill] sm:$0xff] %v11638_v38  ;;  %v11640_v16 = vadd.f32 %v3996_v28, %v3964_v34  ;;  %4094 = vrot.lane.b32.xlu0 %v4045_v11, %s9763_s19 }
 0xa7f   :  { %13837 = vst [vmem:[#allocation24_spill] sm:$0xff] %v11640_v16  ;;  %v4046_v1 = vpack.c.bf16 %v11640_v16, %v11638_v38 }
 0xa81   :  { %4096 = vrot.lane.b32.xlu1 %v4046_v1, %s9763_s19 }
 0xa84   :  { %v3898_v22 = vpop.permute.xlu0 %3897 }
 0xa85   :  { %v3965_v41 = vmul.f32 %v3898_v22, %v3805_v60 }
 0xa86   :  { %v3900_v31 = vpop.permute.xlu1 %3899 }
 0xa87   :  { %v3966_v4 = vmul.f32 %v3900_v31, %v3806_v59  ;;  %v11653_v30 = vadd.f32 %v3997_v57, %v3965_v41 }
 0xa88   :  { %v3902_v21 = vpop.permute.xlu0 %3901 }
 0xa89   :  { %13840 = vst [vmem:[#allocation46_spill] sm:$0xff] %v11653_v30  ;;  %v11655_v39 = vadd.f32 %v3998_v12, %v3966_v4  ;;  %v3967_v49 = vmul.f32 %v3902_v21, %v3807_v61  ;;  %v9704_v12 = vld [vmem:[%s13454_s6 + $0x8] sm:$0xff]  }
 0xa8a   :  { %v3904_v20 = vpop.permute.xlu1 %3903 }
 0xa8b   :  { %13841 = vst [vmem:[#allocation13_spill] sm:$0xff] %v11655_v39  ;;  %v4047_v40 = vpack.c.bf16 %v11655_v39, %v11653_v30  ;;  %v3968_v47 = vmul.f32 %v3904_v20, %v3808_v2  ;;  %v11664_v36 = vadd.f32 %v3999_v8, %v3967_v49 }
 0xa8d   :  { %13844 = vst [vmem:[#allocation12_spill] sm:$0xff] %v11664_v36  ;;  %v11666_v10 = vadd.f32 %v4000_v7, %v3968_v47  ;;  %4098 = vrot.lane.b32.xlu0 %v4047_v40, %s9763_s19 }
 0xa8f   :  { %13845 = vst [vmem:[#allocation27_spill] sm:$0xff] %v11666_v10  ;;  %v4048_v5 = vpack.c.bf16 %v11666_v10, %v11664_v36  ;;  %v4071_v11 = vpop.permute.xlu0 %4070 }
 0xa90   :  { %8652 = vmatprep.mubr.msk.bf16.mxu1 %vm423_vm2, %v4071_v11 }
 0xa91   :  { %4100 = vrot.lane.b32.xlu1 %v4048_v5, %s9763_s19 }
 0xa93   :  { %v4073_v6 = vpop.permute.xlu1 %4072 }
 0xa94   :  { %8653 = vmatmul.mubr.msk.bf16.vlgmr.msra.gmra.mrb[128].mxu1 %vm423_vm2, %v4073_v6 }
 0xa95   :  { %8685 = vmatpush3.bf16.msra.mxu1 %v11459_v37 }
 0xa96   :  { %8686 = vmatprep.subr.bf16.mxu1 %v9702_v14 }
 0xa99   :  { %8687 = vmatpush3.bf16.msra.mxu1 %v9702_v14 }
 0xa9a   :  { %8720 = vmatprep.subr.bf16.mxu1 %v9703_v33 }
 0xa9f   :  { %v4075_v9 = vpop.permute.xlu0 %4074 }
 0xaa0   :  { %8656 = vmatprep.mubr.msk.bf16.mxu1 %vm423_vm2, %v4075_v9 }
 0xaa3   :  { %v4077_v48 = vpop.permute.xlu1 %4076 }
 0xaa4   :  { %8657 = vmatmul.mubr.msk.bf16.gmra.mrb[132].mxu1 %vm423_vm2, %v4077_v48 }
 0xaaf   :  { %v4079_v28 = vpop.permute.xlu0 %4078 }
 0xab0   :  { %8660 = vmatprep.mubr.msk.bf16.mxu1 %vm423_vm2, %v4079_v28 }
 0xab3   :  { %v4081_v37 = vpop.permute.xlu1 %4080 }
 0xab4   :  { %8661 = vmatmul.mubr.msk.bf16.gmra.mrb[136].mxu1 %vm423_vm2, %v4081_v37 }
 0xabf   :  { %v4083_v34 = vpop.permute.xlu0 %4082 }
 0xac0   :  { %8664 = vmatprep.mubr.msk.bf16.mxu1 %vm423_vm2, %v4083_v34 }
 0xac3   :  { %v4085_v1 = vpop.permute.xlu1 %4084 }
 0xac4   :  { %8665 = vmatmul.mubr.msk.bf16.gmra.mrb[140].mxu1 %vm423_vm2, %v4085_v1 }
 0xacf   :  { %v4087_v60 = vpop.permute.xlu0 %4086 }
 0xad0   :  { %8668 = vmatprep.mubr.msk.bf16.mxu1 %vm423_vm2, %v4087_v60 }
 0xad3   :  { %v4089_v22 = vpop.permute.xlu1 %4088 }
 0xad4   :  { %8669 = vmatmul.mubr.msk.bf16.gmra.mrb[144].mxu1 %vm423_vm2, %v4089_v22 }
 0xadf   :  { %v4091_v41 = vpop.permute.xlu0 %4090 }
 0xae0   :  { %8672 = vmatprep.mubr.msk.bf16.mxu1 %vm423_vm2, %v4091_v41 }
 0xae3   :  { %v4093_v59 = vpop.permute.xlu1 %4092 }
 0xae4   :  { %8673 = vmatmul.mubr.msk.bf16.gmra.mrb[148].mxu1 %vm423_vm2, %v4093_v59 }
 0xaef   :  { %v4095_v31 = vpop.permute.xlu0 %4094 }
 0xaf0   :  { %8676 = vmatprep.mubr.msk.bf16.mxu1 %vm423_vm2, %v4095_v31 }
 0xaf3   :  { %v4097_v35 = vpop.permute.xlu1 %4096 }
 0xaf4   :  { %8677 = vmatmul.mubr.msk.bf16.gmra.mrb[152].mxu1 %vm423_vm2, %v4097_v35 }
 0xaff   :  { %v4099_v57 = vpop.permute.xlu0 %4098 }
 0xb00   :  { %8680 = vmatprep.mubr.msk.bf16.mxu1 %vm423_vm2, %v4099_v57 }
 0xb03   :  { %v4101_v50 = vpop.permute.xlu1 %4100 }
 0xb04   :  { %8681 = vmatmul.mubr.msk.bf16.gmra.mrb[156].mxu1 %vm423_vm2, %v4101_v50 }
 0xb05   :  { %8688 = vmatprep.mubr.msk.bf16.mxu1 %vm423_vm2, %v4071_v11 }
 0xb0c   :  { %8689 = vmatmul.mubr.msk.bf16.vlgmr.msra.gmra.mrb[160].mxu1 %vm423_vm2, %v4073_v6 }
 0xb0d   :  { %8692 = vmatprep.mubr.msk.bf16.mxu1 %vm423_vm2, %v4075_v9  ;;  %8721 = vmatpush3.bf16.msra.mxu1 %v9703_v33 }
 0xb0e   :  { %8722 = vmatprep.subr.bf16.mxu1 %v9704_v12 }
 0xb11   :  { %8723 = vmatpush3.bf16.msra.mxu1 %v9704_v12 }
 0xb14   :  { %8693 = vmatmul.mubr.msk.bf16.gmra.mrb[164].mxu1 %vm423_vm2, %v4077_v48 }
 0xb15   :  { %8696 = vmatprep.mubr.msk.bf16.mxu1 %vm423_vm2, %v4079_v28 }
 0xb1c   :  { %8697 = vmatmul.mubr.msk.bf16.gmra.mrb[168].mxu1 %vm423_vm2, %v4081_v37 }
 0xb1d   :  { %8700 = vmatprep.mubr.msk.bf16.mxu1 %vm423_vm2, %v4083_v34 }
 0xb24   :  { %8701 = vmatmul.mubr.msk.bf16.gmra.mrb[172].mxu1 %vm423_vm2, %v4085_v1 }
 0xb25   :  { %8704 = vmatprep.mubr.msk.bf16.mxu1 %vm423_vm2, %v4087_v60 }
 0xb2c   :  { %8705 = vmatmul.mubr.msk.bf16.gmra.mrb[176].mxu1 %vm423_vm2, %v4089_v22 }
 0xb2d   :  { %8708 = vmatprep.mubr.msk.bf16.mxu1 %vm423_vm2, %v4091_v41 }
 0xb34   :  { %8709 = vmatmul.mubr.msk.bf16.gmra.mrb[180].mxu1 %vm423_vm2, %v4093_v59 }
 0xb35   :  { %8712 = vmatprep.mubr.msk.bf16.mxu1 %vm423_vm2, %v4095_v31 }
 0xb3c   :  { %8713 = vmatmul.mubr.msk.bf16.gmra.mrb[184].mxu1 %vm423_vm2, %v4097_v35 }
 0xb3d   :  { %8716 = vmatprep.mubr.msk.bf16.mxu1 %vm423_vm2, %v4099_v57 }
 0xb44   :  { %8717 = vmatmul.mubr.msk.bf16.gmra.mrb[188].mxu1 %vm423_vm2, %v4101_v50 }
 0xb67   :  { %v8654_v4 = vpop.f32.mrb[128].mxu1 }
 0xb68   :  { %v4196_v61 = vpop.f32.mrb[129].mxu1 }
 0xb69   :  { %v8655_v21 = vpop.f32.mrb[130].mxu1 }
 0xb6a   :  { %v4324_v49 = vpack.c.bf16 %v8655_v21, %v8654_v4  ;;  %v4199_v2 = vpop.f32.mrb[131].mxu1 }
 0xb6b   :  { %v4323_v20 = vpack.c.bf16 %v4199_v2, %v4196_v61 }
 0xb77   :  { %v8658_v40 = vpop.f32.mrb[132].mxu1 }
 0xb78   :  { %v4212_v19 = vpop.f32.mrb[133].mxu1 }
 0xb79   :  { %v8659_v8 = vpop.f32.mrb[134].mxu1 }
 0xb7a   :  { %v4326_v42 = vpack.c.bf16 %v8659_v8, %v8658_v40  ;;  %v4215_v7 = vpop.f32.mrb[135].mxu1 }
 0xb7b   :  { %v4325_v47 = vpack.c.bf16 %v4215_v7, %v4212_v19 }
 0xb87   :  { %v8662_v5 = vpop.f32.mrb[136].mxu1 }
 0xb88   :  { %v4228_v11 = vpop.f32.mrb[137].mxu1 }
 0xb89   :  { %v8663_v6 = vpop.f32.mrb[138].mxu1 }
 0xb8a   :  { %v4328_v14 = vpack.c.bf16 %v8663_v6, %v8662_v5  ;;  %v4231_v33 = vpop.f32.mrb[139].mxu1 }
 0xb8b   :  { %v4327_v9 = vpack.c.bf16 %v4231_v33, %v4228_v11 }
 0xb97   :  { %v8666_v48 = vpop.f32.mrb[140].mxu1 }
 0xb98   :  { %v4244_v28 = vpop.f32.mrb[141].mxu1 }
 0xb99   :  { %v8667_v37 = vpop.f32.mrb[142].mxu1 }
 0xb9a   :  { %v4330_v34 = vpack.c.bf16 %v8667_v37, %v8666_v48  ;;  %v4247_v1 = vpop.f32.mrb[143].mxu1  ;;  %v9709_v37 = vld [vmem:[%s13450_s2 + $0x20] ss:$8 sps:$4 sm:$0xff]  }
 0xb9b   :  { %v4329_v60 = vpack.c.bf16 %v4247_v1, %v4244_v28  ;;  %v9711_v1 = vld [vmem:[%s13450_s2 + $0x30] ss:$8 sps:$4 sm:$0xff]  }
 0xba7   :  { %v8670_v22 = vpop.f32.mrb[144].mxu1 }
 0xba8   :  { %v4260_v41 = vpop.f32.mrb[145].mxu1 }
 0xba9   :  { %v8671_v59 = vpop.f32.mrb[146].mxu1 }
 0xbaa   :  { %v4332_v31 = vpack.c.bf16 %v8671_v59, %v8670_v22  ;;  %v4263_v35 = vpop.f32.mrb[147].mxu1  ;;  %v9713_v22 = vld [vmem:[%s13450_s2 + $0x40] ss:$8 sps:$4 sm:$0xff]   ;;  %v9715_v59 = vld [vmem:[%s13450_s2 + $0x50] ss:$8 sps:$4 sm:$0xff]  }
 0xbab   :  { %v4331_v57 = vpack.c.bf16 %v4263_v35, %v4260_v41  ;;  %v9714_v41 = vld [vmem:[%s13450_s2 + $0x54] ss:$8 sps:$4 sm:$0xff]   ;;  %v9717_v35 = vld [vmem:[%s13450_s2 + $0x60] ss:$8 sps:$4 sm:$0xff]  }
 0xbad   :  { %8237 = vmatprep.subr.bf16.mxu0 %v4331_v57  ;;  %v9718_v57 = vld [vmem:[%s13450_s2 + $0x74] ss:$8 sps:$4 sm:$0xff]  }
 0xbae   :  { %8238 = vmatpush3.bf16.msra.mxu0 %v4323_v20 }
 0xbaf   :  { %8239 = vmatprep.subr.bf16.mxu0 %v4332_v31  ;;  %v9716_v31 = vld [vmem:[%s13450_s2 + $0x64] ss:$8 sps:$4 sm:$0xff]  }
 0xbb2   :  { %8240 = vmatpush3.bf16.msra.mxu0 %v4324_v49 }
 0xbb7   :  { %v8674_v50 = vpop.f32.mrb[148].mxu1 }
 0xbb8   :  { %v4276_v12 = vpop.f32.mrb[149].mxu1 }
 0xbb9   :  { %v8675_v4 = vpop.f32.mrb[150].mxu1 }
 0xbba   :  { %v4334_v61 = vpack.c.bf16 %v8675_v4, %v8674_v50  ;;  %v4279_v21 = vpop.f32.mrb[151].mxu1  ;;  %v9719_v50 = vld [vmem:[%s13450_s2 + $0x70] ss:$8 sps:$4 sm:$0xff]   ;;  %v9721_v4 = vld [vmem:[%s13450_s2 + $0x80] ss:$8 sps:$4 sm:$0xff]  }
 0xbbb   :  { %v4333_v2 = vpack.c.bf16 %v4279_v21, %v4276_v12  ;;  %v9720_v12 = vld [vmem:[%s13450_s2 + $0x84] ss:$8 sps:$4 sm:$0xff]   ;;  %v9723_v21 = vld [vmem:[%s13450_s2 + $0x90] ss:$8 sps:$4 sm:$0xff]  }
 0xbbd   :  { %8241 = vmatprep.subr.bf16.mxu0 %v4333_v2  ;;  %v9724_v2 = vld [vmem:[%s13450_s2 + $0xa4] ss:$8 sps:$4 sm:$0xff]  }
 0xbbe   :  { %8242 = vmatpush3.bf16.msra.mxu0 %v4325_v47  ;;  %v9706_v47 = vld [vmem:[%s13450_s2 + $0x14] ss:$8 sps:$4 sm:$0xff]  }
 0xbbf   :  { %8243 = vmatprep.subr.bf16.mxu0 %v4334_v61  ;;  %v9722_v61 = vld [vmem:[%s13450_s2 + $0x94] ss:$8 sps:$4 sm:$0xff]  }
 0xbc2   :  { %8244 = vmatpush3.bf16.msra.mxu0 %v4326_v42  ;;  %v9705_v42 = vld [vmem:[%s13450_s2] ss:$8 sps:$4 sm:$0xff]  }
 0xbc7   :  { %v8678_v40 = vpop.f32.mrb[152].mxu1 }
 0xbc8   :  { %v4292_v19 = vpop.f32.mrb[153].mxu1 }
 0xbc9   :  { %v8679_v8 = vpop.f32.mrb[154].mxu1 }
 0xbca   :  { %v4336_v7 = vpack.c.bf16 %v8679_v8, %v8678_v40  ;;  %v4295_v5 = vpop.f32.mrb[155].mxu1  ;;  %v9725_v40 = vld [vmem:[%s13450_s2 + $0xa0] ss:$8 sps:$4 sm:$0xff]   ;;  %v9727_v8 = vld [vmem:[%s13450_s2 + $0xb0] ss:$8 sps:$4 sm:$0xff]  }
 0xbcb   :  { %v4335_v11 = vpack.c.bf16 %v4295_v5, %v4292_v19  ;;  %v9726_v19 = vld [vmem:[%s13450_s2 + $0xb4] ss:$8 sps:$4 sm:$0xff]   ;;  %v9729_v5 = vld [vmem:[%s13450_s2 + $0xc0] ss:$8 sps:$4 sm:$0xff]  }
 0xbcd   :  { %8245 = vmatprep.subr.bf16.mxu0 %v4335_v11  ;;  %v9730_v11 = vld [vmem:[%s13450_s2 + $0xd4] ss:$8 sps:$4 sm:$0xff]  }
 0xbce   :  { %8246 = vmatpush3.bf16.msra.mxu0 %v4327_v9  ;;  %v9708_v9 = vld [vmem:[%s13450_s2 + $0x24] ss:$8 sps:$4 sm:$0xff]  }
 0xbcf   :  { %8247 = vmatprep.subr.bf16.mxu0 %v4336_v7  ;;  %v9728_v7 = vld [vmem:[%s13450_s2 + $0xc4] ss:$8 sps:$4 sm:$0xff]  }
 0xbd2   :  { %8248 = vmatpush3.bf16.msra.mxu0 %v4328_v14  ;;  %v9707_v14 = vld [vmem:[%s13450_s2 + $0x10] ss:$8 sps:$4 sm:$0xff]  }
 0xbd7   :  { %v8682_v49 = vpop.f32.mrb[156].mxu1 }
 0xbd8   :  { %v4308_v20 = vpop.f32.mrb[157].mxu1 }
 0xbd9   :  { %v8683_v6 = vpop.f32.mrb[158].mxu1 }
 0xbda   :  { %v4338_v33 = vpack.c.bf16 %v8683_v6, %v8682_v49  ;;  %v4311_v48 = vpop.f32.mrb[159].mxu1  ;;  %v9731_v49 = vld [vmem:[%s13450_s2 + $0xd0] ss:$8 sps:$4 sm:$0xff]   ;;  %v9733_v6 = vld [vmem:[%s13450_s2 + $0xe0] ss:$8 sps:$4 sm:$0xff]  }
 0xbdb   :  { %v4337_v28 = vpack.c.bf16 %v4311_v48, %v4308_v20  ;;  %v9732_v20 = vld [vmem:[%s13450_s2 + $0xe4] ss:$8 sps:$4 sm:$0xff]   ;;  %v9735_v48 = vld [vmem:[%s13450_s2 + $0xf0] ss:$8 sps:$4 sm:$0xff]  }
 0xbdd   :  { %8249 = vmatprep.subr.bf16.mxu0 %v4337_v28 }
 0xbde   :  { %8250 = vmatpush3.bf16.msra.mxu0 %v4329_v60  ;;  %v9712_v60 = vld [vmem:[%s13450_s2 + $0x44] ss:$8 sps:$4 sm:$0xff]  }
 0xbdf   :  { %8251 = vmatprep.subr.bf16.mxu0 %v4338_v33  ;;  %v9734_v33 = vld [vmem:[%s13450_s2 + $0xf4] ss:$8 sps:$4 sm:$0xff]  }
 0xbe2   :  { %8252 = vmatpush3.bf16.msra.mxu0 %v4330_v34  ;;  %v9710_v34 = vld [vmem:[%s13450_s2 + $0x34] ss:$8 sps:$4 sm:$0xff]  }
 0xbe5   :  { %4372 = vmatmul.mubr.bf16.vlgmr.msra.gmra.mrb[160].mxu0 %v9705_v42  ;;  %v7850_v42 = vld [vmem:[%s13457_s9] ss:$0 sm:$0xff] }
 0xbe6   :  { %4379 = vmatprep.mubr.bf16.mxu0 %v9706_v47  ;;  %5724 = vrot.lane.b32.xlu0 %v7850_v42, %s9761_s18 }
 0xbed   :  { %4380 = vmatmul.mubr.bf16.gmra.mrb[164].mxu0 %v9707_v14 }
 0xbee   :  { %4387 = vmatprep.mubr.bf16.mxu0 %v9708_v9 }
 0xbf5   :  { %4388 = vmatmul.mubr.bf16.gmra.mrb[168].mxu0 %v9709_v37 }
 0xbf6   :  { %4395 = vmatprep.mubr.bf16.mxu0 %v9710_v34 }
 0xbfd   :  { %4396 = vmatmul.mubr.bf16.gmra.mrb[172].mxu0 %v9711_v1 }
 0xbfe   :  { %4403 = vmatprep.mubr.bf16.mxu0 %v9712_v60 }
 0xc05   :  { %4404 = vmatmul.mubr.bf16.gmra.mrb[176].mxu0 %v9713_v22 }
 0xc06   :  { %4411 = vmatprep.mubr.bf16.mxu0 %v9714_v41 }
 0xc0d   :  { %4412 = vmatmul.mubr.bf16.gmra.mrb[180].mxu0 %v9715_v59 }
 0xc0e   :  { %4419 = vmatprep.mubr.bf16.mxu0 %v9716_v31 }
 0xc15   :  { %4420 = vmatmul.mubr.bf16.gmra.mrb[184].mxu0 %v9717_v35 }
 0xc16   :  { %4427 = vmatprep.mubr.bf16.mxu0 %v9718_v57 }
 0xc1d   :  { %4428 = vmatmul.mubr.bf16.gmra.mrb[188].mxu0 %v9719_v50 }
 0xc1e   :  { %4435 = vmatprep.mubr.bf16.mxu0 %v9720_v12 }
 0xc25   :  { %4436 = vmatmul.mubr.bf16.gmra.mrb[192].mxu0 %v9721_v4 }
 0xc26   :  { %4443 = vmatprep.mubr.bf16.mxu0 %v9722_v61 }
 0xc2d   :  { %4444 = vmatmul.mubr.bf16.gmra.mrb[196].mxu0 %v9723_v21 }
 0xc2e   :  { %4451 = vmatprep.mubr.bf16.mxu0 %v9724_v2 }
 0xc35   :  { %4452 = vmatmul.mubr.bf16.gmra.mrb[200].mxu0 %v9725_v40 }
 0xc36   :  { %4459 = vmatprep.mubr.bf16.mxu0 %v9726_v19 }
 0xc3d   :  { %4460 = vmatmul.mubr.bf16.gmra.mrb[204].mxu0 %v9727_v8 }
 0xc3e   :  { %4467 = vmatprep.mubr.bf16.mxu0 %v9728_v7 }
 0xc45   :  { %4468 = vmatmul.mubr.bf16.gmra.mrb[208].mxu0 %v9729_v5 }
 0xc46   :  { %4475 = vmatprep.mubr.bf16.mxu0 %v9730_v11 }
 0xc4d   :  { %4476 = vmatmul.mubr.bf16.gmra.mrb[212].mxu0 %v9731_v49 }
 0xc4e   :  { %4483 = vmatprep.mubr.bf16.mxu0 %v9732_v20 }
 0xc55   :  { %4484 = vmatmul.mubr.bf16.gmra.mrb[216].mxu0 %v9733_v6 }
 0xc56   :  { %4491 = vmatprep.mubr.bf16.mxu0 %v9734_v33 }
 0xc58   :  { %v11979_v38 = vpop.permute.xlu0 %5724 }
 0xc5d   :  { %4492 = vmatmul.mubr.bf16.gmra.mrb[220].mxu0 %v9735_v48 }
 0xcb8   :  { %v8253_v28 = vpop.f32.mrb[160].mxu0 }
 0xcb9   :  { %v8254_v47 = vpop.f32.mrb[161].mxu0 }
 0xcba   :  { %v8255_v14 = vadd.f32 %v8254_v47, %v8253_v28  ;;  %v8256_v9 = vpop.f32.mrb[162].mxu0 }
 0xcbb   :  { %v8257_v37 = vpop.f32.mrb[163].mxu0 }
 0xcbc   :  { %v8258_v34 = vadd.f32 %v8257_v37, %v8256_v9 }
 0xcbe   :  { %v4500_v1 = vpack.c.bf16 %v8258_v34, %v8255_v14 }
 0xcc0   :  { %v8259_v60 = vpop.f32.mrb[164].mxu0  ;;  %8724 = vmatprep.mubr.msk.bf16.mxu1 %vm423_vm2, %v4500_v1 }
 0xcc1   :  { %v8260_v22 = vpop.f32.mrb[165].mxu0 }
 0xcc2   :  { %v8261_v41 = vadd.f32 %v8260_v22, %v8259_v60  ;;  %v8262_v59 = vpop.f32.mrb[166].mxu0 }
 0xcc3   :  { %v8263_v31 = vpop.f32.mrb[167].mxu0 }
 0xcc4   :  { %v8264_v35 = vadd.f32 %v8263_v31, %v8262_v59 }
 0xcc6   :  { %v4501_v57 = vpack.c.bf16 %v8264_v35, %v8261_v41 }
 0xcc8   :  { %8725 = vmatmul.mubr.msk.bf16.vlgmr.msra.gmra.mrb[160].mxu1 %vm423_vm2, %v4501_v57  ;;  %v8265_v50 = vpop.f32.mrb[168].mxu0 }
 0xcc9   :  { %v8266_v12 = vpop.f32.mrb[169].mxu0 }
 0xcca   :  { %v8267_v4 = vadd.f32 %v8266_v12, %v8265_v50  ;;  %v8268_v61 = vpop.f32.mrb[170].mxu0 }
 0xccb   :  { %v8269_v21 = vpop.f32.mrb[171].mxu0 }
 0xccc   :  { %v8270_v2 = vadd.f32 %v8269_v21, %v8268_v61 }
 0xcce   :  { %v4502_v40 = vpack.c.bf16 %v8270_v2, %v8267_v4 }
 0xcd0   :  { %v8271_v19 = vpop.f32.mrb[172].mxu0  ;;  %8728 = vmatprep.mubr.msk.bf16.mxu1 %vm423_vm2, %v4502_v40 }
 0xcd1   :  { %v8272_v8 = vpop.f32.mrb[173].mxu0 }
 0xcd2   :  { %v8273_v7 = vadd.f32 %v8272_v8, %v8271_v19  ;;  %v8274_v5 = vpop.f32.mrb[174].mxu0 }
 0xcd3   :  { %v8275_v11 = vpop.f32.mrb[175].mxu0 }
 0xcd4   :  { %v8276_v49 = vadd.f32 %v8275_v11, %v8274_v5 }
 0xcd6   :  { %v4503_v20 = vpack.c.bf16 %v8276_v49, %v8273_v7 }
 0xcd8   :  { %8729 = vmatmul.mubr.msk.bf16.gmra.mrb[164].mxu1 %vm423_vm2, %v4503_v20  ;;  %v8277_v6 = vpop.f32.mrb[176].mxu0 }
 0xcd9   :  { %v8278_v33 = vpop.f32.mrb[177].mxu0 }
 0xcda   :  { %v8279_v48 = vadd.f32 %v8278_v33, %v8277_v6  ;;  %v8280_v28 = vpop.f32.mrb[178].mxu0 }
 0xcdb   :  { %v8281_v42 = vpop.f32.mrb[179].mxu0 }
 0xcdc   :  { %v8282_v47 = vadd.f32 %v8281_v42, %v8280_v28 }
 0xcde   :  { %v4504_v14 = vpack.c.bf16 %v8282_v47, %v8279_v48 }
 0xce0   :  { %v8283_v9 = vpop.f32.mrb[180].mxu0  ;;  %8732 = vmatprep.mubr.msk.bf16.mxu1 %vm423_vm2, %v4504_v14 }
 0xce1   :  { %v8284_v37 = vpop.f32.mrb[181].mxu0 }
 0xce2   :  { %v8285_v34 = vadd.f32 %v8284_v37, %v8283_v9  ;;  %v8286_v1 = vpop.f32.mrb[182].mxu0 }
 0xce3   :  { %v8287_v60 = vpop.f32.mrb[183].mxu0 }
 0xce4   :  { %v8288_v22 = vadd.f32 %v8287_v60, %v8286_v1 }
 0xce6   :  { %v4505_v41 = vpack.c.bf16 %v8288_v22, %v8285_v34 }
 0xce8   :  { %8733 = vmatmul.mubr.msk.bf16.gmra.mrb[168].mxu1 %vm423_vm2, %v4505_v41  ;;  %v8289_v59 = vpop.f32.mrb[184].mxu0 }
 0xce9   :  { %v8290_v31 = vpop.f32.mrb[185].mxu0 }
 0xcea   :  { %v8291_v35 = vadd.f32 %v8290_v31, %v8289_v59  ;;  %v8292_v57 = vpop.f32.mrb[186].mxu0 }
 0xceb   :  { %v8293_v50 = vpop.f32.mrb[187].mxu0 }
 0xcec   :  { %v8294_v12 = vadd.f32 %v8293_v50, %v8292_v57 }
 0xcee   :  { %v4506_v4 = vpack.c.bf16 %v8294_v12, %v8291_v35 }
 0xcf0   :  { %v8295_v61 = vpop.f32.mrb[188].mxu0  ;;  %8736 = vmatprep.mubr.msk.bf16.mxu1 %vm423_vm2, %v4506_v4 }
 0xcf1   :  { %v8296_v21 = vpop.f32.mrb[189].mxu0 }
 0xcf2   :  { %v8297_v2 = vadd.f32 %v8296_v21, %v8295_v61  ;;  %v8298_v40 = vpop.f32.mrb[190].mxu0 }
 0xcf3   :  { %v8299_v19 = vpop.f32.mrb[191].mxu0 }
 0xcf4   :  { %v8300_v8 = vadd.f32 %v8299_v19, %v8298_v40 }
 0xcf6   :  { %v4507_v7 = vpack.c.bf16 %v8300_v8, %v8297_v2 }
 0xcf8   :  { %8737 = vmatmul.mubr.msk.bf16.gmra.mrb[172].mxu1 %vm423_vm2, %v4507_v7  ;;  %v8301_v5 = vpop.f32.mrb[192].mxu0 }
 0xcf9   :  { %v8302_v11 = vpop.f32.mrb[193].mxu0 }
 0xcfa   :  { %v8303_v49 = vadd.f32 %v8302_v11, %v8301_v5  ;;  %v8304_v20 = vpop.f32.mrb[194].mxu0 }
 0xcfb   :  { %v8305_v6 = vpop.f32.mrb[195].mxu0 }
 0xcfc   :  { %v8306_v33 = vadd.f32 %v8305_v6, %v8304_v20 }
 0xcfe   :  { %v4508_v48 = vpack.c.bf16 %v8306_v33, %v8303_v49 }
 0xd00   :  { %v8307_v28 = vpop.f32.mrb[196].mxu0  ;;  %8740 = vmatprep.mubr.msk.bf16.mxu1 %vm423_vm2, %v4508_v48 }
 0xd01   :  { %v8308_v42 = vpop.f32.mrb[197].mxu0 }
 0xd02   :  { %v8309_v47 = vadd.f32 %v8308_v42, %v8307_v28  ;;  %v8310_v14 = vpop.f32.mrb[198].mxu0 }
 0xd03   :  { %v8311_v9 = vpop.f32.mrb[199].mxu0 }
 0xd04   :  { %v8312_v37 = vadd.f32 %v8311_v9, %v8310_v14 }
 0xd06   :  { %v4509_v34 = vpack.c.bf16 %v8312_v37, %v8309_v47 }
 0xd08   :  { %8741 = vmatmul.mubr.msk.bf16.gmra.mrb[176].mxu1 %vm423_vm2, %v4509_v34  ;;  %v8313_v1 = vpop.f32.mrb[200].mxu0 }
 0xd09   :  { %v8314_v60 = vpop.f32.mrb[201].mxu0 }
 0xd0a   :  { %v8315_v22 = vadd.f32 %v8314_v60, %v8313_v1  ;;  %v8316_v41 = vpop.f32.mrb[202].mxu0 }
 0xd0b   :  { %v8317_v59 = vpop.f32.mrb[203].mxu0 }
 0xd0c   :  { %v8318_v31 = vadd.f32 %v8317_v59, %v8316_v41 }
 0xd0e   :  { %v4510_v35 = vpack.c.bf16 %v8318_v31, %v8315_v22 }
 0xd10   :  { %v8319_v57 = vpop.f32.mrb[204].mxu0  ;;  %8744 = vmatprep.mubr.msk.bf16.mxu1 %vm423_vm2, %v4510_v35 }
 0xd11   :  { %v8320_v50 = vpop.f32.mrb[205].mxu0 }
 0xd12   :  { %v8321_v12 = vadd.f32 %v8320_v50, %v8319_v57  ;;  %v8322_v4 = vpop.f32.mrb[206].mxu0 }
 0xd13   :  { %v8323_v61 = vpop.f32.mrb[207].mxu0 }
 0xd14   :  { %v8324_v21 = vadd.f32 %v8323_v61, %v8322_v4  ;;  %v11830_v61 = vld [vmem:[%s13456_s8] ss:$0 sm:$0xff] }
 0xd16   :  { %v4511_v2 = vpack.c.bf16 %v8324_v21, %v8321_v12 }
 0xd18   :  { %8745 = vmatmul.mubr.msk.bf16.gmra.mrb[180].mxu1 %vm423_vm2, %v4511_v2  ;;  %v8325_v40 = vpop.f32.mrb[208].mxu0 }
 0xd19   :  { %v8326_v19 = vpop.f32.mrb[209].mxu0 }
 0xd1a   :  { %v8327_v8 = vadd.f32 %v8326_v19, %v8325_v40  ;;  %v8328_v7 = vpop.f32.mrb[210].mxu0 }
 0xd1b   :  { %v8329_v5 = vpop.f32.mrb[211].mxu0 }
 0xd1c   :  { %v8330_v11 = vadd.f32 %v8329_v5, %v8328_v7 }
 0xd1e   :  { %v4512_v49 = vpack.c.bf16 %v8330_v11, %v8327_v8 }
 0xd20   :  { %v8331_v20 = vpop.f32.mrb[212].mxu0  ;;  %8748 = vmatprep.mubr.msk.bf16.mxu1 %vm423_vm2, %v4512_v49 }
 0xd21   :  { %v8332_v6 = vpop.f32.mrb[213].mxu0 }
 0xd22   :  { %v8333_v33 = vadd.f32 %v8332_v6, %v8331_v20  ;;  %v8334_v48 = vpop.f32.mrb[214].mxu0 }
 0xd23   :  { %v8335_v28 = vpop.f32.mrb[215].mxu0 }
 0xd24   :  { %v8336_v42 = vadd.f32 %v8335_v28, %v8334_v48 }
 0xd26   :  { %v4513_v47 = vpack.c.bf16 %v8336_v42, %v8333_v33 }
 0xd28   :  { %8749 = vmatmul.mubr.msk.bf16.gmra.mrb[184].mxu1 %vm423_vm2, %v4513_v47  ;;  %v8337_v14 = vpop.f32.mrb[216].mxu0 }
 0xd29   :  { %v8338_v9 = vpop.f32.mrb[217].mxu0 }
 0xd2a   :  { %v8339_v37 = vadd.f32 %v8338_v9, %v8337_v14  ;;  %v8340_v34 = vpop.f32.mrb[218].mxu0 }
 0xd2b   :  { %v8341_v1 = vpop.f32.mrb[219].mxu0 }
 0xd2c   :  { %v8342_v60 = vadd.f32 %v8341_v1, %v8340_v34 }
 0xd2e   :  { %v4514_v22 = vpack.c.bf16 %v8342_v60, %v8339_v37 }
 0xd30   :  { %v8343_v41 = vpop.f32.mrb[220].mxu0  ;;  %8752 = vmatprep.mubr.msk.bf16.mxu1 %vm423_vm2, %v4514_v22 }
 0xd31   :  { %v8344_v59 = vpop.f32.mrb[221].mxu0 }
 0xd32   :  { %v8345_v31 = vadd.f32 %v8344_v59, %v8343_v41  ;;  %v8346_v35 = vpop.f32.mrb[222].mxu0 }
 0xd33   :  { %v8347_v57 = vpop.f32.mrb[223].mxu0 }
 0xd34   :  { %v8348_v50 = vadd.f32 %v8347_v57, %v8346_v35 }
 0xd36   :  { %v4515_v12 = vpack.c.bf16 %v8348_v50, %v8345_v31 }
 0xd38   :  { %8753 = vmatmul.mubr.msk.bf16.gmra.mrb[188].mxu1 %vm423_vm2, %v4515_v12 }
 0xd9b   :  { %v8726_v4 = vpop.f32.mrb[160].mxu1 }
 0xd9c   :  { %v11833_v21 = vadd.f32 %v11830_v61, %v8726_v4  ;;  %v4759_v2 = vpop.f32.mrb[161].mxu1 }
 0xd9d   :  { %v8727_v40 = vpop.f32.mrb[162].mxu1  ;;  %v11841_v7 = vadd.f32 %v11830_v61, %v4759_v2 }
 0xd9e   :  { %5146 = vrot.lane.b32.xlu0 %v11833_v21, %s9761_s18  ;;  %v4762_v19 = vpop.f32.mrb[163].mxu1  ;;  %v11848_v5 = vadd.f32 %v11830_v61, %v8727_v40 }
 0xd9f   :  { %v11838_v8 = vadd.f32 %v11830_v61, %v4762_v19 }
 0xda1   :  { %5144 = vrot.lane.b32.xlu1 %v11838_v8, %s9761_s18 }
 0xda2   :  { %5142 = vrot.lane.b32.xlu0 %v11841_v7, %s9761_s18 }
 0xda6   :  { %5148 = vrot.lane.b32.xlu0 %v11848_v5, %s9761_s18 }
 0xdab   :  { %v8730_v11 = vpop.f32.mrb[164].mxu1 }
 0xdac   :  { %v11853_v49 = vadd.f32 %v11830_v61, %v8730_v11  ;;  %v4775_v20 = vpop.f32.mrb[165].mxu1 }
 0xdad   :  { %v8731_v6 = vpop.f32.mrb[166].mxu1  ;;  %v11858_v48 = vadd.f32 %v11830_v61, %v4775_v20 }
 0xdae   :  { %5154 = vrot.lane.b32.xlu0 %v11853_v49, %s9761_s18  ;;  %v4778_v33 = vpop.f32.mrb[167].mxu1  ;;  %v11863_v28 = vadd.f32 %v11830_v61, %v8731_v6  ;;  %v7824_v30 = vmul.f32 -1.442695, %v11853_v49 }
 0xdaf   :  { %v11868_v42 = vadd.f32 %v11830_v61, %v4778_v33  ;;  %v7822_v51 = vmul.f32 -1.442695, %v11858_v48 }
 0xdb2   :  { %5150 = vrot.lane.b32.xlu0 %v11858_v48, %s9761_s18 }
 0xdb6   :  { %5156 = vrot.lane.b32.xlu0 %v11863_v28, %s9761_s18 }
 0xdba   :  { %5152 = vrot.lane.b32.xlu0 %v11868_v42, %s9761_s18 }
 0xdbb   :  { %v8734_v47 = vpop.f32.mrb[168].mxu1 }
 0xdbc   :  { %v11873_v14 = vadd.f32 %v11830_v61, %v8734_v47  ;;  %v4791_v9 = vpop.f32.mrb[169].mxu1 }
 0xdbd   :  { %v11876_v37 = vadd.f32 %v11830_v61, %v4791_v9  ;;  %v8735_v34 = vpop.f32.mrb[170].mxu1 }
 0xdbe   :  { %5162 = vrot.lane.b32.xlu1 %v11873_v14, %s9761_s18  ;;  %v4794_v1 = vpop.f32.mrb[171].mxu1  ;;  %v11883_v60 = vadd.f32 %v11830_v61, %v8735_v34  ;;  %v7828_v23 = vmul.f32 -1.442695, %v11873_v14 }
 0xdbf   :  { %5158 = vrot.lane.b32.xlu0 %v11876_v37, %s9761_s18  ;;  %v11888_v22 = vadd.f32 %v11830_v61, %v4794_v1  ;;  %v7826_v17 = vmul.f32 -1.442695, %v11876_v37 }
 0xdc2   :  { %5164 = vrot.lane.b32.xlu1 %v11883_v60, %s9761_s18 }
 0xdc6   :  { %5160 = vrot.lane.b32.xlu1 %v11888_v22, %s9761_s18 }
 0xdcb   :  { %v8738_v41 = vpop.f32.mrb[172].mxu1 }
 0xdcc   :  { %v11893_v59 = vadd.f32 %v11830_v61, %v8738_v41  ;;  %v4807_v31 = vpop.f32.mrb[173].mxu1 }
 0xdcd   :  { %v8739_v35 = vpop.f32.mrb[174].mxu1  ;;  %v11898_v50 = vadd.f32 %v11830_v61, %v4807_v31 }
 0xdce   :  { %5170 = vrot.lane.b32.xlu1 %v11893_v59, %s9761_s18  ;;  %v4810_v57 = vpop.f32.mrb[175].mxu1  ;;  %v11903_v12 = vadd.f32 %v11830_v61, %v8739_v35 }
 0xdcf   :  { %v11908_v4 = vadd.f32 %v11830_v61, %v4810_v57  ;;  %v7820_v57 = vmul.f32 -1.442695, %v11833_v21 }
 0xdd1   :  { %9344 = vpow2.f32 %v7820_v57 }
 0xdd2   :  { %5166 = vrot.lane.b32.xlu1 %v11898_v50, %s9761_s18 }
 0xdd6   :  { %5172 = vrot.lane.b32.xlu1 %v11903_v12, %s9761_s18 }
 0xdda   :  { %5168 = vrot.lane.b32.xlu1 %v11908_v4, %s9761_s18 }
 0xddb   :  { %v8742_v2 = vpop.f32.mrb[176].mxu1 }
 0xddc   :  { %v11913_v40 = vadd.f32 %v11830_v61, %v8742_v2  ;;  %v4823_v19 = vpop.f32.mrb[177].mxu1 }
 0xddd   :  { %v8743_v11 = vpop.f32.mrb[178].mxu1  ;;  %v11921_v33 = vadd.f32 %v11830_v61, %v4823_v19  ;;  %v7818_v19 = vmul.f32 -1.442695, %v11841_v7 }
 0xdde   :  { %5178 = vrot.lane.b32.xlu0 %v11913_v40, %s9761_s18  ;;  %v4826_v20 = vpop.f32.mrb[179].mxu1  ;;  %v11928_v47 = vadd.f32 %v11830_v61, %v8743_v11 }
 0xddf   :  { %v11918_v6 = vadd.f32 %v11830_v61, %v4826_v20  ;;  %9346 = vpow2.f32 %v7818_v19  ;;  %v7821_v20 = vmul.f32 -1.442695, %v11848_v5  ;;  %v9345_v19 = vpop.eup %9344 }
 0xde0   :  { %v5016_v36 = vadd.f32 1.0, %v9345_v19 }
 0xde1   :  { %5176 = vrot.lane.b32.xlu1 %v11918_v6, %s9761_s18  ;;  %9348 = vpow2.f32 %v7821_v20 }
 0xde2   :  { %5174 = vrot.lane.b32.xlu0 %v11921_v33, %s9761_s18 }
 0xde6   :  { %5180 = vrot.lane.b32.xlu0 %v11928_v47, %s9761_s18 }
 0xde9   :  { %v9347_v20 = vpop.eup %9346 }
 0xdeb   :  { %v8746_v9 = vpop.f32.mrb[180].mxu1  ;;  %v9349_v16 = vpop.eup %9348 }
 0xdec   :  { %v11933_v34 = vadd.f32 %v11830_v61, %v8746_v9  ;;  %v4839_v1 = vpop.f32.mrb[181].mxu1  ;;  %v7819_v9 = vmul.f32 -1.442695, %v11838_v8  ;;  %v5017_v19 = vadd.f32 1.0, %v9349_v16 }
 0xded   :  { %v8747_v41 = vpop.f32.mrb[182].mxu1  ;;  %v11938_v35 = vadd.f32 %v11830_v61, %v4839_v1 }
 0xdee   :  { %5186 = vrot.lane.b32.xlu0 %v11933_v34, %s9761_s18  ;;  %v4842_v31 = vpop.f32.mrb[183].mxu1  ;;  %v11944_v2 = vadd.f32 %v11830_v61, %v8747_v41  ;;  %9350 = vpow2.f32 %v7819_v9  ;;  %v5014_v9 = vadd.f32 1.0, %v9347_v20  ;;  %v7823_v20 = vmul.f32 -1.442695, %v11868_v42 }
 0xdef   :  { %v11950_v11 = vadd.f32 %v11830_v61, %v4842_v31  ;;  %9352 = vpow2.f32 %v7824_v30 }
 0xdf0   :  { %9354 = vrcp.f32 %v5016_v36 }
 0xdf1   :  { %9356 = vpow2.f32 %v7822_v51 }
 0xdf2   :  { %5182 = vrot.lane.b32.xlu0 %v11938_v35, %s9761_s18  ;;  %9358 = vrcp.f32 %v5014_v9 }
 0xdf6   :  { %5188 = vrot.lane.b32.xlu0 %v11944_v2, %s9761_s18 }
 0xdf8   :  { %v9351_v63 = vpop.eup %9350 }
 0xdf9   :  { %v5015_v15 = vadd.f32 1.0, %v9351_v63  ;;  %v9353_v36 = vpop.eup %9352 }
 0xdfa   :  { %5184 = vrot.lane.b32.xlu0 %v11950_v11, %s9761_s18  ;;  %v11987_v9 = vpop.eup %9354  ;;  %v5020_v16 = vadd.f32 1.0, %v9353_v36  ;;  %v7829_v36 = vmul.f32 -1.442695, %v11883_v60 }
 0xdfb   :  { %v8750_v1 = vpop.f32.mrb[184].mxu1 }
 0xdfc   :  { %v11957_v41 = vadd.f32 %v11830_v61, %v8750_v1  ;;  %v4855_v57 = vpop.f32.mrb[185].mxu1 }
 0xdfd   :  { %v11960_v39 = vadd.f32 %v11830_v61, %v4855_v57  ;;  %v8751_v10 = vpop.f32.mrb[186].mxu1 }
 0xdfe   :  { %5194 = vrot.lane.b32.xlu1 %v11957_v41, %s9761_s18  ;;  %v4858_v31 = vpop.f32.mrb[187].mxu1  ;;  %v11968_v1 = vadd.f32 %v11830_v61, %v8751_v10  ;;  %v7825_v10 = vmul.f32 -1.442695, %v11863_v28 }
 0xdff   :  { %5190 = vrot.lane.b32.xlu0 %v11960_v39, %s9761_s18  ;;  %v11973_v57 = vadd.f32 %v11830_v61, %v4858_v31 }
 0xe00   :  { %9360 = vpow2.f32 %v7825_v10 }
 0xe01   :  { %9362 = vrcp.f32 %v5017_v19  ;;  %v9357_v19 = vpop.eup %9356 }
 0xe02   :  { %5196 = vrot.lane.b32.xlu1 %v11968_v1, %s9761_s18  ;;  %9364 = vrcp.f32 %v5015_v15  ;;  %v11998_v55 = vpop.eup %9358 }
 0xe03   :  { %9366 = vpow2.f32 %v7823_v20 }
 0xe04   :  { %9368 = vrcp.f32 %v5020_v16 }
 0xe05   :  { %9370 = vpow2.f32 %v7828_v23  ;;  %v7827_v23 = vmul.f32 -1.442695, %v11888_v22 }
 0xe06   :  { %5192 = vrot.lane.b32.xlu1 %v11973_v57, %s9761_s18  ;;  %9372 = vpow2.f32 %v7826_v17 }
 0xe07   :  { %9374 = vpow2.f32 %v7829_v36 }
 0xe0a   :  { %v9361_v25 = vpop.eup %9360 }
 0xe0b   :  { %v8754_v30 = vpop.f32.mrb[188].mxu1  ;;  %v5021_v17 = vadd.f32 1.0, %v9361_v25  ;;  %v7832_v25 = vmul.f32 -1.442695, %v11893_v59 }
 0xe0c   :  { %v11982_v31 = vadd.f32 %v11830_v61, %v8754_v30  ;;  %v4871_v56 = vpop.f32.mrb[189].mxu1 }
 0xe0d   :  { %v8755_v3 = vpop.f32.mrb[190].mxu1  ;;  %v11990_v63 = vadd.f32 %v11830_v61, %v4871_v56 }
 0xe0e   :  { %5202 = vrot.lane.b32.xlu1 %v11982_v31, %s9761_s18  ;;  %v4874_v51 = vpop.f32.mrb[191].mxu1  ;;  %v12001_v15 = vadd.f32 %v11830_v61, %v8755_v3 }
 0xe0f   :  { %v12011_v16 = vadd.f32 %v11830_v61, %v4874_v51 }
 0xe10   :  { %v5147_v30 = vpop.permute.xlu0 %5146 }
 0xe11   :  { %v5240_v10 = vmul.f32 %v11987_v9, %v5147_v30  ;;  %v5018_v30 = vadd.f32 1.0, %v9357_v19 }
 0xe12   :  { %5198 = vrot.lane.b32.xlu1 %v11990_v63, %s9761_s18 }
 0xe13   :  { %5306 = vrot.lane.b32.xlu0 %v5240_v10, %s9762_s4  ;;  %v12008_v10 = vpop.eup %9362  ;;  %v5145_v32 = vpop.permute.xlu1 %5144  ;;  %9376 = vrcp.f32 %v5018_v30 }
 0xe14   :  { %v5143_v56 = vpop.permute.xlu0 %5142  ;;  %v12015_v19 = vpop.eup %9364  ;;  %9378 = vpow2.f32 %v7827_v23 }
 0xe15   :  { %v5238_v20 = vmul.f32 %v11998_v55, %v5143_v56  ;;  %v5239_v61 = vmul.f32 %v12015_v19, %v5145_v32  ;;  %9380 = vrcp.f32 %v5021_v17  ;;  %v7830_v17 = vmul.f32 -1.442695, %v11898_v50 }
 0xe16   :  { %5204 = vrot.lane.b32.xlu1 %v12001_v15, %s9761_s18 }
 0xe17   :  { %5302 = vrot.lane.b32.xlu0 %v5238_v20, %s9762_s4  ;;  %v9367_v20 = vpop.eup %9366 }
 0xe18   :  { %v5149_v3 = vpop.permute.xlu0 %5148  ;;  %v12021_v51 = vpop.eup %9368  ;;  %v5019_v36 = vadd.f32 1.0, %v9367_v20 }
 0xe19   :  { %v5241_v56 = vmul.f32 %v12008_v10, %v5149_v3  ;;  %v9371_v3 = vpop.eup %9370 }
 0xe1a   :  { %5200 = vrot.lane.b32.xlu1 %v12011_v16, %s9761_s18  ;;  %v9373_v24 = vpop.eup %9372  ;;  %9382 = vrcp.f32 %v5019_v36  ;;  %v5024_v62 = vadd.f32 1.0, %v9371_v3 }
 0xe1b   :  { %5308 = vrot.lane.b32.xlu0 %v5241_v56, %s9762_s4  ;;  %v9375_v18 = vpop.eup %9374  ;;  %v5022_v56 = vadd.f32 1.0, %v9373_v24  ;;  %9384 = vpow2.f32 %v7832_v25  ;;  %v7833_v24 = vmul.f32 -1.442695, %v11903_v12 }
 0xe1c   :  { %9386 = vrcp.f32 %v5024_v62 }
 0xe1d   :  { %v12027_v32 = vpop.eup %9376  ;;  %9388 = vrcp.f32 %v5022_v56 }
 0xe1e   :  { %5304 = vrot.lane.b32.xlu1 %v5239_v61, %s9762_s4  ;;  %v5025_v61 = vadd.f32 1.0, %v9375_v18  ;;  %v9379_v44 = vpop.eup %9378  ;;  %9390 = vpow2.f32 %v7830_v17  ;;  %v7831_v18 = vmul.f32 -1.442695, %v11908_v4 }
 0xe1f   :  { %v5023_v25 = vadd.f32 1.0, %v9379_v44  ;;  %v7836_v44 = vmul.f32 -1.442695, %v11913_v40 }
 0xe20   :  { %v5155_v52 = vpop.permute.xlu0 %5154  ;;  %9392 = vrcp.f32 %v5025_v61 }
 0xe21   :  { %v5244_v30 = vmul.f32 %v12021_v51, %v5155_v52  ;;  %v12032_v52 = vpop.eup %9380  ;;  %9394 = vpow2.f32 %v7833_v24 }
 0xe22   :  { %9396 = vrcp.f32 %v5023_v25  ;;  %v7835_v25 = vmul.f32 -1.442695, %v11918_v6 }
 0xe23   :  { %5314 = vrot.lane.b32.xlu0 %v5244_v30, %s9762_s4  ;;  %9398 = vpow2.f32 %v7831_v18  ;;  %v7834_v18 = vmul.f32 -1.442695, %v11921_v33 }
 0xe24   :  { %v5151_v23 = vpop.permute.xlu0 %5150  ;;  %v12037_v30 = vpop.eup %9382  ;;  %9400 = vpow2.f32 %v7836_v44 }
 0xe25   :  { %v5242_v20 = vmul.f32 %v12027_v32, %v5151_v23  ;;  %v9385_v23 = vpop.eup %9384 }
 0xe26   :  { %v12042_v17 = vpop.eup %9386  ;;  %v5028_v24 = vadd.f32 1.0, %v9385_v23 }
 0xe27   :  { %5310 = vrot.lane.b32.xlu0 %v5242_v20, %s9762_s4  ;;  %13846 = vst [vmem:[#allocation26_spill] sm:$0xff] %v12042_v17 }
 0xe28   :  { %v5157_v36 = vpop.permute.xlu0 %5156  ;;  %9402 = vrcp.f32 %v5028_v24 }
 0xe29   :  { %v5245_v3 = vmul.f32 %v12032_v52, %v5157_v36  ;;  %v12044_v36 = vpop.eup %9388  ;;  %9404 = vpow2.f32 %v7835_v25  ;;  %v7840_v25 = vmul.f32 -1.442695, %v11933_v34 }
 0xe2a   :  { %13847 = vst [vmem:[#allocation34_spill] sm:$0xff] %v12044_v36  ;;  %v9391_v45 = vpop.eup %9390  ;;  %9406 = vpow2.f32 %v7834_v18 }
 0xe2b   :  { %5316 = vrot.lane.b32.xlu0 %v5245_v3, %s9762_s4 }
 0xe2c   :  { %v5153_v62 = vpop.permute.xlu0 %5152 }
 0xe2d   :  { %v5243_v56 = vmul.f32 %v12037_v30, %v5153_v62  ;;  %v12051_v62 = vpop.eup %9392 }
 0xe2e   :  { %13848 = vst [vmem:[#allocation35_spill] sm:$0xff] %v12051_v62  ;;  %v9395_v23 = vpop.eup %9394 }
 0xe2f   :  { %5312 = vrot.lane.b32.xlu0 %v5243_v56, %s9762_s4 }
 0xe30   :  { %v5163_v20 = vpop.permute.xlu1 %5162 }
 0xe31   :  { %v5248_v61 = vmul.f32 %v12042_v17, %v5163_v20  ;;  %v5159_v3 = vpop.permute.xlu0 %5158  ;;  %v5026_v20 = vadd.f32 1.0, %v9391_v45 }
 0xe32   :  { %v5246_v53 = vmul.f32 %v12044_v36, %v5159_v3  ;;  %v12057_v3 = vpop.eup %9396 }
 0xe33   :  { %5322 = vrot.lane.b32.xlu1 %v5248_v61, %s9762_s4  ;;  %13849 = vst [vmem:[#allocation29_spill] sm:$0xff] %v12057_v3  ;;  %v7837_v61 = vmul.f32 -1.442695, %v11928_v47  ;;  %9408 = vrcp.f32 %v5026_v20  ;;  %v9399_v44 = vpop.eup %9398 }
 0xe34   :  { %v5165_v56 = vpop.permute.xlu1 %5164  ;;  %5318 = vrot.lane.b32.xlu0 %v5246_v53, %s9762_s4  ;;  %v5029_v53 = vadd.f32 1.0, %v9395_v23  ;;  %v5027_v45 = vadd.f32 1.0, %v9399_v44  ;;  %v9401_v24 = vpop.eup %9400 }
 0xe35   :  { %v5249_v26 = vmul.f32 %v12051_v62, %v5165_v56  ;;  %9410 = vpow2.f32 %v7837_v61  ;;  %v5032_v43 = vadd.f32 1.0, %v9401_v24  ;;  %v7838_v61 = vmul.f32 -1.442695, %v11938_v35 }
 0xe36   :  { %9412 = vrcp.f32 %v5029_v53  ;;  %v7841_v24 = vmul.f32 -1.442695, %v11944_v2 }
 0xe37   :  { %5324 = vrot.lane.b32.xlu1 %v5249_v26, %s9762_s4  ;;  %v12063_v26 = vpop.eup %9402  ;;  %9414 = vrcp.f32 %v5027_v45 }
 0xe38   :  { %v5161_v36 = vpop.permute.xlu1 %5160  ;;  %13850 = vst [vmem:[#allocation15_spill] sm:$0xff] %v12063_v26  ;;  %v9405_v62 = vpop.eup %9404  ;;  %9416 = vpow2.f32 %v7840_v25 }
 0xe39   :  { %v5247_v17 = vmul.f32 %v12057_v3, %v5161_v36  ;;  %v9407_v36 = vpop.eup %9406  ;;  %9418 = vrcp.f32 %v5032_v43 }
 0xe3a   :  { %v5030_v44 = vadd.f32 1.0, %v9407_v36 }
 0xe3b   :  { %5320 = vrot.lane.b32.xlu1 %v5247_v17, %s9762_s4  ;;  %v5031_v17 = vadd.f32 1.0, %v9405_v62 }
 0xe3d   :  { %v12067_v20 = vpop.eup %9408  ;;  %9420 = vrcp.f32 %v5031_v17 }
 0xe3e   :  { %13851 = vst [vmem:[#allocation14_spill] sm:$0xff] %v12067_v20  ;;  %9422 = vpow2.f32 %v7838_v61 }
 0xe3f   :  { %v9411_v3 = vpop.eup %9410  ;;  %9424 = vrcp.f32 %v5030_v44 }
 0xe40   :  { %v5171_v56 = vpop.permute.xlu1 %5170  ;;  %v5033_v62 = vadd.f32 1.0, %v9411_v3  ;;  %9426 = vpow2.f32 %v7841_v24  ;;  %v7844_v3 = vmul.f32 -1.442695, %v11957_v41  ;;  %v7842_v24 = vmul.f32 -1.442695, %v11960_v39 }
 0xe41   :  { %v5252_v18 = vmul.f32 %v12063_v26, %v5171_v56  ;;  %v12072_v56 = vpop.eup %9412 }
 0xe42   :  { %13852 = vst [vmem:[#allocation28_spill] sm:$0xff] %v12072_v56  ;;  %9428 = vrcp.f32 %v5033_v62 }
 0xe43   :  { %5330 = vrot.lane.b32.xlu1 %v5252_v18, %s9762_s4  ;;  %v12077_v18 = vpop.eup %9414 }
 0xe44   :  { %v5167_v23 = vpop.permute.xlu1 %5166  ;;  %13853 = vst [vmem:[#allocation36_spill] sm:$0xff] %v12077_v18  ;;  %v9417_v36 = vpop.eup %9416 }
 0xe45   :  { %v5250_v53 = vmul.f32 %v12067_v20, %v5167_v23  ;;  %v7839_v23 = vmul.f32 -1.442695, %v11950_v11  ;;  %v12082_v17 = vpop.eup %9418  ;;  %v5036_v61 = vadd.f32 1.0, %v9417_v36 }
 0xe46   :  { %13854 = vst [vmem:[#allocation37_spill] sm:$0xff] %v12082_v17 }
 0xe47   :  { %5326 = vrot.lane.b32.xlu1 %v5250_v53, %s9762_s4  ;;  %9430 = vpow2.f32 %v7839_v23  ;;  %v7845_v23 = vmul.f32 -1.442695, %v11968_v1 }
 0xe48   :  { %v5173_v45 = vpop.permute.xlu1 %5172  ;;  %9432 = vrcp.f32 %v5036_v61  ;;  %v7843_v61 = vmul.f32 -1.442695, %v11973_v57 }
 0xe49   :  { %v5253_v25 = vmul.f32 %v12072_v56, %v5173_v45  ;;  %9434 = vpow2.f32 %v7844_v3 }
 0xe4a   :  { %9436 = vpow2.f32 %v7842_v24 }
 0xe4b   :  { %5332 = vrot.lane.b32.xlu1 %v5253_v25, %s9762_s4  ;;  %v12086_v25 = vpop.eup %9420  ;;  %9438 = vpow2.f32 %v7845_v23 }
 0xe4c   :  { %v5169_v43 = vpop.permute.xlu1 %5168  ;;  %13855 = vst [vmem:[#allocation47_spill] sm:$0xff] %v12086_v25  ;;  %v9423_v56 = vpop.eup %9422 }
 0xe4d   :  { %v5251_v53 = vmul.f32 %v12077_v18, %v5169_v43  ;;  %v12090_v62 = vpop.eup %9424 }
 0xe4e   :  { %13856 = vst [vmem:[#allocation17_spill] sm:$0xff] %v12090_v62 }
 0xe4f   :  { %5328 = vrot.lane.b32.xlu1 %v5251_v53, %s9762_s4 }
 0xe50   :  { %v5179_v45 = vpop.permute.xlu0 %5178 }
 0xe51   :  { %v5256_v44 = vmul.f32 %v12082_v17, %v5179_v45  ;;  %v5034_v45 = vadd.f32 1.0, %v9423_v56  ;;  %v9427_v17 = vpop.eup %9426 }
 0xe52   :  { %v12097_v18 = vpop.eup %9428  ;;  %v5037_v3 = vadd.f32 1.0, %v9427_v17 }
 0xe53   :  { %v5177_v20 = vpop.permute.xlu1 %5176  ;;  %5338 = vrot.lane.b32.xlu0 %v5256_v44, %s9762_s4  ;;  %13857 = vst [vmem:[#allocation16_spill] sm:$0xff] %v12097_v18  ;;  %9440 = vrcp.f32 %v5034_v45 }
 0xe54   :  { %v5255_v43 = vmul.f32 %v12086_v25, %v5177_v20  ;;  %v5175_v36 = vpop.permute.xlu0 %5174  ;;  %v9431_v25 = vpop.eup %9430  ;;  %9442 = vpow2.f32 %v7843_v61 }
 0xe55   :  { %v5254_v53 = vmul.f32 %v12090_v62, %v5175_v36  ;;  %v12102_v56 = vpop.eup %9432  ;;  %9444 = vrcp.f32 %v5037_v3  ;;  %v5035_v24 = vadd.f32 1.0, %v9431_v25  ;;  %v7848_v62 = vmul.f32 -1.442695, %v11982_v31 }
 0xe56   :  { %5336 = vrot.lane.b32.xlu1 %v5255_v43, %s9762_s4  ;;  %v9435_v43 = vpop.eup %9434 }
 0xe57   :  { %5334 = vrot.lane.b32.xlu0 %v5254_v53, %s9762_s4  ;;  %v9437_v36 = vpop.eup %9436  ;;  %9446 = vrcp.f32 %v5035_v24  ;;  %v5040_v26 = vadd.f32 1.0, %v9435_v43 }
 0xe58   :  { %v5181_v44 = vpop.permute.xlu0 %5180  ;;  %v5038_v45 = vadd.f32 1.0, %v9437_v36  ;;  %9448 = vpow2.f32 %v7848_v62  ;;  %v7849_v36 = vmul.f32 -1.442695, %v12001_v15 }
 0xe59   :  { %v5257_v20 = vmul.f32 %v12097_v18, %v5181_v44  ;;  %v9439_v44 = vpop.eup %9438  ;;  %9450 = vrcp.f32 %v5040_v26 }
 0xe5a   :  { %v5041_v3 = vadd.f32 1.0, %v9439_v44  ;;  %9452 = vrcp.f32 %v5038_v45  ;;  %v7847_v44 = vmul.f32 -1.442695, %v12011_v16 }
 0xe5b   :  { %5340 = vrot.lane.b32.xlu0 %v5257_v20, %s9762_s4  ;;  %v7846_v20 = vmul.f32 -1.442695, %v11990_v63 }
 0xe5d   :  { %v12107_v17 = vpop.eup %9440  ;;  %9454 = vpow2.f32 %v7846_v20 }
 0xe5e   :  { %13858 = vst [vmem:[#allocation48_spill] sm:$0xff] %v12107_v17  ;;  %v9443_v18 = vpop.eup %9442  ;;  %9456 = vrcp.f32 %v5041_v3 }
 0xe5f   :  { %v12112_v24 = vpop.eup %9444  ;;  %v5039_v62 = vadd.f32 1.0, %v9443_v18  ;;  %9458 = vpow2.f32 %v7849_v36 }
 0xe60   :  { %v5187_v53 = vpop.permute.xlu0 %5186  ;;  %13859 = vst [vmem:[#allocation38_spill] sm:$0xff] %v12112_v24 }
 0xe61   :  { %v5260_v23 = vmul.f32 %v12102_v56, %v5187_v53  ;;  %9460 = vrcp.f32 %v5039_v62 }
 0xe62   :  { %9462 = vpow2.f32 %v7847_v44 }
 0xe63   :  { %5346 = vrot.lane.b32.xlu0 %v5260_v23, %s9762_s4  ;;  %v12117_v23 = vpop.eup %9446 }
 0xe64   :  { %v5183_v61 = vpop.permute.xlu0 %5182  ;;  %13860 = vst [vmem:[#allocation39_spill] sm:$0xff] %v12117_v23 }
 0xe65   :  { %v5258_v25 = vmul.f32 %v12107_v17, %v5183_v61  ;;  %v9449_v61 = vpop.eup %9448 }
 0xe66   :  { %v12122_v20 = vpop.eup %9450 }
 0xe67   :  { %5342 = vrot.lane.b32.xlu0 %v5258_v25, %s9762_s4 }
 0xe68   :  { %v5189_v43 = vpop.permute.xlu0 %5188 }
 0xe69   :  { %v5261_v53 = vmul.f32 %v12112_v24, %v5189_v43  ;;  %v12124_v43 = vpop.eup %9452 }
 0xe6a   :  { %13861 = vst [vmem:[#allocation40_spill] sm:$0xff] %v12124_v43  ;;  %v9455_v24 = vpop.eup %9454 }
 0xe6b   :  { %5348 = vrot.lane.b32.xlu0 %v5261_v53, %s9762_s4  ;;  %v5044_v53 = vadd.f32 1.0, %v9449_v61 }
 0xe6c   :  { %v5185_v26 = vpop.permute.xlu0 %5184 }
 0xe6d   :  { %v5259_v45 = vmul.f32 %v12117_v23, %v5185_v26  ;;  %v12129_v26 = vpop.eup %9456  ;;  %9464 = vrcp.f32 %v5044_v53  ;;  %v5042_v23 = vadd.f32 1.0, %v9455_v24 }
 0xe6e   :  { %v9459_v17 = vpop.eup %9458 }
 0xe6f   :  { %5344 = vrot.lane.b32.xlu0 %v5259_v45, %s9762_s4  ;;  %v12134_v44 = vpop.eup %9460  ;;  %9466 = vrcp.f32 %v5042_v23 }
 0xe70   :  { %v5195_v25 = vpop.permute.xlu1 %5194 }
 0xe71   :  { %v5264_v18 = vmul.f32 %v12122_v20, %v5195_v25  ;;  %v5191_v3 = vpop.permute.xlu0 %5190 }
 0xe72   :  { %v5262_v36 = vmul.f32 %v12124_v43, %v5191_v3  ;;  %v5045_v3 = vadd.f32 1.0, %v9459_v17 }
 0xe73   :  { %5354 = vrot.lane.b32.xlu1 %v5264_v18, %s9762_s4  ;;  %v9463_v18 = vpop.eup %9462 }
 0xe74   :  { %5350 = vrot.lane.b32.xlu0 %v5262_v36, %s9762_s4  ;;  %v5197_v62 = vpop.permute.xlu1 %5196  ;;  %9468 = vrcp.f32 %v5045_v3  ;;  %v5043_v36 = vadd.f32 1.0, %v9463_v18 }
 0xe75   :  { %v5265_v45 = vmul.f32 %v12129_v26, %v5197_v62 }
 0xe76   :  { %9470 = vrcp.f32 %v5043_v36 }
 0xe77   :  { %5356 = vrot.lane.b32.xlu1 %v5265_v45, %s9762_s4  ;;  %v12138_v43 = vpop.eup %9464 }
 0xe78   :  { %v5193_v61 = vpop.permute.xlu1 %5192 }
 0xe79   :  { %v5263_v25 = vmul.f32 %v12134_v44, %v5193_v61  ;;  %v12142_v53 = vpop.eup %9466 }
 0xe7a   :  { %13862 = vst [vmem:[#allocation41_spill] sm:$0xff] %v12142_v53 }
 0xe7b   :  { %5352 = vrot.lane.b32.xlu1 %v5263_v25, %s9762_s4 }
 0xe7e   :  { %v12147_v25 = vpop.eup %9468 }
 0xe80   :  { %v5203_v62 = vpop.permute.xlu1 %5202 }
 0xe81   :  { %v5268_v24 = vmul.f32 %v12138_v43, %v5203_v62 }
 0xe83   :  { %5362 = vrot.lane.b32.xlu1 %v5268_v24, %s9762_s4  ;;  %v12152_v24 = vpop.eup %9470 }
 0xe84   :  { %v5199_v45 = vpop.permute.xlu1 %5198 }
 0xe85   :  { %v5266_v61 = vmul.f32 %v12142_v53, %v5199_v45  ;;  %v5307_v23 = vpop.permute.xlu0 %5306 }
 0xe86   :  { %v5400_v17 = vadd.f32 %v5307_v23, %v11833_v21 }
 0xe87   :  { %5358 = vrot.lane.b32.xlu1 %v5266_v61, %s9762_s4 }
 0xe88   :  { %9472 = vtanh.f32 %v5400_v17  ;;  %v5205_v3 = vpop.permute.xlu1 %5204 }
 0xe89   :  { %v5269_v18 = vmul.f32 %v12147_v25, %v5205_v3  ;;  %v5303_v62 = vpop.permute.xlu0 %5302 }
 0xe8a   :  { %v5398_v36 = vadd.f32 %v5303_v62, %v11841_v7 }
 0xe8b   :  { %5364 = vrot.lane.b32.xlu1 %v5269_v18, %s9762_s4 }
 0xe8c   :  { %9474 = vtanh.f32 %v5398_v36  ;;  %v5201_v45 = vpop.permute.xlu1 %5200 }
 0xe8d   :  { %v5267_v53 = vmul.f32 %v12152_v24, %v5201_v45  ;;  %v5309_v21 = vpop.permute.xlu0 %5308 }
 0xe8e   :  { %v5401_v61 = vadd.f32 %v5309_v21, %v11848_v5 }
 0xe8f   :  { %5360 = vrot.lane.b32.xlu1 %v5267_v53, %s9762_s4 }
 0xe90   :  { %9476 = vtanh.f32 %v5401_v61  ;;  %v5305_v23 = vpop.permute.xlu1 %5304 }
 0xe91   :  { %v5399_v17 = vadd.f32 %v5305_v23, %v11838_v8 }
 0xe92   :  { %v9473_v3 = vpop.eup %9472 }
 0xe93   :  { %9478 = vtanh.f32 %v5399_v17  ;;  %5530 = vrot.lane.b32.xlu0 %v9473_v3, %s9763_s19 }
 0xe95   :  { %v5315_v7 = vpop.permute.xlu0 %5314 }
 0xe96   :  { %v9475_v18 = vpop.eup %9474  ;;  %v5404_v62 = vadd.f32 %v5315_v7, %v11853_v49 }
 0xe97   :  { %5526 = vrot.lane.b32.xlu0 %v9475_v18, %s9763_s19 }
 0xe98   :  { %9480 = vtanh.f32 %v5404_v62 }
 0xe99   :  { %v5311_v36 = vpop.permute.xlu0 %5310 }
 0xe9a   :  { %v9477_v45 = vpop.eup %9476  ;;  %v5402_v5 = vadd.f32 %v5311_v36, %v11858_v48 }
 0xe9b   :  { %5532 = vrot.lane.b32.xlu0 %v9477_v45, %s9763_s19 }
 0xe9c   :  { %9482 = vtanh.f32 %v5402_v5 }
 0xe9d   :  { %v9479_v53 = vpop.eup %9478  ;;  %v5317_v8 = vpop.permute.xlu0 %5316 }
 0xe9e   :  { %v5405_v21 = vadd.f32 %v5317_v8, %v11863_v28  ;;  %5528 = vrot.lane.b32.xlu1 %v9479_v53, %s9763_s19 }
 0xea0   :  { %9484 = vtanh.f32 %v5405_v21 }
 0xea1   :  { %v5313_v61 = vpop.permute.xlu0 %5312 }
 0xea2   :  { %v9481_v23 = vpop.eup %9480  ;;  %v5403_v49 = vadd.f32 %v5313_v61, %v11868_v42 }
 0xea3   :  { %5538 = vrot.lane.b32.xlu1 %v9481_v23, %s9763_s19 }
 0xea4   :  { %9486 = vtanh.f32 %v5403_v49 }
 0xea5   :  { %v5323_v17 = vpop.permute.xlu1 %5322 }
 0xea6   :  { %v9483_v3 = vpop.eup %9482  ;;  %v5408_v48 = vadd.f32 %v5323_v17, %v11873_v14  ;;  %v5319_v7 = vpop.permute.xlu0 %5318 }
 0xea7   :  { %v5406_v18 = vadd.f32 %v5319_v7, %v11876_v37  ;;  %5534 = vrot.lane.b32.xlu0 %v9483_v3, %s9763_s19 }
 0xea8   :  { %9488 = vtanh.f32 %v5408_v48 }
 0xea9   :  { %9490 = vtanh.f32 %v5406_v18  ;;  %v5325_v28 = vpop.permute.xlu1 %5324 }
 0xeaa   :  { %v9485_v62 = vpop.eup %9484  ;;  %v5409_v36 = vadd.f32 %v5325_v28, %v11883_v60 }
 0xeab   :  { %5540 = vrot.lane.b32.xlu1 %v9485_v62, %s9763_s19 }
 0xeac   :  { %9492 = vtanh.f32 %v5409_v36 }
 0xead   :  { %v5321_v42 = vpop.permute.xlu1 %5320 }
 0xeae   :  { %v9487_v45 = vpop.eup %9486  ;;  %v5407_v5 = vadd.f32 %v5321_v42, %v11888_v22 }
 0xeaf   :  { %5536 = vrot.lane.b32.xlu0 %v9487_v45, %s9763_s19 }
 0xeb0   :  { %9494 = vtanh.f32 %v5407_v5 }
 0xeb2   :  { %v9489_v14 = vpop.eup %9488 }
 0xeb3   :  { %v9491_v37 = vpop.eup %9490  ;;  %5546 = vrot.lane.b32.xlu1 %v9489_v14, %s9763_s19 }
 0xeb4   :  { %5542 = vrot.lane.b32.xlu0 %v9491_v37, %s9763_s19 }
 0xeb5   :  { %v5331_v53 = vpop.permute.xlu1 %5330 }
 0xeb6   :  { %v9493_v8 = vpop.eup %9492  ;;  %v5412_v60 = vadd.f32 %v5331_v53, %v11893_v59 }
 0xeb7   :  { %5548 = vrot.lane.b32.xlu1 %v9493_v8, %s9763_s19 }
 0xeb8   :  { %9496 = vtanh.f32 %v5412_v60 }
 0xeb9   :  { %v5327_v21 = vpop.permute.xlu1 %5326 }
 0xeba   :  { %v9495_v61 = vpop.eup %9494  ;;  %v5410_v22 = vadd.f32 %v5327_v21, %v11898_v50 }
 0xebb   :  { %5544 = vrot.lane.b32.xlu1 %v9495_v61, %s9763_s19 }
 0xebc   :  { %9498 = vtanh.f32 %v5410_v22 }
 0xebd   :  { %v5333_v23 = vpop.permute.xlu1 %5332 }
 0xebe   :  { %v5413_v49 = vadd.f32 %v5333_v23, %v11903_v12 }
 0xec0   :  { %9500 = vtanh.f32 %v5413_v49 }
 0xec1   :  { %v5329_v17 = vpop.permute.xlu1 %5328 }
 0xec2   :  { %v9497_v3 = vpop.eup %9496  ;;  %v5411_v48 = vadd.f32 %v5329_v17, %v11908_v4 }
 0xec3   :  { %5554 = vrot.lane.b32.xlu0 %v9497_v3, %s9763_s19 }
 0xec4   :  { %9502 = vtanh.f32 %v5411_v48 }
 0xec5   :  { %v5339_v59 = vpop.permute.xlu0 %5338 }
 0xec6   :  { %v9499_v7 = vpop.eup %9498  ;;  %v5416_v18 = vadd.f32 %v5339_v59, %v11913_v40 }
 0xec7   :  { %5550 = vrot.lane.b32.xlu1 %v9499_v7, %s9763_s19 }
 0xec8   :  { %9504 = vtanh.f32 %v5416_v18  ;;  %v5337_v50 = vpop.permute.xlu1 %5336 }
 0xec9   :  { %v5415_v28 = vadd.f32 %v5337_v50, %v11918_v6  ;;  %v5335_v62 = vpop.permute.xlu0 %5334 }
 0xeca   :  { %v9501_v12 = vpop.eup %9500  ;;  %v5414_v36 = vadd.f32 %v5335_v62, %v11921_v33 }
 0xecb   :  { %9506 = vtanh.f32 %v5415_v28  ;;  %5556 = vrot.lane.b32.xlu0 %v9501_v12, %s9763_s19 }
 0xecc   :  { %9508 = vtanh.f32 %v5414_v36 }
 0xecd   :  { %v5341_v4 = vpop.permute.xlu0 %5340 }
 0xece   :  { %v9503_v42 = vpop.eup %9502  ;;  %v5417_v45 = vadd.f32 %v5341_v4, %v11928_v47 }
 0xecf   :  { %5552 = vrot.lane.b32.xlu1 %v9503_v42, %s9763_s19 }
 0xed0   :  { %9510 = vtanh.f32 %v5417_v45 }
 0xed2   :  { %v9505_v40 = vpop.eup %9504 }
 0xed3   :  { %5562 = vrot.lane.b32.xlu0 %v9505_v40, %s9763_s19 }
 0xed5   :  { %v9507_v5 = vpop.eup %9506  ;;  %v5347_v6 = vpop.permute.xlu0 %5346 }
 0xed6   :  { %v9509_v14 = vpop.eup %9508  ;;  %v5420_v37 = vadd.f32 %v5347_v6, %v11933_v34  ;;  %5560 = vrot.lane.b32.xlu1 %v9507_v5, %s9763_s19 }
 0xed7   :  { %5558 = vrot.lane.b32.xlu0 %v9509_v14, %s9763_s19 }
 0xed8   :  { %9512 = vtanh.f32 %v5420_v37 }
 0xed9   :  { %v5343_v33 = vpop.permute.xlu0 %5342 }
 0xeda   :  { %v9511_v53 = vpop.eup %9510  ;;  %v5418_v47 = vadd.f32 %v5343_v33, %v11938_v35 }
 0xedb   :  { %5564 = vrot.lane.b32.xlu0 %v9511_v53, %s9763_s19  ;;  %v5654_v53 = vmul.f32 %v11998_v55, %v11471_v13  ;;  %v5463_v13 = vsub.f32 1.0, %v12015_v19 }
 0xedc   :  { %9514 = vtanh.f32 %v5418_v47 }
 0xedd   :  { %v5349_v8 = vpop.permute.xlu0 %5348 }
 0xede   :  { %v5421_v60 = vadd.f32 %v5349_v8, %v11944_v2 }
 0xee0   :  { %9516 = vtanh.f32 %v5421_v60 }
 0xee1   :  { %v5345_v21 = vpop.permute.xlu0 %5344 }
 0xee2   :  { %v9513_v61 = vpop.eup %9512  ;;  %v5419_v34 = vadd.f32 %v5345_v21, %v11950_v11 }
 0xee3   :  { %5570 = vrot.lane.b32.xlu1 %v9513_v61, %s9763_s19  ;;  %v5657_v61 = vmul.f32 %v12008_v10, %v11484_v27  ;;  %v5468_v27 = vsub.f32 1.0, %v12021_v51 }
 0xee4   :  { %9518 = vtanh.f32 %v5419_v34 }
 0xee5   :  { %v5355_v22 = vpop.permute.xlu1 %5354 }
 0xee6   :  { %v9515_v23 = vpop.eup %9514  ;;  %v5424_v49 = vadd.f32 %v5355_v22, %v11957_v41  ;;  %v5351_v17 = vpop.permute.xlu0 %5350 }
 0xee7   :  { %v5422_v35 = vadd.f32 %v5351_v17, %v11960_v39  ;;  %5566 = vrot.lane.b32.xlu0 %v9515_v23, %s9763_s19  ;;  %v5655_v23 = vmul.f32 %v12015_v19, %v11473_v0  ;;  %v5466_v19 = vsub.f32 1.0, %v12027_v32 }
 0xee8   :  { %9520 = vtanh.f32 %v5424_v49 }
 0xee9   :  { %9522 = vtanh.f32 %v5422_v35  ;;  %v5357_v2 = vpop.permute.xlu1 %5356 }
 0xeea   :  { %v9517_v3 = vpop.eup %9516  ;;  %v5425_v48 = vadd.f32 %v5357_v2, %v11968_v1 }
 0xeeb   :  { %5572 = vrot.lane.b32.xlu1 %v9517_v3, %s9763_s19  ;;  %v5660_v3 = vmul.f32 %v12021_v51, %v11508_v46  ;;  %v5469_v46 = vsub.f32 1.0, %v12032_v52 }
 0xeec   :  { %9524 = vtanh.f32 %v5425_v48 }
 0xeed   :  { %v5353_v11 = vpop.permute.xlu1 %5352 }
 0xeee   :  { %v9519_v59 = vpop.eup %9518  ;;  %v5423_v7 = vadd.f32 %v5353_v11, %v11973_v57 }
 0xeef   :  { %5568 = vrot.lane.b32.xlu1 %v9519_v59, %s9763_s19 }
 0xef0   :  { %9526 = vtanh.f32 %v5423_v7  ;;  %v5658_v7 = vmul.f32 %v12027_v32, %v11497_v58  ;;  %v5467_v58 = vsub.f32 1.0, %v12037_v30 }
 0xef2   :  { %v9521_v41 = vpop.eup %9520 }
 0xef3   :  { %v9523_v39 = vpop.eup %9522  ;;  %5578 = vrot.lane.b32.xlu1 %v9521_v41, %s9763_s19 }
 0xef4   :  { %5574 = vrot.lane.b32.xlu0 %v9523_v39, %s9763_s19 }
 0xef5   :  { %v5363_v18 = vpop.permute.xlu1 %5362 }
 0xef6   :  { %v9525_v50 = vpop.eup %9524  ;;  %v5428_v1 = vadd.f32 %v5363_v18, %v11982_v31  ;;  %v5464_v31 = vsub.f32 1.0, %v11987_v9 }
 0xef7   :  { %5580 = vrot.lane.b32.xlu1 %v9525_v50, %s9763_s19  ;;  %v5661_v50 = vmul.f32 %v12032_v52, %v11510_v54  ;;  %v13872_v54 = vld [vmem:[#allocation26_spill] sm:$0xff] }
 0xef8   :  { %9528 = vtanh.f32 %v5428_v1  ;;  %v5472_v52 = vsub.f32 1.0, %v13872_v54 }
 0xef9   :  { %v5359_v28 = vpop.permute.xlu1 %5358 }
 0xefa   :  { %v9527_v62 = vpop.eup %9526  ;;  %v5426_v57 = vadd.f32 %v5359_v28, %v11990_v63  ;;  %v5656_v63 = vmul.f32 %v11987_v9, %v11482_v29  ;;  %v5465_v29 = vsub.f32 1.0, %v12008_v10 }
 0xefb   :  { %5576 = vrot.lane.b32.xlu1 %v9527_v62, %s9763_s19 }
 0xefc   :  { %9530 = vtanh.f32 %v5426_v57  ;;  %v13870_v57 = vld [vmem:[#allocation49_spill] sm:$0xff] }
 0xefd   :  { %v5365_v12 = vpop.permute.xlu1 %5364 }
 0xefe   :  { %v5429_v36 = vadd.f32 %v5365_v12, %v12001_v15  ;;  %v5462_v15 = vsub.f32 1.0, %v11998_v55  ;;  %v5659_v12 = vmul.f32 %v12037_v30, %v13870_v57 }
 0xf00   :  { %9532 = vtanh.f32 %v5429_v36 }
 0xf01   :  { %v5361_v4 = vpop.permute.xlu1 %5360 }
 0xf02   :  { %v9529_v42 = vpop.eup %9528  ;;  %v5427_v45 = vadd.f32 %v5361_v4, %v12011_v16 }
 0xf03   :  { %5586 = vrot.lane.b32.xlu0 %v9529_v42, %s9763_s19 }
 0xf04   :  { %9534 = vtanh.f32 %v5427_v45  ;;  %v13873_v45 = vld [vmem:[#allocation34_spill] sm:$0xff] }
 0xf05   :  { %v5531_v40 = vpop.permute.xlu0 %5530 }
 0xf06   :  { %v9531_v5 = vpop.eup %9530  ;;  %v5624_v6 = vmul.f32 %v5531_v40, %v5464_v31  ;;  %v5470_v31 = vsub.f32 1.0, %v13873_v45 }
 0xf07   :  { %5582 = vrot.lane.b32.xlu1 %v9531_v5, %s9763_s19  ;;  %v13874_v5 = vld [vmem:[#allocation6_spill] sm:$0xff] }
 0xf08   :  { %v12219_v14 = vadd.f32 %v5656_v63, %v5624_v6  ;;  %v5664_v63 = vmul.f32 %v13872_v54, %v13874_v5  ;;  %v13890_v54 = vld [vmem:[#allocation28_spill] sm:$0xff] }
 0xf09   :  { %v5527_v37 = vpop.permute.xlu0 %5526 }
 0xf0a   :  { %13863 = vst [vmem:[#allocation19_spill] sm:$0xff] %v12219_v14  ;;  %v9533_v33 = vpop.eup %9532  ;;  %v5729_v16 = vmul.f32 %v11979_v38, %v12219_v14  ;;  %v5622_v47 = vmul.f32 %v5527_v37, %v5462_v15  ;;  %v13875_v37 = vld [vmem:[#allocation42_spill] sm:$0xff] }
 0xf0b   :  { %5588 = vrot.lane.b32.xlu0 %v9533_v33, %s9763_s19  ;;  %v5662_v30 = vmul.f32 %v13873_v45, %v13875_v37 }
 0xf0c   :  { %v12227_v8 = vadd.f32 %v5654_v53, %v5622_v47  ;;  %5795 = vrot.lane.b32.xlu1 %v5729_v16, %s9763_s19  ;;  %v13877_v53 = vld [vmem:[#allocation35_spill] sm:$0xff] }
 0xf0d   :  { %v5533_v9 = vpop.permute.xlu0 %5532  ;;  %v5473_v47 = vsub.f32 1.0, %v13877_v53 }
 0xf0e   :  { %13864 = vst [vmem:[#allocation18_spill] sm:$0xff] %v12227_v8  ;;  %v9535_v60 = vpop.eup %9534  ;;  %v5727_v21 = vmul.f32 %v11979_v38, %v12227_v8  ;;  %v5625_v34 = vmul.f32 %v5533_v9, %v5465_v29 }
 0xf0f   :  { %5584 = vrot.lane.b32.xlu0 %v9535_v60, %s9763_s19 }
 0xf10   :  { %v12237_v55 = vadd.f32 %v5657_v61, %v5625_v34  ;;  %5791 = vrot.lane.b32.xlu1 %v5727_v21, %s9763_s19  ;;  %v5529_v22 = vpop.permute.xlu1 %5528  ;;  %v13879_v21 = vld [vmem:[#allocation43_spill] sm:$0xff] }
 0xf11   :  { %v5623_v49 = vmul.f32 %v5529_v22, %v5463_v13  ;;  %v5665_v61 = vmul.f32 %v13877_v53, %v13879_v21 }
 0xf12   :  { %13865 = vst [vmem:[#allocation50_spill] sm:$0xff] %v12237_v55  ;;  %v5730_v17 = vmul.f32 %v11979_v38, %v12237_v55 }
 0xf13   :  { %v12244_v35 = vadd.f32 %v5655_v23, %v5623_v49  ;;  %v13881_v23 = vld [vmem:[#allocation29_spill] sm:$0xff] }
 0xf14   :  { %5797 = vrot.lane.b32.xlu1 %v5730_v17, %s9763_s19  ;;  %v5471_v49 = vsub.f32 1.0, %v13881_v23 }
 0xf15   :  { %13866 = vst [vmem:[#allocation51_spill] sm:$0xff] %v12244_v35  ;;  %v5728_v10 = vmul.f32 %v11979_v38, %v12244_v35  ;;  %v5539_v2 = vpop.permute.xlu1 %5538 }
 0xf16   :  { %v5628_v48 = vmul.f32 %v5539_v2, %v5468_v27 }
 0xf17   :  { %5793 = vrot.lane.b32.xlu0 %v5728_v10, %s9763_s19  ;;  %v13882_v10 = vld [vmem:[#allocation7_spill] sm:$0xff] }
 0xf18   :  { %v12253_v0 = vadd.f32 %v5660_v3, %v5628_v48  ;;  %v5663_v2 = vmul.f32 %v13881_v23, %v13882_v10 }
 0xf19   :  { %v5535_v11 = vpop.permute.xlu0 %5534 }
 0xf1a   :  { %13867 = vst [vmem:[#allocation52_spill] sm:$0xff] %v12253_v0  ;;  %v5733_v59 = vmul.f32 %v11979_v38, %v12253_v0  ;;  %v5626_v41 = vmul.f32 %v5535_v11, %v5466_v19  ;;  %v13884_v11 = vld [vmem:[#allocation15_spill] sm:$0xff] }
 0xf1c   :  { %v12260_v39 = vadd.f32 %v5658_v7, %v5626_v41  ;;  %5803 = vrot.lane.b32.xlu1 %v5733_v59, %s9763_s19  ;;  %v5476_v59 = vsub.f32 1.0, %v13884_v11  ;;  %v13885_v41 = vld [vmem:[#allocation8_spill] sm:$0xff] }
 0xf1d   :  { %v5541_v51 = vpop.permute.xlu1 %5540 }
 0xf1e   :  { %13868 = vst [vmem:[#allocation53_spill] sm:$0xff] %v12260_v39  ;;  %v5731_v18 = vmul.f32 %v11979_v38, %v12260_v39  ;;  %v5629_v1 = vmul.f32 %v5541_v51, %v5469_v46  ;;  %v5668_v46 = vmul.f32 %v13884_v11, %v13885_v41  ;;  %v13901_v11 = vld [vmem:[#allocation30_spill] sm:$0xff] }
 0xf20   :  { %v12268_v28 = vadd.f32 %v5661_v50, %v5629_v1  ;;  %5799 = vrot.lane.b32.xlu1 %v5731_v18, %s9763_s19  ;;  %v13887_v50 = vld [vmem:[#allocation14_spill] sm:$0xff] }
 0xf21   :  { %v5537_v32 = vpop.permute.xlu0 %5536  ;;  %v5474_v1 = vsub.f32 1.0, %v13887_v50 }
 0xf22   :  { %13869 = vst [vmem:[#allocation54_spill] sm:$0xff] %v12268_v28  ;;  %v5734_v62 = vmul.f32 %v11979_v38, %v12268_v28  ;;  %v5627_v36 = vmul.f32 %v5537_v32, %v5467_v58 }
 0xf24   :  { %v12276_v4 = vadd.f32 %v5659_v12, %v5627_v36  ;;  %5805 = vrot.lane.b32.xlu1 %v5734_v62, %s9763_s19  ;;  %v13888_v62 = vld [vmem:[#allocation21_spill] sm:$0xff] }
 0xf25   :  { %v5547_v42 = vpop.permute.xlu1 %5546  ;;  %v5666_v57 = vmul.f32 %v13887_v50, %v13888_v62  ;;  %v13905_v62 = vld [vmem:[#allocation16_spill] sm:$0xff] }
 0xf26   :  { %13871 = vst [vmem:[#allocation49_spill] sm:$0xff] %v12276_v4  ;;  %v5732_v40 = vmul.f32 %v11979_v38, %v12276_v4  ;;  %v5632_v6 = vmul.f32 %v5547_v42, %v5472_v52  ;;  %v5543_v15 = vpop.permute.xlu0 %5542  ;;  %v5477_v52 = vsub.f32 1.0, %v13890_v54 }
 0xf27   :  { %v5630_v33 = vmul.f32 %v5543_v15, %v5470_v31  ;;  %v13891_v31 = vld [vmem:[#allocation20_spill] sm:$0xff] }
 0xf28   :  { %v12287_v16 = vadd.f32 %v5664_v63, %v5632_v6  ;;  %5801 = vrot.lane.b32.xlu1 %v5732_v40, %s9763_s19  ;;  %v5669_v40 = vmul.f32 %v13890_v54, %v13891_v31  ;;  %v13893_v6 = vld [vmem:[#allocation36_spill] sm:$0xff] }
 0xf29   :  { %v12291_v29 = vadd.f32 %v5662_v30, %v5630_v33  ;;  %v5549_v9 = vpop.permute.xlu1 %5548  ;;  %v5475_v15 = vsub.f32 1.0, %v13893_v6  ;;  %v13894_v33 = vld [vmem:[#allocation9_spill] sm:$0xff] }
 0xf2a   :  { %13876 = vst [vmem:[#allocation26_spill] sm:$0xff] %v12287_v16  ;;  %v5737_v60 = vmul.f32 %v11979_v38, %v12287_v16  ;;  %v5633_v34 = vmul.f32 %v5549_v9, %v5473_v47  ;;  %v5667_v53 = vmul.f32 %v13893_v6, %v13894_v33  ;;  %v5484_v6 = vsub.f32 1.0, %v12102_v56 }
 0xf2b   :  { %13878 = vst [vmem:[#allocation34_spill] sm:$0xff] %v12291_v29  ;;  %v5735_v13 = vmul.f32 %v11979_v38, %v12291_v29 }
 0xf2c   :  { %v12299_v22 = vadd.f32 %v5665_v61, %v5633_v34  ;;  %5811 = vrot.lane.b32.xlu0 %v5737_v60, %s9763_s19  ;;  %v13896_v60 = vld [vmem:[#allocation37_spill] sm:$0xff] }
 0xf2d   :  { %5807 = vrot.lane.b32.xlu1 %v5735_v13, %s9763_s19  ;;  %v5545_v17 = vpop.permute.xlu1 %5544  ;;  %v5480_v21 = vsub.f32 1.0, %v13896_v60  ;;  %v13897_v13 = vld [vmem:[#allocation31_spill] sm:$0xff] }
 0xf2e   :  { %13880 = vst [vmem:[#allocation6_spill] sm:$0xff] %v12299_v22  ;;  %v5738_v27 = vmul.f32 %v11979_v38, %v12299_v22  ;;  %v5631_v3 = vmul.f32 %v5545_v17, %v5471_v49  ;;  %v5672_v23 = vmul.f32 %v13896_v60, %v13897_v13  ;;  %v13898_v17 = vld [vmem:[#allocation47_spill] sm:$0xff] }
 0xf30   :  { %v12308_v48 = vadd.f32 %v5663_v2, %v5631_v3  ;;  %5813 = vrot.lane.b32.xlu0 %v5738_v27, %s9763_s19  ;;  %v5479_v27 = vsub.f32 1.0, %v13898_v17  ;;  %v13900_v3 = vld [vmem:[#allocation17_spill] sm:$0xff] }
 0xf32   :  { %13883 = vst [vmem:[#allocation42_spill] sm:$0xff] %v12308_v48  ;;  %v5736_v19 = vmul.f32 %v11979_v38, %v12308_v48 }
 0xf34   :  { %5809 = vrot.lane.b32.xlu0 %v5736_v19, %s9763_s19  ;;  %v5478_v19 = vsub.f32 1.0, %v13900_v3 }
 0xf35   :  { %v5555_v7 = vpop.permute.xlu0 %5554 }
 0xf36   :  { %v5636_v51 = vmul.f32 %v5555_v7, %v5476_v59  ;;  %v5671_v59 = vmul.f32 %v13898_v17, %v13901_v11  ;;  %v13913_v17 = vld [vmem:[#allocation38_spill] sm:$0xff] }
 0xf38   :  { %v12317_v18 = vadd.f32 %v5668_v46, %v5636_v51  ;;  %v13902_v51 = vld [vmem:[#allocation44_spill] sm:$0xff] }
 0xf39   :  { %v5551_v58 = vpop.permute.xlu1 %5550  ;;  %v5670_v50 = vmul.f32 %v13900_v3, %v13902_v51  ;;  %v13914_v3 = vld [vmem:[#allocation45_spill] sm:$0xff] }
 0xf3a   :  { %13886 = vst [vmem:[#allocation35_spill] sm:$0xff] %v12317_v18  ;;  %v5741_v32 = vmul.f32 %v11979_v38, %v12317_v18  ;;  %v5634_v12 = vmul.f32 %v5551_v58, %v5474_v1 }
 0xf3c   :  { %v12324_v36 = vadd.f32 %v5666_v57, %v5634_v12  ;;  %5819 = vrot.lane.b32.xlu0 %v5741_v32, %s9763_s19  ;;  %v5481_v57 = vsub.f32 1.0, %v13905_v62 }
 0xf3d   :  { %v5557_v42 = vpop.permute.xlu0 %5556 }
 0xf3e   :  { %13889 = vst [vmem:[#allocation43_spill] sm:$0xff] %v12324_v36  ;;  %v5739_v45 = vmul.f32 %v11979_v38, %v12324_v36  ;;  %v5637_v5 = vmul.f32 %v5557_v42, %v5477_v52  ;;  %v13906_v42 = vld [vmem:[#allocation23_spill] sm:$0xff] }
 0xf40   :  { %v12332_v63 = vadd.f32 %v5669_v40, %v5637_v5  ;;  %5815 = vrot.lane.b32.xlu0 %v5739_v45, %s9763_s19  ;;  %v5673_v45 = vmul.f32 %v13905_v62, %v13906_v42 }
 0xf41   :  { %v5553_v37 = vpop.permute.xlu1 %5552 }
 0xf42   :  { %13892 = vst [vmem:[#allocation29_spill] sm:$0xff] %v12332_v63  ;;  %v5742_v30 = vmul.f32 %v11979_v38, %v12332_v63  ;;  %v5635_v47 = vmul.f32 %v5553_v37, %v5475_v15  ;;  %v13908_v37 = vld [vmem:[#allocation10_spill] sm:$0xff] }
 0xf44   :  { %v12340_v9 = vadd.f32 %v5667_v53, %v5635_v47  ;;  %5821 = vrot.lane.b32.xlu0 %v5742_v30, %s9763_s19  ;;  %v5676_v30 = vmul.f32 %v12102_v56, %v13908_v37  ;;  %v13910_v47 = vld [vmem:[#allocation48_spill] sm:$0xff]  ;;  %v13921_v37 = vld [vmem:[#allocation25_spill] sm:$0xff] }
 0xf45   :  { %v5563_v61 = vpop.permute.xlu0 %5562  ;;  %v5482_v60 = vsub.f32 1.0, %v13910_v47 }
 0xf46   :  { %13895 = vst [vmem:[#allocation7_spill] sm:$0xff] %v12340_v9  ;;  %v5740_v34 = vmul.f32 %v11979_v38, %v12340_v9  ;;  %v5640_v49 = vmul.f32 %v5563_v61, %v5480_v21 }
 0xf48   :  { %v12349_v10 = vadd.f32 %v5672_v23, %v5640_v49  ;;  %5817 = vrot.lane.b32.xlu0 %v5740_v34, %s9763_s19  ;;  %v5561_v2 = vpop.permute.xlu1 %5560  ;;  %v13911_v34 = vld [vmem:[#allocation22_spill] sm:$0xff] }
 0xf49   :  { %v5639_v7 = vmul.f32 %v5561_v2, %v5479_v27  ;;  %v5559_v41 = vpop.permute.xlu0 %5558  ;;  %v5674_v13 = vmul.f32 %v13910_v47, %v13911_v34  ;;  %v5485_v27 = vsub.f32 1.0, %v13913_v17 }
 0xf4a   :  { %13899 = vst [vmem:[#allocation15_spill] sm:$0xff] %v12349_v10  ;;  %v5745_v46 = vmul.f32 %v11979_v38, %v12349_v10  ;;  %v5638_v1 = vmul.f32 %v5559_v41, %v5478_v19  ;;  %v5677_v19 = vmul.f32 %v13913_v17, %v13914_v3 }
 0xf4b   :  { %v12359_v58 = vadd.f32 %v5671_v59, %v5639_v7  ;;  %v13916_v7 = vld [vmem:[#allocation39_spill] sm:$0xff] }
 0xf4c   :  { %v12361_v32 = vadd.f32 %v5670_v50, %v5638_v1  ;;  %5827 = vrot.lane.b32.xlu1 %v5745_v46, %s9763_s19  ;;  %v5483_v41 = vsub.f32 1.0, %v13916_v7  ;;  %v13917_v50 = vld [vmem:[#allocation11_spill] sm:$0xff] }
 0xf4d   :  { %13903 = vst [vmem:[#allocation8_spill] sm:$0xff] %v12359_v58  ;;  %v5744_v12 = vmul.f32 %v11979_v38, %v12359_v58  ;;  %v5565_v54 = vpop.permute.xlu0 %5564  ;;  %v5675_v1 = vmul.f32 %v13916_v7, %v13917_v50  ;;  %v13928_v50 = vld [vmem:[#allocation12_spill] sm:$0xff] }
 0xf4e   :  { %13904 = vst [vmem:[#allocation14_spill] sm:$0xff] %v12361_v32  ;;  %v5743_v52 = vmul.f32 %v11979_v38, %v12361_v32  ;;  %v5641_v31 = vmul.f32 %v5565_v54, %v5481_v57 }
 0xf4f   :  { %5825 = vrot.lane.b32.xlu0 %v5744_v12, %s9763_s19  ;;  %v5488_v12 = vsub.f32 1.0, %v12122_v20 }
 0xf50   :  { %v12372_v40 = vadd.f32 %v5673_v45, %v5641_v31  ;;  %5823 = vrot.lane.b32.xlu1 %v5743_v52, %s9763_s19  ;;  %v13919_v52 = vld [vmem:[#allocation40_spill] sm:$0xff]  ;;  %v13920_v31 = vld [vmem:[#allocation33_spill] sm:$0xff] }
 0xf51   :  { %v5486_v42 = vsub.f32 1.0, %v13919_v52 }
 0xf52   :  { %13907 = vst [vmem:[#allocation21_spill] sm:$0xff] %v12372_v40  ;;  %v5746_v5 = vmul.f32 %v11979_v38, %v12372_v40 }
 0xf54   :  { %5829 = vrot.lane.b32.xlu1 %v5746_v5, %s9763_s19  ;;  %v5680_v5 = vmul.f32 %v12122_v20, %v13920_v31 }
 0xf55   :  { %v5571_v15 = vpop.permute.xlu1 %5570 }
 0xf56   :  { %v5644_v33 = vmul.f32 %v5571_v15, %v5484_v6 }
 0xf58   :  { %v12381_v53 = vadd.f32 %v5676_v30, %v5644_v33  ;;  %v5678_v30 = vmul.f32 %v13919_v52, %v13921_v37 }
 0xf59   :  { %v5567_v21 = vpop.permute.xlu0 %5566 }
 0xf5a   :  { %13909 = vst [vmem:[#allocation28_spill] sm:$0xff] %v12381_v53  ;;  %v5749_v61 = vmul.f32 %v11979_v38, %v12381_v53  ;;  %v5642_v23 = vmul.f32 %v5567_v21, %v5482_v60  ;;  %v5489_v60 = vsub.f32 1.0, %v12129_v26 }
 0xf5c   :  { %v12388_v49 = vadd.f32 %v5674_v13, %v5642_v23  ;;  %5835 = vrot.lane.b32.xlu1 %v5749_v61, %s9763_s19  ;;  %v13924_v13 = vld [vmem:[#allocation24_spill] sm:$0xff] }
 0xf5d   :  { %v5573_v56 = vpop.permute.xlu1 %5572  ;;  %v5681_v20 = vmul.f32 %v12129_v26, %v13924_v13 }
 0xf5e   :  { %13912 = vst [vmem:[#allocation20_spill] sm:$0xff] %v12388_v49  ;;  %v5747_v2 = vmul.f32 %v11979_v38, %v12388_v49  ;;  %v5645_v11 = vmul.f32 %v5573_v56, %v5485_v27  ;;  %v5487_v56 = vsub.f32 1.0, %v12134_v44 }
 0xf60   :  { %v12396_v59 = vadd.f32 %v5677_v19, %v5645_v11  ;;  %5831 = vrot.lane.b32.xlu1 %v5747_v2, %s9763_s19  ;;  %v13926_v19 = vld [vmem:[#allocation32_spill] sm:$0xff] }
 0xf61   :  { %v5569_v46 = vpop.permute.xlu1 %5568  ;;  %v5679_v11 = vmul.f32 %v12134_v44, %v13926_v19  ;;  %v13930_v44 = vld [vmem:[#allocation41_spill] sm:$0xff] }
 0xf62   :  { %13915 = vst [vmem:[#allocation36_spill] sm:$0xff] %v12396_v59  ;;  %v5750_v51 = vmul.f32 %v11979_v38, %v12396_v59  ;;  %v5643_v62 = vmul.f32 %v5569_v46, %v5483_v41  ;;  %v5492_v46 = vsub.f32 1.0, %v12138_v43 }
 0xf64   :  { %v12404_v57 = vadd.f32 %v5675_v1, %v5643_v62  ;;  %5837 = vrot.lane.b32.xlu1 %v5750_v51, %s9763_s19  ;;  %v5684_v1 = vmul.f32 %v12138_v43, %v13928_v50 }
 0xf65   :  { %v5579_v54 = vpop.permute.xlu1 %5578 }
 0xf66   :  { %13918 = vst [vmem:[#allocation9_spill] sm:$0xff] %v12404_v57  ;;  %v5748_v45 = vmul.f32 %v11979_v38, %v12404_v57  ;;  %v5648_v6 = vmul.f32 %v5579_v54, %v5488_v12  ;;  %v5575_v15 = vpop.permute.xlu0 %5574  ;;  %v5490_v54 = vsub.f32 1.0, %v13930_v44 }
 0xf67   :  { %v5646_v33 = vmul.f32 %v5575_v15, %v5486_v42  ;;  %v5493_v15 = vsub.f32 1.0, %v12147_v25 }
 0xf68   :  { %v12415_v47 = vadd.f32 %v5680_v5, %v5648_v6  ;;  %5833 = vrot.lane.b32.xlu1 %v5748_v45, %s9763_s19  ;;  %v13931_v45 = vld [vmem:[#allocation46_spill] sm:$0xff] }
 0xf69   :  { %v12419_v21 = vadd.f32 %v5678_v30, %v5646_v33  ;;  %v5581_v61 = vpop.permute.xlu1 %5580  ;;  %v5682_v31 = vmul.f32 %v13930_v44, %v13931_v45  ;;  %v13933_v30 = vld [vmem:[#allocation27_spill] sm:$0xff] }
 0xf6a   :  { %13922 = vst [vmem:[#allocation37_spill] sm:$0xff] %v12415_v47  ;;  %v5753_v34 = vmul.f32 %v11979_v38, %v12415_v47  ;;  %v5649_v23 = vmul.f32 %v5581_v61, %v5489_v60  ;;  %v5685_v33 = vmul.f32 %v12147_v25, %v13933_v30 }
 0xf6b   :  { %13923 = vst [vmem:[#allocation31_spill] sm:$0xff] %v12419_v21  ;;  %v5751_v17 = vmul.f32 %v11979_v38, %v12419_v21 }
 0xf6c   :  { %v12427_v27 = vadd.f32 %v5681_v20, %v5649_v23  ;;  %5843 = vrot.lane.b32.xlu0 %v5753_v34, %s9763_s19  ;;  %v5491_v34 = vsub.f32 1.0, %v12152_v24  ;;  %v13935_v23 = vld [vmem:[#allocation13_spill] sm:$0xff] }
 0xf6d   :  { %5839 = vrot.lane.b32.xlu1 %v5751_v17, %s9763_s19  ;;  %v5577_v2 = vpop.permute.xlu1 %5576  ;;  %v5683_v17 = vmul.f32 %v12152_v24, %v13935_v23 }
 0xf6e   :  { %13925 = vst [vmem:[#allocation47_spill] sm:$0xff] %v12427_v27  ;;  %v5754_v3 = vmul.f32 %v11979_v38, %v12427_v27  ;;  %v5647_v26 = vmul.f32 %v5577_v2, %v5487_v56 }
 0xf70   :  { %v12436_v7 = vadd.f32 %v5679_v11, %v5647_v26  ;;  %5845 = vrot.lane.b32.xlu0 %v5754_v3, %s9763_s19 }
 0xf72   :  { %13927 = vst [vmem:[#allocation17_spill] sm:$0xff] %v12436_v7  ;;  %v5752_v41 = vmul.f32 %v11979_v38, %v12436_v7 }
 0xf74   :  { %5841 = vrot.lane.b32.xlu0 %v5752_v41, %s9763_s19 }
 0xf75   :  { %v5587_v51 = vpop.permute.xlu0 %5586 }
 0xf76   :  { %v5652_v62 = vmul.f32 %v5587_v51, %v5492_v46 }
 0xf78   :  { %v12445_v12 = vadd.f32 %v5684_v1, %v5652_v62 }
 0xf79   :  { %v5583_v52 = vpop.permute.xlu1 %5582 }
 0xf7a   :  { %13929 = vst [vmem:[#allocation30_spill] sm:$0xff] %v12445_v12  ;;  %v5757_v42 = vmul.f32 %v11979_v38, %v12445_v12  ;;  %v5650_v5 = vmul.f32 %v5583_v52, %v5490_v54 }
 0xf7c   :  { %v12452_v6 = vadd.f32 %v5682_v31, %v5650_v5  ;;  %5851 = vrot.lane.b32.xlu0 %v5757_v42, %s9763_s19 }
 0xf7d   :  { %v5589_v43 = vpop.permute.xlu0 %5588 }
 0xf7e   :  { %13932 = vst [vmem:[#allocation44_spill] sm:$0xff] %v12452_v6  ;;  %v5755_v37 = vmul.f32 %v11979_v38, %v12452_v6  ;;  %v5653_v60 = vmul.f32 %v5589_v43, %v5493_v15  ;;  %v5796_v3 = vpop.permute.xlu1 %5795 }
 0xf80   :  { %v12460_v61 = vadd.f32 %v5685_v33, %v5653_v60  ;;  %5847 = vrot.lane.b32.xlu0 %v5755_v37, %s9763_s19 }
 0xf81   :  { %v5585_v13 = vpop.permute.xlu0 %5584 }
 0xf82   :  { %13934 = vst [vmem:[#allocation16_spill] sm:$0xff] %v12460_v61  ;;  %v5758_v20 = vmul.f32 %v11979_v38, %v12460_v61  ;;  %v5651_v56 = vmul.f32 %v5585_v13, %v5491_v34  ;;  %v5792_v19 = vpop.permute.xlu1 %5791 }
 0xf83   :  { %v5887_v11 = vsel %vm423_vm2, %v5792_v19, 0.0 }
 0xf84   :  { %v12468_v2 = vadd.f32 %v5683_v17, %v5651_v56  ;;  %5853 = vrot.lane.b32.xlu0 %v5758_v20, %s9763_s19 }
 0xf86   :  { %13936 = vst [vmem:[#allocation23_spill] sm:$0xff] %v12468_v2  ;;  %v5756_v25 = vmul.f32 %v11979_v38, %v12468_v2  ;;  %v5798_v41 = vpop.permute.xlu1 %5797  ;;  %v5893_v38 = vsel %vm423_vm2, %v5796_v3, 0.0 }
 0xf87   :  { %v5896_v52 = vsel %vm423_vm2, %v5798_v41, 0.0 }
 0xf88   :  { %5849 = vrot.lane.b32.xlu0 %v5756_v25, %s9763_s19 }
 0xf89   :  { %v5794_v26 = vpop.permute.xlu0 %5793 }
 0xf8a   :  { %v5890_v42 = vsel %vm423_vm2, %v5794_v26, 0.0 }
 0xf8e   :  { %v5804_v51 = vpop.permute.xlu1 %5803 }
 0xf8f   :  { %v5905_v15 = vsel %vm423_vm2, %v5804_v51, 0.0 }
 0xf91   :  { %5888 = vadd.xlane.f32.xlu1 %v5887_v11 }
 0xf92   :  { %v5800_v54 = vpop.permute.xlu1 %5799 }
 0xf93   :  { %v5899_v33 = vsel %vm423_vm2, %v5800_v54, 0.0 }
 0xf96   :  { %v5806_v45 = vpop.permute.xlu1 %5805 }
 0xf97   :  { %v5908_v13 = vsel %vm423_vm2, %v5806_v45, 0.0 }
 0xf9a   :  { %v5802_v30 = vpop.permute.xlu1 %5801 }
 0xf9b   :  { %v5902_v56 = vsel %vm423_vm2, %v5802_v30, 0.0 }
 0xf9e   :  { %v5812_v46 = vpop.permute.xlu0 %5811 }
 0xf9f   :  { %v5917_v24 = vsel %vm423_vm2, %v5812_v46, 0.0  ;;  %v5808_v20 = vpop.permute.xlu1 %5807 }
 0xfa0   :  { %5918 = vadd.xlane.f32.xlu1 %v5917_v24  ;;  %v5911_v19 = vsel %vm423_vm2, %v5808_v20, 0.0 }
 0xfa2   :  { %v5814_v50 = vpop.permute.xlu0 %5813 }
 0xfa3   :  { %v5920_v1 = vsel %vm423_vm2, %v5814_v50, 0.0 }
 0xfa4   :  { %5921 = vadd.xlane.f32.xlu1 %v5920_v1 }
 0xfa6   :  { %v5810_v62 = vpop.permute.xlu0 %5809 }
 0xfa7   :  { %v5914_v44 = vsel %vm423_vm2, %v5810_v62, 0.0  ;;  %5894 = vadd.xlane.f32.xlu0 %v5893_v38 }
 0xfa8   :  { %5915 = vadd.xlane.f32.xlu1 %v5914_v44 }
 0xfab   :  { %5897 = vadd.xlane.f32.xlu0 %v5896_v52 }
 0xfae   :  { %v5820_v31 = vpop.permute.xlu0 %5819 }
 0xfaf   :  { %v5929_v5 = vsel %vm423_vm2, %v5820_v31, 0.0  ;;  %5891 = vadd.xlane.f32.xlu0 %v5890_v42 }
 0xfb0   :  { %5930 = vadd.xlane.f32.xlu1 %v5929_v5 }
 0xfb2   :  { %v5816_v43 = vpop.permute.xlu0 %5815 }
 0xfb3   :  { %v5923_v37 = vsel %vm423_vm2, %v5816_v43, 0.0  ;;  %5906 = vadd.xlane.f32.xlu0 %v5905_v15 }
 0xfb4   :  { %5924 = vadd.xlane.f32.xlu1 %v5923_v37 }
 0xfb6   :  { %v5822_v60 = vpop.permute.xlu0 %5821 }
 0xfb7   :  { %v5932_v34 = vsel %vm423_vm2, %v5822_v60, 0.0  ;;  %5900 = vadd.xlane.f32.xlu0 %v5899_v33 }
 0xfb8   :  { %5933 = vadd.xlane.f32.xlu1 %v5932_v34 }
 0xfba   :  { %v5818_v23 = vpop.permute.xlu0 %5817 }
 0xfbb   :  { %v5926_v17 = vsel %vm423_vm2, %v5818_v23, 0.0  ;;  %5909 = vadd.xlane.f32.xlu0 %v5908_v13  ;;  %v9764_v23 = vmov 0  }
 0xfbc   :  { %5927 = vadd.xlane.f32.xlu1 %v5926_v17  ;;  %8897 = vset.pattern.permute.xlu0 %v9764_v23 }
 0xfbd   :  { %8896 = vset.pattern.permute.xlu1 %v9764_v23 }
 0xfbe   :  { %v5828_v25 = vpop.permute.xlu1 %5827 }
 0xfbf   :  { %5903 = vadd.xlane.f32.xlu0 %v5902_v56  ;;  %v5941_v41 = vsel %vm423_vm2, %v5828_v25, 0.0 }
 0xfc1   :  { %v5826_v3 = vpop.permute.xlu0 %5825 }
 0xfc2   :  { %v5938_v11 = vsel %vm423_vm2, %v5826_v3, 0.0  ;;  %v5824_v26 = vpop.permute.xlu1 %5823 }
 0xfc3   :  { %5939 = vadd.xlane.f32.xlu1 %v5938_v11  ;;  %5912 = vadd.xlane.f32.xlu0 %v5911_v19  ;;  %v5935_v46 = vsel %vm423_vm2, %v5824_v26, 0.0  ;;  %v114_v19 = vld [vmem:[%s13449_s1] sm:$0xff] }
 0xfc4   :  { %vm5983_vm3 = vcmp.gt.f32.partialorder %v114_v19, 0.0  ;;  %v12561_v19 = vld [vmem:[%s13449_s1 + $0x8] sm:$0xff] }
 0xfc5   :  { %vm5984_vm10 = vcmp.gt.f32.partialorder %v12561_v19, 0.0 }
 0xfc6   :  { %v5830_v24 = vpop.permute.xlu1 %5829 }
 0xfc7   :  { %5942 = vadd.xlane.f32.xlu0 %v5941_v41  ;;  %v5944_v51 = vsel %vm423_vm2, %v5830_v24, 0.0 }
 0xfcb   :  { %5936 = vadd.xlane.f32.xlu0 %v5935_v46 }
 0xfce   :  { %v5836_v50 = vpop.permute.xlu1 %5835 }
 0xfcf   :  { %5945 = vadd.xlane.f32.xlu0 %v5944_v51  ;;  %v5953_v43 = vsel %vm423_vm2, %v5836_v50, 0.0 }
 0xfd2   :  { %v5832_v1 = vpop.permute.xlu1 %5831 }
 0xfd3   :  { %v5947_v62 = vsel %vm423_vm2, %v5832_v1, 0.0  ;;  %v124_v1 = vld [vmem:[%s13449_s1 + $0x50] sm:$0xff] }
 0xfd4   :  { %5948 = vadd.xlane.f32.xlu0 %v5947_v62  ;;  %vm5993_vm5 = vcmp.gt.f32.partialorder %v124_v1, 0.0 }
 0xfd6   :  { %v5838_v38 = vpop.permute.xlu1 %5837 }
 0xfd7   :  { %v5956_v33 = vsel %vm423_vm2, %v5838_v38, 0.0  ;;  %v12517_v38 = vld [vmem:[%s13449_s1 + $0x58] sm:$0xff] }
 0xfd8   :  { %vm5994_vm6 = vcmp.gt.f32.partialorder %v12517_v38, 0.0 }
 0xfda   :  { %v5834_v44 = vpop.permute.xlu1 %5833 }
 0xfdb   :  { %v5950_v54 = vsel %vm423_vm2, %v5834_v44, 0.0 }
 0xfdc   :  { %5951 = vadd.xlane.f32.xlu0 %v5950_v54 }
 0xfde   :  { %v5844_v52 = vpop.permute.xlu0 %5843 }
 0xfdf   :  { %v5965_v42 = vsel %vm423_vm2, %v5844_v52, 0.0  ;;  %v5840_v45 = vpop.permute.xlu1 %5839 }
 0xfe0   :  { %v5959_v31 = vsel %vm423_vm2, %v5840_v45, 0.0  ;;  %5966 = vadd.xlane.f32.xlu1 %v5965_v42  ;;  %v12525_v45 = vld [vmem:[%s13449_s1 + $0x10] sm:$0xff] }
 0xfe1   :  { %5960 = vadd.xlane.f32.xlu0 %v5959_v31  ;;  %vm5985_vm7 = vcmp.gt.f32.partialorder %v12525_v45, 0.0 }
 0xfe2   :  { %v5846_v5 = vpop.permute.xlu0 %5845 }
 0xfe3   :  { %v5968_v15 = vsel %vm423_vm2, %v5846_v5, 0.0  ;;  %v12530_v5 = vld [vmem:[%s13449_s1 + $0x48] sm:$0xff] }
 0xfe4   :  { %5969 = vadd.xlane.f32.xlu1 %v5968_v15  ;;  %vm5992_vm8 = vcmp.gt.f32.partialorder %v12530_v5, 0.0 }
 0xfe5   :  { %5954 = vadd.xlane.f32.xlu0 %v5953_v43 }
 0xfe6   :  { %v5842_v37 = vpop.permute.xlu0 %5841 }
 0xfe7   :  { %v5962_v30 = vsel %vm423_vm2, %v5842_v37, 0.0 }
 0xfe8   :  { %5963 = vadd.xlane.f32.xlu1 %v5962_v30 }
 0xfe9   :  { %5957 = vadd.xlane.f32.xlu0 %v5956_v33  ;;  %v12541_v33 = vld [vmem:[%s13449_s1 + $0x18] sm:$0xff] }
 0xfea   :  { %vm5986_vm9 = vcmp.gt.f32.partialorder %v12541_v33, 0.0 }
 0xfee   :  { %v5852_v60 = vpop.permute.xlu0 %5851 }
 0xfef   :  { %v5977_v34 = vsel %vm423_vm2, %v5852_v60, 0.0 }
 0xff0   :  { %5978 = vadd.xlane.f32.xlu1 %v5977_v34 }
 0xff2   :  { %v5848_v13 = vpop.permute.xlu0 %5847 }
 0xff3   :  { %v5971_v20 = vsel %vm423_vm2, %v5848_v13, 0.0 }
 0xff4   :  { %5972 = vadd.xlane.f32.xlu1 %v5971_v20 }
 0xff6   :  { %v5854_v17 = vpop.permute.xlu0 %5853 }
 0xff7   :  { %v5980_v3 = vsel %vm423_vm2, %v5854_v17, 0.0 }
 0xffa   :  { %v5850_v56 = vpop.permute.xlu0 %5849 }
 0xffb   :  { %v5974_v25 = vsel %vm423_vm2, %v5850_v56, 0.0 }
 0xffc   :  { %5975 = vadd.xlane.f32.xlu1 %v5974_v25 }
0x1000   :  { %5981 = vadd.xlane.f32.xlu1 %v5980_v3 }
0x101e   :  { %v5889_v11 = vpop.xlane.xlu1 %5888 }
0x101f   :  { %v6015_v26 = vsel %vm5983_vm3, %v5889_v11, -1e+30 }
0x1020   :  { %v6048_v41 = vsel %vm6047_vm4, %v6015_v26, -inf }
0x1021   :  { %v6049_v46 = vrot.slane %v6048_v41, 4 }
0x1023   :  { %v6050_v24 = vmax.f32 %v6048_v41, %v6049_v46 }
0x1025   :  { %v6051_v51 = vrot.slane %v6050_v24, 2 }
0x1027   :  { %v6052_v50 = vmax.f32 %v6050_v24, %v6051_v51 }
0x1029   :  { %v6053_v62 = vrot.slane %v6052_v50, 1 }
0x102b   :  { %v6054_v44 = vmax.f32 %v6052_v50, %v6053_v62 }
0x102d   :  { %v5919_v54 = vpop.xlane.xlu1 %5918  ;;  %v6272_v15 = vsub.f32 %v5889_v11, %v6054_v44 }
0x102e   :  { %v6025_v52 = vsel %vm5993_vm5, %v5919_v54, -1e+30 }
0x102f   :  { %v6118_v42 = vsel %vm6047_vm4, %v6025_v52, -inf  ;;  %v6304_v23 = vsel %vm5983_vm3, %v6272_v15, -1e+30 }
0x1030   :  { %v6119_v31 = vrot.slane %v6118_v42, 4  ;;  %v6336_v44 = vmul.f32 1.442695, %v6304_v23 }
0x1031   :  { %v12532_v43 = vpop.xlane.xlu1 %5921 }
0x1032   :  { %v6120_v37 = vmax.f32 %v6118_v42, %v6119_v31  ;;  %v6026_v30 = vsel %vm5994_vm6, %v12532_v43, -1e+30  ;;  %9536 = vpow2.f32 %v6336_v44 }
0x1033   :  { %v6125_v60 = vsel %vm6047_vm4, %v6026_v30, -inf }
0x1034   :  { %v6121_v34 = vrot.slane %v6120_v37, 2  ;;  %v6126_v13 = vrot.slane %v6125_v60, 4  ;;  %v12545_v20 = vpop.xlane.xlu0 %5894 }
0x1035   :  { %v6017_v17 = vsel %vm5985_vm7, %v12545_v20, -1e+30  ;;  %v12551_v56 = vpop.xlane.xlu1 %5915 }
0x1036   :  { %v6122_v25 = vmax.f32 %v6120_v37, %v6121_v34  ;;  %v6127_v3 = vmax.f32 %v6125_v60, %v6126_v13  ;;  %v6062_v11 = vsel %vm6047_vm4, %v6017_v17, -inf  ;;  %v6024_v26 = vsel %vm5992_vm8, %v12551_v56, -1e+30  ;;  %v12574_v60 = vld [vmem:[%s13449_s1 + $0x70] sm:$0xff] }
0x1037   :  { %v6063_v41 = vrot.slane %v6062_v11, 4  ;;  %v6111_v46 = vsel %vm6047_vm4, %v6024_v26, -inf  ;;  %vm5997_vm11 = vcmp.gt.f32.partialorder %v12574_v60, 0.0 }
0x1038   :  { %v6123_v24 = vrot.slane %v6122_v25, 1  ;;  %v6128_v51 = vrot.slane %v6127_v3, 2  ;;  %v6112_v50 = vrot.slane %v6111_v46, 4  ;;  %v12564_v62 = vpop.xlane.xlu0 %5897 }
0x1039   :  { %v6064_v52 = vmax.f32 %v6062_v11, %v6063_v41  ;;  %v6018_v42 = vsel %vm5986_vm9, %v12564_v62, -1e+30 }
0x103a   :  { %v6124_v31 = vmax.f32 %v6122_v25, %v6123_v24  ;;  %v6129_v15 = vmax.f32 %v6127_v3, %v6128_v51  ;;  %v6113_v37 = vmax.f32 %v6111_v46, %v6112_v50  ;;  %v6069_v30 = vsel %vm6047_vm4, %v6018_v42, -inf  ;;  %v12587_v46 = vld [vmem:[%s13449_s1 + $0x30] sm:$0xff] }
0x103b   :  { %v6065_v34 = vrot.slane %v6064_v52, 2  ;;  %v6070_v13 = vrot.slane %v6069_v30, 4  ;;  %vm5989_vm12 = vcmp.gt.f32.partialorder %v12587_v46, 0.0 }
0x103c   :  { %v6282_v23 = vsub.f32 %v5919_v54, %v6124_v31  ;;  %v6130_v17 = vrot.slane %v6129_v15, 1  ;;  %v6114_v11 = vrot.slane %v6113_v37, 2  ;;  %v12576_v26 = vpop.xlane.xlu0 %5891  ;;  %v12632_v45 = vpop.eup %9536 }
0x103d   :  { %v6066_v41 = vmax.f32 %v6064_v52, %v6065_v34  ;;  %v6071_v61 = vmax.f32 %v6069_v30, %v6070_v13  ;;  %v6016_v25 = vsel %vm5984_vm10, %v12576_v26, -1e+30  ;;  %v12582_v3 = vpop.xlane.xlu1 %5930  ;;  %v12594_v30 = vld [vmem:[%s13449_s1 + $0x60] sm:$0xff]  ;;  %v6400_v33 = vsel %vm6047_vm4, %v12632_v45, 0.0 }
0x103e   :  { %v6314_v54 = vsel %vm5993_vm5, %v6282_v23, -1e+30  ;;  %v6131_v24 = vmax.f32 %v6129_v15, %v6130_v17  ;;  %v6115_v51 = vmax.f32 %v6113_v37, %v6114_v11  ;;  %v6055_v31 = vsel %vm6047_vm4, %v6016_v25, -inf  ;;  %v12604_v37 = vld [vmem:[%s13449_s1 + $0x20] sm:$0xff] }
0x103f   :  { %v6356_v50 = vmul.f32 1.442695, %v6314_v54  ;;  %v6067_v52 = vrot.slane %v6066_v41, 1  ;;  %v6072_v42 = vrot.slane %v6071_v61, 2  ;;  %v6056_v2 = vrot.slane %v6055_v31, 4 }
0x1040   :  { %v6283_v34 = vsub.f32 %v12532_v43, %v6131_v24  ;;  %v6116_v13 = vrot.slane %v6115_v51, 1  ;;  %v6029_v15 = vsel %vm5997_vm11, %v12582_v3, -1e+30  ;;  %v12608_v11 = vpop.xlane.xlu0 %5906  ;;  %vm5995_vm13 = vcmp.gt.f32.partialorder %v12594_v30, 0.0 }
0x1041   :  { %9538 = vpow2.f32 %v6356_v50  ;;  %v6068_v1 = vmax.f32 %v6066_v41, %v6067_v52  ;;  %v6073_v44 = vmax.f32 %v6071_v61, %v6072_v42  ;;  %v6057_v17 = vmax.f32 %v6055_v31, %v6056_v2  ;;  %v12611_v41 = vpop.xlane.xlu1 %5924  ;;  %v12618_v50 = vld [vmem:[%s13449_s1 + $0x78] sm:$0xff] }
0x1042   :  { %v6315_v23 = vsel %vm5994_vm6, %v6283_v34, -1e+30  ;;  %v6117_v43 = vmax.f32 %v6115_v51, %v6116_v13  ;;  %v6146_v24 = vsel %vm6047_vm4, %v6029_v15, -inf  ;;  %vm5987_vm14 = vcmp.gt.f32.partialorder %v12604_v37, 0.0 }
0x1043   :  { %v6358_v61 = vmul.f32 1.442695, %v6315_v23  ;;  %v6274_v25 = vsub.f32 %v12545_v20, %v6068_v1  ;;  %v6074_v54 = vrot.slane %v6073_v44, 1  ;;  %v6058_v2 = vrot.slane %v6057_v17, 2 }
0x1044   :  { %v6281_v38 = vsub.f32 %v12551_v56, %v6117_v43  ;;  %v6147_v51 = vrot.slane %v6146_v24, 4  ;;  %v6021_v20 = vsel %vm5989_vm12, %v12608_v11, -1e+30  ;;  %vm5998_vm15 = vcmp.gt.f32.partialorder %v12618_v50, 0.0  ;;  %v12637_v5 = vpop.xlane.xlu0 %5900  ;;  %v12776_v50 = vld [vmem:[%s13449_s1 + $0x80] sm:$0xff] }
0x1045   :  { %9540 = vpow2.f32 %v6358_v61  ;;  %v6306_v52 = vsel %vm5985_vm7, %v6274_v25, -1e+30  ;;  %v6075_v42 = vmax.f32 %v6073_v44, %v6074_v54  ;;  %v6059_v13 = vmax.f32 %v6057_v17, %v6058_v2  ;;  %v12639_v17 = vpop.xlane.xlu1 %5933 }
0x1046   :  { %v6340_v31 = vmul.f32 1.442695, %v6306_v52  ;;  %v6313_v34 = vsel %vm5992_vm8, %v6281_v38, -1e+30  ;;  %v6148_v15 = vmax.f32 %v6146_v24, %v6147_v51  ;;  %v6090_v23 = vsel %vm6047_vm4, %v6021_v20, -inf }
0x1047   :  { %v6354_v56 = vmul.f32 1.442695, %v6313_v34  ;;  %v6275_v1 = vsub.f32 %v12564_v62, %v6075_v42  ;;  %v6060_v44 = vrot.slane %v6059_v13, 1  ;;  %v6091_v43 = vrot.slane %v6090_v23, 4 }
0x1048   :  { %9542 = vpow2.f32 %v6340_v31  ;;  %v6027_v61 = vsel %vm5995_vm13, %v12611_v41, -1e+30  ;;  %v6149_v25 = vrot.slane %v6148_v15, 2  ;;  %v6019_v20 = vsel %vm5987_vm14, %v12637_v5, -1e+30 }
0x1049   :  { %9544 = vpow2.f32 %v6354_v56  ;;  %v6307_v62 = vsel %vm5986_vm9, %v6275_v1, -1e+30  ;;  %v6132_v54 = vsel %vm6047_vm4, %v6027_v61, -inf  ;;  %v6061_v38 = vmax.f32 %v6059_v13, %v6060_v44 }
0x104a   :  { %v6342_v24 = vmul.f32 1.442695, %v6307_v62  ;;  %v6092_v2 = vmax.f32 %v6090_v23, %v6091_v43  ;;  %v6133_v51 = vrot.slane %v6132_v54, 4  ;;  %v6150_v42 = vmax.f32 %v6148_v15, %v6149_v25 }
0x104b   :  { %v12644_v52 = vpop.eup %9538  ;;  %v6030_v31 = vsel %vm5998_vm15, %v12639_v17, -1e+30  ;;  %v6273_v56 = vsub.f32 %v12576_v26, %v6061_v38  ;;  %v6076_v23 = vsel %vm6047_vm4, %v6019_v20, -inf  ;;  %v6401_v25 = vrot.slane %v6400_v33, 4 }
0x104c   :  { %v6470_v34 = vsel %vm6047_vm4, %v12644_v52, 0.0  ;;  %9546 = vpow2.f32 %v6342_v24  ;;  %v6093_v13 = vrot.slane %v6092_v2, 2  ;;  %v6151_v1 = vrot.slane %v6150_v42, 1 }
0x104d   :  { %v6134_v15 = vmax.f32 %v6132_v54, %v6133_v51  ;;  %v6077_v43 = vrot.slane %v6076_v23, 4  ;;  %v6153_v61 = vsel %vm6047_vm4, %v6030_v31, -inf  ;;  %v6471_v59 = vrot.slane %v6470_v34, 4  ;;  %v12669_v51 = vld [vmem:[%s13449_s1 + $0x38] sm:$0xff] }
0x104e   :  { %v6094_v44 = vmax.f32 %v6092_v2, %v6093_v13  ;;  %v6152_v6 = vmax.f32 %v6150_v42, %v6151_v1  ;;  %v6305_v54 = vsel %vm5984_vm10, %v6273_v56, -1e+30  ;;  %v6154_v2 = vrot.slane %v6153_v61, 4 }
0x104f   :  { %v12659_v62 = vpop.eup %9540  ;;  %v6135_v12 = vrot.slane %v6134_v15, 2  ;;  %v6078_v21 = vmax.f32 %v6076_v23, %v6077_v43  ;;  %v6402_v23 = vadd.f32 %v6401_v25, %v6400_v33  ;;  %v6472_v56 = vadd.f32 %v6471_v59, %v6470_v34 }
0x1050   :  { %v6477_v24 = vsel %vm6047_vm4, %v12659_v62, 0.0  ;;  %v6095_v53 = vrot.slane %v6094_v44, 1  ;;  %v6286_v38 = vsub.f32 %v12582_v3, %v6152_v6  ;;  %v6338_v43 = vmul.f32 1.442695, %v6305_v54  ;;  %v12679_v3 = vpop.xlane.xlu0 %5909 }
0x1051   :  { %v6478_v26 = vrot.slane %v6477_v24, 4  ;;  %v6136_v31 = vmax.f32 %v6134_v15, %v6135_v12  ;;  %v6079_v13 = vrot.slane %v6078_v21, 2  ;;  %vm5990_vm0 = vcmp.gt.f32.partialorder %v12669_v51, 0.0 }
0x1052   :  { %v12671_v42 = vpop.eup %9542  ;;  %v6096_v20 = vmax.f32 %v6094_v44, %v6095_v53  ;;  %v6318_v19 = vsel %vm5997_vm11, %v6286_v38, -1e+30  ;;  %v12684_v53 = vld [vmem:[%s13449_s1 + $0x68] sm:$0xff]  ;;  %v6155_v60 = vmax.f32 %v6153_v61, %v6154_v2  ;;  %v6403_v54 = vrot.slane %v6402_v23, 2 }
0x1053   :  { %v12673_v1 = vpop.eup %9544  ;;  %v6479_v12 = vadd.f32 %v6478_v26, %v6477_v24  ;;  %v6414_v33 = vsel %vm6047_vm4, %v12671_v42, 0.0  ;;  %v6137_v15 = vrot.slane %v6136_v31, 1  ;;  %v6080_v25 = vmax.f32 %v6078_v21, %v6079_v13  ;;  %v12703_v21 = vld [vmem:[%s13449_s1 + $0x28] sm:$0xff]  ;;  %v12708_v13 = vld [vmem:[%s13449_s1 + $0x40] sm:$0xff] }
0x1054   :  { %13937 = vst [vmem:[#allocation10_spill] sm:$0xff] %v12673_v1  ;;  %v6278_v6 = vsub.f32 %v12608_v11, %v6096_v20  ;;  %v6463_v59 = vsel %vm6047_vm4, %v12673_v1, 0.0  ;;  %v6364_v11 = vmul.f32 1.442695, %v6318_v19  ;;  %v6022_v24 = vsel %vm5990_vm0, %v12679_v3, -1e+30  ;;  %v12698_v20 = vpop.xlane.xlu1 %5927 }
0x1055   :  { %vm5996_vm1 = vcmp.gt.f32.partialorder %v12684_v53, 0.0  ;;  %v6473_v26 = vrot.slane %v6472_v56, 2  ;;  %9548 = vpow2.f32 %v6338_v43  ;;  %v6138_v61 = vmax.f32 %v6136_v31, %v6137_v15  ;;  %v12713_v15 = vpop.xlane.xlu0 %5903 }
0x1056   :  { %v12688_v44 = vpop.eup %9546  ;;  %v6310_v34 = vsel %vm5989_vm12, %v6278_v6, -1e+30  ;;  %v6081_v2 = vrot.slane %v6080_v25, 1  ;;  %v6480_v57 = vrot.slane %v6479_v12, 2  ;;  %v6415_v19 = vrot.slane %v6414_v33, 4 }
0x1057   :  { %v6348_v38 = vmul.f32 1.442695, %v6310_v34  ;;  %v6464_v49 = vrot.slane %v6463_v59, 4  ;;  %v6156_v46 = vrot.slane %v6155_v60, 2  ;;  %v6421_v31 = vsel %vm6047_vm4, %v12688_v44, 0.0 }
0x1058   :  { %9550 = vpow2.f32 %v6364_v11  ;;  %v6284_v43 = vsub.f32 %v12611_v41, %v6138_v61  ;;  %v6082_v6 = vmax.f32 %v6080_v25, %v6081_v2  ;;  %v6097_v7 = vsel %vm6047_vm4, %v6022_v24, -inf  ;;  %v12728_v41 = vld [vmem:[%s13449_s1 + $0x88] sm:$0xff] }
0x1059   :  { %9552 = vpow2.f32 %v6348_v38  ;;  %v6157_v34 = vmax.f32 %v6155_v60, %v6156_v46  ;;  %v6028_v58 = vsel %vm5996_vm1, %v12698_v20, -1e+30  ;;  %v12719_v27 = vadd.f32 %v6403_v54, %v6402_v23 }
0x105a   :  { %v6316_v40 = vsel %vm5995_vm13, %v6284_v43, -1e+30  ;;  %vm5988_vm3 = vcmp.gt.f32.partialorder %v12703_v21, 0.0  ;;  %vm5991_vm5 = vcmp.gt.f32.partialorder %v12708_v13, 0.0  ;;  %v6416_v60 = vadd.f32 %v6415_v19, %v6414_v33  ;;  %v12740_v33 = vld [vmem:[%s13449_s1 + $0x90] sm:$0xff]  ;;  %v12770_v43 = vpop.xlane.xlu1 %5939 }
0x105b   :  { %v6422_v11 = vrot.slane %v6421_v31, 4  ;;  %v6360_v25 = vmul.f32 1.442695, %v6316_v40  ;;  %v6276_v38 = vsub.f32 %v12637_v5, %v6082_v6  ;;  %v12731_v24 = vadd.f32 %v6473_v26, %v6472_v56  ;;  %v12744_v26 = vpop.xlane.xlu0 %5912 }
0x105c   :  { %v6158_v23 = vrot.slane %v6157_v34, 1  ;;  %v6098_v54 = vrot.slane %v6097_v7, 4  ;;  %v6139_v30 = vsel %vm6047_vm4, %v6028_v58, -inf  ;;  %v12734_v61 = vadd.f32 %v6480_v57, %v6479_v12 }
0x105d   :  { %v6465_v2 = vadd.f32 %v6464_v49, %v6463_v59  ;;  %v6140_v46 = vrot.slane %v6139_v30, 4  ;;  %vm6000_vm6 = vcmp.gt.f32.partialorder %v12728_v41, 0.0  ;;  %9554 = vpow2.f32 %v6360_v25 }
0x105e   :  { %v6308_v40 = vsel %vm5987_vm14, %v6276_v38, -1e+30  ;;  %v6159_v5 = vmax.f32 %v6157_v34, %v6158_v23  ;;  %v6099_v56 = vmax.f32 %v6097_v7, %v6098_v54  ;;  %v6417_v58 = vrot.slane %v6416_v60, 2 }
0x105f   :  { %v6423_v57 = vadd.f32 %v6422_v11, %v6421_v31  ;;  %v6141_v12 = vmax.f32 %v6139_v30, %v6140_v46  ;;  %v6020_v49 = vsel %vm5988_vm3, %v12713_v15, -1e+30  ;;  %v12749_v59 = vpop.eup %9548  ;;  %vm6001_vm7 = vcmp.gt.f32.partialorder %v12740_v33, 0.0 }
0x1060   :  { %v6287_v37 = vsub.f32 %v12639_v17, %v6159_v5  ;;  %v6100_v6 = vrot.slane %v6099_v56, 2  ;;  %v6344_v7 = vmul.f32 1.442695, %v6308_v40  ;;  %v6083_v31 = vsel %vm6047_vm4, %v6020_v49, -inf }
0x1061   :  { %v6142_v34 = vrot.slane %v6141_v12, 2  ;;  %v6023_v11 = vsel %vm5991_vm5, %v12744_v26, -1e+30  ;;  %v6466_v23 = vrot.slane %v6465_v2, 2  ;;  %v12766_v46 = vadd.f32 %v6417_v58, %v6416_v60 }
0x1062   :  { %v12759_v25 = vpop.eup %9550  ;;  %v6319_v54 = vsel %vm5998_vm15, %v6287_v37, -1e+30  ;;  %v6101_v17 = vmax.f32 %v6099_v56, %v6100_v6  ;;  %v6424_v40 = vrot.slane %v6423_v57, 2  ;;  %v6407_v5 = vsel %vm6047_vm4, %v12749_v59, 0.0  ;;  %v12780_v37 = vpop.xlane.xlu0 %5942 }
0x1063   :  { %v12764_v30 = vpop.eup %9552  ;;  %v6143_v49 = vmax.f32 %v6141_v12, %v6142_v34  ;;  %v6366_v19 = vmul.f32 1.442695, %v6319_v54  ;;  %v6084_v32 = vrot.slane %v6083_v31, 4  ;;  %v6104_v38 = vsel %vm6047_vm4, %v6023_v11, -inf }
0x1064   :  { %v6102_v47 = vrot.slane %v6101_v17, 1  ;;  %v6498_v60 = vsel %vm6047_vm4, %v12759_v25, 0.0  ;;  %9556 = vpow2.f32 %v6344_v7  ;;  %v6105_v58 = vrot.slane %v6104_v38, 4 }
0x1065   :  { %v6144_v56 = vrot.slane %v6143_v49, 1  ;;  %v6442_v12 = vsel %vm6047_vm4, %v12764_v30, 0.0  ;;  %v6085_v34 = vmax.f32 %v6083_v31, %v6084_v32  ;;  %v6032_v11 = vsel %vm6000_vm6, %v12770_v43, -1e+30  ;;  %v12795_v32 = vld [vmem:[%s13449_s1 + $0x98] sm:$0xff] }
0x1066   :  { %v6103_v6 = vmax.f32 %v6101_v17, %v6102_v47  ;;  %v6408_v54 = vrot.slane %v6407_v5, 4  ;;  %v6106_v48 = vmax.f32 %v6104_v38, %v6105_v58  ;;  %v6167_v29 = vsel %vm6047_vm4, %v6032_v11, -inf }
0x1067   :  { %v6145_v10 = vmax.f32 %v6143_v49, %v6144_v56  ;;  %vm5999_vm8 = vcmp.gt.f32.partialorder %v12776_v50, 0.0  ;;  %v12789_v7 = vpop.eup %9554  ;;  %v6499_v9 = vrot.slane %v6498_v60, 4  ;;  %9558 = vpow2.f32 %v6366_v19 }
0x1068   :  { %v6279_v16 = vsub.f32 %v12679_v3, %v6103_v6  ;;  %v6086_v28 = vrot.slane %v6085_v34, 2  ;;  %v12797_v47 = vadd.f32 %v6466_v23, %v6465_v2  ;;  %v6443_v31 = vrot.slane %v6442_v12, 4  ;;  %v12810_v23 = vpop.xlane.xlu0 %5936 }
0x1069   :  { %v6285_v38 = vsub.f32 %v12698_v20, %v6145_v10  ;;  %v6107_v17 = vrot.slane %v6106_v48, 2  ;;  %v6168_v58 = vrot.slane %v6167_v29, 4  ;;  %v12803_v3 = vadd.f32 %v6424_v40, %v6423_v57 }
0x106a   :  { %v6311_v56 = vsel %vm5990_vm0, %v6279_v16, -1e+30  ;;  %v6087_v19 = vmax.f32 %v6085_v34, %v6086_v28  ;;  %v6484_v6 = vsel %vm6047_vm4, %v12789_v7, 0.0  ;;  %v6033_v2 = vsel %vm6001_vm7, %v12780_v37, -1e+30  ;;  %v12818_v34 = vld [vmem:[%s13449_s1 + $0xa0] sm:$0xff] }
0x106b   :  { %v6350_v11 = vmul.f32 1.442695, %v6311_v56  ;;  %vm6002_vm9 = vcmp.gt.f32.partialorder %v12795_v32, 0.0  ;;  %v6409_v10 = vadd.f32 %v6408_v54, %v6407_v5  ;;  %v6500_v20 = vadd.f32 %v6499_v9, %v6498_v60 }
0x106c   :  { %v6088_v51 = vrot.slane %v6087_v19, 1  ;;  %v6108_v16 = vmax.f32 %v6106_v48, %v6107_v17  ;;  %v6444_v28 = vadd.f32 %v6443_v31, %v6442_v12  ;;  %v6317_v57 = vsel %vm5996_vm1, %v6285_v38, -1e+30  ;;  %v12830_v38 = vld [vmem:[%s13449_s1 + $0xa8] sm:$0xff] }
0x106d   :  { %9560 = vpow2.f32 %v6350_v11  ;;  %v6169_v40 = vmax.f32 %v6167_v29, %v6168_v58  ;;  %v6485_v56 = vrot.slane %v6484_v6, 4  ;;  %v6174_v63 = vsel %vm6047_vm4, %v6033_v2, -inf  ;;  %v12832_v2 = vpop.xlane.xlu0 %5945 }
0x106e   :  { %v6089_v49 = vmax.f32 %v6087_v19, %v6088_v51  ;;  %v6109_v4 = vrot.slane %v6108_v16, 1  ;;  %v12821_v5 = vpop.eup %9556  ;;  %v6175_v53 = vrot.slane %v6174_v63, 4  ;;  %v6410_v12 = vrot.slane %v6409_v10, 2 }
0x106f   :  { %v6170_v60 = vrot.slane %v6169_v40, 2  ;;  %v6362_v29 = vmul.f32 1.442695, %v6317_v57  ;;  %vm6003_vm10 = vcmp.gt.f32.partialorder %v12818_v34, 0.0  ;;  %v6501_v17 = vrot.slane %v6500_v20, 2 }
0x1070   :  { %v6277_v54 = vsub.f32 %v12713_v15, %v6089_v49  ;;  %v6110_v31 = vmax.f32 %v6108_v16, %v6109_v4  ;;  %v6445_v19 = vrot.slane %v6444_v28, 2  ;;  %v6176_v11 = vmax.f32 %v6174_v63, %v6175_v53 }
0x1071   :  { %v6171_v58 = vmax.f32 %v6169_v40, %v6170_v60  ;;  %v12834_v51 = vpop.eup %9558  ;;  %v6486_v48 = vadd.f32 %v6485_v56, %v6484_v6  ;;  %v6031_v49 = vsel %vm5999_vm8, %v12810_v23, -1e+30  ;;  %v6428_v16 = vsel %vm6047_vm4, %v12821_v5, 0.0  ;;  %v12862_v39 = vpop.xlane.xlu0 %5948 }
0x1072   :  { %v6309_v15 = vsel %vm5988_vm3, %v6277_v54, -1e+30  ;;  %v6280_v4 = vsub.f32 %v12744_v26, %v6110_v31  ;;  %v6177_v63 = vrot.slane %v6176_v11, 2  ;;  %vm6004_vm11 = vcmp.gt.f32.partialorder %v12830_v38, 0.0 }
0x1073   :  { %v6346_v57 = vmul.f32 1.442695, %v6309_v15  ;;  %v6172_v40 = vrot.slane %v6171_v58, 1  ;;  %9562 = vpow2.f32 %v6362_v29  ;;  %v6160_v21 = vsel %vm6047_vm4, %v6031_v49, -inf }
0x1074   :  { %v6312_v6 = vsel %vm5991_vm5, %v6280_v4, -1e+30  ;;  %v13938_v26 = vrot.slane %v12719_v27, 1  ;;  %v6505_v60 = vsel %vm6047_vm4, %v12834_v51, 0.0  ;;  %v6178_v31 = vmax.f32 %v6176_v11, %v6177_v63 }
0x1075   :  { %9564 = vpow2.f32 %v6346_v57  ;;  %v6352_v53 = vmul.f32 1.442695, %v6312_v6  ;;  %v6173_v54 = vmax.f32 %v6171_v58, %v6172_v40  ;;  %v6161_v15 = vrot.slane %v6160_v21, 4 }
0x1076   :  { %v6406_v56 = vadd.f32 %v13938_v26, %v12719_v27  ;;  %v6034_v13 = vsel %vm6002_vm9, %v12832_v2, -1e+30  ;;  %v12858_v4 = vadd.f32 %v6410_v12, %v6409_v10  ;;  %v6429_v49 = vrot.slane %v6428_v16, 4  ;;  %v12871_v10 = vld [vmem:[%s13449_s1 + $0xd0] sm:$0xff] }
0x1077   :  { %v12856_v29 = vpop.eup %9560  ;;  %v6289_v27 = vsub.f32 %v12770_v43, %v6173_v54  ;;  %v6181_v26 = vsel %vm6047_vm4, %v6034_v13, -inf  ;;  %v6506_v57 = vrot.slane %v6505_v60, 4  ;;  %v6179_v58 = vrot.slane %v6178_v31, 1 }
0x1078   :  { %v6624_v9 = vmax.f32 %v6406_v56, 1e-20  ;;  %v6162_v11 = vmax.f32 %v6160_v21, %v6161_v15  ;;  %v12864_v40 = vadd.f32 %v6501_v17, %v6500_v20  ;;  %v12866_v63 = vadd.f32 %v6445_v19, %v6444_v28  ;;  %v12880_v17 = vpop.xlane.xlu0 %5951 }
0x1079   :  { %v6487_v6 = vrot.slane %v6486_v48, 2  ;;  %v6182_v56 = vrot.slane %v6181_v26, 4  ;;  %v6449_v43 = vsel %vm6047_vm4, %v12856_v29, 0.0  ;;  %v6180_v12 = vmax.f32 %v6178_v31, %v6179_v58 }
0x107a   :  { %9566 = vrcp.f32 %v6624_v9  ;;  %v6163_v54 = vrot.slane %v6162_v11, 2  ;;  %v6430_v13 = vadd.f32 %v6429_v49, %v6428_v16  ;;  %v6321_v20 = vsel %vm6000_vm6, %v6289_v27, -1e+30  ;;  %v12889_v49 = vld [vmem:[%s13449_s1 + $0xc0] sm:$0xff] }
0x107b   :  { %9568 = vpow2.f32 %v6352_v53  ;;  %v6183_v9 = vmax.f32 %v6181_v26, %v6182_v56  ;;  %v6035_v28 = vsel %vm6003_vm10, %v12862_v39, -1e+30  ;;  %v6507_v19 = vadd.f32 %v6506_v57, %v6505_v60 }
0x107c   :  { %v6290_v21 = vsub.f32 %v12780_v37, %v6180_v12  ;;  %v6164_v15 = vmax.f32 %v6162_v11, %v6163_v54  ;;  %v6188_v36 = vsel %vm6047_vm4, %v6035_v28, -inf  ;;  %vm6009_vm12 = vcmp.gt.f32.partialorder %v12871_v10, 0.0 }
0x107d   :  { %v6450_v53 = vrot.slane %v6449_v43, 4  ;;  %v6184_v41 = vrot.slane %v6183_v9, 2  ;;  %v6189_v31 = vrot.slane %v6188_v36, 4  ;;  %v12891_v27 = vpop.eup %9562  ;;  %v6370_v37 = vmul.f32 1.442695, %v6321_v20 }
0x107e   :  { %v6165_v26 = vrot.slane %v6164_v15, 1  ;;  %v6036_v57 = vsel %vm6004_vm11, %v12880_v17, -1e+30  ;;  %v12900_v56 = vadd.f32 %v6487_v6, %v6486_v48  ;;  %v6431_v12 = vrot.slane %v6430_v13, 2 }
0x107f   :  { %v12897_v58 = vpop.eup %9564  ;;  %v6185_v54 = vmax.f32 %v6183_v9, %v6184_v41  ;;  %v6508_v28 = vrot.slane %v6507_v19, 2  ;;  %v6322_v16 = vsel %vm6001_vm7, %v6290_v21, -1e+30  ;;  %v6190_v60 = vmax.f32 %v6188_v36, %v6189_v31  ;;  %v12914_v9 = vld [vmem:[%s13449_s1 + $0xd8] sm:$0xff] }
0x1080   :  { %v6166_v0 = vmax.f32 %v6164_v15, %v6165_v26  ;;  %vm6007_vm13 = vcmp.gt.f32.partialorder %v12889_v49, 0.0  ;;  %v6451_v20 = vadd.f32 %v6450_v53, %v6449_v43  ;;  %v6491_v18 = vsel %vm6047_vm4, %v12891_v27, 0.0 }
0x1081   :  { %v6195_v55 = vsel %vm6047_vm4, %v6036_v57, -inf  ;;  %v13939_v48 = vrot.slane %v12734_v61, 1  ;;  %9570 = vpow2.f32 %v6370_v37  ;;  %v6186_v21 = vrot.slane %v6185_v54, 1  ;;  %v12931_v57 = vpop.xlane.xlu1 %5966 }
0x1082   :  { %v6288_v36 = vsub.f32 %v12810_v23, %v6166_v0  ;;  %v6191_v43 = vrot.slane %v6190_v60, 2  ;;  %v12917_v15 = vadd.f32 %v6431_v12, %v6430_v13  ;;  %v6435_v53 = vsel %vm6047_vm4, %v12897_v58, 0.0 }
0x1083   :  { %v6483_v6 = vadd.f32 %v13939_v48, %v12734_v61  ;;  %v6372_v41 = vmul.f32 1.442695, %v6322_v16  ;;  %v12925_v61 = vld [vmem:[%s13449_s1 + $0xb0] sm:$0xff]  ;;  %v6187_v23 = vmax.f32 %v6185_v54, %v6186_v21  ;;  %v6196_v13 = vrot.slane %v6195_v55, 4 }
0x1084   :  { %v9567_v33 = vpop.eup %9566  ;;  %v6320_v0 = vsel %vm5999_vm8, %v6288_v36, -1e+30  ;;  %v6192_v37 = vmax.f32 %v6190_v60, %v6191_v43  ;;  %vm6010_vm14 = vcmp.gt.f32.partialorder %v12914_v9, 0.0  ;;  %v12934_v16 = vadd.f32 %v6508_v28, %v6507_v19 }
0x1085   :  { %v6688_v31 = vmul.f32 %v9567_v33, %v12632_v45  ;;  %v12927_v26 = vpop.eup %9568  ;;  %v6492_v45 = vrot.slane %v6491_v18, 4  ;;  %v6368_v12 = vmul.f32 1.442695, %v6320_v0  ;;  %v6635_v48 = vmax.f32 %v6483_v6, 1e-20 }
0x1086   :  { %v6452_v33 = vrot.slane %v6451_v20, 2  ;;  %v6291_v11 = vsub.f32 %v12832_v2, %v6187_v23  ;;  %v6193_v35 = vrot.slane %v6192_v37, 1  ;;  %v6197_v22 = vmax.f32 %v6195_v55, %v6196_v13  ;;  %v12945_v2 = vpop.xlane.xlu0 %5960 }
0x1087   :  { %6722 = vperm.xlu0 %8897, %v6688_v31   ;;  %vm6005_vm15 = vcmp.gt.f32.partialorder %v12925_v61, 0.0  ;;  %v6436_v50 = vrot.slane %v6435_v53, 4  ;;  %v6456_v60 = vsel %vm6047_vm4, %v12927_v26, 0.0  ;;  %9572 = vpow2.f32 %v6372_v41 }
0x1088   :  { %v6041_v19 = vsel %vm6009_vm12, %v12931_v57, -1e+30  ;;  %9574 = vpow2.f32 %v6368_v12  ;;  %v6323_v54 = vsel %vm6002_vm9, %v6291_v11, -1e+30  ;;  %v6194_v28 = vmax.f32 %v6192_v37, %v6193_v35  ;;  %v12958_v37 = vld [vmem:[%s13449_s1 + $0xc8] sm:$0xff]  ;;  %v12966_v12 = vpop.xlane.xlu1 %5969 }
0x1089   :  { %v6198_v6 = vrot.slane %v6197_v22, 2  ;;  %v6374_v21 = vmul.f32 1.442695, %v6323_v54  ;;  %9576 = vrcp.f32 %v6635_v48  ;;  %v6493_v43 = vadd.f32 %v6492_v45, %v6491_v18 }
0x108a   :  { %v6292_v41 = vsub.f32 %v12862_v39, %v6194_v28  ;;  %v6230_v0 = vsel %vm6047_vm4, %v6041_v19, -inf  ;;  %v6457_v32 = vrot.slane %v6456_v60, 4  ;;  %v6039_v35 = vsel %vm6007_vm13, %v12945_v2, -1e+30 }
0x108b   :  { %v6199_v31 = vmax.f32 %v6197_v22, %v6198_v6  ;;  %v6231_v11 = vrot.slane %v6230_v0, 4  ;;  %v12960_v13 = vpop.eup %9570  ;;  %v12962_v18 = vadd.f32 %v6452_v33, %v6451_v20  ;;  %v6437_v39 = vadd.f32 %v6436_v50, %v6435_v53  ;;  %v12972_v33 = vpop.xlane.xlu0 %5954 }
0x108c   :  { %13940 = vst [vmem:[#allocation48_spill] sm:$0xff] %v12960_v13  ;;  %v6324_v22 = vsel %vm6003_vm10, %v6292_v41, -1e+30  ;;  %9578 = vpow2.f32 %v6374_v21  ;;  %v6216_v54 = vsel %vm6047_vm4, %v6039_v35, -inf  ;;  %v6494_v28 = vrot.slane %v6493_v43, 2 }
0x108d   :  { %v6200_v45 = vrot.slane %v6199_v31, 1  ;;  %v6376_v48 = vmul.f32 1.442695, %v6324_v22  ;;  %v6232_v19 = vmax.f32 %v6230_v0, %v6231_v11  ;;  %v6217_v23 = vrot.slane %v6216_v54, 4 }
0x108e   :  { %v13941_v36 = vrot.slane %v12766_v46, 1  ;;  %vm6008_vm0 = vcmp.gt.f32.partialorder %v12958_v37, 0.0  ;;  %v6458_v34 = vadd.f32 %v6457_v32, %v6456_v60  ;;  %v6519_v53 = vsel %vm6047_vm4, %v12960_v13, 0.0  ;;  %v12990_v32 = vld [vmem:[%s13449_s1 + $0xb8] sm:$0xff] }
0x108f   :  { %v6201_v6 = vmax.f32 %v6199_v31, %v6200_v45  ;;  %v6233_v50 = vrot.slane %v6232_v19, 2  ;;  %v6042_v21 = vsel %vm6010_vm14, %v12966_v12, -1e+30  ;;  %9580 = vpow2.f32 %v6376_v48 }
0x1090   :  { %v6420_v20 = vadd.f32 %v13941_v36, %v12766_v46  ;;  %v6218_v31 = vmax.f32 %v6216_v54, %v6217_v23  ;;  %v6438_v46 = vrot.slane %v6437_v39, 2  ;;  %v6237_v35 = vsel %vm6047_vm4, %v6042_v21, -inf }
0x1091   :  { %v6293_v41 = vsub.f32 %v12880_v17, %v6201_v6  ;;  %v12981_v11 = vpop.eup %9572  ;;  %v6234_v36 = vmax.f32 %v6232_v19, %v6233_v50  ;;  %v6037_v60 = vsel %vm6005_vm15, %v12972_v33, -1e+30  ;;  %v6459_v19 = vrot.slane %v6458_v34, 2 }
0x1092   :  { %v6626_v0 = vmax.f32 %v6420_v20, 1e-20  ;;  %13942 = vst [vmem:[#allocation22_spill] sm:$0xff] %v12981_v11  ;;  %v12992_v22 = vpop.eup %9574  ;;  %v6219_v45 = vrot.slane %v6218_v31, 2  ;;  %v6520_v54 = vrot.slane %v6519_v53, 4  ;;  %v6238_v55 = vrot.slane %v6237_v35, 4 }
0x1093   :  { %13943 = vst [vmem:[#allocation38_spill] sm:$0xff] %v12992_v22  ;;  %v6325_v23 = vsel %vm6004_vm11, %v6293_v41, -1e+30  ;;  %v9577_v48 = vpop.eup %9576  ;;  %v6235_v20 = vrot.slane %v6234_v36, 1  ;;  %v6202_v14 = vsel %vm6047_vm4, %v6037_v60, -inf  ;;  %vm6006_vm1 = vcmp.gt.f32.partialorder %v12990_v32, 0.0 }
0x1094   :  { %9582 = vrcp.f32 %v6626_v0  ;;  %v6378_v6 = vmul.f32 1.442695, %v6325_v23  ;;  %v6699_v50 = vmul.f32 %v9577_v48, %v12659_v62  ;;  %v6220_v21 = vmax.f32 %v6218_v31, %v6219_v45  ;;  %v13008_v23 = vpop.xlane.xlu1 %5963 }
0x1095   :  { %v13000_v8 = vadd.f32 %v6494_v28, %v6493_v43  ;;  %v13002_v17 = vadd.f32 %v6438_v46, %v6437_v39  ;;  %v6526_v38 = vsel %vm6047_vm4, %v12981_v11, 0.0  ;;  %v6236_v41 = vmax.f32 %v6234_v36, %v6235_v20  ;;  %v13031_v11 = vpop.xlane.xlu0 %5957 }
0x1096   :  { %v6512_v0 = vsel %vm6047_vm4, %v12992_v22, 0.0  ;;  %9584 = vpow2.f32 %v6378_v6  ;;  %6777 = vperm.xlu0 %8897, %v6699_v50   ;;  %v6239_v62 = vmax.f32 %v6237_v35, %v6238_v55  ;;  %v6203_v31 = vrot.slane %v6202_v14, 4  ;;  %v13010_v60 = vpop.eup %9578 }
0x1097   :  { %13944 = vst [vmem:[#allocation45_spill] sm:$0xff] %v13010_v60  ;;  %v6521_v45 = vadd.f32 %v6520_v54, %v6519_v53  ;;  %v6298_v43 = vsub.f32 %v12931_v57, %v6236_v41  ;;  %v6221_v39 = vrot.slane %v6220_v21, 1  ;;  %v13945_v28 = vrot.slane %v12803_v3, 1 }
0x1098   :  { %v13016_v36 = vadd.f32 %v6459_v19, %v6458_v34  ;;  %v6527_v48 = vrot.slane %v6526_v38, 4  ;;  %v6240_v20 = vrot.slane %v6239_v62, 2  ;;  %v6204_v6 = vmax.f32 %v6202_v14, %v6203_v31 }
0x1099   :  { %v6427_v46 = vadd.f32 %v13945_v28, %v12803_v3  ;;  %v6513_v35 = vrot.slane %v6512_v0, 4  ;;  %v6330_v50 = vsel %vm6009_vm12, %v6298_v43, -1e+30  ;;  %v6040_v57 = vsel %vm6008_vm0, %v13008_v23, -1e+30  ;;  %v13024_v53 = vpop.eup %9580 }
0x109a   :  { %v6533_v3 = vsel %vm6047_vm4, %v13010_v60, 0.0  ;;  %v6241_v34 = vmax.f32 %v6239_v62, %v6240_v20  ;;  %v6522_v14 = vrot.slane %v6521_v45, 2  ;;  %v6388_v41 = vmul.f32 1.442695, %v6330_v50 }
0x109b   :  { %v6627_v19 = vmax.f32 %v6427_v46, 1e-20  ;;  %v6222_v31 = vmax.f32 %v6220_v21, %v6221_v39  ;;  %v6205_v28 = vrot.slane %v6204_v6, 2  ;;  %v6461_v10 = vrot.slane %v13016_v36, 1 }
0x109c   :  { %v6528_v43 = vadd.f32 %v6527_v48, %v6526_v38  ;;  %v6242_v13 = vrot.slane %v6241_v34, 1  ;;  %v6223_v22 = vsel %vm6047_vm4, %v6040_v57, -inf  ;;  %v6514_v1 = vadd.f32 %v6513_v35, %v6512_v0 }
0x109d   :  { %v6534_v54 = vrot.slane %v6533_v3, 4  ;;  %v6540_v60 = vsel %vm6047_vm4, %v13024_v53, 0.0  ;;  %v6206_v20 = vmax.f32 %v6204_v6, %v6205_v28  ;;  %9586 = vrcp.f32 %v6627_v19 }
0x109e   :  { %v9583_v55 = vpop.eup %9582  ;;  %v6243_v46 = vmax.f32 %v6241_v34, %v6242_v13  ;;  %v6224_v21 = vrot.slane %v6223_v22, 4  ;;  %v13036_v39 = vadd.f32 %v6522_v14, %v6521_v45  ;;  %9588 = vpow2.f32 %v6388_v41 }
0x109f   :  { %v6690_v62 = vmul.f32 %v9583_v55, %v12671_v42  ;;  %v6296_v38 = vsub.f32 %v12945_v2, %v6222_v31  ;;  %v6038_v0 = vsel %vm6006_vm1, %v13031_v11, -1e+30  ;;  %v6529_v35 = vrot.slane %v6528_v43, 2 }
0x10a0   :  { %v13042_v48 = vpop.eup %9584  ;;  %v6299_v50 = vsub.f32 %v12966_v12, %v6243_v46  ;;  %v6207_v42 = vrot.slane %v6206_v20, 1  ;;  %v6225_v13 = vmax.f32 %v6223_v22, %v6224_v21  ;;  %v6535_v6 = vadd.f32 %v6534_v54, %v6533_v3 }
0x10a1   :  { %6732 = vperm.xlu1 %8896, %v6690_v62   ;;  %v6541_v55 = vrot.slane %v6540_v60, 4  ;;  %v6209_v45 = vsel %vm6047_vm4, %v6038_v0, -inf  ;;  %v13946_v57 = vrot.slane %v12858_v4, 1  ;;  %v6515_v34 = vrot.slane %v6514_v1, 2 }
0x10a2   :  { %v6331_v19 = vsel %vm6010_vm14, %v6299_v50, -1e+30  ;;  %v6226_v14 = vrot.slane %v6225_v13, 2  ;;  %v6210_v41 = vrot.slane %v6209_v45, 4  ;;  %v6547_v31 = vsel %vm6047_vm4, %v13042_v48, 0.0 }
0x10a3   :  { %v6413_v2 = vadd.f32 %v13946_v57, %v12858_v4  ;;  %v6328_v12 = vsel %vm6007_vm13, %v6296_v38, -1e+30  ;;  %v6208_v22 = vmax.f32 %v6206_v20, %v6207_v42  ;;  %v6390_v3 = vmul.f32 1.442695, %v6331_v19 }
0x10a4   :  { %v6227_v28 = vmax.f32 %v6225_v13, %v6226_v14  ;;  %v6211_v62 = vmax.f32 %v6209_v45, %v6210_v41  ;;  %v13947_v4 = vrot.slane %v12864_v40, 1  ;;  %v6536_v21 = vrot.slane %v6535_v6, 2 }
0x10a5   :  { %v6625_v54 = vmax.f32 %v6413_v2, 1e-20  ;;  %v6542_v9 = vadd.f32 %v6541_v55, %v6540_v60  ;;  %v13948_v0 = vrot.slane %v12866_v63, 1  ;;  %v13949_v57 = vrot.slane %v12900_v56, 1 }
0x10a6   :  { %v6504_v46 = vadd.f32 %v13947_v4, %v12864_v40  ;;  %v6384_v38 = vmul.f32 1.442695, %v6328_v12  ;;  %v6228_v20 = vrot.slane %v6227_v28, 1  ;;  %v6212_v42 = vrot.slane %v6211_v62, 2 }
0x10a7   :  { %v6448_v50 = vadd.f32 %v13948_v0, %v12866_v63  ;;  %v6490_v49 = vadd.f32 %v13949_v57, %v12900_v56  ;;  %9590 = vrcp.f32 %v6625_v54  ;;  %v13064_v13 = vadd.f32 %v6529_v35, %v6528_v43  ;;  %v9587_v19 = vpop.eup %9586  ;;  %v13070_v63 = vld [vmem:[%s13449_s1 + $0xf0] sm:$0xff] }
0x10a8   :  { %v6548_v45 = vrot.slane %v6547_v31, 4  ;;  %v6294_v2 = vsub.f32 %v12972_v33, %v6208_v22  ;;  %v6638_v40 = vmax.f32 %v6504_v46, 1e-20  ;;  %9592 = vpow2.f32 %v6390_v3  ;;  %v13072_v56 = vpop.eup %9588  ;;  %v13080_v3 = vpop.xlane.xlu1 %5978 }
0x10a9   :  { %v6229_v60 = vmax.f32 %v6227_v28, %v6228_v20  ;;  %v6213_v55 = vmax.f32 %v6211_v62, %v6212_v42  ;;  %v6630_v14 = vmax.f32 %v6448_v50, 1e-20  ;;  %v13074_v41 = vadd.f32 %v6515_v34, %v6514_v1 }
0x10aa   :  { %v13076_v43 = vadd.f32 %v6536_v21, %v6535_v6  ;;  %v6691_v35 = vmul.f32 %v9587_v19, %v12688_v44  ;;  %v6636_v33 = vmax.f32 %v6490_v49, 1e-20  ;;  %v6543_v12 = vrot.slane %v6542_v9, 2  ;;  %v13104_v49 = vld [vmem:[%s13449_s1 + $0xe0] sm:$0xff] }
0x10ab   :  { %9594 = vpow2.f32 %v6384_v38  ;;  %v6297_v22 = vsub.f32 %v13008_v23, %v6229_v60  ;;  %v6214_v54 = vrot.slane %v6213_v55, 1  ;;  %v6326_v28 = vsel %vm6005_vm15, %v6294_v2, -1e+30 }
0x10ac   :  { %6737 = vperm.xlu1 %8896, %v6691_v35   ;;  %9596 = vrcp.f32 %v6638_v40  ;;  %vm6013_vm3 = vcmp.gt.f32.partialorder %v13070_v63, 0.0  ;;  %v13950_v1 = vrot.slane %v12917_v15, 1  ;;  %v6549_v44 = vadd.f32 %v6548_v45, %v6547_v31  ;;  %v13108_v45 = vpop.xlane.xlu1 %5972 }
0x10ad   :  { %v6582_v34 = vsel %vm6047_vm4, %v13072_v56, 0.0  ;;  %v6329_v23 = vsel %vm6008_vm0, %v6297_v22, -1e+30  ;;  %9598 = vrcp.f32 %v6630_v14  ;;  %v6215_v4 = vmax.f32 %v6213_v55, %v6214_v54  ;;  %vm8785_vm0 = vmpackc.low %vm423_vm2, %vm423_vm2 }
0x10ae   :  { %v6434_v6 = vadd.f32 %v13950_v1, %v12917_v15  ;;  %v6386_v62 = vmul.f32 1.442695, %v6329_v23  ;;  %9600 = vrcp.f32 %v6636_v33  ;;  %v6045_v61 = vsel %vm6013_vm3, %v13080_v3, -1e+30 }
0x10af   :  { %v13095_v46 = vadd.f32 %v6543_v12, %v6542_v9  ;;  %v6380_v21 = vmul.f32 1.442695, %v6326_v28  ;;  %v6258_v15 = vsel %vm6047_vm4, %v6045_v61, -inf  ;;  %v6583_v0 = vrot.slane %v6582_v34, 4 }
0x10b0   :  { %v6628_v31 = vmax.f32 %v6434_v6, 1e-20  ;;  %9602 = vpow2.f32 %v6386_v62  ;;  %v6259_v50 = vrot.slane %v6258_v15, 4  ;;  %v13951_v37 = vrot.slane %v12934_v16, 1 }
0x10b1   :  { %v9591_v38 = vpop.eup %9590  ;;  %v6524_v9 = vrot.slane %v13036_v39, 1  ;;  %v6531_v20 = vrot.slane %v13064_v13, 1  ;;  %v6550_v42 = vrot.slane %v6549_v44, 2  ;;  %v6517_v2 = vrot.slane %v13074_v41, 1 }
0x10b2   :  { %v6511_v57 = vadd.f32 %v13951_v37, %v12934_v16  ;;  %9604 = vrcp.f32 %v6628_v31  ;;  %v6538_v40 = vrot.slane %v13076_v43, 1  ;;  %v6295_v16 = vsub.f32 %v13031_v11, %v6215_v4  ;;  %v13114_v60 = vpop.eup %9592 }
0x10b3   :  { %v6689_v19 = vmul.f32 %v9591_v38, %v12749_v59  ;;  %v6260_v55 = vmax.f32 %v6258_v15, %v6259_v50  ;;  %vm6011_vm5 = vcmp.gt.f32.partialorder %v13104_v49, 0.0  ;;  %v13952_v35 = vrot.slane %v12962_v18, 1 }
0x10b4   :  { %v6639_v14 = vmax.f32 %v6511_v57, 1e-20  ;;  %v6545_v12 = vrot.slane %v13095_v46, 1  ;;  %v6584_v22 = vadd.f32 %v6583_v0, %v6582_v34  ;;  %9606 = vpow2.f32 %v6380_v21 }
0x10b5   :  { %v6455_v33 = vadd.f32 %v13952_v35, %v12962_v18  ;;  %6727 = vperm.xlu1 %8896, %v6689_v19   ;;  %v6043_v11 = vsel %vm6011_vm5, %v13108_v45, -1e+30  ;;  %v13124_v59 = vpop.eup %9594  ;;  %v13126_v54 = vadd.f32 %v6550_v42, %v6549_v44  ;;  %v6261_v28 = vrot.slane %v6260_v55, 2 }
0x10b6   :  { %9608 = vrcp.f32 %v6639_v14  ;;  %v6244_v1 = vsel %vm6047_vm4, %v6043_v11, -inf  ;;  %v9597_v6 = vpop.eup %9596  ;;  %v6589_v18 = vsel %vm6047_vm4, %v13114_v60, 0.0  ;;  %v6327_v34 = vsel %vm6006_vm1, %v6295_v16, -1e+30 }
0x10b7   :  { %v6245_v23 = vrot.slane %v6244_v1, 4  ;;  %v6631_v62 = vmax.f32 %v6455_v33, 1e-20  ;;  %v9599_v4 = vpop.eup %9598  ;;  %v6702_v61 = vmul.f32 %v9597_v6, %v12759_v25  ;;  %v6262_v21 = vmax.f32 %v6260_v55, %v6261_v28  ;;  %v13146_v25 = vld [vmem:[%s13449_s1 + $0xe8] sm:$0xff] }
0x10b8   :  { %v13953_v44 = vrot.slane %v13000_v8, 1  ;;  %v13954_v31 = vrot.slane %v13002_v17, 1  ;;  %v9601_v50 = vpop.eup %9600  ;;  %v6585_v37 = vrot.slane %v6584_v22, 2  ;;  %v6568_v32 = vsel %vm6047_vm4, %v13124_v59, 0.0 }
0x10b9   :  { %v6694_v57 = vmul.f32 %v9599_v4, %v12764_v30  ;;  %v6246_v38 = vmax.f32 %v6244_v1, %v6245_v23  ;;  %6792 = vperm.xlu0 %8897, %v6702_v61   ;;  %v6263_v42 = vrot.slane %v6262_v21, 1  ;;  %9610 = vrcp.f32 %v6631_v62 }
0x10ba   :  { %v6497_v15 = vadd.f32 %v13953_v44, %v13000_v8  ;;  %v6441_v0 = vadd.f32 %v13954_v31, %v13002_v17  ;;  %v6700_v8 = vmul.f32 %v9601_v50, %v12789_v7  ;;  %v13149_v17 = vpop.xlane.xlu1 %5975  ;;  %v13151_v19 = vpop.eup %9602  ;;  %v6590_v55 = vrot.slane %v6589_v18, 4 }
0x10bb   :  { %v6382_v14 = vmul.f32 1.442695, %v6327_v34  ;;  %6752 = vperm.xlu1 %8896, %v6694_v57   ;;  %v6247_v30 = vrot.slane %v6246_v38, 2  ;;  %v6575_v11 = vsel %vm6047_vm4, %v13151_v19, 0.0  ;;  %v6264_v28 = vmax.f32 %v6262_v21, %v6263_v42 }
0x10bc   :  { %v6637_v16 = vmax.f32 %v6497_v15, 1e-20  ;;  %v6629_v35 = vmax.f32 %v6441_v0, 1e-20  ;;  %v9605_v33 = vpop.eup %9604  ;;  %vm6012_vm6 = vcmp.gt.f32.partialorder %v13146_v25, 0.0  ;;  %v6569_v7 = vrot.slane %v6568_v32, 4 }
0x10bd   :  { %v6576_v1 = vrot.slane %v6575_v11, 4  ;;  %v6692_v6 = vmul.f32 %v9605_v33, %v12821_v5  ;;  %v6248_v23 = vmax.f32 %v6246_v38, %v6247_v30  ;;  %6782 = vperm.xlu0 %8897, %v6700_v8   ;;  %v6302_v62 = vsub.f32 %v13080_v3, %v6264_v28  ;;  %v13172_v3 = vld [vmem:[%s13449_s1 + $0xf8] sm:$0xff] }
0x10be   :  { %9612 = vrcp.f32 %v6637_v16  ;;  %v6044_v34 = vsel %vm6012_vm6, %v13149_v17, -1e+30  ;;  %v13955_v4 = vrot.slane %v12731_v24, 1  ;;  %v13164_v21 = vpop.eup %9606  ;;  %v13166_v44 = vadd.f32 %v6585_v37, %v6584_v22  ;;  %v13176_v38 = vpop.xlane.xlu1 %5981 }
0x10bf   :  { %9614 = vrcp.f32 %v6629_v35  ;;  %v6591_v15 = vadd.f32 %v6590_v55, %v6589_v18  ;;  %6742 = vperm.xlu1 %8896, %v6692_v6   ;;  %v6249_v5 = vrot.slane %v6248_v23, 1  ;;  %v6251_v31 = vsel %vm6047_vm4, %v6044_v34, -inf }
0x10c0   :  { %v6476_v61 = vadd.f32 %v13955_v4, %v12731_v24  ;;  %v9609_v0 = vpop.eup %9608  ;;  %9616 = vpow2.f32 %v6382_v14  ;;  %v6334_v50 = vsel %vm6013_vm3, %v6302_v62, -1e+30  ;;  %v6252_v24 = vrot.slane %v6251_v31, 4 }
0x10c1   :  { %v13178_v22 = vadd.f32 %v6569_v7, %v6568_v32  ;;  %v6577_v18 = vadd.f32 %v6576_v1, %v6575_v11  ;;  %v6396_v37 = vmul.f32 1.442695, %v6334_v50  ;;  %v6703_v8 = vmul.f32 %v9609_v0, %v12834_v51 }
0x10c2   :  { %v6634_v57 = vmax.f32 %v6476_v61, 1e-20  ;;  %v6250_v42 = vmax.f32 %v6248_v23, %v6249_v5  ;;  %v6253_v16 = vmax.f32 %v6251_v31, %v6252_v24  ;;  %vm6014_vm7 = vcmp.gt.f32.partialorder %v13172_v3, 0.0 }
0x10c3   :  { %v6587_v55 = vrot.slane %v13166_v44, 1  ;;  %v6592_v14 = vrot.slane %v6591_v15, 2  ;;  %6797 = vperm.xlu0 %8897, %v6703_v8   ;;  %v6046_v63 = vsel %vm6014_vm7, %v13176_v38, -1e+30  ;;  %v9611_v32 = vpop.eup %9610  ;;  %v6462_v33 = vadd.f32 %v6461_v10, %v13016_v36 }
0x10c4   :  { %9618 = vrcp.f32 %v6634_v57  ;;  %v6300_v30 = vsub.f32 %v13108_v45, %v6250_v42  ;;  %v6254_v35 = vrot.slane %v6253_v16, 2  ;;  %v6265_v51 = vsel %vm6047_vm4, %v6046_v63, -inf }
0x10c5   :  { %9620 = vpow2.f32 %v6396_v37  ;;  %v6554_v11 = vsel %vm6047_vm4, %v13164_v21, 0.0  ;;  %v6578_v28 = vrot.slane %v6577_v18, 2  ;;  %v6695_v7 = vmul.f32 %v9611_v32, %v12856_v29 }
0x10c6   :  { %v6266_v1 = vrot.slane %v6265_v51, 4  ;;  %v6332_v23 = vsel %vm6011_vm5, %v6300_v30, -1e+30  ;;  %v6255_v62 = vmax.f32 %v6253_v16, %v6254_v35  ;;  %v6632_v45 = vmax.f32 %v6462_v33, 1e-20 }
0x10c7   :  { %v13956_v34 = vrot.slane %v12797_v47, 1  ;;  %v6593_v61 = vadd.f32 %v6592_v14, %v6591_v15  ;;  %v6392_v5 = vmul.f32 1.442695, %v6332_v23  ;;  %6757 = vperm.xlu1 %8896, %v6695_v7   ;;  %v6532_v49 = vadd.f32 %v6531_v20, %v13064_v13 }
0x10c8   :  { %v9613_v6 = vpop.eup %9612  ;;  %v6267_v10 = vmax.f32 %v6265_v51, %v6266_v1  ;;  %v6256_v0 = vrot.slane %v6255_v62, 1  ;;  %9622 = vrcp.f32 %v6632_v45  ;;  %v6579_v50 = vadd.f32 %v6578_v28, %v6577_v18 }
0x10c9   :  { %v6469_v4 = vadd.f32 %v13956_v34, %v12797_v47  ;;  %v6701_v36 = vmul.f32 %v9613_v6, %v12891_v27  ;;  %v9615_v31 = vpop.eup %9614  ;;  %9624 = vpow2.f32 %v6392_v5  ;;  %v6642_v27 = vmax.f32 %v6532_v49, 1e-20 }
0x10ca   :  { %v6693_v24 = vmul.f32 %v9615_v31, %v12897_v58  ;;  %v6268_v47 = vrot.slane %v6267_v10, 2  ;;  %v13204_v15 = vpop.eup %9616  ;;  %v6257_v57 = vmax.f32 %v6255_v62, %v6256_v0  ;;  %v6518_v37 = vadd.f32 %v6517_v2, %v13074_v41 }
0x10cb   :  { %v6633_v29 = vmax.f32 %v6469_v4, 1e-20  ;;  %6787 = vperm.xlu0 %8897, %v6701_v36   ;;  %v6552_v8 = vrot.slane %v13126_v54, 1  ;;  %v6571_v42 = vrot.slane %v13178_v22, 2  ;;  %v6555_v13 = vrot.slane %v6554_v11, 4 }
0x10cc   :  { %6747 = vperm.xlu1 %8896, %v6693_v24   ;;  %v6269_v20 = vmax.f32 %v6267_v10, %v6268_v47  ;;  %v6594_v16 = vrot.slane %v6593_v61, 1  ;;  %v6301_v58 = vsub.f32 %v13149_v17, %v6257_v57  ;;  %v6539_v14 = vadd.f32 %v6538_v40, %v13076_v43  ;;  %v13957_v24 = vld [vmem:[#allocation10_spill] sm:$0xff] }
0x10cd   :  { %9626 = vrcp.f32 %v6633_v29  ;;  %v6588_v63 = vadd.f32 %v6587_v55, %v13166_v44  ;;  %v6580_v41 = vrot.slane %v6579_v50, 1  ;;  %v6561_v2 = vsel %vm6047_vm4, %v13204_v15, 0.0 }
0x10ce   :  { %v9619_v18 = vpop.eup %9618  ;;  %v6270_v35 = vrot.slane %v6269_v20, 1  ;;  %v6333_v17 = vsel %vm6012_vm6, %v6301_v58, -1e+30  ;;  %9628 = vrcp.f32 %v6642_v27  ;;  %v6640_v33 = vmax.f32 %v6518_v37, 1e-20  ;;  %v13958_v58 = vld [vmem:[#allocation22_spill] sm:$0xff] }
0x10cf   :  { %v13216_v32 = vpop.eup %9620  ;;  %v6698_v30 = vmul.f32 %v9619_v18, %v12644_v52  ;;  %v13226_v43 = vadd.f32 %v6571_v42, %v13178_v22  ;;  %v6394_v44 = vmul.f32 1.442695, %v6333_v17  ;;  %v6556_v28 = vadd.f32 %v6555_v13, %v6554_v11 }
0x10d0   :  { %v6610_v51 = vsel %vm6047_vm4, %v13216_v32, 0.0  ;;  %v6271_v55 = vmax.f32 %v6269_v20, %v6270_v35  ;;  %v6643_v7 = vmax.f32 %v6539_v14, 1e-20  ;;  %v6650_v1 = vmax.f32 %v6588_v63, 1e-20 }
0x10d1   :  { %v6611_v40 = vrot.slane %v6610_v51, 4  ;;  %6772 = vperm.xlu1 %8896, %v6698_v30   ;;  %v6595_v52 = vadd.f32 %v6594_v16, %v6593_v61  ;;  %v6562_v6 = vrot.slane %v6561_v2, 4  ;;  %9630 = vpow2.f32 %v6394_v44 }
0x10d2   :  { %v6303_v62 = vsub.f32 %v13176_v38, %v6271_v55  ;;  %v9623_v25 = vpop.eup %9622  ;;  %9632 = vrcp.f32 %v6640_v33  ;;  %v6525_v22 = vadd.f32 %v6524_v9, %v13036_v39  ;;  %v6581_v34 = vadd.f32 %v6580_v41, %v6579_v50 }
0x10d3   :  { %v6612_v23 = vadd.f32 %v6611_v40, %v6610_v51  ;;  %v6651_v45 = vmax.f32 %v6595_v52, 1e-20  ;;  %v13232_v4 = vpop.eup %9624  ;;  %v6696_v61 = vmul.f32 %v9623_v25, %v12927_v26  ;;  %9634 = vrcp.f32 %v6650_v1 }
0x10d4   :  { %v6335_v11 = vsel %vm6014_vm7, %v6303_v62, -1e+30  ;;  %v6557_v10 = vrot.slane %v6556_v28, 2  ;;  %v6596_v38 = vsel %vm6047_vm4, %v13232_v4, 0.0  ;;  %9636 = vrcp.f32 %v6643_v7  ;;  %v13959_v7 = vld [vmem:[#allocation38_spill] sm:$0xff] }
0x10d5   :  { %v6613_v5 = vrot.slane %v6612_v23, 2  ;;  %v6398_v31 = vmul.f32 1.442695, %v6335_v11  ;;  %v6563_v0 = vadd.f32 %v6562_v6, %v6561_v2  ;;  %v6597_v9 = vrot.slane %v6596_v38, 4  ;;  %6762 = vperm.xlu1 %8896, %v6696_v61   ;;  %v13960_v61 = vld [vmem:[#allocation45_spill] sm:$0xff] }
0x10d6   :  { %9638 = vrcp.f32 %v6651_v45  ;;  %v6641_v29 = vmax.f32 %v6525_v22, 1e-20  ;;  %v6546_v3 = vadd.f32 %v6545_v12, %v13095_v46  ;;  %v6649_v26 = vmax.f32 %v6581_v34, 1e-20 }
0x10d7   :  { %v9627_v36 = vpop.eup %9626  ;;  %v6614_v39 = vadd.f32 %v6613_v5, %v6612_v23  ;;  %9640 = vpow2.f32 %v6398_v31  ;;  %v6598_v50 = vadd.f32 %v6597_v9, %v6596_v38  ;;  %v6558_v27 = vadd.f32 %v6557_v10, %v6556_v28 }
0x10d8   :  { %v6697_v47 = vmul.f32 %v9627_v36, %v13957_v24  ;;  %v9629_v57 = vpop.eup %9628  ;;  %9642 = vrcp.f32 %v6649_v26  ;;  %v6564_v37 = vrot.slane %v6563_v0, 2  ;;  %v6573_v20 = vrot.slane %v13226_v43, 1 }
0x10d9   :  { %v6615_v49 = vrot.slane %v6614_v39, 1  ;;  %v6599_v42 = vrot.slane %v6598_v50, 2  ;;  %9644 = vrcp.f32 %v6641_v29  ;;  %v6644_v18 = vmax.f32 %v6546_v3, 1e-20  ;;  %v13961_v3 = vld [vmem:[#allocation48_spill] sm:$0xff] }
0x10da   :  { %6767 = vperm.xlu1 %8896, %v6697_v47   ;;  %v6553_v46 = vadd.f32 %v6552_v8, %v13126_v54  ;;  %v6706_v14 = vmul.f32 %v9629_v57, %v13958_v58  ;;  %v6559_v2 = vrot.slane %v6558_v27, 1  ;;  %v6565_v51 = vadd.f32 %v6564_v37, %v6563_v0 }
0x10db   :  { %v6616_v13 = vadd.f32 %v6615_v49, %v6614_v39  ;;  %v13247_v12 = vpop.eup %9630  ;;  %v6600_v16 = vadd.f32 %v6599_v42, %v6598_v50  ;;  %v6574_v44 = vadd.f32 %v6573_v20, %v13226_v43  ;;  %vm7242_vm8 = vcmask 1041409  }
0x10dc   :  { %v9633_v41 = vpop.eup %9632  ;;  %v6603_v30 = vsel %vm6047_vm4, %v13247_v12, 0.0  ;;  %v6645_v8 = vmax.f32 %v6553_v46, 1e-20  ;;  %v6566_v62 = vrot.slane %v6565_v51, 1  ;;  %v6560_v5 = vadd.f32 %v6559_v2, %v6558_v27 }
0x10dd   :  { %v6654_v63 = vmax.f32 %v6616_v13, 1e-20  ;;  %v9635_v35 = vpop.eup %9634  ;;  %v6601_v17 = vrot.slane %v6600_v16, 1  ;;  %v6604_v33 = vrot.slane %v6603_v30, 4  ;;  %v6704_v1 = vmul.f32 %v9633_v41, %v13959_v7  ;;  %v13965_v7 = vld [vmem:[#allocation51_spill] sm:$0xff] }
0x10de   :  { %6812 = vperm.xlu1 %8896, %v6706_v14   ;;  %v9637_v40 = vpop.eup %9636  ;;  %v6714_v54 = vmul.f32 %v9635_v35, %v13072_v56  ;;  %v6648_v43 = vmax.f32 %v6574_v44, 1e-20  ;;  %v6646_v39 = vmax.f32 %v6560_v5, 1e-20  ;;  %v6567_v9 = vadd.f32 %v6566_v62, %v6565_v51  ;;  %v13964_v44 = vld [vmem:[#allocation6_spill] sm:$0xff]  ;;  %v13967_v5 = vld [vmem:[#allocation35_spill] sm:$0xff] }
0x10df   :  { %9646 = vrcp.f32 %v6654_v63  ;;  %v6605_v28 = vadd.f32 %v6604_v33, %v6603_v30  ;;  %v6602_v52 = vadd.f32 %v6601_v17, %v6600_v16  ;;  %v6707_v36 = vmul.f32 %v9637_v40, %v13960_v61  ;;  %v13963_v33 = vld [vmem:[#allocation19_spill] sm:$0xff] }
0x10e0   :  { %9648 = vrcp.f32 %v6644_v18  ;;  %v9639_v55 = vpop.eup %9638  ;;  %6852 = vperm.xlu0 %8897, %v6714_v54   ;;  %vm7244_vm9 = vcmask 1042434   ;;  %vm7246_vm10 = vcmask 1043459   ;;  %vm7248_vm11 = vcmask 1044484  }
0x10e1   :  { %v13255_v6 = vpop.eup %9640  ;;  %v6715_v23 = vmul.f32 %v9639_v55, %v13114_v60  ;;  %v6606_v25 = vrot.slane %v6605_v28, 2  ;;  %v6652_v56 = vmax.f32 %v6602_v52, 1e-20  ;;  %9650 = vrcp.f32 %v6645_v8  ;;  %v13966_v52 = vld [vmem:[#allocation50_spill] sm:$0xff] }
0x10e2   :  { %v6617_v22 = vsel %vm6047_vm4, %v13255_v6, 0.0  ;;  %6802 = vperm.xlu1 %8896, %v6704_v1   ;;  %v9643_v45 = vpop.eup %9642  ;;  %vm6912_vm4 = vcmask 523520   ;;  %vm7250_vm12 = vcmask 1045509   ;;  %vm7252_vm13 = vcmask 1046534  }
0x10e3   :  { %v6618_v34 = vrot.slane %v6617_v22, 4  ;;  %v6607_v11 = vadd.f32 %v6606_v25, %v6605_v28  ;;  %9652 = vrcp.f32 %v6652_v56  ;;  %v9645_v10 = vpop.eup %9644  ;;  %v6713_v60 = vmul.f32 %v9643_v45, %v13151_v19 }
0x10e4   :  { %6857 = vperm.xlu0 %8897, %v6715_v23   ;;  %9654 = vrcp.f32 %v6648_v43  ;;  %v6705_v26 = vmul.f32 %v9645_v10, %v13961_v3  ;;  %v6647_v19 = vmax.f32 %v6567_v9, 1e-20  ;;  %v13968_v10 = vld [vmem:[#allocation52_spill] sm:$0xff]  ;;  %v13969_v3 = vld [vmem:[#allocation43_spill] sm:$0xff]  ;;  %vm7254_vm14 = vcmask 1047559  }
0x10e5   :  { %v6619_v38 = vadd.f32 %v6618_v34, %v6617_v22  ;;  %v6608_v31 = vrot.slane %v6607_v11, 1  ;;  %9656 = vrcp.f32 %v6646_v39  ;;  %vm9766_vm15 = vmmov 0  }
0x10e6   :  { %6817 = vperm.xlu1 %8896, %v6707_v36   ;;  %vm7526_vm1 = vcmask 253952  }
0x10e7   :  { %v6620_v0 = vrot.slane %v6619_v38, 2  ;;  %v6609_v49 = vadd.f32 %v6608_v31, %v6607_v11 }
0x10e8   :  { %6847 = vperm.xlu0 %8897, %v6713_v60  }
0x10e9   :  { %v9647_v29 = vpop.eup %9646  ;;  %v6621_v24 = vadd.f32 %v6620_v0, %v6619_v38  ;;  %v6653_v57 = vmax.f32 %v6609_v49, 1e-20 }
0x10ea   :  { %v9649_v50 = vpop.eup %9648  ;;  %v6718_v47 = vmul.f32 %v9647_v29, %v13216_v32  ;;  %6807 = vperm.xlu1 %8896, %v6705_v26  }
0x10eb   :  { %v6622_v27 = vrot.slane %v6621_v24, 1  ;;  %v6708_v37 = vmul.f32 %v9649_v50, %v13024_v53  ;;  %9658 = vrcp.f32 %v6653_v57  ;;  %v9651_v42 = vpop.eup %9650 }
0x10ec   :  { %6872 = vperm.xlu0 %8897, %v6718_v47   ;;  %9660 = vrcp.f32 %v6647_v19  ;;  %v6709_v16 = vmul.f32 %v9651_v42, %v13042_v48  ;;  %v13970_v47 = vld [vmem:[#allocation53_spill] sm:$0xff] }
0x10ed   :  { %v6623_v13 = vadd.f32 %v6622_v27, %v6621_v24  ;;  %v9653_v20 = vpop.eup %9652 }
0x10ee   :  { %6822 = vperm.xlu1 %8896, %v6708_v37   ;;  %v6716_v18 = vmul.f32 %v9653_v20, %v13232_v4  ;;  %v9655_v32 = vpop.eup %9654 }
0x10ef   :  { %v6655_v46 = vmax.f32 %v6623_v13, 1e-20  ;;  %v6712_v58 = vmul.f32 %v9655_v32, %v13124_v59  ;;  %v9657_v14 = vpop.eup %9656  ;;  %v8956_v59 = vld [vmem:[%s13458_s10] sm:$0xff]  }
0x10f0   :  { %6862 = vperm.xlu0 %8897, %v6716_v18   ;;  %v6710_v41 = vmul.f32 %v9657_v14, %v13164_v21  ;;  %8756 = vmatprep.subr.bf16.mxu0 %v8956_v59  ;;  %v13962_v21 = vld [vmem:[#allocation18_spill] sm:$0xff] }
0x10f1   :  { %9662 = vrcp.f32 %v6655_v46  ;;  %8757 = vmatpush3.bf16.msra.mxu0 %v8956_v59 }
0x10f2   :  { %6827 = vperm.xlu1 %8896, %v6709_v16  }
0x10f5   :  { %v9659_v53 = vpop.eup %9658 }
0x10f6   :  { %6842 = vperm.xlu1 %8896, %v6712_v58   ;;  %v6717_v63 = vmul.f32 %v9659_v53, %v13247_v12  ;;  %v9661_v2 = vpop.eup %9660 }
0x10f7   :  { %v6711_v30 = vmul.f32 %v9661_v2, %v13204_v15 }
0x10f8   :  { %6867 = vperm.xlu0 %8897, %v6717_v63  }
0x10fa   :  { %6832 = vperm.xlu1 %8896, %v6710_v41  }
0x10fb   :  { %v9663_v4 = vpop.eup %9662 }
0x10fc   :  { %v6719_v48 = vmul.f32 %v9663_v4, %v13255_v6 }
0x10fe   :  { %6837 = vperm.xlu1 %8896, %v6711_v30   ;;  %6877 = vperm.xlu0 %8897, %v6719_v48   ;;  %v13971_v30 = vld [vmem:[#allocation29_spill] sm:$0xff] }
0x1106   :  { %v6723_v12 = vpop.permute.xlu0 %6722 }
0x1107   :  { %v6880_v17 = vmul.f32 %v6723_v12, %v13962_v21 }
0x1109   :  { %v6913_v15 = vsel %vm6912_vm4, %v6880_v17, 0.0 }
0x110a   :  { %v6914_v23 = vrot.slane %v6913_v15, 4 }
0x110c   :  { %v6915_v36 = vadd.f32 %v6914_v23, %v6913_v15  ;;  %v13972_v23 = vld [vmem:[#allocation49_spill] sm:$0xff] }
0x110e   :  { %v6916_v50 = vrot.slane %v6915_v36, 2 }
0x1110   :  { %v6917_v58 = vadd.f32 %v6916_v50, %v6915_v36 }
0x1115   :  { %v6778_v54 = vpop.permute.xlu0 %6777 }
0x1116   :  { %v6891_v55 = vmul.f32 %v6778_v54, %v13964_v44 }
0x1118   :  { %v6990_v56 = vsel %vm6912_vm4, %v6891_v55, 0.0 }
0x1119   :  { %v6991_v60 = vrot.slane %v6990_v56, 4 }
0x111b   :  { %v6992_v27 = vadd.f32 %v6991_v60, %v6990_v56  ;;  %v13974_v60 = vld [vmem:[#allocation26_spill] sm:$0xff] }
0x111d   :  { %v6993_v14 = vrot.slane %v6992_v27, 2 }
0x111f   :  { %v6994_v21 = vadd.f32 %v6993_v14, %v6992_v27 }
0x1120   :  { %v6733_v35 = vpop.permute.xlu1 %6732 }
0x1121   :  { %v6882_v40 = vmul.f32 %v6733_v35, %v13963_v33 }
0x1123   :  { %v6927_v28 = vsel %vm6912_vm4, %v6882_v40, 0.0 }
0x1124   :  { %v6928_v25 = vrot.slane %v6927_v28, 4 }
0x1126   :  { %v6929_v31 = vadd.f32 %v6928_v25, %v6927_v28 }
0x1128   :  { %v6930_v19 = vrot.slane %v6929_v31, 2 }
0x112a   :  { %v6931_v53 = vadd.f32 %v6930_v19, %v6929_v31 }
0x112b   :  { %v6738_v51 = vpop.permute.xlu1 %6737 }
0x112c   :  { %v6883_v6 = vmul.f32 %v6738_v51, %v13966_v52  ;;  %v6918_v51 = vrot.slane %v6917_v58, 1  ;;  %v6932_v17 = vrot.slane %v6931_v53, 1 }
0x112e   :  { %v6934_v34 = vsel %vm6912_vm4, %v6883_v6, 0.0  ;;  %v6933_v25 = vadd.f32 %v6932_v17, %v6931_v53 }
0x112f   :  { %v6935_v0 = vrot.slane %v6934_v34, 4 }
0x1131   :  { %v6936_v42 = vadd.f32 %v6935_v0, %v6934_v34 }
0x1133   :  { %v6937_v41 = vrot.slane %v6936_v42, 2 }
0x1134   :  { %v6728_v8 = vpop.permute.xlu1 %6727 }
0x1135   :  { %v6881_v1 = vmul.f32 %v6728_v8, %v13965_v7  ;;  %v6938_v40 = vadd.f32 %v6937_v41, %v6936_v42  ;;  %v6919_v7 = vadd.f32 %v6918_v51, %v6917_v58 }
0x1137   :  { %v6920_v62 = vsel %vm6912_vm4, %v6881_v1, 0.0  ;;  %v6995_v1 = vrot.slane %v6994_v21, 1 }
0x1138   :  { %v6921_v22 = vrot.slane %v6920_v62, 4  ;;  %v6793_v45 = vpop.permute.xlu0 %6792 }
0x1139   :  { %v6894_v11 = vmul.f32 %v6793_v45, %v13967_v5  ;;  %v13973_v5 = vld [vmem:[#allocation54_spill] sm:$0xff]  ;;  %v6996_v0 = vadd.f32 %v6995_v1, %v6994_v21 }
0x113a   :  { %v6922_v43 = vadd.f32 %v6921_v22, %v6920_v62  ;;  %v6753_v61 = vpop.permute.xlu1 %6752  ;;  %v6939_v22 = vrot.slane %v6938_v40, 1 }
0x113b   :  { %v6886_v38 = vmul.f32 %v6753_v61, %v13968_v10  ;;  %v7011_v9 = vsel %vm6912_vm4, %v6894_v11, 0.0  ;;  %v7137_v10 = vpack.c.bf16 %v6919_v7, %v6919_v7 }
0x113c   :  { %v6923_v39 = vrot.slane %v6922_v43, 2  ;;  %v6783_v29 = vpop.permute.xlu0 %6782  ;;  %v7012_v37 = vrot.slane %v7011_v9, 4 }
0x113d   :  { %v6892_v26 = vmul.f32 %v6783_v29, %v13969_v3  ;;  %v6955_v24 = vsel %vm6912_vm4, %v6886_v38, 0.0  ;;  %v7139_v3 = vpack.c.bf16 %v6933_v25, %v6933_v25  ;;  %v7210_v19 = vunpack.c.l.b16 %v7137_v10  ;;  %v13978_v10 = vld [vmem:[#allocation15_spill] sm:$0xff] }
0x113e   :  { %v6743_v49 = vpop.permute.xlu1 %6742  ;;  %v6924_v13 = vadd.f32 %v6923_v39, %v6922_v43  ;;  %v6956_v18 = vrot.slane %v6955_v24, 4  ;;  %v7013_v63 = vadd.f32 %v7012_v37, %v7011_v9  ;;  %v13975_v37 = vld [vmem:[#allocation7_spill] sm:$0xff] }
0x113f   :  { %v6884_v57 = vmul.f32 %v6743_v49, %v13970_v47  ;;  %v6997_v46 = vsel %vm6912_vm4, %v6892_v26, 0.0 }
0x1140   :  { %v6925_v2 = vrot.slane %v6924_v13, 1  ;;  %v6998_v4 = vrot.slane %v6997_v46, 4  ;;  %v6957_v59 = vadd.f32 %v6956_v18, %v6955_v24  ;;  %v7014_v33 = vrot.slane %v7013_v63, 2 }
0x1141   :  { %v6941_v20 = vsel %vm6912_vm4, %v6884_v57, 0.0  ;;  %v6940_v24 = vadd.f32 %v6939_v22, %v6938_v40  ;;  %v7148_v18 = vpack.c.bf16 %v6996_v0, %v6996_v0 }
0x1142   :  { %v6942_v16 = vrot.slane %v6941_v20, 4  ;;  %v6798_v32 = vpop.permute.xlu0 %6797  ;;  %v6926_v54 = vadd.f32 %v6925_v2, %v6924_v13  ;;  %v6999_v15 = vadd.f32 %v6998_v4, %v6997_v46  ;;  %v6958_v44 = vrot.slane %v6957_v59, 2 }
0x1143   :  { %v6895_v48 = vmul.f32 %v6798_v32, %v13971_v30  ;;  %v7015_v52 = vadd.f32 %v7014_v33, %v7013_v63  ;;  %v13976_v63 = vld [vmem:[#allocation34_spill] sm:$0xff]  ;;  %v7212_v2 = vunpack.c.l.b16 %v7139_v3  ;;  %v7140_v4 = vpack.c.bf16 %v6940_v24, %v6940_v24 }
0x1144   :  { %v6943_v35 = vadd.f32 %v6942_v16, %v6941_v20  ;;  %v7138_v56 = vpack.c.bf16 %v6926_v54, %v6926_v54  ;;  %v7000_v45 = vrot.slane %v6999_v15, 2  ;;  %v6959_v34 = vadd.f32 %v6958_v44, %v6957_v59 }
0x1145   :  { %v7018_v8 = vsel %vm6912_vm4, %v6895_v48, 0.0  ;;  %v7016_v39 = vrot.slane %v7015_v52, 1  ;;  %v13306_v21 = vunpack.c.l.b16 %v7148_v18  ;;  %v7213_v7 = vunpack.c.l.b16 %v7140_v4 }
0x1146   :  { %v6758_v12 = vpop.permute.xlu1 %6757  ;;  %v6944_v55 = vrot.slane %v6943_v35, 2  ;;  %v7019_v6 = vrot.slane %v7018_v8, 4  ;;  %v7211_v26 = vunpack.c.l.b16 %v7138_v56  ;;  %v7001_v49 = vadd.f32 %v7000_v45, %v6999_v15 }
0x1147   :  { %v6887_v11 = vmul.f32 %v6758_v12, %v13973_v5  ;;  %v6960_v47 = vrot.slane %v6959_v34, 1  ;;  %v7017_v46 = vadd.f32 %v7016_v39, %v7015_v52 }
0x1148   :  { %v6945_v43 = vadd.f32 %v6944_v55, %v6943_v35  ;;  %v7020_v9 = vadd.f32 %v7019_v6, %v7018_v8  ;;  %v7243_v58 = vsel %vm7242_vm8, %v7211_v26, %v7210_v19  ;;  %v7002_v14 = vrot.slane %v7001_v49, 1  ;;  %v13977_v55 = vld [vmem:[#allocation42_spill] sm:$0xff] }
0x1149   :  { %v6962_v27 = vsel %vm6912_vm4, %v6887_v11, 0.0  ;;  %v6961_v30 = vadd.f32 %v6960_v47, %v6959_v34  ;;  %v7245_v17 = vsel %vm7244_vm9, %v7212_v2, %v7243_v58  ;;  %v7151_v15 = vpack.c.bf16 %v7017_v46, %v7017_v46 }
0x114a   :  { %v6788_v29 = vpop.permute.xlu0 %6787  ;;  %v6946_v57 = vrot.slane %v6945_v43, 1  ;;  %v7021_v16 = vrot.slane %v7020_v9, 2  ;;  %v6963_v53 = vrot.slane %v6962_v27, 4  ;;  %v7003_v8 = vadd.f32 %v7002_v14, %v7001_v49 }
0x114b   :  { %v6748_v28 = vpop.permute.xlu1 %6747  ;;  %v6893_v42 = vmul.f32 %v6788_v29, %v13975_v37  ;;  %v7247_v56 = vsel %vm7246_vm10, %v7213_v7, %v7245_v17  ;;  %v13312_v11 = vunpack.c.l.b16 %v7151_v15 }
0x114c   :  { %v6885_v62 = vmul.f32 %v6748_v28, %v13972_v23  ;;  %v6947_v48 = vadd.f32 %v6946_v57, %v6945_v43  ;;  %v7022_v33 = vadd.f32 %v7021_v16, %v7020_v9  ;;  %v6964_v44 = vadd.f32 %v6963_v53, %v6962_v27 }
0x114d   :  { %v7004_v59 = vsel %vm6912_vm4, %v6893_v42, 0.0  ;;  %v7143_v23 = vpack.c.bf16 %v6961_v30, %v6961_v30  ;;  %v13979_v42 = vld [vmem:[#allocation14_spill] sm:$0xff] }
0x114e   :  { %v6948_v61 = vsel %vm6912_vm4, %v6885_v62, 0.0  ;;  %v7141_v1 = vpack.c.bf16 %v6947_v48, %v6947_v48  ;;  %v7005_v52 = vrot.slane %v7004_v59, 4  ;;  %v7023_v45 = vrot.slane %v7022_v33, 1 }
0x114f   :  { %v6949_v38 = vrot.slane %v6948_v61, 4  ;;  %v13315_v9 = vunpack.c.l.b16 %v7143_v23 }
0x1150   :  { %v6773_v36 = vpop.permute.xlu1 %6772 }
0x1151   :  { %v6890_v31 = vmul.f32 %v6773_v36, %v13974_v60  ;;  %v6950_v13 = vadd.f32 %v6949_v38, %v6948_v61  ;;  %v7149_v61 = vpack.c.bf16 %v7003_v8, %v7003_v8  ;;  %v6965_v36 = vrot.slane %v6964_v44, 2 }
0x1152   :  { %v7214_v60 = vunpack.c.l.b16 %v7141_v1 }
0x1153   :  { %v6983_v50 = vsel %vm6912_vm4, %v6890_v31, 0.0  ;;  %v6951_v35 = vrot.slane %v6950_v13, 2  ;;  %v7006_v31 = vadd.f32 %v7005_v52, %v7004_v59  ;;  %v13318_v19 = vunpack.c.l.b16 %v7149_v61  ;;  %v13984_v61 = vld [vmem:[#allocation17_spill] sm:$0xff] }
0x1154   :  { %v6984_v20 = vrot.slane %v6983_v50, 4  ;;  %v6763_v32 = vpop.permute.xlu1 %6762  ;;  %v6966_v37 = vadd.f32 %v6965_v36, %v6964_v44  ;;  %v13323_v46 = vsel %vm7248_vm11, %v7214_v60, %v7247_v56 }
0x1155   :  { %v6888_v41 = vmul.f32 %v6763_v32, %v13976_v63  ;;  %v6952_v62 = vadd.f32 %v6951_v35, %v6950_v13  ;;  %v7007_v16 = vrot.slane %v7006_v31, 2 }
0x1156   :  { %v6985_v12 = vadd.f32 %v6984_v20, %v6983_v50  ;;  %v7024_v50 = vadd.f32 %v7023_v45, %v7022_v33  ;;  %v13980_v20 = vld [vmem:[#allocation37_spill] sm:$0xff] }
0x1157   :  { %v6969_v51 = vsel %vm6912_vm4, %v6888_v41, 0.0  ;;  %v6953_v29 = vrot.slane %v6952_v62, 1  ;;  %v7008_v15 = vadd.f32 %v7007_v16, %v7006_v31 }
0x1158   :  { %v6970_v40 = vrot.slane %v6969_v51, 4  ;;  %v6986_v25 = vrot.slane %v6985_v12, 2  ;;  %v7152_v4 = vpack.c.bf16 %v7024_v50, %v7024_v50 }
0x1159   :  { %v6768_v54 = vpop.permute.xlu1 %6767  ;;  %v6954_v14 = vadd.f32 %v6953_v29, %v6952_v62 }
0x115a   :  { %v6889_v28 = vmul.f32 %v6768_v54, %v13977_v55  ;;  %v6971_v6 = vadd.f32 %v6970_v40, %v6969_v51  ;;  %v6987_v3 = vadd.f32 %v6986_v25, %v6985_v12  ;;  %v6967_v12 = vrot.slane %v6966_v37, 1  ;;  %v13981_v51 = vld [vmem:[#allocation21_spill] sm:$0xff]  ;;  %v13982_v40 = vld [vmem:[#allocation47_spill] sm:$0xff] }
0x115c   :  { %v6976_v22 = vsel %vm6912_vm4, %v6889_v28, 0.0  ;;  %v6972_v34 = vrot.slane %v6971_v6, 2  ;;  %v6988_v53 = vrot.slane %v6987_v3, 1  ;;  %v7142_v28 = vpack.c.bf16 %v6954_v14, %v6954_v14 }
0x115d   :  { %v6977_v43 = vrot.slane %v6976_v22, 4  ;;  %v6813_v5 = vpop.permute.xlu1 %6812  ;;  %v6968_v45 = vadd.f32 %v6967_v12, %v6966_v37 }
0x115e   :  { %v6898_v38 = vmul.f32 %v6813_v5, %v13978_v10  ;;  %v6973_v0 = vadd.f32 %v6972_v34, %v6971_v6  ;;  %v6989_v7 = vadd.f32 %v6988_v53, %v6987_v3  ;;  %v7009_v10 = vrot.slane %v7008_v15, 1 }
0x115f   :  { %v6978_v39 = vadd.f32 %v6977_v43, %v6976_v22  ;;  %v6853_v49 = vpop.permute.xlu0 %6852  ;;  %v13983_v43 = vld [vmem:[#allocation8_spill] sm:$0xff] }
0x1160   :  { %v7039_v26 = vsel %vm6912_vm4, %v6898_v38, 0.0  ;;  %v6974_v24 = vrot.slane %v6973_v0, 1  ;;  %v6906_v18 = vmul.f32 %v6853_v49, %v13980_v20  ;;  %v7144_v20 = vpack.c.bf16 %v6968_v45, %v6968_v45 }
0x1161   :  { %v6979_v47 = vrot.slane %v6978_v39, 2  ;;  %v7040_v57 = vrot.slane %v7039_v26, 4  ;;  %v6803_v27 = vpop.permute.xlu1 %6802 }
0x1162   :  { %v6896_v13 = vmul.f32 %v6803_v27, %v13979_v42  ;;  %v7095_v41 = vsel %vm6912_vm4, %v6906_v18, 0.0  ;;  %v6975_v30 = vadd.f32 %v6974_v24, %v6973_v0  ;;  %v13333_v0 = vunpack.c.l.b16 %v7152_v4  ;;  %v13985_v42 = vld [vmem:[#allocation20_spill] sm:$0xff] }
0x1163   :  { %v6980_v32 = vadd.f32 %v6979_v47, %v6978_v39  ;;  %v7041_v58 = vadd.f32 %v7040_v57, %v7039_v26  ;;  %v6858_v2 = vpop.permute.xlu0 %6857  ;;  %v7096_v33 = vrot.slane %v7095_v41, 4  ;;  %v7215_v39 = vunpack.c.l.b16 %v7142_v28 }
0x1164   :  { %v7025_v63 = vsel %vm6912_vm4, %v6896_v13, 0.0  ;;  %v6907_v54 = vmul.f32 %v6858_v2, %v13982_v40  ;;  %v7145_v23 = vpack.c.bf16 %v6975_v30, %v6975_v30  ;;  %v7147_v26 = vpack.c.bf16 %v6989_v7, %v6989_v7  ;;  %v8957_v40 = vld [vmem:[%s13458_s10 + $0x8] sm:$0xff]  }
0x1165   :  { %v6981_v48 = vrot.slane %v6980_v32, 1  ;;  %v7026_v59 = vrot.slane %v7025_v63, 4  ;;  %v6818_v35 = vpop.permute.xlu1 %6817  ;;  %v7042_v44 = vrot.slane %v7041_v58, 2  ;;  %v7097_v56 = vadd.f32 %v7096_v33, %v7095_v41  ;;  %8758 = vmatprep.subr.bf16.mxu0 %v8957_v40 }
0x1166   :  { %v6899_v17 = vmul.f32 %v6818_v35, %v13981_v51  ;;  %v7102_v52 = vsel %vm6912_vm4, %v6907_v54, 0.0  ;;  %v7218_v49 = vunpack.c.l.b16 %v7145_v23  ;;  %v7010_v18 = vadd.f32 %v7009_v10, %v7008_v15  ;;  %v13986_v51 = vld [vmem:[#allocation9_spill] sm:$0xff]  ;;  %8759 = vmatpush3.bf16.msra.mxu0 %v8957_v40 }
0x1167   :  { %v6982_v8 = vadd.f32 %v6981_v48, %v6980_v32  ;;  %v7027_v55 = vadd.f32 %v7026_v59, %v7025_v63  ;;  %v6848_v6 = vpop.permute.xlu0 %6847  ;;  %v7043_v38 = vadd.f32 %v7042_v44, %v7041_v58  ;;  %v7103_v31 = vrot.slane %v7102_v52, 4 }
0x1168   :  { %v7046_v1 = vsel %vm6912_vm4, %v6899_v17, 0.0  ;;  %v6905_v36 = vmul.f32 %v6848_v6, %v13984_v61  ;;  %v7098_v24 = vrot.slane %v7097_v56, 2  ;;  %v7220_v41 = vunpack.c.l.b16 %v7147_v26 }
0x1169   :  { %v7146_v62 = vpack.c.bf16 %v6982_v8, %v6982_v8  ;;  %v7047_v25 = vrot.slane %v7046_v1, 4  ;;  %v6808_v22 = vpop.permute.xlu1 %6807  ;;  %v7028_v34 = vrot.slane %v7027_v55, 2  ;;  %v7044_v16 = vrot.slane %v7043_v38, 1 }
0x116a   :  { %v6897_v5 = vmul.f32 %v6808_v22, %v13983_v43  ;;  %v7088_v47 = vsel %vm6912_vm4, %v6905_v36, 0.0  ;;  %v7104_v32 = vadd.f32 %v7103_v31, %v7102_v52  ;;  %v7099_v4 = vadd.f32 %v7098_v24, %v7097_v56  ;;  %v13987_v56 = vld [vmem:[#allocation31_spill] sm:$0xff] }
0x116b   :  { %v7048_v60 = vadd.f32 %v7047_v25, %v7046_v1  ;;  %v7219_v29 = vunpack.c.l.b16 %v7146_v62  ;;  %v7029_v57 = vadd.f32 %v7028_v34, %v7027_v55  ;;  %v7089_v63 = vrot.slane %v7088_v47, 4  ;;  %v13342_v59 = vpop.permute.xlu0 %6872 }
0x116c   :  { %v7032_v3 = vsel %vm6912_vm4, %v6897_v5, 0.0  ;;  %v7251_v48 = vsel %vm7250_vm12, %v7215_v39, %v13323_v46  ;;  %v7150_v54 = vpack.c.bf16 %v7010_v18, %v7010_v18  ;;  %v7105_v44 = vrot.slane %v7104_v32, 2 }
0x116d   :  { %v6823_v50 = vpop.permute.xlu1 %6822  ;;  %v7049_v27 = vrot.slane %v7048_v60, 2  ;;  %v7033_v37 = vrot.slane %v7032_v3, 4  ;;  %v7256_v58 = vsel %vm7242_vm8, %v7219_v29, %v7218_v49  ;;  %v7030_v35 = vrot.slane %v7029_v57, 1 }
0x116e   :  { %v6900_v13 = vmul.f32 %v6823_v50, %v13985_v42  ;;  %v7090_v33 = vadd.f32 %v7089_v63, %v7088_v47  ;;  %v7257_v15 = vsel %vm7244_vm9, %v7220_v41, %v7256_v58  ;;  %v7045_v55 = vadd.f32 %v7044_v16, %v7043_v38  ;;  %v13988_v47 = vld [vmem:[#allocation28_spill] sm:$0xff] }
0x116f   :  { %v7034_v14 = vadd.f32 %v7033_v37, %v7032_v3  ;;  %v7050_v12 = vadd.f32 %v7049_v27, %v7048_v60  ;;  %v7253_v7 = vsel %vm7252_vm13, %v13315_v9, %v7251_v48  ;;  %v7217_v1 = vunpack.c.l.b16 %v7144_v20  ;;  %v6863_v9 = vpop.permute.xlu0 %6862 }
0x1170   :  { %v7053_v53 = vsel %vm6912_vm4, %v6900_v13, 0.0  ;;  %v7100_v52 = vrot.slane %v7099_v4, 1  ;;  %v7091_v62 = vrot.slane %v7090_v33, 2  ;;  %v7031_v25 = vadd.f32 %v7030_v35, %v7029_v57 }
0x1171   :  { %v7054_v2 = vrot.slane %v7053_v53, 4  ;;  %v6828_v30 = vpop.permute.xlu1 %6827  ;;  %v7035_v8 = vrot.slane %v7034_v14, 2  ;;  %v7051_v22 = vrot.slane %v7050_v12, 1  ;;  %v7258_v34 = vsel %vm7246_vm10, %v13306_v21, %v7257_v15 }
0x1172   :  { %v6901_v17 = vmul.f32 %v6828_v30, %v13986_v51  ;;  %v7223_v43 = vunpack.c.l.b16 %v7150_v54  ;;  %v7106_v61 = vadd.f32 %v7105_v44, %v7104_v32  ;;  %v7255_v36 = vsel %vm7254_vm14, %v7217_v1, %v7253_v7  ;;  %v13990_v54 = vld [vmem:[#allocation30_spill] sm:$0xff] }
0x1173   :  { %v7055_v28 = vadd.f32 %v7054_v2, %v7053_v53  ;;  %v7036_v5 = vadd.f32 %v7035_v8, %v7034_v14  ;;  %v7155_v10 = vpack.c.bf16 %v7045_v55, %v7045_v55  ;;  %v7259_v31 = vsel %vm7248_vm11, %v13318_v19, %v7258_v34 }
0x1174   :  { %v7060_v46 = vsel %vm6912_vm4, %v6901_v17, 0.0  ;;  %v13359_v39 = vadd.f32 %v7100_v52, %v7099_v4  ;;  %v7092_v26 = vadd.f32 %v7091_v62, %v7090_v33  ;;  %v7153_v21 = vpack.c.bf16 %v7031_v25, %v7031_v25  ;;  %v13991_v52 = vld [vmem:[#allocation44_spill] sm:$0xff] }
0x1175   :  { %v7061_v6 = vrot.slane %v7060_v46, 4  ;;  %v6843_v23 = vpop.permute.xlu1 %6842  ;;  %v7056_v38 = vrot.slane %v7055_v28, 2  ;;  %v13361_v50 = vadd.f32 %v7051_v22, %v7050_v12  ;;  %v7260_v24 = vsel %vm7250_vm12, %v7223_v43, %v7259_v31 }
0x1176   :  { %v6904_v45 = vmul.f32 %v6843_v23, %v13987_v56  ;;  %v7037_v27 = vrot.slane %v7036_v5, 1  ;;  %v7107_v37 = vrot.slane %v7106_v61, 1  ;;  %v7261_v13 = vsel %vm7252_vm13, %v13312_v11, %v7260_v24  ;;  %v13989_v11 = vld [vmem:[#allocation36_spill] sm:$0xff]  ;;  %v13992_v23 = vld [vmem:[#allocation23_spill] sm:$0xff] }
0x1177   :  { %v7062_v29 = vadd.f32 %v7061_v6, %v7060_v46  ;;  %v6868_v19 = vpop.permute.xlu0 %6867  ;;  %v13367_v20 = vunpack.c.l.b16 %v7155_v10  ;;  %v7057_v18 = vadd.f32 %v7056_v38, %v7055_v28  ;;  %v7262_v16 = vsel %vm7254_vm14, %v13333_v0, %v7261_v13 }
0x1178   :  { %v7081_v60 = vsel %vm6912_vm4, %v6904_v45, 0.0  ;;  %v7093_v53 = vrot.slane %v7092_v26, 1  ;;  %v7277_v63 = vpack.c.b16 %v7262_v16, %v7255_v36  ;;  %v7226_v2 = vunpack.c.l.b16 %v7153_v21 }
0x1179   :  { %v7082_v3 = vrot.slane %v7081_v60, 4  ;;  %v6833_v49 = vpop.permute.xlu1 %6832  ;;  %v7063_v58 = vrot.slane %v7062_v29, 2  ;;  %v7163_v4 = vpack.c.bf16 %v13359_v39, %v13359_v39  ;;  %v7156_v35 = vpack.c.bf16 %v13361_v50, %v13361_v50 }
0x117a   :  { %v6902_v57 = vmul.f32 %v6833_v49, %v13988_v47  ;;  %v7038_v12 = vadd.f32 %v7037_v27, %v7036_v5  ;;  %v13377_v51 = vadd.f32 %v7107_v37, %v7106_v61  ;;  %7279 = vrot.lane.b32.xlu1 %v7277_v63, %s9763_s19  ;;  %v7058_v17 = vrot.slane %v7057_v18, 1  ;;  %v13993_v5 = vld [vmem:[#allocation16_spill] sm:$0xff] }
0x117b   :  { %v7083_v42 = vadd.f32 %v7082_v3, %v7081_v60  ;;  %v6910_v15 = vmul.f32 %v13342_v59, %v13990_v54  ;;  %v7064_v8 = vadd.f32 %v7063_v58, %v7062_v29  ;;  %v7094_v55 = vadd.f32 %v7093_v53, %v7092_v26 }
0x117c   :  { %v7067_v32 = vsel %vm6912_vm4, %v6902_v57, 0.0  ;;  %v6908_v6 = vmul.f32 %v6863_v9, %v13991_v52  ;;  %v6909_v62 = vmul.f32 %v6868_v19, %v13992_v23  ;;  %v7154_v25 = vpack.c.bf16 %v7038_v12, %v7038_v12 }
0x117d   :  { %v7084_v14 = vrot.slane %v7083_v42, 2  ;;  %v6838_v41 = vpop.permute.xlu1 %6837  ;;  %v7068_v30 = vrot.slane %v7067_v32, 4  ;;  %v6878_v46 = vpop.permute.xlu0 %6877  ;;  %v7123_v1 = vsel %vm6912_vm4, %v6910_v15, 0.0  ;;  %v7162_v36 = vpack.c.bf16 %v7094_v55, %v7094_v55 }
0x117e   :  { %v6903_v48 = vmul.f32 %v6838_v41, %v13989_v11  ;;  %v7124_v45 = vrot.slane %v7123_v1, 4  ;;  %v7109_v43 = vsel %vm6912_vm4, %v6908_v6, 0.0  ;;  %v7116_v59 = vsel %vm6912_vm4, %v6909_v62, 0.0 }
0x117f   :  { %v7085_v0 = vadd.f32 %v7084_v14, %v7083_v42  ;;  %v7069_v33 = vadd.f32 %v7068_v30, %v7067_v32  ;;  %v6911_v61 = vmul.f32 %v6878_v46, %v13993_v5  ;;  %v7110_v60 = vrot.slane %v7109_v43, 4 }
0x1180   :  { %v7074_v40 = vsel %vm6912_vm4, %v6903_v48, 0.0  ;;  %v7125_v38 = vadd.f32 %v7124_v45, %v7123_v1  ;;  %v7065_v31 = vrot.slane %v7064_v8, 1  ;;  %v7117_v9 = vrot.slane %v7116_v59, 4 }
0x1181   :  { %v7086_v44 = vrot.slane %v7085_v0, 1  ;;  %v7075_v28 = vrot.slane %v7074_v40, 4  ;;  %v7070_v7 = vrot.slane %v7069_v33, 2  ;;  %v7130_v29 = vsel %vm6912_vm4, %v6911_v61, 0.0 }
0x1182   :  { %v7126_v49 = vrot.slane %v7125_v38, 2  ;;  %v7111_v21 = vadd.f32 %v7110_v60, %v7109_v43  ;;  %v7227_v24 = vunpack.c.l.b16 %v7154_v25  ;;  %v7059_v47 = vadd.f32 %v7058_v17, %v7057_v18 }
0x1183   :  { %v7087_v22 = vadd.f32 %v7086_v44, %v7085_v0  ;;  %v7076_v56 = vadd.f32 %v7075_v28, %v7074_v40  ;;  %v7071_v34 = vadd.f32 %v7070_v7, %v7069_v33  ;;  %v7118_v57 = vadd.f32 %v7117_v9, %v7116_v59 }
0x1184   :  { %v7131_v27 = vrot.slane %v7130_v29, 4  ;;  %v7235_v37 = vunpack.c.l.b16 %v7162_v36  ;;  %v7127_v13 = vadd.f32 %v7126_v49, %v7125_v38  ;;  %v7112_v19 = vrot.slane %v7111_v21, 2 }
0x1185   :  { %v7077_v10 = vrot.slane %v7076_v56, 2  ;;  %v7161_v39 = vpack.c.bf16 %v7087_v22, %v7087_v22  ;;  %v7072_v3 = vrot.slane %v7071_v34, 1  ;;  %v7066_v16 = vadd.f32 %v7065_v31, %v7064_v8 }
0x1186   :  { %v7119_v58 = vrot.slane %v7118_v57, 2  ;;  %v7132_v14 = vadd.f32 %v7131_v27, %v7130_v29  ;;  %v7164_v53 = vpack.c.bf16 %v13377_v51, %v13377_v51  ;;  %v7128_v41 = vrot.slane %v7127_v13, 1  ;;  %v8958_v51 = vld [vmem:[%s13458_s10 + $0x10] sm:$0xff]  }
0x1187   :  { %v7078_v26 = vadd.f32 %v7077_v10, %v7076_v56  ;;  %v7234_v32 = vunpack.c.l.b16 %v7161_v39  ;;  %v7073_v63 = vadd.f32 %v7072_v3, %v7071_v34  ;;  %v7113_v30 = vadd.f32 %v7112_v19, %v7111_v21  ;;  %8764 = vmatprep.subr.bf16.mxu1 %v8958_v51 }
0x1188   :  { %v7263_v11 = vsel %vm7242_vm8, %v7227_v24, %v7226_v2  ;;  %v7120_v18 = vadd.f32 %v7119_v58, %v7118_v57  ;;  %v7133_v12 = vrot.slane %v7132_v14, 2  ;;  %v7157_v0 = vpack.c.bf16 %v7059_v47, %v7059_v47  ;;  %8765 = vmatpush3.bf16.msra.mxu1 %v8958_v51  ;;  %v8959_v24 = vld [vmem:[%s13458_s10 + $0x18] sm:$0xff]   ;;  %v7851_v47 = vld [vmem:[%s13459_s11] ss:$0 sm:$0xff] }
0x1189   :  { %v7079_v42 = vrot.slane %v7078_v26, 1  ;;  %v7236_v17 = vunpack.c.l.b16 %v7163_v4  ;;  %v7129_v33 = vadd.f32 %v7128_v41, %v7127_v13  ;;  %v7114_v40 = vrot.slane %v7113_v30, 1  ;;  %8766 = vmatprep.subr.bf16.mxu1 %v8959_v24 }
0x118a   :  { %v7158_v54 = vpack.c.bf16 %v7066_v16, %v7066_v16  ;;  %v7270_v15 = vsel %vm7242_vm8, %v7235_v37, %v7234_v32  ;;  %v7121_v8 = vrot.slane %v7120_v18, 1  ;;  %v7134_v44 = vadd.f32 %v7133_v12, %v7132_v14 }
0x118b   :  { %v7080_v48 = vadd.f32 %v7079_v42, %v7078_v26  ;;  %v7229_v2 = vunpack.c.l.b16 %v7156_v35  ;;  %v7264_v55 = vsel %vm7244_vm9, %v13367_v20, %v7263_v11  ;;  %v7159_v28 = vpack.c.bf16 %v7073_v63, %v7073_v63 }
0x118c   :  { %v7115_v4 = vadd.f32 %v7114_v40, %v7113_v30  ;;  %v7237_v46 = vunpack.c.l.b16 %v7164_v53  ;;  %v7122_v1 = vadd.f32 %v7121_v8, %v7120_v18  ;;  %v7135_v52 = vrot.slane %v7134_v44, 1  ;;  %8767 = vmatpush3.bf16.msra.mxu1 %v8959_v24  ;;  %v7860_v18 = vld [vmem:[%s13459_s11 + $0x1] ss:$0 sm:$0xff] }
0x118d   :  { %v7160_v7 = vpack.c.bf16 %v7080_v48, %v7080_v48  ;;  %v7230_v6 = vunpack.c.l.b16 %v7157_v0  ;;  %v7271_v23 = vsel %vm7244_vm9, %v7236_v17, %v7270_v15  ;;  %v7167_v62 = vpack.c.bf16 %v7129_v33, %v7129_v33 }
0x118e   :  { %v7165_v25 = vpack.c.bf16 %v7115_v4, %v7115_v4  ;;  %v7265_v22 = vsel %vm7246_vm10, %v7229_v2, %v7264_v55  ;;  %v7231_v50 = vunpack.c.l.b16 %v7158_v54  ;;  %v7166_v35 = vpack.c.bf16 %v7122_v1, %v7122_v1 }
0x118f   :  { %v7136_v56 = vadd.f32 %v7135_v52, %v7134_v44  ;;  %v7232_v45 = vunpack.c.l.b16 %v7159_v28  ;;  %v7233_v34 = vunpack.c.l.b16 %v7160_v7  ;;  %v7272_v43 = vsel %vm7246_vm10, %v7237_v46, %v7271_v23  ;;  %v7437_v46 = vld [vmem:[%s13460_s12] sm:$0x1] }
0x1190   :  { %v7238_v20 = vunpack.c.l.b16 %v7165_v25  ;;  %v7239_v59 = vunpack.c.l.b16 %v7166_v35  ;;  %v7266_v61 = vsel %vm7248_vm11, %v7230_v6, %v7265_v22  ;;  %v7240_v36 = vunpack.c.l.b16 %v7167_v62 }
0x1191   :  { %v7168_v5 = vpack.c.bf16 %v7136_v56, %v7136_v56  ;;  %v7267_v60 = vsel %vm7250_vm12, %v7231_v50, %v7266_v61  ;;  %v9765_v11 = vmov 0.0|0.0   ;;  %v9767_v48 = vmov 0.0  }
0x1192   :  { %v7273_v10 = vsel %vm7248_vm11, %v7238_v20, %v7272_v43  ;;  %v7268_v39 = vsel %vm7252_vm13, %v7232_v45, %v7267_v60  ;;  %8783 = vmatprep.subr.bf16.mxu0 %v9765_v11  ;;  %7525 = vst [vmem:[#allocation3] sm:$0xff] %v9767_v48  ;;  %v7439_v7 = vstv %s13461_s13 }
0x1193   :  { %v7241_v38 = vunpack.c.l.b16 %v7168_v5  ;;  %v7274_v31 = vsel %vm7250_vm12, %v7239_v59, %v7273_v10  ;;  %v7269_v29 = vsel %vm7254_vm14, %v7233_v34, %v7268_v39 }
0x1194   :  { %v7275_v9 = vsel %vm7252_vm13, %v7240_v36, %v7274_v31 }
0x1195   :  { %v7276_v3 = vsel %vm7254_vm14, %v7241_v38, %v7275_v9 }
0x1196   :  { %v7278_v26 = vpack.c.b16 %v7276_v3, %v7269_v29 }
0x1198   :  { %7281 = vrot.lane.b32.xlu0 %v7278_v26, %s9763_s19 }
0x11ec   :  { %v7280_v49 = vpop.permute.xlu1 %7279 }
0x11ed   :  { %8760 = vmatprep.mubr.msk.bf16.mxu0 %vm423_vm2, %v7280_v49 }
0x120a   :  { %v7282_v21 = vpop.permute.xlu0 %7281 }
0x120b   :  { %8761 = vmatmul.mubr.msk.bf16.vlgmr.msra.gmra.mrb[224].mxu0 %vm423_vm2, %v7282_v21 }
0x120c   :  { %8780 = vmatprep.mubr.msk.f32.mxu0 %vm9766_vm15, %v9767_v48 }
0x12de   :  { %v8762_v57 = vpop.f32.mrb[224].mxu0 }
0x12df   :  { %v7344_v27 = vadd.f32 %v8762_v57, %v7851_v47  ;;  %v7335_v37 = vpop.f32.mrb[225].mxu0 }
0x12e0   :  { %v7336_v42 = vadd.f32 %v7851_v47, %v7335_v37  ;;  %v8763_v13 = vpop.f32.mrb[226].mxu0 }
0x12e1   :  { %v7347_v19 = vadd.f32 %v8763_v13, %v7851_v47  ;;  %v7338_v16 = vpop.f32.mrb[227].mxu0  ;;  %v7352_v58 = vmax.f32 %v7344_v27, 0.0 }
0x12e2   :  { %v7339_v32 = vadd.f32 %v7851_v47, %v7338_v16  ;;  %v7350_v53 = vmax.f32 %v7336_v42, 0.0 }
0x12e3   :  { %v7353_v14 = vmax.f32 %v7347_v19, 0.0 }
0x12e4   :  { %v7351_v63 = vmax.f32 %v7339_v32, 0.0 }
0x12e5   :  { %v7355_v41 = vpack.c.bf16 %v7353_v14, %v7352_v58 }
0x12e6   :  { %v7354_v30 = vpack.c.bf16 %v7351_v63, %v7350_v53 }
0x12e8   :  { %8768 = vmatprep.mubr.msk.bf16.mxu1 %vm423_vm2, %v7354_v30 }
0x12e9   :  { %8769 = vmatmul.mubr.msk.bf16.vlgmr.msra.gmra.mrb[192].mxu1 %vm423_vm2, %v7355_v41 }
0x13bc   :  { %v8770_v12 = vpop.f32.mrb[192].mxu1 }
0x13bd   :  { %v7427_v0 = vadd.f32 %v8770_v12, %v7860_v18  ;;  %v7418_v17 = vpop.f32.mrb[193].mxu1 }
0x13be   :  { %v7419_v33 = vadd.f32 %v7860_v18, %v7418_v17  ;;  %v8771_v40 = vpop.f32.mrb[194].mxu1 }
0x13bf   :  { %v7430_v54 = vadd.f32 %v8771_v40, %v7860_v18  ;;  %v7421_v15 = vpop.f32.mrb[195].mxu1  ;;  %v7435_v44 = vmax.f32 %v7427_v0, 0.0 }
0x13c0   :  { %v7422_v8 = vadd.f32 %v7860_v18, %v7421_v15  ;;  %v7433_v2 = vmax.f32 %v7419_v33, 0.0 }
0x13c1   :  { %v7436_v51 = vmax.f32 %v7430_v54, 0.0 }
0x13c2   :  { %v7434_v55 = vmax.f32 %v7422_v8, 0.0 }
0x13c3   :  { %v8788_v28 = vpack.c.bf16 %v7436_v51, %v7435_v44 }
0x13c4   :  { %v8784_v4 = vpack.c.bf16 %v7434_v55, %v7433_v2 }
0x13c6   :  { %8786 = vmatpush3.bf16.xpose.msk.msra.mxu0 %vm8785_vm0, %v8784_v4 }
0x13c7   :  { %8787 = vmatprep.subr.bf16.mxu0 %v9765_v11 }
0x13ce   :  { %8790 = vmatpush3.bf16.xpose.msk.msra.mxu0 %vm8785_vm0, %v8788_v28 }
0x13d5   :  { %8781 = vmatmul.mubr.msk.f32.vlgmr.msra.gmra.mrb[228].mxu0 %vm423_vm2, %v7437_v46 }
0x14a8   :  { %v7521_v1 = vpop.f32.mrb[228].mxu0 }
0x14a9   :  { %v7522_v52 = vadd.f32 %v7521_v1, %v7439_v7  ;;  %v8782_v6 = vpop.f32.mrb[229].mxu0 }
0x14ab   :  { %7527 = vst.msk [vmem:[#allocation3] sm:$0x1] %vm7526_vm1, %v7522_v52 }
0x14ac   :  { %9748 = shalt.err (!%p9745_p4)
}
0x14ad   :  { %s9749_s3 = scalar_lea.hbm %s13462_s14, 128 }
0x14ae   :  { %p9750_p5 = scmp.ne.s32.totalorder %s13462_s14, %s9749_s3  ;;  %p9753_p6 = scmp.lt.u32.totalorder %s9749_s3, %s13462_s14 }
0x14b0   :  { %p9755_p7 = pnand %p9753_p6, %p9750_p5 }
0x14b2   :  { %9758 = shalt.err (!%p9755_p7)
}
0x14b3   :  { %7537 = dma.vmem_to_hbm [thread:$0]  %s7535_s20, 128, %s13462_s14, [#allocation4]  }
0x14b4   :  { %9759 = dma.done.wait [#allocation4], 128  }
0x14b5   :  { %9760 = vsyncadd [#allocation4], 4294967168 }
0x14b6   :  { %7541 = vsyncpa [#allocation4], 1 }

</bundles_post_ra>
